<compile_context>
chip_gen: v7x
topology: tpu7x:2x2x1
jax: 0.10.0
libtpu: 0.0.40
codegen_flags: <defaults>
</compile_context>

<pallas_src>
import functools

import jax
import jax.numpy as jnp
from jax.experimental import pallas as pl
from jax.experimental.pallas import tpu as pltpu

DEPTH = 28
WIDTH = 50
IN_DIM = 29
OUT_DIM = 2
N_BODY = DEPTH - 2          # 26 hidden Linear layers
NEG_SLOPE = 0.01            # PyTorch nn.LeakyReLU default

# Padded (TPU-friendly) dims
IN_PAD = 32                 # 29 -> 32  (zero-padded columns)
WIDTH_PAD = 64              # 50 -> 64  (zero-padded rows/cols; padded lanes stay 0)
OUT_PAD = 128               # 2  -> 128 (lane-dense output store)
TILE_B = 128                # batch rows per grid step (multiple of 8)


def _leaky_relu(x):
    return jnp.where(x > 0, x, NEG_SLOPE * x)


def _make_kernel(tile_b, n_chunks):
    sub = tile_b // n_chunks

    def mlp_kernel(x_ref, w_in_ref, b_in_ref, w_body_ref, b_body_ref,
                   w_out_ref, b_out_ref, o_ref):
        w_in = w_in_ref[...]
        b_in = b_in_ref[...]
        w_out = w_out_ref[...]
        b_out = b_out_ref[...]

        # Input layer on each independent batch sub-chunk:
        # (sub, 32) @ (32, 64) + (1, 64)
        hs = []
        for c in range(n_chunks):
            xc = x_ref[pl.ds(c * sub, sub), :]
            hc = jnp.dot(xc, w_in, preferred_element_type=jnp.float32) + b_in
            hs.append(_leaky_relu(hc))

        # 26 hidden layers, unrolled at trace time; the n_chunks independent
        # chains are interleaved so the MXU never waits on a single dependent
        # push->drain chain.
        for i in range(N_BODY):
            w = w_body_ref[i]          # (64, 64)
            b = b_body_ref[i]          # (1, 64)
            hs = [_leaky_relu(
                      jnp.dot(h, w, preferred_element_type=jnp.float32) + b)
                  for h in hs]

        # Output layer: lane-dense (padded to 128 lanes) store.
        for c in range(n_chunks):
            yc = jnp.dot(hs[c], w_out, preferred_element_type=jnp.float32) + b_out
            o_ref[pl.ds(c * sub, sub), :] = yc.astype(o_ref.dtype)

    return mlp_kernel


def _pad_params(params):
    w_in, b_in, w_body, b_body, w_out, b_out = params
    f32 = jnp.float32
    w_in_p = jnp.zeros((IN_PAD, WIDTH_PAD), f32).at[:IN_DIM, :WIDTH].set(w_in)
    b_in_p = jnp.zeros((1, WIDTH_PAD), f32).at[:, :WIDTH].set(b_in)
    w_body_p = (jnp.zeros((N_BODY, WIDTH_PAD, WIDTH_PAD), f32)
                .at[:, :WIDTH, :WIDTH].set(w_body))
    b_body_p = (jnp.zeros((N_BODY, 1, WIDTH_PAD), f32)
                .at[:, :, :WIDTH].set(b_body))
    w_out_p = jnp.zeros((WIDTH_PAD, OUT_PAD), f32).at[:WIDTH, :OUT_DIM].set(w_out)
    b_out_p = jnp.zeros((1, OUT_PAD), f32).at[:, :OUT_DIM].set(b_out)
    return w_in_p, b_in_p, w_body_p, b_body_p, w_out_p, b_out_p


@functools.partial(jax.jit, static_argnames=("tile_b",))
def neural_network_forward(x, params, tile_b=TILE_B):
    B = x.shape[0]
    w_in_p, b_in_p, w_body_p, b_body_p, w_out_p, b_out_p = _pad_params(params)

    # Choose batch tile: multiple of 8, no larger than (rounded-up) batch.
    tb = max(8, min(tile_b, ((B + 7) // 8) * 8))
    pad_b = ((B + tb - 1) // tb) * tb
    x_p = jnp.zeros((pad_b, IN_PAD), jnp.float32).at[:B, :IN_DIM].set(x)

    n_chunks = 2 if (tb % 16 == 0) else 1
    grid = (pad_b // tb,)

    flops = 2 * pad_b * (IN_DIM * WIDTH + N_BODY * WIDTH * WIDTH + WIDTH * OUT_DIM)
    bytes_accessed = 4 * (pad_b * IN_PAD + pad_b * OUT_PAD
                          + IN_PAD * WIDTH_PAD + WIDTH_PAD
                          + N_BODY * WIDTH_PAD * WIDTH_PAD + N_BODY * WIDTH_PAD
                          + WIDTH_PAD * OUT_PAD + OUT_PAD)

    out_p = pl.pallas_call(
        _make_kernel(tb, n_chunks),
        out_shape=jax.ShapeDtypeStruct((pad_b, OUT_PAD), jnp.float32),
        grid=grid,
        in_specs=[
            pl.BlockSpec((tb, IN_PAD), lambda i: (i, 0)),                    # x tile
            pl.BlockSpec((IN_PAD, WIDTH_PAD), lambda i: (0, 0)),             # w_in
            pl.BlockSpec((1, WIDTH_PAD), lambda i: (0, 0)),                  # b_in
            pl.BlockSpec((N_BODY, WIDTH_PAD, WIDTH_PAD), lambda i: (0, 0, 0)),  # w_body
            pl.BlockSpec((N_BODY, 1, WIDTH_PAD), lambda i: (0, 0, 0)),       # b_body
            pl.BlockSpec((WIDTH_PAD, OUT_PAD), lambda i: (0, 0)),            # w_out
            pl.BlockSpec((1, OUT_PAD), lambda i: (0, 0)),                    # b_out
        ],
        out_specs=pl.BlockSpec((tb, OUT_PAD), lambda i: (i, 0)),
        compiler_params=pltpu.CompilerParams(
            dimension_semantics=("parallel",)),
        cost_estimate=pl.CostEstimate(flops=flops, transcendentals=0,
                                      bytes_accessed=bytes_accessed),
    )(x_p, w_in_p, b_in_p, w_body_p, b_body_p, w_out_p, b_out_p)

    return out_p[:B, :OUT_DIM]


def init_params(key):
    """Deterministic init mimicking PyTorch's default Linear init
    (uniform in [-1/sqrt(fan_in), 1/sqrt(fan_in)]); weights stored as (in, out)."""
    ks = jax.random.split(key, 6)

    def uniform(k, shape, fan_in):
        bound = 1.0 / jnp.sqrt(jnp.float32(fan_in))
        return jax.random.uniform(k, shape, jnp.float32, -bound, bound)

    w_in = uniform(ks[0], (IN_DIM, WIDTH), IN_DIM)
    b_in = uniform(ks[1], (1, WIDTH), IN_DIM)
    w_body = uniform(ks[2], (N_BODY, WIDTH, WIDTH), WIDTH)
    b_body = uniform(ks[3], (N_BODY, 1, WIDTH), WIDTH)
    w_out = uniform(ks[4], (WIDTH, OUT_DIM), WIDTH)
    b_out = uniform(ks[5], (1, OUT_DIM), WIDTH)
    return (w_in, b_in, w_body, b_body, w_out, b_out)


def reference_forward(x, params):
    """Pure-JAX reference (same math, unpadded) for a sanity check."""
    w_in, b_in, w_body, b_body, w_out, b_out = params
    h = _leaky_relu(x @ w_in + b_in)
    for i in range(N_BODY):
        h = _leaky_relu(h @ w_body[i] + b_body[i])
    return h @ w_out + b_out


if __name__ == "__main__":
    key = jax.random.PRNGKey(0)
    k_x, k_p = jax.random.split(key)

    B = 256   # small, but exercises the batch grid (grid = (2,) at TILE_B=128)
    x = jax.random.normal(k_x, (B, IN_DIM), dtype=jnp.float32)
    params = init_params(k_p)

    out = jax.block_until_ready(neural_network_forward(x, params))
    ref = jax.block_until_ready(reference_forward(x, params))

    assert out.shape == (B, OUT_DIM)
    assert jnp.allclose(out, ref, atol=1e-4, rtol=1e-4)
    print("KERNEL_OK")
</pallas_src>

<mosaic_0001>
module attributes {stable_mosaic.version = 11 : i64} {
  func.func @mlp_kernel(%arg0: i32, %arg1: memref<128x32xf32, #tpu.memory_space<vmem>>, %arg2: memref<32x64xf32, #tpu.memory_space<vmem>>, %arg3: memref<1x64xf32, #tpu.memory_space<vmem>>, %arg4: memref<26x64x64xf32, #tpu.memory_space<vmem>>, %arg5: memref<26x1x64xf32, #tpu.memory_space<vmem>>, %arg6: memref<64x128xf32, #tpu.memory_space<vmem>>, %arg7: memref<1x128xf32, #tpu.memory_space<vmem>>, %arg8: memref<128x128xf32, #tpu.memory_space<vmem>>) attributes {dimension_semantics = [#tpu.dimension_semantics<parallel>], iteration_bounds = array<i64: 2>, scalar_prefetch = 0 : i64, scratch_operands = 0 : i64, tpu.core_type = #tpu.core_type<tc>, window_params = [{transform_indices = @transform_0, window_bounds = array<i64: 128, 32>}, {pipeline_mode = #tpu.pipeline_mode<synchronous>, transform_indices = @transform_1, window_bounds = array<i64: 32, 64>}, {pipeline_mode = #tpu.pipeline_mode<synchronous>, transform_indices = @transform_2, window_bounds = array<i64: 1, 64>}, {pipeline_mode = #tpu.pipeline_mode<synchronous>, transform_indices = @transform_3, window_bounds = array<i64: 26, 64, 64>}, {pipeline_mode = #tpu.pipeline_mode<synchronous>, transform_indices = @transform_4, window_bounds = array<i64: 26, 1, 64>}, {pipeline_mode = #tpu.pipeline_mode<synchronous>, transform_indices = @transform_5, window_bounds = array<i64: 64, 128>}, {pipeline_mode = #tpu.pipeline_mode<synchronous>, transform_indices = @transform_6, window_bounds = array<i64: 1, 128>}, {transform_indices = @transform_7, window_bounds = array<i64: 128, 128>}]} {
    %c0 = arith.constant 0 : index
    %c0_0 = arith.constant 0 : index
    %0 = vector.load %arg2[%c0, %c0_0] : memref<32x64xf32, #tpu.memory_space<vmem>>, vector<32x64xf32>
    %c0_1 = arith.constant 0 : index
    %c0_2 = arith.constant 0 : index
    %1 = vector.load %arg3[%c0_1, %c0_2] : memref<1x64xf32, #tpu.memory_space<vmem>>, vector<1x64xf32>
    %c0_3 = arith.constant 0 : index
    %c0_4 = arith.constant 0 : index
    %2 = vector.load %arg6[%c0_3, %c0_4] : memref<64x128xf32, #tpu.memory_space<vmem>>, vector<64x128xf32>
    %c0_5 = arith.constant 0 : index
    %c0_6 = arith.constant 0 : index
    %3 = vector.load %arg7[%c0_5, %c0_6] : memref<1x128xf32, #tpu.memory_space<vmem>>, vector<1x128xf32>
    %c0_7 = arith.constant 0 : index
    %c0_8 = arith.constant 0 : index
    %4 = vector.load %arg1[%c0_7, %c0_8] : memref<128x32xf32, #tpu.memory_space<vmem>>, vector<64x32xf32>
    %cst = arith.constant dense<0.000000e+00> : vector<64x64xf32>
    %5 = tpu.matmul %4, %0, %cst {dimension_numbers = #tpu.dot_dimension_numbers<[1], [0], [0], [1], [0, 0, 1, 1], [], []>} : vector<64x32xf32>, vector<32x64xf32>, vector<64x64xf32> -> vector<64x64xf32>
    %6 = vector.broadcast %1 : vector<1x64xf32> to vector<64x64xf32>
    %7 = arith.addf %5, %6 : vector<64x64xf32>
    %cst_9 = arith.constant 0.000000e+00 : f32
    %8 = vector.broadcast %cst_9 : f32 to vector<64x64xf32>
    %9 = arith.cmpf ogt, %7, %8 : vector<64x64xf32>
    %cst_10 = arith.constant 0.00999999977 : f32
    %10 = vector.broadcast %cst_10 : f32 to vector<64x64xf32>
    %11 = arith.mulf %10, %7 : vector<64x64xf32>
    %12 = arith.select %9, %7, %11 : vector<64x64xi1>, vector<64x64xf32>
    %c64 = arith.constant 64 : index
    %c0_11 = arith.constant 0 : index
    %13 = vector.load %arg1[%c64, %c0_11] : memref<128x32xf32, #tpu.memory_space<vmem>>, vector<64x32xf32>
    %cst_12 = arith.constant dense<0.000000e+00> : vector<64x64xf32>
    %14 = tpu.matmul %13, %0, %cst_12 {dimension_numbers = #tpu.dot_dimension_numbers<[1], [0], [0], [1], [0, 0, 1, 1], [], []>} : vector<64x32xf32>, vector<32x64xf32>, vector<64x64xf32> -> vector<64x64xf32>
    %15 = vector.broadcast %1 : vector<1x64xf32> to vector<64x64xf32>
    %16 = arith.addf %14, %15 : vector<64x64xf32>
    %cst_13 = arith.constant 0.000000e+00 : f32
    %17 = vector.broadcast %cst_13 : f32 to vector<64x64xf32>
    %18 = arith.cmpf ogt, %16, %17 : vector<64x64xf32>
    %cst_14 = arith.constant 0.00999999977 : f32
    %19 = vector.broadcast %cst_14 : f32 to vector<64x64xf32>
    %20 = arith.mulf %19, %16 : vector<64x64xf32>
    %21 = arith.select %18, %16, %20 : vector<64x64xi1>, vector<64x64xf32>
    %c0_15 = arith.constant 0 : index
    %c0_16 = arith.constant 0 : index
    %c0_17 = arith.constant 0 : index
    %22 = vector.load %arg4[%c0_15, %c0_16, %c0_17] : memref<26x64x64xf32, #tpu.memory_space<vmem>>, vector<1x64x64xf32>
    %23 = vector.shape_cast %22 : vector<1x64x64xf32> to vector<64x64xf32>
    %c0_18 = arith.constant 0 : index
    %c0_19 = arith.constant 0 : index
    %c0_20 = arith.constant 0 : index
    %24 = vector.load %arg5[%c0_18, %c0_19, %c0_20] : memref<26x1x64xf32, #tpu.memory_space<vmem>>, vector<1x1x64xf32>
    %25 = vector.shape_cast %24 : vector<1x1x64xf32> to vector<1x64xf32>
    %cst_21 = arith.constant dense<0.000000e+00> : vector<64x64xf32>
    %26 = tpu.matmul %12, %23, %cst_21 {dimension_numbers = #tpu.dot_dimension_numbers<[1], [0], [0], [1], [0, 0, 1, 1], [], []>} : vector<64x64xf32>, vector<64x64xf32>, vector<64x64xf32> -> vector<64x64xf32>
    %27 = vector.broadcast %25 : vector<1x64xf32> to vector<64x64xf32>
    %28 = arith.addf %26, %27 : vector<64x64xf32>
    %cst_22 = arith.constant 0.000000e+00 : f32
    %29 = vector.broadcast %cst_22 : f32 to vector<64x64xf32>
    %30 = arith.cmpf ogt, %28, %29 : vector<64x64xf32>
    %cst_23 = arith.constant 0.00999999977 : f32
    %31 = vector.broadcast %cst_23 : f32 to vector<64x64xf32>
    %32 = arith.mulf %31, %28 : vector<64x64xf32>
    %33 = arith.select %30, %28, %32 : vector<64x64xi1>, vector<64x64xf32>
    %cst_24 = arith.constant dense<0.000000e+00> : vector<64x64xf32>
    %34 = tpu.matmul %21, %23, %cst_24 {dimension_numbers = #tpu.dot_dimension_numbers<[1], [0], [0], [1], [0, 0, 1, 1], [], []>} : vector<64x64xf32>, vector<64x64xf32>, vector<64x64xf32> -> vector<64x64xf32>
    %35 = vector.broadcast %25 : vector<1x64xf32> to vector<64x64xf32>
    %36 = arith.addf %34, %35 : vector<64x64xf32>
    %cst_25 = arith.constant 0.000000e+00 : f32
    %37 = vector.broadcast %cst_25 : f32 to vector<64x64xf32>
    %38 = arith.cmpf ogt, %36, %37 : vector<64x64xf32>
    %cst_26 = arith.constant 0.00999999977 : f32
    %39 = vector.broadcast %cst_26 : f32 to vector<64x64xf32>
    %40 = arith.mulf %39, %36 : vector<64x64xf32>
    %41 = arith.select %38, %36, %40 : vector<64x64xi1>, vector<64x64xf32>
    %c1 = arith.constant 1 : index
    %c0_27 = arith.constant 0 : index
    %c0_28 = arith.constant 0 : index
    %42 = vector.load %arg4[%c1, %c0_27, %c0_28] : memref<26x64x64xf32, #tpu.memory_space<vmem>>, vector<1x64x64xf32>
    %43 = vector.shape_cast %42 : vector<1x64x64xf32> to vector<64x64xf32>
    %c1_29 = arith.constant 1 : index
    %c0_30 = arith.constant 0 : index
    %c0_31 = arith.constant 0 : index
    %44 = vector.load %arg5[%c1_29, %c0_30, %c0_31] : memref<26x1x64xf32, #tpu.memory_space<vmem>>, vector<1x1x64xf32>
    %45 = vector.shape_cast %44 : vector<1x1x64xf32> to vector<1x64xf32>
    %cst_32 = arith.constant dense<0.000000e+00> : vector<64x64xf32>
    %46 = tpu.matmul %33, %43, %cst_32 {dimension_numbers = #tpu.dot_dimension_numbers<[1], [0], [0], [1], [0, 0, 1, 1], [], []>} : vector<64x64xf32>, vector<64x64xf32>, vector<64x64xf32> -> vector<64x64xf32>
    %47 = vector.broadcast %45 : vector<1x64xf32> to vector<64x64xf32>
    %48 = arith.addf %46, %47 : vector<64x64xf32>
    %cst_33 = arith.constant 0.000000e+00 : f32
    %49 = vector.broadcast %cst_33 : f32 to vector<64x64xf32>
    %50 = arith.cmpf ogt, %48, %49 : vector<64x64xf32>
    %cst_34 = arith.constant 0.00999999977 : f32
    %51 = vector.broadcast %cst_34 : f32 to vector<64x64xf32>
    %52 = arith.mulf %51, %48 : vector<64x64xf32>
    %53 = arith.select %50, %48, %52 : vector<64x64xi1>, vector<64x64xf32>
    %cst_35 = arith.constant dense<0.000000e+00> : vector<64x64xf32>
    %54 = tpu.matmul %41, %43, %cst_35 {dimension_numbers = #tpu.dot_dimension_numbers<[1], [0], [0], [1], [0, 0, 1, 1], [], []>} : vector<64x64xf32>, vector<64x64xf32>, vector<64x64xf32> -> vector<64x64xf32>
    %55 = vector.broadcast %45 : vector<1x64xf32> to vector<64x64xf32>
    %56 = arith.addf %54, %55 : vector<64x64xf32>
    %cst_36 = arith.constant 0.000000e+00 : f32
    %57 = vector.broadcast %cst_36 : f32 to vector<64x64xf32>
    %58 = arith.cmpf ogt, %56, %57 : vector<64x64xf32>
    %cst_37 = arith.constant 0.00999999977 : f32
    %59 = vector.broadcast %cst_37 : f32 to vector<64x64xf32>
    %60 = arith.mulf %59, %56 : vector<64x64xf32>
    %61 = arith.select %58, %56, %60 : vector<64x64xi1>, vector<64x64xf32>
    %c2 = arith.constant 2 : index
    %c0_38 = arith.constant 0 : index
    %c0_39 = arith.constant 0 : index
    %62 = vector.load %arg4[%c2, %c0_38, %c0_39] : memref<26x64x64xf32, #tpu.memory_space<vmem>>, vector<1x64x64xf32>
    %63 = vector.shape_cast %62 : vector<1x64x64xf32> to vector<64x64xf32>
    %c2_40 = arith.constant 2 : index
    %c0_41 = arith.constant 0 : index
    %c0_42 = arith.constant 0 : index
    %64 = vector.load %arg5[%c2_40, %c0_41, %c0_42] : memref<26x1x64xf32, #tpu.memory_space<vmem>>, vector<1x1x64xf32>
    %65 = vector.shape_cast %64 : vector<1x1x64xf32> to vector<1x64xf32>
    %cst_43 = arith.constant dense<0.000000e+00> : vector<64x64xf32>
    %66 = tpu.matmul %53, %63, %cst_43 {dimension_numbers = #tpu.dot_dimension_numbers<[1], [0], [0], [1], [0, 0, 1, 1], [], []>} : vector<64x64xf32>, vector<64x64xf32>, vector<64x64xf32> -> vector<64x64xf32>
    %67 = vector.broadcast %65 : vector<1x64xf32> to vector<64x64xf32>
    %68 = arith.addf %66, %67 : vector<64x64xf32>
    %cst_44 = arith.constant 0.000000e+00 : f32
    %69 = vector.broadcast %cst_44 : f32 to vector<64x64xf32>
    %70 = arith.cmpf ogt, %68, %69 : vector<64x64xf32>
    %cst_45 = arith.constant 0.00999999977 : f32
    %71 = vector.broadcast %cst_45 : f32 to vector<64x64xf32>
    %72 = arith.mulf %71, %68 : vector<64x64xf32>
    %73 = arith.select %70, %68, %72 : vector<64x64xi1>, vector<64x64xf32>
    %cst_46 = arith.constant dense<0.000000e+00> : vector<64x64xf32>
    %74 = tpu.matmul %61, %63, %cst_46 {dimension_numbers = #tpu.dot_dimension_numbers<[1], [0], [0], [1], [0, 0, 1, 1], [], []>} : vector<64x64xf32>, vector<64x64xf32>, vector<64x64xf32> -> vector<64x64xf32>
    %75 = vector.broadcast %65 : vector<1x64xf32> to vector<64x64xf32>
    %76 = arith.addf %74, %75 : vector<64x64xf32>
    %cst_47 = arith.constant 0.000000e+00 : f32
    %77 = vector.broadcast %cst_47 : f32 to vector<64x64xf32>
    %78 = arith.cmpf ogt, %76, %77 : vector<64x64xf32>
    %cst_48 = arith.constant 0.00999999977 : f32
    %79 = vector.broadcast %cst_48 : f32 to vector<64x64xf32>
    %80 = arith.mulf %79, %76 : vector<64x64xf32>
    %81 = arith.select %78, %76, %80 : vector<64x64xi1>, vector<64x64xf32>
    %c3 = arith.constant 3 : index
    %c0_49 = arith.constant 0 : index
    %c0_50 = arith.constant 0 : index
    %82 = vector.load %arg4[%c3, %c0_49, %c0_50] : memref<26x64x64xf32, #tpu.memory_space<vmem>>, vector<1x64x64xf32>
    %83 = vector.shape_cast %82 : vector<1x64x64xf32> to vector<64x64xf32>
    %c3_51 = arith.constant 3 : index
    %c0_52 = arith.constant 0 : index
    %c0_53 = arith.constant 0 : index
    %84 = vector.load %arg5[%c3_51, %c0_52, %c0_53] : memref<26x1x64xf32, #tpu.memory_space<vmem>>, vector<1x1x64xf32>
    %85 = vector.shape_cast %84 : vector<1x1x64xf32> to vector<1x64xf32>
    %cst_54 = arith.constant dense<0.000000e+00> : vector<64x64xf32>
    %86 = tpu.matmul %73, %83, %cst_54 {dimension_numbers = #tpu.dot_dimension_numbers<[1], [0], [0], [1], [0, 0, 1, 1], [], []>} : vector<64x64xf32>, vector<64x64xf32>, vector<64x64xf32> -> vector<64x64xf32>
    %87 = vector.broadcast %85 : vector<1x64xf32> to vector<64x64xf32>
    %88 = arith.addf %86, %87 : vector<64x64xf32>
    %cst_55 = arith.constant 0.000000e+00 : f32
    %89 = vector.broadcast %cst_55 : f32 to vector<64x64xf32>
    %90 = arith.cmpf ogt, %88, %89 : vector<64x64xf32>
    %cst_56 = arith.constant 0.00999999977 : f32
    %91 = vector.broadcast %cst_56 : f32 to vector<64x64xf32>
    %92 = arith.mulf %91, %88 : vector<64x64xf32>
    %93 = arith.select %90, %88, %92 : vector<64x64xi1>, vector<64x64xf32>
    %cst_57 = arith.constant dense<0.000000e+00> : vector<64x64xf32>
    %94 = tpu.matmul %81, %83, %cst_57 {dimension_numbers = #tpu.dot_dimension_numbers<[1], [0], [0], [1], [0, 0, 1, 1], [], []>} : vector<64x64xf32>, vector<64x64xf32>, vector<64x64xf32> -> vector<64x64xf32>
    %95 = vector.broadcast %85 : vector<1x64xf32> to vector<64x64xf32>
    %96 = arith.addf %94, %95 : vector<64x64xf32>
    %cst_58 = arith.constant 0.000000e+00 : f32
    %97 = vector.broadcast %cst_58 : f32 to vector<64x64xf32>
    %98 = arith.cmpf ogt, %96, %97 : vector<64x64xf32>
    %cst_59 = arith.constant 0.00999999977 : f32
    %99 = vector.broadcast %cst_59 : f32 to vector<64x64xf32>
    %100 = arith.mulf %99, %96 : vector<64x64xf32>
    %101 = arith.select %98, %96, %100 : vector<64x64xi1>, vector<64x64xf32>
    %c4 = arith.constant 4 : index
    %c0_60 = arith.constant 0 : index
    %c0_61 = arith.constant 0 : index
    %102 = vector.load %arg4[%c4, %c0_60, %c0_61] : memref<26x64x64xf32, #tpu.memory_space<vmem>>, vector<1x64x64xf32>
    %103 = vector.shape_cast %102 : vector<1x64x64xf32> to vector<64x64xf32>
    %c4_62 = arith.constant 4 : index
    %c0_63 = arith.constant 0 : index
    %c0_64 = arith.constant 0 : index
    %104 = vector.load %arg5[%c4_62, %c0_63, %c0_64] : memref<26x1x64xf32, #tpu.memory_space<vmem>>, vector<1x1x64xf32>
    %105 = vector.shape_cast %104 : vector<1x1x64xf32> to vector<1x64xf32>
    %cst_65 = arith.constant dense<0.000000e+00> : vector<64x64xf32>
    %106 = tpu.matmul %93, %103, %cst_65 {dimension_numbers = #tpu.dot_dimension_numbers<[1], [0], [0], [1], [0, 0, 1, 1], [], []>} : vector<64x64xf32>, vector<64x64xf32>, vector<64x64xf32> -> vector<64x64xf32>
    %107 = vector.broadcast %105 : vector<1x64xf32> to vector<64x64xf32>
    %108 = arith.addf %106, %107 : vector<64x64xf32>
    %cst_66 = arith.constant 0.000000e+00 : f32
    %109 = vector.broadcast %cst_66 : f32 to vector<64x64xf32>
    %110 = arith.cmpf ogt, %108, %109 : vector<64x64xf32>
    %cst_67 = arith.constant 0.00999999977 : f32
    %111 = vector.broadcast %cst_67 : f32 to vector<64x64xf32>
    %112 = arith.mulf %111, %108 : vector<64x64xf32>
    %113 = arith.select %110, %108, %112 : vector<64x64xi1>, vector<64x64xf32>
    %cst_68 = arith.constant dense<0.000000e+00> : vector<64x64xf32>
    %114 = tpu.matmul %101, %103, %cst_68 {dimension_numbers = #tpu.dot_dimension_numbers<[1], [0], [0], [1], [0, 0, 1, 1], [], []>} : vector<64x64xf32>, vector<64x64xf32>, vector<64x64xf32> -> vector<64x64xf32>
    %115 = vector.broadcast %105 : vector<1x64xf32> to vector<64x64xf32>
    %116 = arith.addf %114, %115 : vector<64x64xf32>
    %cst_69 = arith.constant 0.000000e+00 : f32
    %117 = vector.broadcast %cst_69 : f32 to vector<64x64xf32>
    %118 = arith.cmpf ogt, %116, %117 : vector<64x64xf32>
    %cst_70 = arith.constant 0.00999999977 : f32
    %119 = vector.broadcast %cst_70 : f32 to vector<64x64xf32>
    %120 = arith.mulf %119, %116 : vector<64x64xf32>
    %121 = arith.select %118, %116, %120 : vector<64x64xi1>, vector<64x64xf32>
    %c5 = arith.constant 5 : index
    %c0_71 = arith.constant 0 : index
    %c0_72 = arith.constant 0 : index
    %122 = vector.load %arg4[%c5, %c0_71, %c0_72] : memref<26x64x64xf32, #tpu.memory_space<vmem>>, vector<1x64x64xf32>
    %123 = vector.shape_cast %122 : vector<1x64x64xf32> to vector<64x64xf32>
    %c5_73 = arith.constant 5 : index
    %c0_74 = arith.constant 0 : index
    %c0_75 = arith.constant 0 : index
    %124 = vector.load %arg5[%c5_73, %c0_74, %c0_75] : memref<26x1x64xf32, #tpu.memory_space<vmem>>, vector<1x1x64xf32>
    %125 = vector.shape_cast %124 : vector<1x1x64xf32> to vector<1x64xf32>
    %cst_76 = arith.constant dense<0.000000e+00> : vector<64x64xf32>
    %126 = tpu.matmul %113, %123, %cst_76 {dimension_numbers = #tpu.dot_dimension_numbers<[1], [0], [0], [1], [0, 0, 1, 1], [], []>} : vector<64x64xf32>, vector<64x64xf32>, vector<64x64xf32> -> vector<64x64xf32>
    %127 = vector.broadcast %125 : vector<1x64xf32> to vector<64x64xf32>
    %128 = arith.addf %126, %127 : vector<64x64xf32>
    %cst_77 = arith.constant 0.000000e+00 : f32
    %129 = vector.broadcast %cst_77 : f32 to vector<64x64xf32>
    %130 = arith.cmpf ogt, %128, %129 : vector<64x64xf32>
    %cst_78 = arith.constant 0.00999999977 : f32
    %131 = vector.broadcast %cst_78 : f32 to vector<64x64xf32>
    %132 = arith.mulf %131, %128 : vector<64x64xf32>
    %133 = arith.select %130, %128, %132 : vector<64x64xi1>, vector<64x64xf32>
    %cst_79 = arith.constant dense<0.000000e+00> : vector<64x64xf32>
    %134 = tpu.matmul %121, %123, %cst_79 {dimension_numbers = #tpu.dot_dimension_numbers<[1], [0], [0], [1], [0, 0, 1, 1], [], []>} : vector<64x64xf32>, vector<64x64xf32>, vector<64x64xf32> -> vector<64x64xf32>
    %135 = vector.broadcast %125 : vector<1x64xf32> to vector<64x64xf32>
    %136 = arith.addf %134, %135 : vector<64x64xf32>
    %cst_80 = arith.constant 0.000000e+00 : f32
    %137 = vector.broadcast %cst_80 : f32 to vector<64x64xf32>
    %138 = arith.cmpf ogt, %136, %137 : vector<64x64xf32>
    %cst_81 = arith.constant 0.00999999977 : f32
    %139 = vector.broadcast %cst_81 : f32 to vector<64x64xf32>
    %140 = arith.mulf %139, %136 : vector<64x64xf32>
    %141 = arith.select %138, %136, %140 : vector<64x64xi1>, vector<64x64xf32>
    %c6 = arith.constant 6 : index
    %c0_82 = arith.constant 0 : index
    %c0_83 = arith.constant 0 : index
    %142 = vector.load %arg4[%c6, %c0_82, %c0_83] : memref<26x64x64xf32, #tpu.memory_space<vmem>>, vector<1x64x64xf32>
    %143 = vector.shape_cast %142 : vector<1x64x64xf32> to vector<64x64xf32>
    %c6_84 = arith.constant 6 : index
    %c0_85 = arith.constant 0 : index
    %c0_86 = arith.constant 0 : index
    %144 = vector.load %arg5[%c6_84, %c0_85, %c0_86] : memref<26x1x64xf32, #tpu.memory_space<vmem>>, vector<1x1x64xf32>
    %145 = vector.shape_cast %144 : vector<1x1x64xf32> to vector<1x64xf32>
    %cst_87 = arith.constant dense<0.000000e+00> : vector<64x64xf32>
    %146 = tpu.matmul %133, %143, %cst_87 {dimension_numbers = #tpu.dot_dimension_numbers<[1], [0], [0], [1], [0, 0, 1, 1], [], []>} : vector<64x64xf32>, vector<64x64xf32>, vector<64x64xf32> -> vector<64x64xf32>
    %147 = vector.broadcast %145 : vector<1x64xf32> to vector<64x64xf32>
    %148 = arith.addf %146, %147 : vector<64x64xf32>
    %cst_88 = arith.constant 0.000000e+00 : f32
    %149 = vector.broadcast %cst_88 : f32 to vector<64x64xf32>
    %150 = arith.cmpf ogt, %148, %149 : vector<64x64xf32>
    %cst_89 = arith.constant 0.00999999977 : f32
    %151 = vector.broadcast %cst_89 : f32 to vector<64x64xf32>
    %152 = arith.mulf %151, %148 : vector<64x64xf32>
    %153 = arith.select %150, %148, %152 : vector<64x64xi1>, vector<64x64xf32>
    %cst_90 = arith.constant dense<0.000000e+00> : vector<64x64xf32>
    %154 = tpu.matmul %141, %143, %cst_90 {dimension_numbers = #tpu.dot_dimension_numbers<[1], [0], [0], [1], [0, 0, 1, 1], [], []>} : vector<64x64xf32>, vector<64x64xf32>, vector<64x64xf32> -> vector<64x64xf32>
    %155 = vector.broadcast %145 : vector<1x64xf32> to vector<64x64xf32>
    %156 = arith.addf %154, %155 : vector<64x64xf32>
    %cst_91 = arith.constant 0.000000e+00 : f32
    %157 = vector.broadcast %cst_91 : f32 to vector<64x64xf32>
    %158 = arith.cmpf ogt, %156, %157 : vector<64x64xf32>
    %cst_92 = arith.constant 0.00999999977 : f32
    %159 = vector.broadcast %cst_92 : f32 to vector<64x64xf32>
    %160 = arith.mulf %159, %156 : vector<64x64xf32>
    %161 = arith.select %158, %156, %160 : vector<64x64xi1>, vector<64x64xf32>
    %c7 = arith.constant 7 : index
    %c0_93 = arith.constant 0 : index
    %c0_94 = arith.constant 0 : index
    %162 = vector.load %arg4[%c7, %c0_93, %c0_94] : memref<26x64x64xf32, #tpu.memory_space<vmem>>, vector<1x64x64xf32>
    %163 = vector.shape_cast %162 : vector<1x64x64xf32> to vector<64x64xf32>
    %c7_95 = arith.constant 7 : index
    %c0_96 = arith.constant 0 : index
    %c0_97 = arith.constant 0 : index
    %164 = vector.load %arg5[%c7_95, %c0_96, %c0_97] : memref<26x1x64xf32, #tpu.memory_space<vmem>>, vector<1x1x64xf32>
    %165 = vector.shape_cast %164 : vector<1x1x64xf32> to vector<1x64xf32>
    %cst_98 = arith.constant dense<0.000000e+00> : vector<64x64xf32>
    %166 = tpu.matmul %153, %163, %cst_98 {dimension_numbers = #tpu.dot_dimension_numbers<[1], [0], [0], [1], [0, 0, 1, 1], [], []>} : vector<64x64xf32>, vector<64x64xf32>, vector<64x64xf32> -> vector<64x64xf32>
    %167 = vector.broadcast %165 : vector<1x64xf32> to vector<64x64xf32>
    %168 = arith.addf %166, %167 : vector<64x64xf32>
    %cst_99 = arith.constant 0.000000e+00 : f32
    %169 = vector.broadcast %cst_99 : f32 to vector<64x64xf32>
    %170 = arith.cmpf ogt, %168, %169 : vector<64x64xf32>
    %cst_100 = arith.constant 0.00999999977 : f32
    %171 = vector.broadcast %cst_100 : f32 to vector<64x64xf32>
    %172 = arith.mulf %171, %168 : vector<64x64xf32>
    %173 = arith.select %170, %168, %172 : vector<64x64xi1>, vector<64x64xf32>
    %cst_101 = arith.constant dense<0.000000e+00> : vector<64x64xf32>
    %174 = tpu.matmul %161, %163, %cst_101 {dimension_numbers = #tpu.dot_dimension_numbers<[1], [0], [0], [1], [0, 0, 1, 1], [], []>} : vector<64x64xf32>, vector<64x64xf32>, vector<64x64xf32> -> vector<64x64xf32>
    %175 = vector.broadcast %165 : vector<1x64xf32> to vector<64x64xf32>
    %176 = arith.addf %174, %175 : vector<64x64xf32>
    %cst_102 = arith.constant 0.000000e+00 : f32
    %177 = vector.broadcast %cst_102 : f32 to vector<64x64xf32>
    %178 = arith.cmpf ogt, %176, %177 : vector<64x64xf32>
    %cst_103 = arith.constant 0.00999999977 : f32
    %179 = vector.broadcast %cst_103 : f32 to vector<64x64xf32>
    %180 = arith.mulf %179, %176 : vector<64x64xf32>
    %181 = arith.select %178, %176, %180 : vector<64x64xi1>, vector<64x64xf32>
    %c8 = arith.constant 8 : index
    %c0_104 = arith.constant 0 : index
    %c0_105 = arith.constant 0 : index
    %182 = vector.load %arg4[%c8, %c0_104, %c0_105] : memref<26x64x64xf32, #tpu.memory_space<vmem>>, vector<1x64x64xf32>
    %183 = vector.shape_cast %182 : vector<1x64x64xf32> to vector<64x64xf32>
    %c8_106 = arith.constant 8 : index
    %c0_107 = arith.constant 0 : index
    %c0_108 = arith.constant 0 : index
    %184 = vector.load %arg5[%c8_106, %c0_107, %c0_108] : memref<26x1x64xf32, #tpu.memory_space<vmem>>, vector<1x1x64xf32>
    %185 = vector.shape_cast %184 : vector<1x1x64xf32> to vector<1x64xf32>
    %cst_109 = arith.constant dense<0.000000e+00> : vector<64x64xf32>
    %186 = tpu.matmul %173, %183, %cst_109 {dimension_numbers = #tpu.dot_dimension_numbers<[1], [0], [0], [1], [0, 0, 1, 1], [], []>} : vector<64x64xf32>, vector<64x64xf32>, vector<64x64xf32> -> vector<64x64xf32>
    %187 = vector.broadcast %185 : vector<1x64xf32> to vector<64x64xf32>
    %188 = arith.addf %186, %187 : vector<64x64xf32>
    %cst_110 = arith.constant 0.000000e+00 : f32
    %189 = vector.broadcast %cst_110 : f32 to vector<64x64xf32>
    %190 = arith.cmpf ogt, %188, %189 : vector<64x64xf32>
    %cst_111 = arith.constant 0.00999999977 : f32
    %191 = vector.broadcast %cst_111 : f32 to vector<64x64xf32>
    %192 = arith.mulf %191, %188 : vector<64x64xf32>
    %193 = arith.select %190, %188, %192 : vector<64x64xi1>, vector<64x64xf32>
    %cst_112 = arith.constant dense<0.000000e+00> : vector<64x64xf32>
    %194 = tpu.matmul %181, %183, %cst_112 {dimension_numbers = #tpu.dot_dimension_numbers<[1], [0], [0], [1], [0, 0, 1, 1], [], []>} : vector<64x64xf32>, vector<64x64xf32>, vector<64x64xf32> -> vector<64x64xf32>
    %195 = vector.broadcast %185 : vector<1x64xf32> to vector<64x64xf32>
    %196 = arith.addf %194, %195 : vector<64x64xf32>
    %cst_113 = arith.constant 0.000000e+00 : f32
    %197 = vector.broadcast %cst_113 : f32 to vector<64x64xf32>
    %198 = arith.cmpf ogt, %196, %197 : vector<64x64xf32>
    %cst_114 = arith.constant 0.00999999977 : f32
    %199 = vector.broadcast %cst_114 : f32 to vector<64x64xf32>
    %200 = arith.mulf %199, %196 : vector<64x64xf32>
    %201 = arith.select %198, %196, %200 : vector<64x64xi1>, vector<64x64xf32>
    %c9 = arith.constant 9 : index
    %c0_115 = arith.constant 0 : index
    %c0_116 = arith.constant 0 : index
    %202 = vector.load %arg4[%c9, %c0_115, %c0_116] : memref<26x64x64xf32, #tpu.memory_space<vmem>>, vector<1x64x64xf32>
    %203 = vector.shape_cast %202 : vector<1x64x64xf32> to vector<64x64xf32>
    %c9_117 = arith.constant 9 : index
    %c0_118 = arith.constant 0 : index
    %c0_119 = arith.constant 0 : index
    %204 = vector.load %arg5[%c9_117, %c0_118, %c0_119] : memref<26x1x64xf32, #tpu.memory_space<vmem>>, vector<1x1x64xf32>
    %205 = vector.shape_cast %204 : vector<1x1x64xf32> to vector<1x64xf32>
    %cst_120 = arith.constant dense<0.000000e+00> : vector<64x64xf32>
    %206 = tpu.matmul %193, %203, %cst_120 {dimension_numbers = #tpu.dot_dimension_numbers<[1], [0], [0], [1], [0, 0, 1, 1], [], []>} : vector<64x64xf32>, vector<64x64xf32>, vector<64x64xf32> -> vector<64x64xf32>
    %207 = vector.broadcast %205 : vector<1x64xf32> to vector<64x64xf32>
    %208 = arith.addf %206, %207 : vector<64x64xf32>
    %cst_121 = arith.constant 0.000000e+00 : f32
    %209 = vector.broadcast %cst_121 : f32 to vector<64x64xf32>
    %210 = arith.cmpf ogt, %208, %209 : vector<64x64xf32>
    %cst_122 = arith.constant 0.00999999977 : f32
    %211 = vector.broadcast %cst_122 : f32 to vector<64x64xf32>
    %212 = arith.mulf %211, %208 : vector<64x64xf32>
    %213 = arith.select %210, %208, %212 : vector<64x64xi1>, vector<64x64xf32>
    %cst_123 = arith.constant dense<0.000000e+00> : vector<64x64xf32>
    %214 = tpu.matmul %201, %203, %cst_123 {dimension_numbers = #tpu.dot_dimension_numbers<[1], [0], [0], [1], [0, 0, 1, 1], [], []>} : vector<64x64xf32>, vector<64x64xf32>, vector<64x64xf32> -> vector<64x64xf32>
    %215 = vector.broadcast %205 : vector<1x64xf32> to vector<64x64xf32>
    %216 = arith.addf %214, %215 : vector<64x64xf32>
    %cst_124 = arith.constant 0.000000e+00 : f32
    %217 = vector.broadcast %cst_124 : f32 to vector<64x64xf32>
    %218 = arith.cmpf ogt, %216, %217 : vector<64x64xf32>
    %cst_125 = arith.constant 0.00999999977 : f32
    %219 = vector.broadcast %cst_125 : f32 to vector<64x64xf32>
    %220 = arith.mulf %219, %216 : vector<64x64xf32>
    %221 = arith.select %218, %216, %220 : vector<64x64xi1>, vector<64x64xf32>
    %c10 = arith.constant 10 : index
    %c0_126 = arith.constant 0 : index
    %c0_127 = arith.constant 0 : index
    %222 = vector.load %arg4[%c10, %c0_126, %c0_127] : memref<26x64x64xf32, #tpu.memory_space<vmem>>, vector<1x64x64xf32>
    %223 = vector.shape_cast %222 : vector<1x64x64xf32> to vector<64x64xf32>
    %c10_128 = arith.constant 10 : index
    %c0_129 = arith.constant 0 : index
    %c0_130 = arith.constant 0 : index
    %224 = vector.load %arg5[%c10_128, %c0_129, %c0_130] : memref<26x1x64xf32, #tpu.memory_space<vmem>>, vector<1x1x64xf32>
    %225 = vector.shape_cast %224 : vector<1x1x64xf32> to vector<1x64xf32>
    %cst_131 = arith.constant dense<0.000000e+00> : vector<64x64xf32>
    %226 = tpu.matmul %213, %223, %cst_131 {dimension_numbers = #tpu.dot_dimension_numbers<[1], [0], [0], [1], [0, 0, 1, 1], [], []>} : vector<64x64xf32>, vector<64x64xf32>, vector<64x64xf32> -> vector<64x64xf32>
    %227 = vector.broadcast %225 : vector<1x64xf32> to vector<64x64xf32>
    %228 = arith.addf %226, %227 : vector<64x64xf32>
    %cst_132 = arith.constant 0.000000e+00 : f32
    %229 = vector.broadcast %cst_132 : f32 to vector<64x64xf32>
    %230 = arith.cmpf ogt, %228, %229 : vector<64x64xf32>
    %cst_133 = arith.constant 0.00999999977 : f32
    %231 = vector.broadcast %cst_133 : f32 to vector<64x64xf32>
    %232 = arith.mulf %231, %228 : vector<64x64xf32>
    %233 = arith.select %230, %228, %232 : vector<64x64xi1>, vector<64x64xf32>
    %cst_134 = arith.constant dense<0.000000e+00> : vector<64x64xf32>
    %234 = tpu.matmul %221, %223, %cst_134 {dimension_numbers = #tpu.dot_dimension_numbers<[1], [0], [0], [1], [0, 0, 1, 1], [], []>} : vector<64x64xf32>, vector<64x64xf32>, vector<64x64xf32> -> vector<64x64xf32>
    %235 = vector.broadcast %225 : vector<1x64xf32> to vector<64x64xf32>
    %236 = arith.addf %234, %235 : vector<64x64xf32>
    %cst_135 = arith.constant 0.000000e+00 : f32
    %237 = vector.broadcast %cst_135 : f32 to vector<64x64xf32>
    %238 = arith.cmpf ogt, %236, %237 : vector<64x64xf32>
    %cst_136 = arith.constant 0.00999999977 : f32
    %239 = vector.broadcast %cst_136 : f32 to vector<64x64xf32>
    %240 = arith.mulf %239, %236 : vector<64x64xf32>
    %241 = arith.select %238, %236, %240 : vector<64x64xi1>, vector<64x64xf32>
    %c11 = arith.constant 11 : index
    %c0_137 = arith.constant 0 : index
    %c0_138 = arith.constant 0 : index
    %242 = vector.load %arg4[%c11, %c0_137, %c0_138] : memref<26x64x64xf32, #tpu.memory_space<vmem>>, vector<1x64x64xf32>
    %243 = vector.shape_cast %242 : vector<1x64x64xf32> to vector<64x64xf32>
    %c11_139 = arith.constant 11 : index
    %c0_140 = arith.constant 0 : index
    %c0_141 = arith.constant 0 : index
    %244 = vector.load %arg5[%c11_139, %c0_140, %c0_141] : memref<26x1x64xf32, #tpu.memory_space<vmem>>, vector<1x1x64xf32>
    %245 = vector.shape_cast %244 : vector<1x1x64xf32> to vector<1x64xf32>
    %cst_142 = arith.constant dense<0.000000e+00> : vector<64x64xf32>
    %246 = tpu.matmul %233, %243, %cst_142 {dimension_numbers = #tpu.dot_dimension_numbers<[1], [0], [0], [1], [0, 0, 1, 1], [], []>} : vector<64x64xf32>, vector<64x64xf32>, vector<64x64xf32> -> vector<64x64xf32>
    %247 = vector.broadcast %245 : vector<1x64xf32> to vector<64x64xf32>
    %248 = arith.addf %246, %247 : vector<64x64xf32>
    %cst_143 = arith.constant 0.000000e+00 : f32
    %249 = vector.broadcast %cst_143 : f32 to vector<64x64xf32>
    %250 = arith.cmpf ogt, %248, %249 : vector<64x64xf32>
    %cst_144 = arith.constant 0.00999999977 : f32
    %251 = vector.broadcast %cst_144 : f32 to vector<64x64xf32>
    %252 = arith.mulf %251, %248 : vector<64x64xf32>
    %253 = arith.select %250, %248, %252 : vector<64x64xi1>, vector<64x64xf32>
    %cst_145 = arith.constant dense<0.000000e+00> : vector<64x64xf32>
    %254 = tpu.matmul %241, %243, %cst_145 {dimension_numbers = #tpu.dot_dimension_numbers<[1], [0], [0], [1], [0, 0, 1, 1], [], []>} : vector<64x64xf32>, vector<64x64xf32>, vector<64x64xf32> -> vector<64x64xf32>
    %255 = vector.broadcast %245 : vector<1x64xf32> to vector<64x64xf32>
    %256 = arith.addf %254, %255 : vector<64x64xf32>
    %cst_146 = arith.constant 0.000000e+00 : f32
    %257 = vector.broadcast %cst_146 : f32 to vector<64x64xf32>
    %258 = arith.cmpf ogt, %256, %257 : vector<64x64xf32>
    %cst_147 = arith.constant 0.00999999977 : f32
    %259 = vector.broadcast %cst_147 : f32 to vector<64x64xf32>
    %260 = arith.mulf %259, %256 : vector<64x64xf32>
    %261 = arith.select %258, %256, %260 : vector<64x64xi1>, vector<64x64xf32>
    %c12 = arith.constant 12 : index
    %c0_148 = arith.constant 0 : index
    %c0_149 = arith.constant 0 : index
    %262 = vector.load %arg4[%c12, %c0_148, %c0_149] : memref<26x64x64xf32, #tpu.memory_space<vmem>>, vector<1x64x64xf32>
    %263 = vector.shape_cast %262 : vector<1x64x64xf32> to vector<64x64xf32>
    %c12_150 = arith.constant 12 : index
    %c0_151 = arith.constant 0 : index
    %c0_152 = arith.constant 0 : index
    %264 = vector.load %arg5[%c12_150, %c0_151, %c0_152] : memref<26x1x64xf32, #tpu.memory_space<vmem>>, vector<1x1x64xf32>
    %265 = vector.shape_cast %264 : vector<1x1x64xf32> to vector<1x64xf32>
    %cst_153 = arith.constant dense<0.000000e+00> : vector<64x64xf32>
    %266 = tpu.matmul %253, %263, %cst_153 {dimension_numbers = #tpu.dot_dimension_numbers<[1], [0], [0], [1], [0, 0, 1, 1], [], []>} : vector<64x64xf32>, vector<64x64xf32>, vector<64x64xf32> -> vector<64x64xf32>
    %267 = vector.broadcast %265 : vector<1x64xf32> to vector<64x64xf32>
    %268 = arith.addf %266, %267 : vector<64x64xf32>
    %cst_154 = arith.constant 0.000000e+00 : f32
    %269 = vector.broadcast %cst_154 : f32 to vector<64x64xf32>
    %270 = arith.cmpf ogt, %268, %269 : vector<64x64xf32>
    %cst_155 = arith.constant 0.00999999977 : f32
    %271 = vector.broadcast %cst_155 : f32 to vector<64x64xf32>
    %272 = arith.mulf %271, %268 : vector<64x64xf32>
    %273 = arith.select %270, %268, %272 : vector<64x64xi1>, vector<64x64xf32>
    %cst_156 = arith.constant dense<0.000000e+00> : vector<64x64xf32>
    %274 = tpu.matmul %261, %263, %cst_156 {dimension_numbers = #tpu.dot_dimension_numbers<[1], [0], [0], [1], [0, 0, 1, 1], [], []>} : vector<64x64xf32>, vector<64x64xf32>, vector<64x64xf32> -> vector<64x64xf32>
    %275 = vector.broadcast %265 : vector<1x64xf32> to vector<64x64xf32>
    %276 = arith.addf %274, %275 : vector<64x64xf32>
    %cst_157 = arith.constant 0.000000e+00 : f32
    %277 = vector.broadcast %cst_157 : f32 to vector<64x64xf32>
    %278 = arith.cmpf ogt, %276, %277 : vector<64x64xf32>
    %cst_158 = arith.constant 0.00999999977 : f32
    %279 = vector.broadcast %cst_158 : f32 to vector<64x64xf32>
    %280 = arith.mulf %279, %276 : vector<64x64xf32>
    %281 = arith.select %278, %276, %280 : vector<64x64xi1>, vector<64x64xf32>
    %c13 = arith.constant 13 : index
    %c0_159 = arith.constant 0 : index
    %c0_160 = arith.constant 0 : index
    %282 = vector.load %arg4[%c13, %c0_159, %c0_160] : memref<26x64x64xf32, #tpu.memory_space<vmem>>, vector<1x64x64xf32>
    %283 = vector.shape_cast %282 : vector<1x64x64xf32> to vector<64x64xf32>
    %c13_161 = arith.constant 13 : index
    %c0_162 = arith.constant 0 : index
    %c0_163 = arith.constant 0 : index
    %284 = vector.load %arg5[%c13_161, %c0_162, %c0_163] : memref<26x1x64xf32, #tpu.memory_space<vmem>>, vector<1x1x64xf32>
    %285 = vector.shape_cast %284 : vector<1x1x64xf32> to vector<1x64xf32>
    %cst_164 = arith.constant dense<0.000000e+00> : vector<64x64xf32>
    %286 = tpu.matmul %273, %283, %cst_164 {dimension_numbers = #tpu.dot_dimension_numbers<[1], [0], [0], [1], [0, 0, 1, 1], [], []>} : vector<64x64xf32>, vector<64x64xf32>, vector<64x64xf32> -> vector<64x64xf32>
    %287 = vector.broadcast %285 : vector<1x64xf32> to vector<64x64xf32>
    %288 = arith.addf %286, %287 : vector<64x64xf32>
    %cst_165 = arith.constant 0.000000e+00 : f32
    %289 = vector.broadcast %cst_165 : f32 to vector<64x64xf32>
    %290 = arith.cmpf ogt, %288, %289 : vector<64x64xf32>
    %cst_166 = arith.constant 0.00999999977 : f32
    %291 = vector.broadcast %cst_166 : f32 to vector<64x64xf32>
    %292 = arith.mulf %291, %288 : vector<64x64xf32>
    %293 = arith.select %290, %288, %292 : vector<64x64xi1>, vector<64x64xf32>
    %cst_167 = arith.constant dense<0.000000e+00> : vector<64x64xf32>
    %294 = tpu.matmul %281, %283, %cst_167 {dimension_numbers = #tpu.dot_dimension_numbers<[1], [0], [0], [1], [0, 0, 1, 1], [], []>} : vector<64x64xf32>, vector<64x64xf32>, vector<64x64xf32> -> vector<64x64xf32>
    %295 = vector.broadcast %285 : vector<1x64xf32> to vector<64x64xf32>
    %296 = arith.addf %294, %295 : vector<64x64xf32>
    %cst_168 = arith.constant 0.000000e+00 : f32
    %297 = vector.broadcast %cst_168 : f32 to vector<64x64xf32>
    %298 = arith.cmpf ogt, %296, %297 : vector<64x64xf32>
    %cst_169 = arith.constant 0.00999999977 : f32
    %299 = vector.broadcast %cst_169 : f32 to vector<64x64xf32>
    %300 = arith.mulf %299, %296 : vector<64x64xf32>
    %301 = arith.select %298, %296, %300 : vector<64x64xi1>, vector<64x64xf32>
    %c14 = arith.constant 14 : index
    %c0_170 = arith.constant 0 : index
    %c0_171 = arith.constant 0 : index
    %302 = vector.load %arg4[%c14, %c0_170, %c0_171] : memref<26x64x64xf32, #tpu.memory_space<vmem>>, vector<1x64x64xf32>
    %303 = vector.shape_cast %302 : vector<1x64x64xf32> to vector<64x64xf32>
    %c14_172 = arith.constant 14 : index
    %c0_173 = arith.constant 0 : index
    %c0_174 = arith.constant 0 : index
    %304 = vector.load %arg5[%c14_172, %c0_173, %c0_174] : memref<26x1x64xf32, #tpu.memory_space<vmem>>, vector<1x1x64xf32>
    %305 = vector.shape_cast %304 : vector<1x1x64xf32> to vector<1x64xf32>
    %cst_175 = arith.constant dense<0.000000e+00> : vector<64x64xf32>
    %306 = tpu.matmul %293, %303, %cst_175 {dimension_numbers = #tpu.dot_dimension_numbers<[1], [0], [0], [1], [0, 0, 1, 1], [], []>} : vector<64x64xf32>, vector<64x64xf32>, vector<64x64xf32> -> vector<64x64xf32>
    %307 = vector.broadcast %305 : vector<1x64xf32> to vector<64x64xf32>
    %308 = arith.addf %306, %307 : vector<64x64xf32>
    %cst_176 = arith.constant 0.000000e+00 : f32
    %309 = vector.broadcast %cst_176 : f32 to vector<64x64xf32>
    %310 = arith.cmpf ogt, %308, %309 : vector<64x64xf32>
    %cst_177 = arith.constant 0.00999999977 : f32
    %311 = vector.broadcast %cst_177 : f32 to vector<64x64xf32>
    %312 = arith.mulf %311, %308 : vector<64x64xf32>
    %313 = arith.select %310, %308, %312 : vector<64x64xi1>, vector<64x64xf32>
    %cst_178 = arith.constant dense<0.000000e+00> : vector<64x64xf32>
    %314 = tpu.matmul %301, %303, %cst_178 {dimension_numbers = #tpu.dot_dimension_numbers<[1], [0], [0], [1], [0, 0, 1, 1], [], []>} : vector<64x64xf32>, vector<64x64xf32>, vector<64x64xf32> -> vector<64x64xf32>
    %315 = vector.broadcast %305 : vector<1x64xf32> to vector<64x64xf32>
    %316 = arith.addf %314, %315 : vector<64x64xf32>
    %cst_179 = arith.constant 0.000000e+00 : f32
    %317 = vector.broadcast %cst_179 : f32 to vector<64x64xf32>
    %318 = arith.cmpf ogt, %316, %317 : vector<64x64xf32>
    %cst_180 = arith.constant 0.00999999977 : f32
    %319 = vector.broadcast %cst_180 : f32 to vector<64x64xf32>
    %320 = arith.mulf %319, %316 : vector<64x64xf32>
    %321 = arith.select %318, %316, %320 : vector<64x64xi1>, vector<64x64xf32>
    %c15 = arith.constant 15 : index
    %c0_181 = arith.constant 0 : index
    %c0_182 = arith.constant 0 : index
    %322 = vector.load %arg4[%c15, %c0_181, %c0_182] : memref<26x64x64xf32, #tpu.memory_space<vmem>>, vector<1x64x64xf32>
    %323 = vector.shape_cast %322 : vector<1x64x64xf32> to vector<64x64xf32>
    %c15_183 = arith.constant 15 : index
    %c0_184 = arith.constant 0 : index
    %c0_185 = arith.constant 0 : index
    %324 = vector.load %arg5[%c15_183, %c0_184, %c0_185] : memref<26x1x64xf32, #tpu.memory_space<vmem>>, vector<1x1x64xf32>
    %325 = vector.shape_cast %324 : vector<1x1x64xf32> to vector<1x64xf32>
    %cst_186 = arith.constant dense<0.000000e+00> : vector<64x64xf32>
    %326 = tpu.matmul %313, %323, %cst_186 {dimension_numbers = #tpu.dot_dimension_numbers<[1], [0], [0], [1], [0, 0, 1, 1], [], []>} : vector<64x64xf32>, vector<64x64xf32>, vector<64x64xf32> -> vector<64x64xf32>
    %327 = vector.broadcast %325 : vector<1x64xf32> to vector<64x64xf32>
    %328 = arith.addf %326, %327 : vector<64x64xf32>
    %cst_187 = arith.constant 0.000000e+00 : f32
    %329 = vector.broadcast %cst_187 : f32 to vector<64x64xf32>
    %330 = arith.cmpf ogt, %328, %329 : vector<64x64xf32>
    %cst_188 = arith.constant 0.00999999977 : f32
    %331 = vector.broadcast %cst_188 : f32 to vector<64x64xf32>
    %332 = arith.mulf %331, %328 : vector<64x64xf32>
    %333 = arith.select %330, %328, %332 : vector<64x64xi1>, vector<64x64xf32>
    %cst_189 = arith.constant dense<0.000000e+00> : vector<64x64xf32>
    %334 = tpu.matmul %321, %323, %cst_189 {dimension_numbers = #tpu.dot_dimension_numbers<[1], [0], [0], [1], [0, 0, 1, 1], [], []>} : vector<64x64xf32>, vector<64x64xf32>, vector<64x64xf32> -> vector<64x64xf32>
    %335 = vector.broadcast %325 : vector<1x64xf32> to vector<64x64xf32>
    %336 = arith.addf %334, %335 : vector<64x64xf32>
    %cst_190 = arith.constant 0.000000e+00 : f32
    %337 = vector.broadcast %cst_190 : f32 to vector<64x64xf32>
    %338 = arith.cmpf ogt, %336, %337 : vector<64x64xf32>
    %cst_191 = arith.constant 0.00999999977 : f32
    %339 = vector.broadcast %cst_191 : f32 to vector<64x64xf32>
    %340 = arith.mulf %339, %336 : vector<64x64xf32>
    %341 = arith.select %338, %336, %340 : vector<64x64xi1>, vector<64x64xf32>
    %c16 = arith.constant 16 : index
    %c0_192 = arith.constant 0 : index
    %c0_193 = arith.constant 0 : index
    %342 = vector.load %arg4[%c16, %c0_192, %c0_193] : memref<26x64x64xf32, #tpu.memory_space<vmem>>, vector<1x64x64xf32>
    %343 = vector.shape_cast %342 : vector<1x64x64xf32> to vector<64x64xf32>
    %c16_194 = arith.constant 16 : index
    %c0_195 = arith.constant 0 : index
    %c0_196 = arith.constant 0 : index
    %344 = vector.load %arg5[%c16_194, %c0_195, %c0_196] : memref<26x1x64xf32, #tpu.memory_space<vmem>>, vector<1x1x64xf32>
    %345 = vector.shape_cast %344 : vector<1x1x64xf32> to vector<1x64xf32>
    %cst_197 = arith.constant dense<0.000000e+00> : vector<64x64xf32>
    %346 = tpu.matmul %333, %343, %cst_197 {dimension_numbers = #tpu.dot_dimension_numbers<[1], [0], [0], [1], [0, 0, 1, 1], [], []>} : vector<64x64xf32>, vector<64x64xf32>, vector<64x64xf32> -> vector<64x64xf32>
    %347 = vector.broadcast %345 : vector<1x64xf32> to vector<64x64xf32>
    %348 = arith.addf %346, %347 : vector<64x64xf32>
    %cst_198 = arith.constant 0.000000e+00 : f32
    %349 = vector.broadcast %cst_198 : f32 to vector<64x64xf32>
    %350 = arith.cmpf ogt, %348, %349 : vector<64x64xf32>
    %cst_199 = arith.constant 0.00999999977 : f32
    %351 = vector.broadcast %cst_199 : f32 to vector<64x64xf32>
    %352 = arith.mulf %351, %348 : vector<64x64xf32>
    %353 = arith.select %350, %348, %352 : vector<64x64xi1>, vector<64x64xf32>
    %cst_200 = arith.constant dense<0.000000e+00> : vector<64x64xf32>
    %354 = tpu.matmul %341, %343, %cst_200 {dimension_numbers = #tpu.dot_dimension_numbers<[1], [0], [0], [1], [0, 0, 1, 1], [], []>} : vector<64x64xf32>, vector<64x64xf32>, vector<64x64xf32> -> vector<64x64xf32>
    %355 = vector.broadcast %345 : vector<1x64xf32> to vector<64x64xf32>
    %356 = arith.addf %354, %355 : vector<64x64xf32>
    %cst_201 = arith.constant 0.000000e+00 : f32
    %357 = vector.broadcast %cst_201 : f32 to vector<64x64xf32>
    %358 = arith.cmpf ogt, %356, %357 : vector<64x64xf32>
    %cst_202 = arith.constant 0.00999999977 : f32
    %359 = vector.broadcast %cst_202 : f32 to vector<64x64xf32>
    %360 = arith.mulf %359, %356 : vector<64x64xf32>
    %361 = arith.select %358, %356, %360 : vector<64x64xi1>, vector<64x64xf32>
    %c17 = arith.constant 17 : index
    %c0_203 = arith.constant 0 : index
    %c0_204 = arith.constant 0 : index
    %362 = vector.load %arg4[%c17, %c0_203, %c0_204] : memref<26x64x64xf32, #tpu.memory_space<vmem>>, vector<1x64x64xf32>
    %363 = vector.shape_cast %362 : vector<1x64x64xf32> to vector<64x64xf32>
    %c17_205 = arith.constant 17 : index
    %c0_206 = arith.constant 0 : index
    %c0_207 = arith.constant 0 : index
    %364 = vector.load %arg5[%c17_205, %c0_206, %c0_207] : memref<26x1x64xf32, #tpu.memory_space<vmem>>, vector<1x1x64xf32>
    %365 = vector.shape_cast %364 : vector<1x1x64xf32> to vector<1x64xf32>
    %cst_208 = arith.constant dense<0.000000e+00> : vector<64x64xf32>
    %366 = tpu.matmul %353, %363, %cst_208 {dimension_numbers = #tpu.dot_dimension_numbers<[1], [0], [0], [1], [0, 0, 1, 1], [], []>} : vector<64x64xf32>, vector<64x64xf32>, vector<64x64xf32> -> vector<64x64xf32>
    %367 = vector.broadcast %365 : vector<1x64xf32> to vector<64x64xf32>
    %368 = arith.addf %366, %367 : vector<64x64xf32>
    %cst_209 = arith.constant 0.000000e+00 : f32
    %369 = vector.broadcast %cst_209 : f32 to vector<64x64xf32>
    %370 = arith.cmpf ogt, %368, %369 : vector<64x64xf32>
    %cst_210 = arith.constant 0.00999999977 : f32
    %371 = vector.broadcast %cst_210 : f32 to vector<64x64xf32>
    %372 = arith.mulf %371, %368 : vector<64x64xf32>
    %373 = arith.select %370, %368, %372 : vector<64x64xi1>, vector<64x64xf32>
    %cst_211 = arith.constant dense<0.000000e+00> : vector<64x64xf32>
    %374 = tpu.matmul %361, %363, %cst_211 {dimension_numbers = #tpu.dot_dimension_numbers<[1], [0], [0], [1], [0, 0, 1, 1], [], []>} : vector<64x64xf32>, vector<64x64xf32>, vector<64x64xf32> -> vector<64x64xf32>
    %375 = vector.broadcast %365 : vector<1x64xf32> to vector<64x64xf32>
    %376 = arith.addf %374, %375 : vector<64x64xf32>
    %cst_212 = arith.constant 0.000000e+00 : f32
    %377 = vector.broadcast %cst_212 : f32 to vector<64x64xf32>
    %378 = arith.cmpf ogt, %376, %377 : vector<64x64xf32>
    %cst_213 = arith.constant 0.00999999977 : f32
    %379 = vector.broadcast %cst_213 : f32 to vector<64x64xf32>
    %380 = arith.mulf %379, %376 : vector<64x64xf32>
    %381 = arith.select %378, %376, %380 : vector<64x64xi1>, vector<64x64xf32>
    %c18 = arith.constant 18 : index
    %c0_214 = arith.constant 0 : index
    %c0_215 = arith.constant 0 : index
    %382 = vector.load %arg4[%c18, %c0_214, %c0_215] : memref<26x64x64xf32, #tpu.memory_space<vmem>>, vector<1x64x64xf32>
    %383 = vector.shape_cast %382 : vector<1x64x64xf32> to vector<64x64xf32>
    %c18_216 = arith.constant 18 : index
    %c0_217 = arith.constant 0 : index
    %c0_218 = arith.constant 0 : index
    %384 = vector.load %arg5[%c18_216, %c0_217, %c0_218] : memref<26x1x64xf32, #tpu.memory_space<vmem>>, vector<1x1x64xf32>
    %385 = vector.shape_cast %384 : vector<1x1x64xf32> to vector<1x64xf32>
    %cst_219 = arith.constant dense<0.000000e+00> : vector<64x64xf32>
    %386 = tpu.matmul %373, %383, %cst_219 {dimension_numbers = #tpu.dot_dimension_numbers<[1], [0], [0], [1], [0, 0, 1, 1], [], []>} : vector<64x64xf32>, vector<64x64xf32>, vector<64x64xf32> -> vector<64x64xf32>
    %387 = vector.broadcast %385 : vector<1x64xf32> to vector<64x64xf32>
    %388 = arith.addf %386, %387 : vector<64x64xf32>
    %cst_220 = arith.constant 0.000000e+00 : f32
    %389 = vector.broadcast %cst_220 : f32 to vector<64x64xf32>
    %390 = arith.cmpf ogt, %388, %389 : vector<64x64xf32>
    %cst_221 = arith.constant 0.00999999977 : f32
    %391 = vector.broadcast %cst_221 : f32 to vector<64x64xf32>
    %392 = arith.mulf %391, %388 : vector<64x64xf32>
    %393 = arith.select %390, %388, %392 : vector<64x64xi1>, vector<64x64xf32>
    %cst_222 = arith.constant dense<0.000000e+00> : vector<64x64xf32>
    %394 = tpu.matmul %381, %383, %cst_222 {dimension_numbers = #tpu.dot_dimension_numbers<[1], [0], [0], [1], [0, 0, 1, 1], [], []>} : vector<64x64xf32>, vector<64x64xf32>, vector<64x64xf32> -> vector<64x64xf32>
    %395 = vector.broadcast %385 : vector<1x64xf32> to vector<64x64xf32>
    %396 = arith.addf %394, %395 : vector<64x64xf32>
    %cst_223 = arith.constant 0.000000e+00 : f32
    %397 = vector.broadcast %cst_223 : f32 to vector<64x64xf32>
    %398 = arith.cmpf ogt, %396, %397 : vector<64x64xf32>
    %cst_224 = arith.constant 0.00999999977 : f32
    %399 = vector.broadcast %cst_224 : f32 to vector<64x64xf32>
    %400 = arith.mulf %399, %396 : vector<64x64xf32>
    %401 = arith.select %398, %396, %400 : vector<64x64xi1>, vector<64x64xf32>
    %c19 = arith.constant 19 : index
    %c0_225 = arith.constant 0 : index
    %c0_226 = arith.constant 0 : index
    %402 = vector.load %arg4[%c19, %c0_225, %c0_226] : memref<26x64x64xf32, #tpu.memory_space<vmem>>, vector<1x64x64xf32>
    %403 = vector.shape_cast %402 : vector<1x64x64xf32> to vector<64x64xf32>
    %c19_227 = arith.constant 19 : index
    %c0_228 = arith.constant 0 : index
    %c0_229 = arith.constant 0 : index
    %404 = vector.load %arg5[%c19_227, %c0_228, %c0_229] : memref<26x1x64xf32, #tpu.memory_space<vmem>>, vector<1x1x64xf32>
    %405 = vector.shape_cast %404 : vector<1x1x64xf32> to vector<1x64xf32>
    %cst_230 = arith.constant dense<0.000000e+00> : vector<64x64xf32>
    %406 = tpu.matmul %393, %403, %cst_230 {dimension_numbers = #tpu.dot_dimension_numbers<[1], [0], [0], [1], [0, 0, 1, 1], [], []>} : vector<64x64xf32>, vector<64x64xf32>, vector<64x64xf32> -> vector<64x64xf32>
    %407 = vector.broadcast %405 : vector<1x64xf32> to vector<64x64xf32>
    %408 = arith.addf %406, %407 : vector<64x64xf32>
    %cst_231 = arith.constant 0.000000e+00 : f32
    %409 = vector.broadcast %cst_231 : f32 to vector<64x64xf32>
    %410 = arith.cmpf ogt, %408, %409 : vector<64x64xf32>
    %cst_232 = arith.constant 0.00999999977 : f32
    %411 = vector.broadcast %cst_232 : f32 to vector<64x64xf32>
    %412 = arith.mulf %411, %408 : vector<64x64xf32>
    %413 = arith.select %410, %408, %412 : vector<64x64xi1>, vector<64x64xf32>
    %cst_233 = arith.constant dense<0.000000e+00> : vector<64x64xf32>
    %414 = tpu.matmul %401, %403, %cst_233 {dimension_numbers = #tpu.dot_dimension_numbers<[1], [0], [0], [1], [0, 0, 1, 1], [], []>} : vector<64x64xf32>, vector<64x64xf32>, vector<64x64xf32> -> vector<64x64xf32>
    %415 = vector.broadcast %405 : vector<1x64xf32> to vector<64x64xf32>
    %416 = arith.addf %414, %415 : vector<64x64xf32>
    %cst_234 = arith.constant 0.000000e+00 : f32
    %417 = vector.broadcast %cst_234 : f32 to vector<64x64xf32>
    %418 = arith.cmpf ogt, %416, %417 : vector<64x64xf32>
    %cst_235 = arith.constant 0.00999999977 : f32
    %419 = vector.broadcast %cst_235 : f32 to vector<64x64xf32>
    %420 = arith.mulf %419, %416 : vector<64x64xf32>
    %421 = arith.select %418, %416, %420 : vector<64x64xi1>, vector<64x64xf32>
    %c20 = arith.constant 20 : index
    %c0_236 = arith.constant 0 : index
    %c0_237 = arith.constant 0 : index
    %422 = vector.load %arg4[%c20, %c0_236, %c0_237] : memref<26x64x64xf32, #tpu.memory_space<vmem>>, vector<1x64x64xf32>
    %423 = vector.shape_cast %422 : vector<1x64x64xf32> to vector<64x64xf32>
    %c20_238 = arith.constant 20 : index
    %c0_239 = arith.constant 0 : index
    %c0_240 = arith.constant 0 : index
    %424 = vector.load %arg5[%c20_238, %c0_239, %c0_240] : memref<26x1x64xf32, #tpu.memory_space<vmem>>, vector<1x1x64xf32>
    %425 = vector.shape_cast %424 : vector<1x1x64xf32> to vector<1x64xf32>
    %cst_241 = arith.constant dense<0.000000e+00> : vector<64x64xf32>
    %426 = tpu.matmul %413, %423, %cst_241 {dimension_numbers = #tpu.dot_dimension_numbers<[1], [0], [0], [1], [0, 0, 1, 1], [], []>} : vector<64x64xf32>, vector<64x64xf32>, vector<64x64xf32> -> vector<64x64xf32>
    %427 = vector.broadcast %425 : vector<1x64xf32> to vector<64x64xf32>
    %428 = arith.addf %426, %427 : vector<64x64xf32>
    %cst_242 = arith.constant 0.000000e+00 : f32
    %429 = vector.broadcast %cst_242 : f32 to vector<64x64xf32>
    %430 = arith.cmpf ogt, %428, %429 : vector<64x64xf32>
    %cst_243 = arith.constant 0.00999999977 : f32
    %431 = vector.broadcast %cst_243 : f32 to vector<64x64xf32>
    %432 = arith.mulf %431, %428 : vector<64x64xf32>
    %433 = arith.select %430, %428, %432 : vector<64x64xi1>, vector<64x64xf32>
    %cst_244 = arith.constant dense<0.000000e+00> : vector<64x64xf32>
    %434 = tpu.matmul %421, %423, %cst_244 {dimension_numbers = #tpu.dot_dimension_numbers<[1], [0], [0], [1], [0, 0, 1, 1], [], []>} : vector<64x64xf32>, vector<64x64xf32>, vector<64x64xf32> -> vector<64x64xf32>
    %435 = vector.broadcast %425 : vector<1x64xf32> to vector<64x64xf32>
    %436 = arith.addf %434, %435 : vector<64x64xf32>
    %cst_245 = arith.constant 0.000000e+00 : f32
    %437 = vector.broadcast %cst_245 : f32 to vector<64x64xf32>
    %438 = arith.cmpf ogt, %436, %437 : vector<64x64xf32>
    %cst_246 = arith.constant 0.00999999977 : f32
    %439 = vector.broadcast %cst_246 : f32 to vector<64x64xf32>
    %440 = arith.mulf %439, %436 : vector<64x64xf32>
    %441 = arith.select %438, %436, %440 : vector<64x64xi1>, vector<64x64xf32>
    %c21 = arith.constant 21 : index
    %c0_247 = arith.constant 0 : index
    %c0_248 = arith.constant 0 : index
    %442 = vector.load %arg4[%c21, %c0_247, %c0_248] : memref<26x64x64xf32, #tpu.memory_space<vmem>>, vector<1x64x64xf32>
    %443 = vector.shape_cast %442 : vector<1x64x64xf32> to vector<64x64xf32>
    %c21_249 = arith.constant 21 : index
    %c0_250 = arith.constant 0 : index
    %c0_251 = arith.constant 0 : index
    %444 = vector.load %arg5[%c21_249, %c0_250, %c0_251] : memref<26x1x64xf32, #tpu.memory_space<vmem>>, vector<1x1x64xf32>
    %445 = vector.shape_cast %444 : vector<1x1x64xf32> to vector<1x64xf32>
    %cst_252 = arith.constant dense<0.000000e+00> : vector<64x64xf32>
    %446 = tpu.matmul %433, %443, %cst_252 {dimension_numbers = #tpu.dot_dimension_numbers<[1], [0], [0], [1], [0, 0, 1, 1], [], []>} : vector<64x64xf32>, vector<64x64xf32>, vector<64x64xf32> -> vector<64x64xf32>
    %447 = vector.broadcast %445 : vector<1x64xf32> to vector<64x64xf32>
    %448 = arith.addf %446, %447 : vector<64x64xf32>
    %cst_253 = arith.constant 0.000000e+00 : f32
    %449 = vector.broadcast %cst_253 : f32 to vector<64x64xf32>
    %450 = arith.cmpf ogt, %448, %449 : vector<64x64xf32>
    %cst_254 = arith.constant 0.00999999977 : f32
    %451 = vector.broadcast %cst_254 : f32 to vector<64x64xf32>
    %452 = arith.mulf %451, %448 : vector<64x64xf32>
    %453 = arith.select %450, %448, %452 : vector<64x64xi1>, vector<64x64xf32>
    %cst_255 = arith.constant dense<0.000000e+00> : vector<64x64xf32>
    %454 = tpu.matmul %441, %443, %cst_255 {dimension_numbers = #tpu.dot_dimension_numbers<[1], [0], [0], [1], [0, 0, 1, 1], [], []>} : vector<64x64xf32>, vector<64x64xf32>, vector<64x64xf32> -> vector<64x64xf32>
    %455 = vector.broadcast %445 : vector<1x64xf32> to vector<64x64xf32>
    %456 = arith.addf %454, %455 : vector<64x64xf32>
    %cst_256 = arith.constant 0.000000e+00 : f32
    %457 = vector.broadcast %cst_256 : f32 to vector<64x64xf32>
    %458 = arith.cmpf ogt, %456, %457 : vector<64x64xf32>
    %cst_257 = arith.constant 0.00999999977 : f32
    %459 = vector.broadcast %cst_257 : f32 to vector<64x64xf32>
    %460 = arith.mulf %459, %456 : vector<64x64xf32>
    %461 = arith.select %458, %456, %460 : vector<64x64xi1>, vector<64x64xf32>
    %c22 = arith.constant 22 : index
    %c0_258 = arith.constant 0 : index
    %c0_259 = arith.constant 0 : index
    %462 = vector.load %arg4[%c22, %c0_258, %c0_259] : memref<26x64x64xf32, #tpu.memory_space<vmem>>, vector<1x64x64xf32>
    %463 = vector.shape_cast %462 : vector<1x64x64xf32> to vector<64x64xf32>
    %c22_260 = arith.constant 22 : index
    %c0_261 = arith.constant 0 : index
    %c0_262 = arith.constant 0 : index
    %464 = vector.load %arg5[%c22_260, %c0_261, %c0_262] : memref<26x1x64xf32, #tpu.memory_space<vmem>>, vector<1x1x64xf32>
    %465 = vector.shape_cast %464 : vector<1x1x64xf32> to vector<1x64xf32>
    %cst_263 = arith.constant dense<0.000000e+00> : vector<64x64xf32>
    %466 = tpu.matmul %453, %463, %cst_263 {dimension_numbers = #tpu.dot_dimension_numbers<[1], [0], [0], [1], [0, 0, 1, 1], [], []>} : vector<64x64xf32>, vector<64x64xf32>, vector<64x64xf32> -> vector<64x64xf32>
    %467 = vector.broadcast %465 : vector<1x64xf32> to vector<64x64xf32>
    %468 = arith.addf %466, %467 : vector<64x64xf32>
    %cst_264 = arith.constant 0.000000e+00 : f32
    %469 = vector.broadcast %cst_264 : f32 to vector<64x64xf32>
    %470 = arith.cmpf ogt, %468, %469 : vector<64x64xf32>
    %cst_265 = arith.constant 0.00999999977 : f32
    %471 = vector.broadcast %cst_265 : f32 to vector<64x64xf32>
    %472 = arith.mulf %471, %468 : vector<64x64xf32>
    %473 = arith.select %470, %468, %472 : vector<64x64xi1>, vector<64x64xf32>
    %cst_266 = arith.constant dense<0.000000e+00> : vector<64x64xf32>
    %474 = tpu.matmul %461, %463, %cst_266 {dimension_numbers = #tpu.dot_dimension_numbers<[1], [0], [0], [1], [0, 0, 1, 1], [], []>} : vector<64x64xf32>, vector<64x64xf32>, vector<64x64xf32> -> vector<64x64xf32>
    %475 = vector.broadcast %465 : vector<1x64xf32> to vector<64x64xf32>
    %476 = arith.addf %474, %475 : vector<64x64xf32>
    %cst_267 = arith.constant 0.000000e+00 : f32
    %477 = vector.broadcast %cst_267 : f32 to vector<64x64xf32>
    %478 = arith.cmpf ogt, %476, %477 : vector<64x64xf32>
    %cst_268 = arith.constant 0.00999999977 : f32
    %479 = vector.broadcast %cst_268 : f32 to vector<64x64xf32>
    %480 = arith.mulf %479, %476 : vector<64x64xf32>
    %481 = arith.select %478, %476, %480 : vector<64x64xi1>, vector<64x64xf32>
    %c23 = arith.constant 23 : index
    %c0_269 = arith.constant 0 : index
    %c0_270 = arith.constant 0 : index
    %482 = vector.load %arg4[%c23, %c0_269, %c0_270] : memref<26x64x64xf32, #tpu.memory_space<vmem>>, vector<1x64x64xf32>
    %483 = vector.shape_cast %482 : vector<1x64x64xf32> to vector<64x64xf32>
    %c23_271 = arith.constant 23 : index
    %c0_272 = arith.constant 0 : index
    %c0_273 = arith.constant 0 : index
    %484 = vector.load %arg5[%c23_271, %c0_272, %c0_273] : memref<26x1x64xf32, #tpu.memory_space<vmem>>, vector<1x1x64xf32>
    %485 = vector.shape_cast %484 : vector<1x1x64xf32> to vector<1x64xf32>
    %cst_274 = arith.constant dense<0.000000e+00> : vector<64x64xf32>
    %486 = tpu.matmul %473, %483, %cst_274 {dimension_numbers = #tpu.dot_dimension_numbers<[1], [0], [0], [1], [0, 0, 1, 1], [], []>} : vector<64x64xf32>, vector<64x64xf32>, vector<64x64xf32> -> vector<64x64xf32>
    %487 = vector.broadcast %485 : vector<1x64xf32> to vector<64x64xf32>
    %488 = arith.addf %486, %487 : vector<64x64xf32>
    %cst_275 = arith.constant 0.000000e+00 : f32
    %489 = vector.broadcast %cst_275 : f32 to vector<64x64xf32>
    %490 = arith.cmpf ogt, %488, %489 : vector<64x64xf32>
    %cst_276 = arith.constant 0.00999999977 : f32
    %491 = vector.broadcast %cst_276 : f32 to vector<64x64xf32>
    %492 = arith.mulf %491, %488 : vector<64x64xf32>
    %493 = arith.select %490, %488, %492 : vector<64x64xi1>, vector<64x64xf32>
    %cst_277 = arith.constant dense<0.000000e+00> : vector<64x64xf32>
    %494 = tpu.matmul %481, %483, %cst_277 {dimension_numbers = #tpu.dot_dimension_numbers<[1], [0], [0], [1], [0, 0, 1, 1], [], []>} : vector<64x64xf32>, vector<64x64xf32>, vector<64x64xf32> -> vector<64x64xf32>
    %495 = vector.broadcast %485 : vector<1x64xf32> to vector<64x64xf32>
    %496 = arith.addf %494, %495 : vector<64x64xf32>
    %cst_278 = arith.constant 0.000000e+00 : f32
    %497 = vector.broadcast %cst_278 : f32 to vector<64x64xf32>
    %498 = arith.cmpf ogt, %496, %497 : vector<64x64xf32>
    %cst_279 = arith.constant 0.00999999977 : f32
    %499 = vector.broadcast %cst_279 : f32 to vector<64x64xf32>
    %500 = arith.mulf %499, %496 : vector<64x64xf32>
    %501 = arith.select %498, %496, %500 : vector<64x64xi1>, vector<64x64xf32>
    %c24 = arith.constant 24 : index
    %c0_280 = arith.constant 0 : index
    %c0_281 = arith.constant 0 : index
    %502 = vector.load %arg4[%c24, %c0_280, %c0_281] : memref<26x64x64xf32, #tpu.memory_space<vmem>>, vector<1x64x64xf32>
    %503 = vector.shape_cast %502 : vector<1x64x64xf32> to vector<64x64xf32>
    %c24_282 = arith.constant 24 : index
    %c0_283 = arith.constant 0 : index
    %c0_284 = arith.constant 0 : index
    %504 = vector.load %arg5[%c24_282, %c0_283, %c0_284] : memref<26x1x64xf32, #tpu.memory_space<vmem>>, vector<1x1x64xf32>
    %505 = vector.shape_cast %504 : vector<1x1x64xf32> to vector<1x64xf32>
    %cst_285 = arith.constant dense<0.000000e+00> : vector<64x64xf32>
    %506 = tpu.matmul %493, %503, %cst_285 {dimension_numbers = #tpu.dot_dimension_numbers<[1], [0], [0], [1], [0, 0, 1, 1], [], []>} : vector<64x64xf32>, vector<64x64xf32>, vector<64x64xf32> -> vector<64x64xf32>
    %507 = vector.broadcast %505 : vector<1x64xf32> to vector<64x64xf32>
    %508 = arith.addf %506, %507 : vector<64x64xf32>
    %cst_286 = arith.constant 0.000000e+00 : f32
    %509 = vector.broadcast %cst_286 : f32 to vector<64x64xf32>
    %510 = arith.cmpf ogt, %508, %509 : vector<64x64xf32>
    %cst_287 = arith.constant 0.00999999977 : f32
    %511 = vector.broadcast %cst_287 : f32 to vector<64x64xf32>
    %512 = arith.mulf %511, %508 : vector<64x64xf32>
    %513 = arith.select %510, %508, %512 : vector<64x64xi1>, vector<64x64xf32>
    %cst_288 = arith.constant dense<0.000000e+00> : vector<64x64xf32>
    %514 = tpu.matmul %501, %503, %cst_288 {dimension_numbers = #tpu.dot_dimension_numbers<[1], [0], [0], [1], [0, 0, 1, 1], [], []>} : vector<64x64xf32>, vector<64x64xf32>, vector<64x64xf32> -> vector<64x64xf32>
    %515 = vector.broadcast %505 : vector<1x64xf32> to vector<64x64xf32>
    %516 = arith.addf %514, %515 : vector<64x64xf32>
    %cst_289 = arith.constant 0.000000e+00 : f32
    %517 = vector.broadcast %cst_289 : f32 to vector<64x64xf32>
    %518 = arith.cmpf ogt, %516, %517 : vector<64x64xf32>
    %cst_290 = arith.constant 0.00999999977 : f32
    %519 = vector.broadcast %cst_290 : f32 to vector<64x64xf32>
    %520 = arith.mulf %519, %516 : vector<64x64xf32>
    %521 = arith.select %518, %516, %520 : vector<64x64xi1>, vector<64x64xf32>
    %c25 = arith.constant 25 : index
    %c0_291 = arith.constant 0 : index
    %c0_292 = arith.constant 0 : index
    %522 = vector.load %arg4[%c25, %c0_291, %c0_292] : memref<26x64x64xf32, #tpu.memory_space<vmem>>, vector<1x64x64xf32>
    %523 = vector.shape_cast %522 : vector<1x64x64xf32> to vector<64x64xf32>
    %c25_293 = arith.constant 25 : index
    %c0_294 = arith.constant 0 : index
    %c0_295 = arith.constant 0 : index
    %524 = vector.load %arg5[%c25_293, %c0_294, %c0_295] : memref<26x1x64xf32, #tpu.memory_space<vmem>>, vector<1x1x64xf32>
    %525 = vector.shape_cast %524 : vector<1x1x64xf32> to vector<1x64xf32>
    %cst_296 = arith.constant dense<0.000000e+00> : vector<64x64xf32>
    %526 = tpu.matmul %513, %523, %cst_296 {dimension_numbers = #tpu.dot_dimension_numbers<[1], [0], [0], [1], [0, 0, 1, 1], [], []>} : vector<64x64xf32>, vector<64x64xf32>, vector<64x64xf32> -> vector<64x64xf32>
    %527 = vector.broadcast %525 : vector<1x64xf32> to vector<64x64xf32>
    %528 = arith.addf %526, %527 : vector<64x64xf32>
    %cst_297 = arith.constant 0.000000e+00 : f32
    %529 = vector.broadcast %cst_297 : f32 to vector<64x64xf32>
    %530 = arith.cmpf ogt, %528, %529 : vector<64x64xf32>
    %cst_298 = arith.constant 0.00999999977 : f32
    %531 = vector.broadcast %cst_298 : f32 to vector<64x64xf32>
    %532 = arith.mulf %531, %528 : vector<64x64xf32>
    %533 = arith.select %530, %528, %532 : vector<64x64xi1>, vector<64x64xf32>
    %cst_299 = arith.constant dense<0.000000e+00> : vector<64x64xf32>
    %534 = tpu.matmul %521, %523, %cst_299 {dimension_numbers = #tpu.dot_dimension_numbers<[1], [0], [0], [1], [0, 0, 1, 1], [], []>} : vector<64x64xf32>, vector<64x64xf32>, vector<64x64xf32> -> vector<64x64xf32>
    %535 = vector.broadcast %525 : vector<1x64xf32> to vector<64x64xf32>
    %536 = arith.addf %534, %535 : vector<64x64xf32>
    %cst_300 = arith.constant 0.000000e+00 : f32
    %537 = vector.broadcast %cst_300 : f32 to vector<64x64xf32>
    %538 = arith.cmpf ogt, %536, %537 : vector<64x64xf32>
    %cst_301 = arith.constant 0.00999999977 : f32
    %539 = vector.broadcast %cst_301 : f32 to vector<64x64xf32>
    %540 = arith.mulf %539, %536 : vector<64x64xf32>
    %541 = arith.select %538, %536, %540 : vector<64x64xi1>, vector<64x64xf32>
    %cst_302 = arith.constant dense<0.000000e+00> : vector<64x128xf32>
    %542 = tpu.matmul %533, %2, %cst_302 {dimension_numbers = #tpu.dot_dimension_numbers<[1], [0], [0], [1], [0, 0, 1, 1], [], []>} : vector<64x64xf32>, vector<64x128xf32>, vector<64x128xf32> -> vector<64x128xf32>
    %543 = vector.broadcast %3 : vector<1x128xf32> to vector<64x128xf32>
    %544 = arith.addf %542, %543 : vector<64x128xf32>
    %c0_303 = arith.constant 0 : index
    %c0_304 = arith.constant 0 : index
    %545 = vector.load %arg8[%c0_303, %c0_304] : memref<128x128xf32, #tpu.memory_space<vmem>>, vector<64x128xf32>
    tpu.vector_store %arg8[%c0_303, %c0_304], %544 {strides = array<i32>} : memref<128x128xf32, #tpu.memory_space<vmem>>, vector<64x128xf32>,
    %cst_305 = arith.constant dense<0.000000e+00> : vector<64x128xf32>
    %546 = tpu.matmul %541, %2, %cst_305 {dimension_numbers = #tpu.dot_dimension_numbers<[1], [0], [0], [1], [0, 0, 1, 1], [], []>} : vector<64x64xf32>, vector<64x128xf32>, vector<64x128xf32> -> vector<64x128xf32>
    %547 = vector.broadcast %3 : vector<1x128xf32> to vector<64x128xf32>
    %548 = arith.addf %546, %547 : vector<64x128xf32>
    %c64_306 = arith.constant 64 : index
    %c0_307 = arith.constant 0 : index
    %549 = vector.load %arg8[%c64_306, %c0_307] : memref<128x128xf32, #tpu.memory_space<vmem>>, vector<64x128xf32>
    tpu.vector_store %arg8[%c64_306, %c0_307], %548 {strides = array<i32>} : memref<128x128xf32, #tpu.memory_space<vmem>>, vector<64x128xf32>,
    return
  }
  func.func @transform_0(%arg0: i32) -> (i32, i32) {
    %c0_i32 = arith.constant 0 : i32
    %c0_i32_0 = arith.constant 0 : i32
    return %arg0, %c0_i32 : i32, i32
  }
  func.func @transform_1(%arg0: i32) -> (i32, i32) {
    %c0_i32 = arith.constant 0 : i32
    %c0_i32_0 = arith.constant 0 : i32
    %c0_i32_1 = arith.constant 0 : i32
    return %c0_i32, %c0_i32_0 : i32, i32
  }
  func.func @transform_2(%arg0: i32) -> (i32, i32) {
    %c0_i32 = arith.constant 0 : i32
    %c0_i32_0 = arith.constant 0 : i32
    %c0_i32_1 = arith.constant 0 : i32
    return %c0_i32, %c0_i32_0 : i32, i32
  }
  func.func @transform_3(%arg0: i32) -> (i32, i32, i32) {
    %c0_i32 = arith.constant 0 : i32
    %c0_i32_0 = arith.constant 0 : i32
    %c0_i32_1 = arith.constant 0 : i32
    %c0_i32_2 = arith.constant 0 : i32
    return %c0_i32, %c0_i32_0, %c0_i32_1 : i32, i32, i32
  }
  func.func @transform_4(%arg0: i32) -> (i32, i32, i32) {
    %c0_i32 = arith.constant 0 : i32
    %c0_i32_0 = arith.constant 0 : i32
    %c0_i32_1 = arith.constant 0 : i32
    %c0_i32_2 = arith.constant 0 : i32
    return %c0_i32, %c0_i32_0, %c0_i32_1 : i32, i32, i32
  }
  func.func @transform_5(%arg0: i32) -> (i32, i32) {
    %c0_i32 = arith.constant 0 : i32
    %c0_i32_0 = arith.constant 0 : i32
    %c0_i32_1 = arith.constant 0 : i32
    return %c0_i32, %c0_i32_0 : i32, i32
  }
  func.func @transform_6(%arg0: i32) -> (i32, i32) {
    %c0_i32 = arith.constant 0 : i32
    %c0_i32_0 = arith.constant 0 : i32
    %c0_i32_1 = arith.constant 0 : i32
    return %c0_i32, %c0_i32_0 : i32, i32
  }
  func.func @transform_7(%arg0: i32) -> (i32, i32) {
    %c0_i32 = arith.constant 0 : i32
    %c0_i32_0 = arith.constant 0 : i32
    return %arg0, %c0_i32 : i32, i32
  }
}

</mosaic_0001>

<bundles_post_ra>
// kernel: neural_network_forward.1
= control target key start
LH: loop header
LB: loop body
LE: loop exit
PB: predicated region body
PF: predicated region fallthrough
CT: control target
= control target key end

     0   :  { %s13446_s24 = smov 0   ;;  %s15317_s0 = inlined_call_operand.vmem [shape: f32[256,32], index: 0, kind: input, shape index: {}]   ;;  %s15318_s1 = inlined_call_operand.vmem [shape: f32[32,64], index: 1, kind: input, shape index: {}]   ;;  %s15319_s2 = inlined_call_operand.vmem [shape: f32[1,64], index: 2, kind: input, shape index: {}]   ;;  %s15320_s3 = inlined_call_operand.vmem [shape: f32[26,64,64], index: 3, kind: input, shape index: {}]   ;;  %s15321_s4 = inlined_call_operand.vmem [shape: f32[26,1,64], index: 4, kind: input, shape index: {}]   ;;  %s15322_s5 = inlined_call_operand.vmem [shape: f32[64,128], index: 5, kind: input, shape index: {}]   ;;  %s15323_s6 = inlined_call_operand.vmem [shape: f32[1,128], index: 6, kind: input, shape index: {}]   ;;  %s15324_s7 = inlined_call_operand.vmem [shape: f32[256,128], index: 7, kind: output, shape index: {}]  }
   0x1 LB: > { %s9358_s25 = sadd.s32 4294967295, %s13404_s24   ;;  %p9362_p0 = scmp.ge.s32.totalorder %s13404_s24, 1  ;;  %s13404_s24 = sphi %s13446_s24, %s17_s24  }
   0x2   : > { %p238_p1 = scmp.lt.s32.totalorder %s13404_s24, 3 }
   0x4   : > { %p239_p2 = pnand %p9362_p0, %p238_p1 }
   0x5   : > { %v282_v0 = vld [vmem:[%s15318_s1] sm:$0xff] (!%p239_p2)  ;;  %v283_v1 = vld [vmem:[%s15318_s1 + $0x8] sm:$0xff] (!%p239_p2)  ;;  %v284_v2 = vld [vmem:[%s15318_s1 + $0x10] sm:$0xff] (!%p239_p2)  ;;  %s9363_s9 = sshll.u32 (!%p239_p2), %s9358_s25, 4  ;;  %vm310_vm0 = vcmask (!%p239_p2), 261120   ;;  %vm640_vm1 = vcmask (!%p239_p2), 523264  }
   0x6   : > { %242 = sbr.rel (%p239_p2) target bundleno = 6162 (0x1812), region = 48  ;;  %v12510_v3 = vpack.c.bf16 (!%p239_p2), %v283_v1, %v282_v0  ;;  %v285_v4 = vld [vmem:[%s15318_s1 + $0x18] sm:$0xff] (!%p239_p2)  ;;  %p271_p3 = scmp.lt.s32.totalorder (!%p239_p2), %s9363_s9, 31  ;;  %v625_v6 = vld [vmem:[%s15320_s3] sm:$0xff] (!%p239_p2)  ;;  %v626_v7 = vld [vmem:[%s15320_s3 + $0x8] sm:$0xff] (!%p239_p2) }
   0x7   : > { %v12514_v5 = vpack.c.bf16 (!%p239_p2), %v285_v4, %v284_v2  ;;  %v12526_v8 = vpack.c.bf16 (!%p239_p2), %v626_v7, %v625_v6  ;;  %v627_v9 = vld [vmem:[%s15320_s3 + $0x10] sm:$0xff] (!%p239_p2)  ;;  %v628_v12 = vld [vmem:[%s15320_s3 + $0x18] sm:$0xff] (!%p239_p2)  ;;  %v629_v18 = vld [vmem:[%s15320_s3 + $0x20] sm:$0xff] (!%p239_p2) }
   0x8   : > { %12511 = vmatprep.subr.bf16.mxu0 (!%p239_p2), %v12510_v3  ;;  %12519 = vmatprep.subr.bf16.mxu1 (!%p239_p2), %v12510_v3  ;;  %v12530_v17 = vpack.c.bf16 (!%p239_p2), %v628_v12, %v627_v9  ;;  %v630_v19 = vld [vmem:[%s15320_s3 + $0x28] sm:$0xff] (!%p239_p2)  ;;  %v631_v31 = vld [vmem:[%s15320_s3 + $0x30] sm:$0xff] (!%p239_p2)  ;;  %v632_v32 = vld [vmem:[%s15320_s3 + $0x38] sm:$0xff] (!%p239_p2) }
   0x9   : > { %12513 = vmatpush3.bf16.msra.mxu0 (!%p239_p2), %v12510_v3  ;;  %12521 = vmatpush3.bf16.msra.mxu1 (!%p239_p2), %v12510_v3  ;;  %v12534_v24 = vpack.c.bf16 (!%p239_p2), %v630_v19, %v629_v18  ;;  %v12538_v33 = vpack.c.bf16 (!%p239_p2), %v632_v32, %v631_v31  ;;  %v9401_v34 = vld [vmem:[%s15320_s3 + $0x40] sm:$0xff] (!%p239_p2)  ;;  %v9402_v35 = vld [vmem:[%s15320_s3 + $0x48] sm:$0xff] (!%p239_p2)  ;;  %v9403_v46 = vld [vmem:[%s15320_s3 + $0x50] sm:$0xff] (!%p239_p2) }
   0xa   : > { %12515 = vmatprep.subr.bf16.mxu0 (!%p239_p2), %v12514_v5  ;;  %12523 = vmatprep.subr.bf16.mxu1 (!%p239_p2), %v12514_v5  ;;  %v12558_v36 = vpack.c.bf16 (!%p239_p2), %v9402_v35, %v9401_v34  ;;  %v13541_v37 = vld [vmem:[%s15319_s2] ss:$0 sm:$0xff] (!%p239_p2)  ;;  %v9404_v47 = vld [vmem:[%s15320_s3 + $0x58] sm:$0xff] (!%p239_p2)  ;;  %v9406_v2 = vld [vmem:[%s15320_s3 + $0x68] sm:$0xff] (!%p239_p2) }
   0xb   : > { %v12562_v55 = vpack.c.bf16 (!%p239_p2), %v9404_v47, %v9403_v46  ;;  %v9405_v1 = vld [vmem:[%s15320_s3 + $0x60] sm:$0xff] (!%p239_p2) }
   0xc   : > { %v9427_v47 = vld [vmem:[%s15320_s3 + $0x80] sm:$0xff] (!%p239_p2) }
   0xd   : > { %s15326_s9 = smov (!%p271_p3, %s9363_s9), 31  ;;  %12517 = vmatpush3.bf16.msra.mxu0 %v12514_v5  ;;  %12525 = vmatpush3.bf16.msra.mxu1 %v12514_v5 }
   0xe   : > { %s9364_s16 = sshll.u32 %s15326_s9, 3  ;;  %12527 = vmatprep.subr.bf16.mxu0 %v12526_v8  ;;  %12543 = vmatprep.subr.bf16.mxu1 %v12526_v8 }
   0xf   : > { %s13480_s19 = scalar_lea.vmem %s15317_s0, %s9364_s16  ;;  %s15296_s27 = scalar_lea.vmem %s15324_s7, %s9364_s16 }
  0x10   : > { %v296_v10 = vld [vmem:[%s13480_s19] sm:$0xff]  ;;  %v297_v13 = vld [vmem:[%s13480_s19 + $0x8] sm:$0xff]  ;;  %v298_v15 = vld [vmem:[%s13480_s19 + $0x10] sm:$0xff] }
  0x11   : > { %v464_v11 = vld [vmem:[%s13480_s19 + $0x40] sm:$0xff]  ;;  %v465_v14 = vld [vmem:[%s13480_s19 + $0x48] sm:$0xff]  ;;  %10966 = vmatprep.mubr.msk.f32.mxu0 %vm310_vm0, %v296_v10  ;;  %v466_v16 = vld [vmem:[%s13480_s19 + $0x50] sm:$0xff]  ;;  %v12566_v10 = vpack.c.bf16 %v9406_v2, %v9405_v1 }
  0x12   : > { %10986 = vmatprep.mubr.msk.f32.mxu1 %vm310_vm0, %v464_v11  ;;  %10967 = vmatmul.mubr.msk.f32.vlgmr.msra.gmra.mrb[0].mxu0 %vm310_vm0, %v297_v13  ;;  %v299_v20 = vld [vmem:[%s13480_s19 + $0x18] sm:$0xff]  ;;  %v300_v22 = vld [vmem:[%s13480_s19 + $0x20] sm:$0xff]  ;;  %v301_v25 = vld [vmem:[%s13480_s19 + $0x28] sm:$0xff] }
  0x13   : > { %10987 = vmatmul.mubr.msk.f32.vlgmr.msra.gmra.mrb[0].mxu1 %vm310_vm0, %v465_v14  ;;  %10969 = vmatprep.mubr.msk.f32.mxu0 %vm310_vm0, %v298_v15  ;;  %v467_v21 = vld [vmem:[%s13480_s19 + $0x58] sm:$0xff]  ;;  %v468_v23 = vld [vmem:[%s13480_s19 + $0x60] sm:$0xff]  ;;  %v469_v26 = vld [vmem:[%s13480_s19 + $0x68] sm:$0xff] }
  0x14   : > { %10989 = vmatprep.mubr.msk.f32.mxu1 %vm310_vm0, %v466_v16  ;;  %12529 = vmatpush3.bf16.msra.mxu0 %v12526_v8  ;;  %v302_v27 = vld [vmem:[%s13480_s19 + $0x30] sm:$0xff]  ;;  %v303_v29 = vld [vmem:[%s13480_s19 + $0x38] sm:$0xff] }
  0x15   : > { %12545 = vmatpush3.bf16.msra.mxu1 %v12526_v8  ;;  %12531 = vmatprep.subr.bf16.mxu0 %v12530_v17  ;;  %v470_v28 = vld [vmem:[%s13480_s19 + $0x70] sm:$0xff]  ;;  %v471_v30 = vld [vmem:[%s13480_s19 + $0x78] sm:$0xff] }
  0x16   : > { %12547 = vmatprep.subr.bf16.mxu1 %v12530_v17  ;;  %10970 = vmatmul.mubr.msk.f32.gmra.mrb[2].mxu0 %vm310_vm0, %v299_v20 }
  0x17   : > { %10990 = vmatmul.mubr.msk.f32.gmra.mrb[2].mxu1 %vm310_vm0, %v467_v21  ;;  %10972 = vmatprep.mubr.msk.f32.mxu0 %vm310_vm0, %v300_v22 }
  0x18   : > { %10992 = vmatprep.mubr.msk.f32.mxu1 %vm310_vm0, %v468_v23  ;;  %12533 = vmatpush3.bf16.msra.mxu0 %v12530_v17 }
  0x19   : > { %12549 = vmatpush3.bf16.msra.mxu1 %v12530_v17  ;;  %12535 = vmatprep.subr.bf16.mxu0 %v12534_v24 }
  0x1a   : > { %12551 = vmatprep.subr.bf16.mxu1 %v12534_v24  ;;  %10973 = vmatmul.mubr.msk.f32.gmra.mrb[4].mxu0 %vm310_vm0, %v301_v25 }
  0x1b   : > { %10993 = vmatmul.mubr.msk.f32.gmra.mrb[4].mxu1 %vm310_vm0, %v469_v26  ;;  %10975 = vmatprep.mubr.msk.f32.mxu0 %vm310_vm0, %v302_v27 }
  0x1c   : > { %10995 = vmatprep.mubr.msk.f32.mxu1 %vm310_vm0, %v470_v28  ;;  %12537 = vmatpush3.bf16.msra.mxu0 %v12534_v24 }
  0x1d   : > { %12553 = vmatpush3.bf16.msra.mxu1 %v12534_v24  ;;  %12539 = vmatprep.subr.bf16.mxu0 %v12538_v33 }
  0x1e   : > { %10976 = vmatmul.mubr.msk.f32.gmra.mrb[6].mxu0 %vm310_vm0, %v303_v29  ;;  %12555 = vmatprep.subr.bf16.mxu1 %v12538_v33 }
  0x1f   : > { %10996 = vmatmul.mubr.msk.f32.gmra.mrb[6].mxu1 %vm310_vm0, %v471_v30 }
  0x20   : > { %12541 = vmatpush3.bf16.msra.mxu0 %v12538_v33 }
  0x21   : > { %12557 = vmatpush3.bf16.msra.mxu1 %v12538_v33  ;;  %12559 = vmatprep.subr.bf16.mxu0 %v12558_v36 }
  0x22   : > { %12575 = vmatprep.subr.bf16.mxu1 %v12558_v36 }
  0xe5   : > { %v10968_v38 = vpop.f32.mrb[0].mxu0 }
  0xe6   : > { %v10988_v39 = vpop.f32.mrb[0].mxu1  ;;  %v407_v40 = vadd.f32 %v10968_v38, %v13541_v37  ;;  %v401_v42 = vpop.f32.mrb[1].mxu0 }
  0xe7   : > { %v568_v41 = vadd.f32 %v10988_v39, %v13541_v37  ;;  %v562_v43 = vpop.f32.mrb[1].mxu1  ;;  %v402_v44 = vadd.f32 %v13541_v37, %v401_v42 }
  0xe8   : > { %v563_v45 = vadd.f32 %v13541_v37, %v562_v43  ;;  %vm441_vm2 = vcmp.gt.f32.partialorder %v407_v40, 0.0  ;;  %v449_v48 = vmul.f32 0.01, %v407_v40 }
  0xe9   : > { %vm602_vm3 = vcmp.gt.f32.partialorder %v568_v41, 0.0  ;;  %v610_v49 = vmul.f32 0.01, %v568_v41  ;;  %vm440_vm4 = vcmp.gt.f32.partialorder %v402_v44, 0.0  ;;  %v448_v50 = vmul.f32 0.01, %v402_v44 }
  0xea   : > { %vm601_vm5 = vcmp.gt.f32.partialorder %v563_v45, 0.0  ;;  %v609_v51 = vmul.f32 0.01, %v563_v45  ;;  %v457_v52 = vsel %vm441_vm2, %v407_v40, %v449_v48  ;;  %v10971_v53 = vpop.f32.mrb[2].mxu0  ;;  %v10991_v54 = vpop.f32.mrb[2].mxu1  ;;  %v9428_v48 = vld [vmem:[%s15320_s3 + $0x88] sm:$0xff] }
  0xeb   : > { %v417_v56 = vadd.f32 %v10971_v53, %v13541_v37  ;;  %v578_v57 = vadd.f32 %v10991_v54, %v13541_v37  ;;  %v411_v58 = vpop.f32.mrb[3].mxu0  ;;  %v572_v59 = vpop.f32.mrb[3].mxu1  ;;  %v456_v60 = vsel %vm440_vm4, %v402_v44, %v448_v50  ;;  %v618_v62 = vsel %vm602_vm3, %v568_v41, %v610_v49  ;;  %v9407_v44 = vld [vmem:[%s15320_s3 + $0x70] sm:$0xff]  ;;  %v13608_v50 = vld [vmem:[%s15321_s4] ss:$0 sm:$0xff] }
  0xec   : > { %v617_v61 = vsel %vm601_vm5, %v563_v45, %v609_v51  ;;  %v412_v63 = vadd.f32 %v13541_v37, %v411_v58  ;;  %v573_v0 = vadd.f32 %v13541_v37, %v572_v59  ;;  %11014 = vmatprep.mubr.msk.f32.mxu0 %vm640_vm1, %v456_v60  ;;  %v9408_v45 = vld [vmem:[%s15320_s3 + $0x78] sm:$0xff]  ;;  %v12590_v49 = vpack.c.bf16 %v9428_v48, %v9427_v47  ;;  %v9429_v59 = vld [vmem:[%s15320_s3 + $0x90] sm:$0xff] }
  0xed   : > { %11042 = vmatprep.mubr.msk.f32.mxu1 %vm640_vm1, %v617_v61  ;;  %vm443_vm6 = vcmp.gt.f32.partialorder %v417_v56, 0.0  ;;  %v451_v3 = vmul.f32 0.01, %v417_v56  ;;  %vm604_vm7 = vcmp.gt.f32.partialorder %v578_v57, 0.0  ;;  %v612_v4 = vmul.f32 0.01, %v578_v57  ;;  %11015 = vmatmul.mubr.msk.f32.vlgmr.msra.gmra.mrb[8].mxu0 %vm640_vm1, %v457_v52 }
  0xee   : > { %11043 = vmatmul.mubr.msk.f32.vlgmr.msra.gmra.mrb[8].mxu1 %vm640_vm1, %v618_v62  ;;  %vm442_vm8 = vcmp.gt.f32.partialorder %v412_v63, 0.0  ;;  %v450_v5 = vmul.f32 0.01, %v412_v63  ;;  %vm603_vm9 = vcmp.gt.f32.partialorder %v573_v0, 0.0  ;;  %v611_v6 = vmul.f32 0.01, %v573_v0  ;;  %12561 = vmatpush3.bf16.msra.mxu0 %v12558_v36 }
  0xef   : > { %12577 = vmatpush3.bf16.msra.mxu1 %v12558_v36  ;;  %v10974_v7 = vpop.f32.mrb[4].mxu0  ;;  %v10994_v8 = vpop.f32.mrb[4].mxu1  ;;  %v459_v9 = vsel %vm443_vm6, %v417_v56, %v451_v3  ;;  %12563 = vmatprep.subr.bf16.mxu0 %v12562_v55  ;;  %v620_v21 = vsel %vm604_vm7, %v578_v57, %v612_v4  ;;  %v12570_v46 = vpack.c.bf16 %v9408_v45, %v9407_v44  ;;  %v9430_v60 = vld [vmem:[%s15320_s3 + $0x98] sm:$0xff] }
  0xf0   : > { %12579 = vmatprep.subr.bf16.mxu1 %v12562_v55  ;;  %v427_v11 = vadd.f32 %v10974_v7, %v13541_v37  ;;  %v588_v12 = vadd.f32 %v10994_v8, %v13541_v37  ;;  %v421_v13 = vpop.f32.mrb[5].mxu0  ;;  %v582_v14 = vpop.f32.mrb[5].mxu1  ;;  %v458_v15 = vsel %vm442_vm8, %v412_v63, %v450_v5  ;;  %v619_v16 = vsel %vm603_vm9, %v573_v0, %v611_v6 }
  0xf1   : > { %v422_v17 = vadd.f32 %v13541_v37, %v421_v13  ;;  %v583_v18 = vadd.f32 %v13541_v37, %v582_v14  ;;  %11017 = vmatprep.mubr.msk.f32.mxu0 %vm640_vm1, %v458_v15  ;;  %11045 = vmatprep.mubr.msk.f32.mxu1 %vm640_vm1, %v619_v16  ;;  %v10977_v19 = vpop.f32.mrb[6].mxu0  ;;  %v12594_v4 = vpack.c.bf16 %v9430_v60, %v9429_v59  ;;  %v9431_v14 = vld [vmem:[%s15320_s3 + $0xa0] sm:$0xff]  ;;  %v9432_v15 = vld [vmem:[%s15320_s3 + $0xa8] sm:$0xff] }
  0xf2   : > { %v10997_v20 = vpop.f32.mrb[6].mxu1  ;;  %vm445_vm10 = vcmp.gt.f32.partialorder %v427_v11, 0.0  ;;  %v453_v22 = vmul.f32 0.01, %v427_v11  ;;  %vm606_vm11 = vcmp.gt.f32.partialorder %v588_v12, 0.0  ;;  %11018 = vmatmul.mubr.msk.f32.gmra.mrb[10].mxu0 %vm640_vm1, %v459_v9  ;;  %11046 = vmatmul.mubr.msk.f32.gmra.mrb[10].mxu1 %vm640_vm1, %v620_v21  ;;  %v437_v26 = vadd.f32 %v10977_v19, %v13541_v37  ;;  %v431_v28 = vpop.f32.mrb[7].mxu0 }
  0xf3   : > { %v614_v23 = vmul.f32 0.01, %v588_v12  ;;  %vm444_vm12 = vcmp.gt.f32.partialorder %v422_v17, 0.0  ;;  %v452_v24 = vmul.f32 0.01, %v422_v17  ;;  %vm605_vm13 = vcmp.gt.f32.partialorder %v583_v18, 0.0  ;;  %12565 = vmatpush3.bf16.msra.mxu0 %v12562_v55  ;;  %12581 = vmatpush3.bf16.msra.mxu1 %v12562_v55 }
  0xf4   : > { %v613_v25 = vmul.f32 0.01, %v583_v18  ;;  %v598_v27 = vadd.f32 %v10997_v20, %v13541_v37  ;;  %v592_v29 = vpop.f32.mrb[7].mxu1  ;;  %v461_v30 = vsel %vm445_vm10, %v427_v11, %v453_v22  ;;  %12567 = vmatprep.subr.bf16.mxu0 %v12566_v10  ;;  %v432_v32 = vadd.f32 %v13541_v37, %v431_v28  ;;  %12583 = vmatprep.subr.bf16.mxu1 %v12566_v10  ;;  %v9453_v60 = vld [vmem:[%s15320_s3 + $0xc0] sm:$0xff] }
  0xf5   : > { %v622_v31 = vsel %vm606_vm11, %v588_v12, %v614_v23  ;;  %v593_v33 = vadd.f32 %v13541_v37, %v592_v29  ;;  %v460_v34 = vsel %vm444_vm12, %v422_v17, %v452_v24  ;;  %vm447_vm14 = vcmp.gt.f32.partialorder %v437_v26, 0.0 }
  0xf6   : > { %v621_v35 = vsel %vm605_vm13, %v583_v18, %v613_v25  ;;  %v455_v36 = vmul.f32 0.01, %v437_v26  ;;  %vm608_vm15 = vcmp.gt.f32.partialorder %v598_v27, 0.0  ;;  %v616_v38 = vmul.f32 0.01, %v598_v27  ;;  %11020 = vmatprep.mubr.msk.f32.mxu0 %vm640_vm1, %v460_v34 }
  0xf7   : > { %11048 = vmatprep.mubr.msk.f32.mxu1 %vm640_vm1, %v621_v35  ;;  %vm446_vm0 = vcmp.gt.f32.partialorder %v432_v32, 0.0  ;;  %v454_v39 = vmul.f32 0.01, %v432_v32  ;;  %vm607_vm2 = vcmp.gt.f32.partialorder %v593_v33, 0.0  ;;  %v615_v40 = vmul.f32 0.01, %v593_v33  ;;  %11021 = vmatmul.mubr.msk.f32.gmra.mrb[12].mxu0 %vm640_vm1, %v461_v30 }
  0xf8   : > { %11049 = vmatmul.mubr.msk.f32.gmra.mrb[12].mxu1 %vm640_vm1, %v622_v31  ;;  %12569 = vmatpush3.bf16.msra.mxu0 %v12566_v10  ;;  %v463_v42 = vsel %vm447_vm14, %v437_v26, %v455_v36  ;;  %v624_v43 = vsel %vm608_vm15, %v598_v27, %v616_v38  ;;  %v12598_v23 = vpack.c.bf16 %v9432_v15, %v9431_v14 }
  0xf9   : > { %12585 = vmatpush3.bf16.msra.mxu1 %v12566_v10  ;;  %v462_v37 = vsel %vm446_vm0, %v432_v32, %v454_v39  ;;  %v623_v41 = vsel %vm607_vm2, %v593_v33, %v615_v40  ;;  %12571 = vmatprep.subr.bf16.mxu0 %v12570_v46 }
  0xfa   : > { %11023 = vmatprep.mubr.msk.f32.mxu0 %vm640_vm1, %v462_v37  ;;  %11051 = vmatprep.mubr.msk.f32.mxu1 %vm640_vm1, %v623_v41 }
  0xfb   : > { %11024 = vmatmul.mubr.msk.f32.gmra.mrb[14].mxu0 %vm640_vm1, %v463_v42  ;;  %12587 = vmatprep.subr.bf16.mxu1 %v12570_v46 }
  0xfc   : > { %11052 = vmatmul.mubr.msk.f32.gmra.mrb[14].mxu1 %vm640_vm1, %v624_v43  ;;  %12573 = vmatpush3.bf16.msra.mxu0 %v12570_v46 }
  0xfd   : > { %12589 = vmatpush3.bf16.msra.mxu1 %v12570_v46  ;;  %12591 = vmatprep.subr.bf16.mxu0 %v12590_v49 }
  0xfe   : > { %12607 = vmatprep.subr.bf16.mxu1 %v12590_v49 }
 0x1c0   : > { %v11016_v51 = vpop.f32.mrb[8].mxu0 }
 0x1c1   : > { %v11044_v52 = vpop.f32.mrb[8].mxu1  ;;  %v737_v53 = vadd.f32 %v11016_v51, %v13608_v50  ;;  %v731_v55 = vpop.f32.mrb[9].mxu0 }
 0x1c2   : > { %v890_v54 = vadd.f32 %v11044_v52, %v13608_v50  ;;  %v884_v56 = vpop.f32.mrb[9].mxu1  ;;  %v732_v57 = vadd.f32 %v13608_v50, %v731_v55 }
 0x1c3   : > { %v885_v58 = vadd.f32 %v13608_v50, %v884_v56  ;;  %vm771_vm3 = vcmp.gt.f32.partialorder %v737_v53, 0.0  ;;  %v779_v61 = vmul.f32 0.01, %v737_v53 }
 0x1c4   : > { %vm924_vm4 = vcmp.gt.f32.partialorder %v890_v54, 0.0  ;;  %v932_v62 = vmul.f32 0.01, %v890_v54  ;;  %vm770_vm5 = vcmp.gt.f32.partialorder %v732_v57, 0.0  ;;  %v778_v63 = vmul.f32 0.01, %v732_v57 }
 0x1c5   : > { %vm923_vm6 = vcmp.gt.f32.partialorder %v885_v58, 0.0  ;;  %v931_v0 = vmul.f32 0.01, %v885_v58  ;;  %v787_v1 = vsel %vm771_vm3, %v737_v53, %v779_v61  ;;  %v11019_v2 = vpop.f32.mrb[10].mxu0  ;;  %v11047_v3 = vpop.f32.mrb[10].mxu1  ;;  %v9454_v61 = vld [vmem:[%s15320_s3 + $0xc8] sm:$0xff] }
 0x1c6   : > { %v747_v5 = vadd.f32 %v11019_v2, %v13608_v50  ;;  %v900_v6 = vadd.f32 %v11047_v3, %v13608_v50  ;;  %v741_v7 = vpop.f32.mrb[11].mxu0  ;;  %v894_v8 = vpop.f32.mrb[11].mxu1  ;;  %v786_v9 = vsel %vm770_vm5, %v732_v57, %v778_v63  ;;  %v940_v11 = vsel %vm924_vm4, %v890_v54, %v932_v62  ;;  %v9433_v57 = vld [vmem:[%s15320_s3 + $0xb0] sm:$0xff]  ;;  %v13674_v63 = vld [vmem:[%s15321_s4 + $0x1] ss:$0 sm:$0xff] }
 0x1c7   : > { %v939_v10 = vsel %vm923_vm6, %v885_v58, %v931_v0  ;;  %v742_v12 = vadd.f32 %v13608_v50, %v741_v7  ;;  %v895_v13 = vadd.f32 %v13608_v50, %v894_v8  ;;  %11070 = vmatprep.mubr.msk.f32.mxu0 %vm640_vm1, %v786_v9  ;;  %v9434_v58 = vld [vmem:[%s15320_s3 + $0xb8] sm:$0xff]  ;;  %v12622_v62 = vpack.c.bf16 %v9454_v61, %v9453_v60  ;;  %v9455_v8 = vld [vmem:[%s15320_s3 + $0xd0] sm:$0xff] }
 0x1c8   : > { %11098 = vmatprep.mubr.msk.f32.mxu1 %vm640_vm1, %v939_v10  ;;  %vm773_vm7 = vcmp.gt.f32.partialorder %v747_v5, 0.0  ;;  %v781_v16 = vmul.f32 0.01, %v747_v5  ;;  %vm926_vm8 = vcmp.gt.f32.partialorder %v900_v6, 0.0  ;;  %v934_v17 = vmul.f32 0.01, %v900_v6  ;;  %11071 = vmatmul.mubr.msk.f32.vlgmr.msra.gmra.mrb[16].mxu0 %vm640_vm1, %v787_v1 }
 0x1c9   : > { %11099 = vmatmul.mubr.msk.f32.vlgmr.msra.gmra.mrb[16].mxu1 %vm640_vm1, %v940_v11  ;;  %vm772_vm9 = vcmp.gt.f32.partialorder %v742_v12, 0.0  ;;  %v780_v18 = vmul.f32 0.01, %v742_v12  ;;  %vm925_vm10 = vcmp.gt.f32.partialorder %v895_v13, 0.0  ;;  %v933_v19 = vmul.f32 0.01, %v895_v13  ;;  %12593 = vmatpush3.bf16.msra.mxu0 %v12590_v49 }
 0x1ca   : > { %12609 = vmatpush3.bf16.msra.mxu1 %v12590_v49  ;;  %v11022_v20 = vpop.f32.mrb[12].mxu0  ;;  %v789_v22 = vsel %vm773_vm7, %v747_v5, %v781_v16  ;;  %12595 = vmatprep.subr.bf16.mxu0 %v12594_v4  ;;  %v942_v32 = vsel %vm926_vm8, %v900_v6, %v934_v17  ;;  %v12602_v59 = vpack.c.bf16 %v9434_v58, %v9433_v57  ;;  %v9456_v9 = vld [vmem:[%s15320_s3 + $0xd8] sm:$0xff] }
 0x1cb   : > { %v11050_v21 = vpop.f32.mrb[12].mxu1  ;;  %12611 = vmatprep.subr.bf16.mxu1 %v12594_v4  ;;  %v757_v24 = vadd.f32 %v11022_v20, %v13608_v50  ;;  %v751_v26 = vpop.f32.mrb[13].mxu0  ;;  %v788_v28 = vsel %vm772_vm9, %v742_v12, %v780_v18  ;;  %v941_v29 = vsel %vm925_vm10, %v895_v13, %v933_v19  ;;  %v12626_v17 = vpack.c.bf16 %v9456_v9, %v9455_v8  ;;  %v9479_v9 = vld [vmem:[%s15320_s3 + $0x100] sm:$0xff] }
 0x1cc   : > { %v910_v25 = vadd.f32 %v11050_v21, %v13608_v50  ;;  %v904_v27 = vpop.f32.mrb[13].mxu1  ;;  %v752_v30 = vadd.f32 %v13608_v50, %v751_v26  ;;  %11073 = vmatprep.mubr.msk.f32.mxu0 %vm640_vm1, %v788_v28  ;;  %11101 = vmatprep.mubr.msk.f32.mxu1 %vm640_vm1, %v941_v29  ;;  %v9458_v28 = vld [vmem:[%s15320_s3 + $0xe8] sm:$0xff] }
 0x1cd   : > { %v905_v31 = vadd.f32 %v13608_v50, %v904_v27  ;;  %vm775_vm11 = vcmp.gt.f32.partialorder %v757_v24, 0.0  ;;  %v783_v33 = vmul.f32 0.01, %v757_v24  ;;  %11074 = vmatmul.mubr.msk.f32.gmra.mrb[18].mxu0 %vm640_vm1, %v789_v22  ;;  %11102 = vmatmul.mubr.msk.f32.gmra.mrb[18].mxu1 %vm640_vm1, %v942_v32  ;;  %v9457_v27 = vld [vmem:[%s15320_s3 + $0xe0] sm:$0xff] }
 0x1ce   : > { %vm928_vm12 = vcmp.gt.f32.partialorder %v910_v25, 0.0  ;;  %v936_v34 = vmul.f32 0.01, %v910_v25  ;;  %vm774_vm13 = vcmp.gt.f32.partialorder %v752_v30, 0.0  ;;  %v782_v35 = vmul.f32 0.01, %v752_v30  ;;  %12597 = vmatpush3.bf16.msra.mxu0 %v12594_v4  ;;  %12613 = vmatpush3.bf16.msra.mxu1 %v12594_v4 }
 0x1cf   : > { %vm927_vm14 = vcmp.gt.f32.partialorder %v905_v31, 0.0  ;;  %v935_v36 = vmul.f32 0.01, %v905_v31  ;;  %v11025_v38 = vpop.f32.mrb[14].mxu0  ;;  %v11053_v39 = vpop.f32.mrb[14].mxu1  ;;  %v791_v40 = vsel %vm775_vm11, %v757_v24, %v783_v33  ;;  %12599 = vmatprep.subr.bf16.mxu0 %v12598_v23  ;;  %12615 = vmatprep.subr.bf16.mxu1 %v12598_v23 }
 0x1d0   : > { %v767_v37 = vadd.f32 %v11025_v38, %v13608_v50  ;;  %v920_v41 = vadd.f32 %v11053_v39, %v13608_v50  ;;  %v761_v42 = vpop.f32.mrb[15].mxu0  ;;  %v914_v43 = vpop.f32.mrb[15].mxu1  ;;  %v790_v44 = vsel %vm774_vm13, %v752_v30, %v782_v35  ;;  %v944_v48 = vsel %vm928_vm12, %v910_v25, %v936_v34 }
 0x1d1   : > { %v943_v45 = vsel %vm927_vm14, %v905_v31, %v935_v36  ;;  %v762_v46 = vadd.f32 %v13608_v50, %v761_v42  ;;  %v915_v47 = vadd.f32 %v13608_v50, %v914_v43  ;;  %11076 = vmatprep.mubr.msk.f32.mxu0 %vm640_vm1, %v790_v44  ;;  %v12630_v36 = vpack.c.bf16 %v9458_v28, %v9457_v27 }
 0x1d2   : > { %11104 = vmatprep.mubr.msk.f32.mxu1 %vm640_vm1, %v943_v45  ;;  %vm777_vm15 = vcmp.gt.f32.partialorder %v767_v37, 0.0  ;;  %v785_v49 = vmul.f32 0.01, %v767_v37  ;;  %vm930_vm0 = vcmp.gt.f32.partialorder %v920_v41, 0.0  ;;  %v938_v51 = vmul.f32 0.01, %v920_v41  ;;  %11077 = vmatmul.mubr.msk.f32.gmra.mrb[20].mxu0 %vm640_vm1, %v791_v40 }
 0x1d3   : > { %11105 = vmatmul.mubr.msk.f32.gmra.mrb[20].mxu1 %vm640_vm1, %v944_v48  ;;  %vm776_vm2 = vcmp.gt.f32.partialorder %v762_v46, 0.0  ;;  %v784_v52 = vmul.f32 0.01, %v762_v46  ;;  %vm929_vm3 = vcmp.gt.f32.partialorder %v915_v47, 0.0  ;;  %v937_v53 = vmul.f32 0.01, %v915_v47  ;;  %12601 = vmatpush3.bf16.msra.mxu0 %v12598_v23 }
 0x1d4   : > { %12617 = vmatpush3.bf16.msra.mxu1 %v12598_v23  ;;  %v793_v55 = vsel %vm777_vm15, %v767_v37, %v785_v49  ;;  %v946_v56 = vsel %vm930_vm0, %v920_v41, %v938_v51  ;;  %12603 = vmatprep.subr.bf16.mxu0 %v12602_v59 }
 0x1d5   : > { %v792_v50 = vsel %vm776_vm2, %v762_v46, %v784_v52  ;;  %v945_v54 = vsel %vm929_vm3, %v915_v47, %v937_v53  ;;  %12619 = vmatprep.subr.bf16.mxu1 %v12602_v59 }
 0x1d6   : > { %11079 = vmatprep.mubr.msk.f32.mxu0 %vm640_vm1, %v792_v50  ;;  %11107 = vmatprep.mubr.msk.f32.mxu1 %vm640_vm1, %v945_v54 }
 0x1d7   : > { %11080 = vmatmul.mubr.msk.f32.gmra.mrb[22].mxu0 %vm640_vm1, %v793_v55  ;;  %11108 = vmatmul.mubr.msk.f32.gmra.mrb[22].mxu1 %vm640_vm1, %v946_v56 }
 0x1d8   : > { %12605 = vmatpush3.bf16.msra.mxu0 %v12602_v59  ;;  %12621 = vmatpush3.bf16.msra.mxu1 %v12602_v59 }
 0x1d9   : > { %12623 = vmatprep.subr.bf16.mxu0 %v12622_v62  ;;  %12639 = vmatprep.subr.bf16.mxu1 %v12622_v62 }
 0x29b   : > { %v11072_v0 = vpop.f32.mrb[16].mxu0 }
 0x29c   : > { %v11100_v1 = vpop.f32.mrb[16].mxu1  ;;  %v1060_v2 = vadd.f32 %v11072_v0, %v13674_v63  ;;  %v1054_v4 = vpop.f32.mrb[17].mxu0 }
 0x29d   : > { %v1213_v3 = vadd.f32 %v11100_v1, %v13674_v63  ;;  %v1207_v5 = vpop.f32.mrb[17].mxu1  ;;  %v1055_v6 = vadd.f32 %v13674_v63, %v1054_v4 }
 0x29e   : > { %v1208_v7 = vadd.f32 %v13674_v63, %v1207_v5  ;;  %vm1094_vm4 = vcmp.gt.f32.partialorder %v1060_v2, 0.0  ;;  %v1102_v10 = vmul.f32 0.01, %v1060_v2 }
 0x29f   : > { %vm1247_vm5 = vcmp.gt.f32.partialorder %v1213_v3, 0.0  ;;  %v1255_v11 = vmul.f32 0.01, %v1213_v3  ;;  %vm1093_vm6 = vcmp.gt.f32.partialorder %v1055_v6, 0.0  ;;  %v1101_v12 = vmul.f32 0.01, %v1055_v6 }
 0x2a0   : > { %vm1246_vm7 = vcmp.gt.f32.partialorder %v1208_v7, 0.0  ;;  %v1254_v13 = vmul.f32 0.01, %v1208_v7  ;;  %v1110_v14 = vsel %vm1094_vm4, %v1060_v2, %v1102_v10  ;;  %v11075_v15 = vpop.f32.mrb[18].mxu0  ;;  %v11103_v16 = vpop.f32.mrb[18].mxu1  ;;  %v9480_v10 = vld [vmem:[%s15320_s3 + $0x108] sm:$0xff] }
 0x2a1   : > { %v1070_v18 = vadd.f32 %v11075_v15, %v13674_v63  ;;  %v1223_v19 = vadd.f32 %v11103_v16, %v13674_v63  ;;  %v1064_v20 = vpop.f32.mrb[19].mxu0  ;;  %v1217_v21 = vpop.f32.mrb[19].mxu1  ;;  %v1109_v22 = vsel %vm1093_vm6, %v1055_v6, %v1101_v12  ;;  %v1263_v24 = vsel %vm1247_vm5, %v1213_v3, %v1255_v11  ;;  %v9459_v6 = vld [vmem:[%s15320_s3 + $0xf0] sm:$0xff]  ;;  %v13740_v12 = vld [vmem:[%s15321_s4 + $0x2] ss:$0 sm:$0xff] }
 0x2a2   : > { %v1262_v23 = vsel %vm1246_vm7, %v1208_v7, %v1254_v13  ;;  %v1065_v25 = vadd.f32 %v13674_v63, %v1064_v20  ;;  %v1218_v26 = vadd.f32 %v13674_v63, %v1217_v21  ;;  %11126 = vmatprep.mubr.msk.f32.mxu0 %vm640_vm1, %v1109_v22  ;;  %v9460_v7 = vld [vmem:[%s15320_s3 + $0xf8] sm:$0xff]  ;;  %v12654_v11 = vpack.c.bf16 %v9480_v10, %v9479_v9  ;;  %v9481_v21 = vld [vmem:[%s15320_s3 + $0x110] sm:$0xff] }
 0x2a3   : > { %11154 = vmatprep.mubr.msk.f32.mxu1 %vm640_vm1, %v1262_v23  ;;  %vm1096_vm8 = vcmp.gt.f32.partialorder %v1070_v18, 0.0  ;;  %v1104_v29 = vmul.f32 0.01, %v1070_v18  ;;  %vm1249_vm9 = vcmp.gt.f32.partialorder %v1223_v19, 0.0  ;;  %v1257_v30 = vmul.f32 0.01, %v1223_v19  ;;  %11127 = vmatmul.mubr.msk.f32.vlgmr.msra.gmra.mrb[24].mxu0 %vm640_vm1, %v1110_v14 }
 0x2a4   : > { %11155 = vmatmul.mubr.msk.f32.vlgmr.msra.gmra.mrb[24].mxu1 %vm640_vm1, %v1263_v24  ;;  %vm1095_vm10 = vcmp.gt.f32.partialorder %v1065_v25, 0.0  ;;  %v1103_v31 = vmul.f32 0.01, %v1065_v25  ;;  %vm1248_vm11 = vcmp.gt.f32.partialorder %v1218_v26, 0.0  ;;  %v1256_v32 = vmul.f32 0.01, %v1218_v26  ;;  %12625 = vmatpush3.bf16.msra.mxu0 %v12622_v62 }
 0x2a5   : > { %12641 = vmatpush3.bf16.msra.mxu1 %v12622_v62  ;;  %v11078_v33 = vpop.f32.mrb[20].mxu0  ;;  %v1112_v35 = vsel %vm1096_vm8, %v1070_v18, %v1104_v29  ;;  %12627 = vmatprep.subr.bf16.mxu0 %v12626_v17  ;;  %v1265_v45 = vsel %vm1249_vm9, %v1223_v19, %v1257_v30  ;;  %v12634_v8 = vpack.c.bf16 %v9460_v7, %v9459_v6  ;;  %v9482_v22 = vld [vmem:[%s15320_s3 + $0x118] sm:$0xff] }
 0x2a6   : > { %v11106_v34 = vpop.f32.mrb[20].mxu1  ;;  %12643 = vmatprep.subr.bf16.mxu1 %v12626_v17  ;;  %v1080_v38 = vadd.f32 %v11078_v33, %v13674_v63  ;;  %v1074_v40 = vpop.f32.mrb[21].mxu0  ;;  %v1111_v41 = vsel %vm1095_vm10, %v1065_v25, %v1103_v31  ;;  %v1264_v42 = vsel %vm1248_vm11, %v1218_v26, %v1256_v32  ;;  %v12658_v30 = vpack.c.bf16 %v9482_v22, %v9481_v21  ;;  %v9505_v22 = vld [vmem:[%s15320_s3 + $0x140] sm:$0xff] }
 0x2a7   : > { %v1233_v39 = vadd.f32 %v11106_v34, %v13674_v63  ;;  %v1227_v37 = vpop.f32.mrb[21].mxu1  ;;  %v1075_v43 = vadd.f32 %v13674_v63, %v1074_v40  ;;  %11129 = vmatprep.mubr.msk.f32.mxu0 %vm640_vm1, %v1111_v41  ;;  %11157 = vmatprep.mubr.msk.f32.mxu1 %vm640_vm1, %v1264_v42  ;;  %v9484_v41 = vld [vmem:[%s15320_s3 + $0x128] sm:$0xff] }
 0x2a8   : > { %v1228_v44 = vadd.f32 %v13674_v63, %v1227_v37  ;;  %vm1098_vm12 = vcmp.gt.f32.partialorder %v1080_v38, 0.0  ;;  %v1106_v46 = vmul.f32 0.01, %v1080_v38  ;;  %11130 = vmatmul.mubr.msk.f32.gmra.mrb[26].mxu0 %vm640_vm1, %v1112_v35  ;;  %11158 = vmatmul.mubr.msk.f32.gmra.mrb[26].mxu1 %vm640_vm1, %v1265_v45  ;;  %v9483_v37 = vld [vmem:[%s15320_s3 + $0x120] sm:$0xff] }
 0x2a9   : > { %vm1251_vm13 = vcmp.gt.f32.partialorder %v1233_v39, 0.0  ;;  %v1259_v47 = vmul.f32 0.01, %v1233_v39  ;;  %vm1097_vm14 = vcmp.gt.f32.partialorder %v1075_v43, 0.0  ;;  %v1105_v48 = vmul.f32 0.01, %v1075_v43  ;;  %12629 = vmatpush3.bf16.msra.mxu0 %v12626_v17  ;;  %12645 = vmatpush3.bf16.msra.mxu1 %v12626_v17 }
 0x2aa   : > { %vm1250_vm15 = vcmp.gt.f32.partialorder %v1228_v44, 0.0  ;;  %v1258_v49 = vmul.f32 0.01, %v1228_v44  ;;  %v11081_v51 = vpop.f32.mrb[22].mxu0  ;;  %v11109_v52 = vpop.f32.mrb[22].mxu1  ;;  %v1114_v53 = vsel %vm1098_vm12, %v1080_v38, %v1106_v46  ;;  %12631 = vmatprep.subr.bf16.mxu0 %v12630_v36  ;;  %12647 = vmatprep.subr.bf16.mxu1 %v12630_v36 }
 0x2ab   : > { %v1090_v50 = vadd.f32 %v11081_v51, %v13674_v63  ;;  %v1243_v54 = vadd.f32 %v11109_v52, %v13674_v63  ;;  %v1084_v55 = vpop.f32.mrb[23].mxu0  ;;  %v1237_v56 = vpop.f32.mrb[23].mxu1  ;;  %v1113_v57 = vsel %vm1097_vm14, %v1075_v43, %v1105_v48  ;;  %v1267_v61 = vsel %vm1251_vm13, %v1233_v39, %v1259_v47 }
 0x2ac   : > { %v1266_v58 = vsel %vm1250_vm15, %v1228_v44, %v1258_v49  ;;  %v1085_v59 = vadd.f32 %v13674_v63, %v1084_v55  ;;  %v1238_v60 = vadd.f32 %v13674_v63, %v1237_v56  ;;  %11132 = vmatprep.mubr.msk.f32.mxu0 %vm640_vm1, %v1113_v57  ;;  %v12662_v49 = vpack.c.bf16 %v9484_v41, %v9483_v37 }
 0x2ad   : > { %11160 = vmatprep.mubr.msk.f32.mxu1 %vm640_vm1, %v1266_v58  ;;  %vm1100_vm0 = vcmp.gt.f32.partialorder %v1090_v50, 0.0  ;;  %v1108_v62 = vmul.f32 0.01, %v1090_v50  ;;  %vm1253_vm2 = vcmp.gt.f32.partialorder %v1243_v54, 0.0  ;;  %v1261_v0 = vmul.f32 0.01, %v1243_v54  ;;  %11133 = vmatmul.mubr.msk.f32.gmra.mrb[28].mxu0 %vm640_vm1, %v1114_v53 }
 0x2ae   : > { %11161 = vmatmul.mubr.msk.f32.gmra.mrb[28].mxu1 %vm640_vm1, %v1267_v61  ;;  %vm1099_vm3 = vcmp.gt.f32.partialorder %v1085_v59, 0.0  ;;  %v1107_v1 = vmul.f32 0.01, %v1085_v59  ;;  %vm1252_vm4 = vcmp.gt.f32.partialorder %v1238_v60, 0.0  ;;  %v1260_v2 = vmul.f32 0.01, %v1238_v60  ;;  %12633 = vmatpush3.bf16.msra.mxu0 %v12630_v36 }
 0x2af   : > { %12649 = vmatpush3.bf16.msra.mxu1 %v12630_v36  ;;  %v1116_v4 = vsel %vm1100_vm0, %v1090_v50, %v1108_v62  ;;  %v1269_v5 = vsel %vm1253_vm2, %v1243_v54, %v1261_v0  ;;  %12635 = vmatprep.subr.bf16.mxu0 %v12634_v8 }
 0x2b0   : > { %v1115_v63 = vsel %vm1099_vm3, %v1085_v59, %v1107_v1  ;;  %v1268_v3 = vsel %vm1252_vm4, %v1238_v60, %v1260_v2  ;;  %12651 = vmatprep.subr.bf16.mxu1 %v12634_v8 }
 0x2b1   : > { %11135 = vmatprep.mubr.msk.f32.mxu0 %vm640_vm1, %v1115_v63  ;;  %11163 = vmatprep.mubr.msk.f32.mxu1 %vm640_vm1, %v1268_v3 }
 0x2b2   : > { %11136 = vmatmul.mubr.msk.f32.gmra.mrb[30].mxu0 %vm640_vm1, %v1116_v4  ;;  %11164 = vmatmul.mubr.msk.f32.gmra.mrb[30].mxu1 %vm640_vm1, %v1269_v5 }
 0x2b3   : > { %12637 = vmatpush3.bf16.msra.mxu0 %v12634_v8  ;;  %12653 = vmatpush3.bf16.msra.mxu1 %v12634_v8 }
 0x2b4   : > { %12655 = vmatprep.subr.bf16.mxu0 %v12654_v11  ;;  %12671 = vmatprep.subr.bf16.mxu1 %v12654_v11 }
 0x376   : > { %v11128_v13 = vpop.f32.mrb[24].mxu0 }
 0x377   : > { %v11156_v14 = vpop.f32.mrb[24].mxu1  ;;  %v1383_v15 = vadd.f32 %v11128_v13, %v13740_v12  ;;  %v1377_v17 = vpop.f32.mrb[25].mxu0 }
 0x378   : > { %v1536_v16 = vadd.f32 %v11156_v14, %v13740_v12  ;;  %v1530_v18 = vpop.f32.mrb[25].mxu1  ;;  %v1378_v19 = vadd.f32 %v13740_v12, %v1377_v17 }
 0x379   : > { %v1531_v20 = vadd.f32 %v13740_v12, %v1530_v18  ;;  %vm1417_vm5 = vcmp.gt.f32.partialorder %v1383_v15, 0.0  ;;  %v1425_v23 = vmul.f32 0.01, %v1383_v15 }
 0x37a   : > { %vm1570_vm6 = vcmp.gt.f32.partialorder %v1536_v16, 0.0  ;;  %v1578_v24 = vmul.f32 0.01, %v1536_v16  ;;  %vm1416_vm7 = vcmp.gt.f32.partialorder %v1378_v19, 0.0  ;;  %v1424_v25 = vmul.f32 0.01, %v1378_v19 }
 0x37b   : > { %vm1569_vm8 = vcmp.gt.f32.partialorder %v1531_v20, 0.0  ;;  %v1577_v26 = vmul.f32 0.01, %v1531_v20  ;;  %v1433_v27 = vsel %vm1417_vm5, %v1383_v15, %v1425_v23  ;;  %v11131_v28 = vpop.f32.mrb[26].mxu0  ;;  %v11159_v29 = vpop.f32.mrb[26].mxu1  ;;  %v9506_v23 = vld [vmem:[%s15320_s3 + $0x148] sm:$0xff] }
 0x37c   : > { %v1393_v31 = vadd.f32 %v11131_v28, %v13740_v12  ;;  %v1546_v32 = vadd.f32 %v11159_v29, %v13740_v12  ;;  %v1387_v33 = vpop.f32.mrb[27].mxu0  ;;  %v1540_v34 = vpop.f32.mrb[27].mxu1  ;;  %v1432_v35 = vsel %vm1416_vm7, %v1378_v19, %v1424_v25  ;;  %v1586_v38 = vsel %vm1570_vm6, %v1536_v16, %v1578_v24  ;;  %v9485_v19 = vld [vmem:[%s15320_s3 + $0x130] sm:$0xff]  ;;  %v13806_v25 = vld [vmem:[%s15321_s4 + $0x3] ss:$0 sm:$0xff] }
 0x37d   : > { %v1585_v36 = vsel %vm1569_vm8, %v1531_v20, %v1577_v26  ;;  %v1388_v39 = vadd.f32 %v13740_v12, %v1387_v33  ;;  %v1541_v40 = vadd.f32 %v13740_v12, %v1540_v34  ;;  %11182 = vmatprep.mubr.msk.f32.mxu0 %vm640_vm1, %v1432_v35  ;;  %v9486_v20 = vld [vmem:[%s15320_s3 + $0x138] sm:$0xff]  ;;  %v12686_v24 = vpack.c.bf16 %v9506_v23, %v9505_v22  ;;  %v9507_v34 = vld [vmem:[%s15320_s3 + $0x150] sm:$0xff] }
 0x37e   : > { %11210 = vmatprep.mubr.msk.f32.mxu1 %vm640_vm1, %v1585_v36  ;;  %vm1419_vm9 = vcmp.gt.f32.partialorder %v1393_v31, 0.0  ;;  %v1427_v42 = vmul.f32 0.01, %v1393_v31  ;;  %vm1572_vm10 = vcmp.gt.f32.partialorder %v1546_v32, 0.0  ;;  %v1580_v43 = vmul.f32 0.01, %v1546_v32  ;;  %11183 = vmatmul.mubr.msk.f32.vlgmr.msra.gmra.mrb[32].mxu0 %vm640_vm1, %v1433_v27 }
 0x37f   : > { %11211 = vmatmul.mubr.msk.f32.vlgmr.msra.gmra.mrb[32].mxu1 %vm640_vm1, %v1586_v38  ;;  %vm1418_vm11 = vcmp.gt.f32.partialorder %v1388_v39, 0.0  ;;  %v1426_v44 = vmul.f32 0.01, %v1388_v39  ;;  %vm1571_vm12 = vcmp.gt.f32.partialorder %v1541_v40, 0.0  ;;  %v1579_v45 = vmul.f32 0.01, %v1541_v40  ;;  %12657 = vmatpush3.bf16.msra.mxu0 %v12654_v11 }
 0x380   : > { %12673 = vmatpush3.bf16.msra.mxu1 %v12654_v11  ;;  %v11134_v46 = vpop.f32.mrb[28].mxu0  ;;  %v1435_v48 = vsel %vm1419_vm9, %v1393_v31, %v1427_v42  ;;  %12659 = vmatprep.subr.bf16.mxu0 %v12658_v30  ;;  %v1588_v58 = vsel %vm1572_vm10, %v1546_v32, %v1580_v43  ;;  %v12666_v21 = vpack.c.bf16 %v9486_v20, %v9485_v19  ;;  %v9508_v35 = vld [vmem:[%s15320_s3 + $0x158] sm:$0xff] }
 0x381   : > { %v11162_v47 = vpop.f32.mrb[28].mxu1  ;;  %12675 = vmatprep.subr.bf16.mxu1 %v12658_v30  ;;  %v1403_v51 = vadd.f32 %v11134_v46, %v13740_v12  ;;  %v1397_v53 = vpop.f32.mrb[29].mxu0  ;;  %v1434_v54 = vsel %vm1418_vm11, %v1388_v39, %v1426_v44  ;;  %v1587_v55 = vsel %vm1571_vm12, %v1541_v40, %v1579_v45  ;;  %v12690_v43 = vpack.c.bf16 %v9508_v35, %v9507_v34  ;;  %v9531_v35 = vld [vmem:[%s15320_s3 + $0x180] sm:$0xff] }
 0x382   : > { %v1556_v52 = vadd.f32 %v11162_v47, %v13740_v12  ;;  %v1550_v50 = vpop.f32.mrb[29].mxu1  ;;  %v1398_v56 = vadd.f32 %v13740_v12, %v1397_v53  ;;  %11185 = vmatprep.mubr.msk.f32.mxu0 %vm640_vm1, %v1434_v54  ;;  %11213 = vmatprep.mubr.msk.f32.mxu1 %vm640_vm1, %v1587_v55  ;;  %v9510_v54 = vld [vmem:[%s15320_s3 + $0x168] sm:$0xff] }
 0x383   : > { %v1551_v57 = vadd.f32 %v13740_v12, %v1550_v50  ;;  %vm1421_vm13 = vcmp.gt.f32.partialorder %v1403_v51, 0.0  ;;  %v1429_v59 = vmul.f32 0.01, %v1403_v51  ;;  %11186 = vmatmul.mubr.msk.f32.gmra.mrb[34].mxu0 %vm640_vm1, %v1435_v48  ;;  %11214 = vmatmul.mubr.msk.f32.gmra.mrb[34].mxu1 %vm640_vm1, %v1588_v58  ;;  %v9509_v50 = vld [vmem:[%s15320_s3 + $0x160] sm:$0xff] }
 0x384   : > { %vm1574_vm14 = vcmp.gt.f32.partialorder %v1556_v52, 0.0  ;;  %v1582_v60 = vmul.f32 0.01, %v1556_v52  ;;  %vm1420_vm15 = vcmp.gt.f32.partialorder %v1398_v56, 0.0  ;;  %v1428_v61 = vmul.f32 0.01, %v1398_v56  ;;  %12661 = vmatpush3.bf16.msra.mxu0 %v12658_v30  ;;  %12677 = vmatpush3.bf16.msra.mxu1 %v12658_v30 }
 0x385   : > { %vm1573_vm0 = vcmp.gt.f32.partialorder %v1551_v57, 0.0  ;;  %v1581_v62 = vmul.f32 0.01, %v1551_v57  ;;  %v11137_v0 = vpop.f32.mrb[30].mxu0  ;;  %v11165_v1 = vpop.f32.mrb[30].mxu1  ;;  %v1437_v2 = vsel %vm1421_vm13, %v1403_v51, %v1429_v59  ;;  %12663 = vmatprep.subr.bf16.mxu0 %v12662_v49  ;;  %12679 = vmatprep.subr.bf16.mxu1 %v12662_v49 }
 0x386   : > { %v1413_v63 = vadd.f32 %v11137_v0, %v13740_v12  ;;  %v1566_v3 = vadd.f32 %v11165_v1, %v13740_v12  ;;  %v1407_v4 = vpop.f32.mrb[31].mxu0  ;;  %v1560_v5 = vpop.f32.mrb[31].mxu1  ;;  %v1436_v6 = vsel %vm1420_vm15, %v1398_v56, %v1428_v61  ;;  %v1590_v10 = vsel %vm1574_vm14, %v1556_v52, %v1582_v60 }
 0x387   : > { %v1589_v7 = vsel %vm1573_vm0, %v1551_v57, %v1581_v62  ;;  %v1408_v8 = vadd.f32 %v13740_v12, %v1407_v4  ;;  %v1561_v9 = vadd.f32 %v13740_v12, %v1560_v5  ;;  %11188 = vmatprep.mubr.msk.f32.mxu0 %vm640_vm1, %v1436_v6  ;;  %v12694_v62 = vpack.c.bf16 %v9510_v54, %v9509_v50 }
 0x388   : > { %11216 = vmatprep.mubr.msk.f32.mxu1 %vm640_vm1, %v1589_v7  ;;  %vm1423_vm2 = vcmp.gt.f32.partialorder %v1413_v63, 0.0  ;;  %v1431_v11 = vmul.f32 0.01, %v1413_v63  ;;  %vm1576_vm3 = vcmp.gt.f32.partialorder %v1566_v3, 0.0  ;;  %v1584_v13 = vmul.f32 0.01, %v1566_v3  ;;  %11189 = vmatmul.mubr.msk.f32.gmra.mrb[36].mxu0 %vm640_vm1, %v1437_v2 }
 0x389   : > { %11217 = vmatmul.mubr.msk.f32.gmra.mrb[36].mxu1 %vm640_vm1, %v1590_v10  ;;  %vm1422_vm4 = vcmp.gt.f32.partialorder %v1408_v8, 0.0  ;;  %v1430_v14 = vmul.f32 0.01, %v1408_v8  ;;  %vm1575_vm5 = vcmp.gt.f32.partialorder %v1561_v9, 0.0  ;;  %v1583_v15 = vmul.f32 0.01, %v1561_v9  ;;  %12665 = vmatpush3.bf16.msra.mxu0 %v12662_v49 }
 0x38a   : > { %12681 = vmatpush3.bf16.msra.mxu1 %v12662_v49  ;;  %v1439_v17 = vsel %vm1423_vm2, %v1413_v63, %v1431_v11  ;;  %v1592_v18 = vsel %vm1576_vm3, %v1566_v3, %v1584_v13  ;;  %12667 = vmatprep.subr.bf16.mxu0 %v12666_v21 }
 0x38b   : > { %v1438_v12 = vsel %vm1422_vm4, %v1408_v8, %v1430_v14  ;;  %v1591_v16 = vsel %vm1575_vm5, %v1561_v9, %v1583_v15  ;;  %12683 = vmatprep.subr.bf16.mxu1 %v12666_v21 }
 0x38c   : > { %11191 = vmatprep.mubr.msk.f32.mxu0 %vm640_vm1, %v1438_v12  ;;  %11219 = vmatprep.mubr.msk.f32.mxu1 %vm640_vm1, %v1591_v16 }
 0x38d   : > { %11192 = vmatmul.mubr.msk.f32.gmra.mrb[38].mxu0 %vm640_vm1, %v1439_v17  ;;  %11220 = vmatmul.mubr.msk.f32.gmra.mrb[38].mxu1 %vm640_vm1, %v1592_v18 }
 0x38e   : > { %12669 = vmatpush3.bf16.msra.mxu0 %v12666_v21  ;;  %12685 = vmatpush3.bf16.msra.mxu1 %v12666_v21 }
 0x38f   : > { %12687 = vmatprep.subr.bf16.mxu0 %v12686_v24  ;;  %12703 = vmatprep.subr.bf16.mxu1 %v12686_v24 }
 0x451   : > { %v11184_v26 = vpop.f32.mrb[32].mxu0 }
 0x452   : > { %v11212_v27 = vpop.f32.mrb[32].mxu1  ;;  %v1706_v28 = vadd.f32 %v11184_v26, %v13806_v25  ;;  %v1700_v30 = vpop.f32.mrb[33].mxu0 }
 0x453   : > { %v1859_v29 = vadd.f32 %v11212_v27, %v13806_v25  ;;  %v1853_v31 = vpop.f32.mrb[33].mxu1  ;;  %v1701_v32 = vadd.f32 %v13806_v25, %v1700_v30 }
 0x454   : > { %v1854_v33 = vadd.f32 %v13806_v25, %v1853_v31  ;;  %vm1740_vm6 = vcmp.gt.f32.partialorder %v1706_v28, 0.0  ;;  %v1748_v36 = vmul.f32 0.01, %v1706_v28 }
 0x455   : > { %vm1893_vm7 = vcmp.gt.f32.partialorder %v1859_v29, 0.0  ;;  %v1901_v38 = vmul.f32 0.01, %v1859_v29  ;;  %vm1739_vm8 = vcmp.gt.f32.partialorder %v1701_v32, 0.0  ;;  %v1747_v39 = vmul.f32 0.01, %v1701_v32 }
 0x456   : > { %vm1892_vm9 = vcmp.gt.f32.partialorder %v1854_v33, 0.0  ;;  %v1900_v40 = vmul.f32 0.01, %v1854_v33  ;;  %v1756_v37 = vsel %vm1740_vm6, %v1706_v28, %v1748_v36  ;;  %v11187_v41 = vpop.f32.mrb[34].mxu0  ;;  %v11215_v42 = vpop.f32.mrb[34].mxu1  ;;  %v9532_v36 = vld [vmem:[%s15320_s3 + $0x188] sm:$0xff] }
 0x457   : > { %v1716_v44 = vadd.f32 %v11187_v41, %v13806_v25  ;;  %v1869_v45 = vadd.f32 %v11215_v42, %v13806_v25  ;;  %v1710_v46 = vpop.f32.mrb[35].mxu0  ;;  %v1863_v47 = vpop.f32.mrb[35].mxu1  ;;  %v1755_v48 = vsel %vm1739_vm8, %v1701_v32, %v1747_v39  ;;  %v1909_v51 = vsel %vm1893_vm7, %v1859_v29, %v1901_v38  ;;  %v9511_v32 = vld [vmem:[%s15320_s3 + $0x170] sm:$0xff]  ;;  %v13872_v39 = vld [vmem:[%s15321_s4 + $0x4] ss:$0 sm:$0xff] }
 0x458   : > { %v1908_v49 = vsel %vm1892_vm9, %v1854_v33, %v1900_v40  ;;  %v1711_v52 = vadd.f32 %v13806_v25, %v1710_v46  ;;  %v1864_v53 = vadd.f32 %v13806_v25, %v1863_v47  ;;  %11238 = vmatprep.mubr.msk.f32.mxu0 %vm640_vm1, %v1755_v48  ;;  %v9512_v33 = vld [vmem:[%s15320_s3 + $0x178] sm:$0xff]  ;;  %v12718_v38 = vpack.c.bf16 %v9532_v36, %v9531_v35  ;;  %v9533_v47 = vld [vmem:[%s15320_s3 + $0x190] sm:$0xff] }
 0x459   : > { %11266 = vmatprep.mubr.msk.f32.mxu1 %vm640_vm1, %v1908_v49  ;;  %vm1742_vm10 = vcmp.gt.f32.partialorder %v1716_v44, 0.0  ;;  %v1750_v55 = vmul.f32 0.01, %v1716_v44  ;;  %vm1895_vm11 = vcmp.gt.f32.partialorder %v1869_v45, 0.0  ;;  %v1903_v56 = vmul.f32 0.01, %v1869_v45  ;;  %11239 = vmatmul.mubr.msk.f32.vlgmr.msra.gmra.mrb[40].mxu0 %vm640_vm1, %v1756_v37 }
 0x45a   : > { %11267 = vmatmul.mubr.msk.f32.vlgmr.msra.gmra.mrb[40].mxu1 %vm640_vm1, %v1909_v51  ;;  %vm1741_vm12 = vcmp.gt.f32.partialorder %v1711_v52, 0.0  ;;  %v1749_v57 = vmul.f32 0.01, %v1711_v52  ;;  %vm1894_vm13 = vcmp.gt.f32.partialorder %v1864_v53, 0.0  ;;  %v1902_v58 = vmul.f32 0.01, %v1864_v53  ;;  %12689 = vmatpush3.bf16.msra.mxu0 %v12686_v24 }
 0x45b   : > { %12705 = vmatpush3.bf16.msra.mxu1 %v12686_v24  ;;  %v11190_v59 = vpop.f32.mrb[36].mxu0  ;;  %v1758_v61 = vsel %vm1742_vm10, %v1716_v44, %v1750_v55  ;;  %12691 = vmatprep.subr.bf16.mxu0 %v12690_v43  ;;  %v1911_v7 = vsel %vm1895_vm11, %v1869_v45, %v1903_v56  ;;  %v12698_v34 = vpack.c.bf16 %v9512_v33, %v9511_v32  ;;  %v9534_v48 = vld [vmem:[%s15320_s3 + $0x198] sm:$0xff] }
 0x45c   : > { %v11218_v60 = vpop.f32.mrb[36].mxu1  ;;  %12707 = vmatprep.subr.bf16.mxu1 %v12690_v43  ;;  %v1726_v0 = vadd.f32 %v11190_v59, %v13806_v25  ;;  %v1720_v2 = vpop.f32.mrb[37].mxu0  ;;  %v1757_v3 = vsel %vm1741_vm12, %v1711_v52, %v1749_v57  ;;  %v1910_v4 = vsel %vm1894_vm13, %v1864_v53, %v1902_v58  ;;  %v12722_v56 = vpack.c.bf16 %v9534_v48, %v9533_v47  ;;  %v9557_v48 = vld [vmem:[%s15320_s3 + $0x1c0] sm:$0xff] }
 0x45d   : > { %v1879_v1 = vadd.f32 %v11218_v60, %v13806_v25  ;;  %v1873_v63 = vpop.f32.mrb[37].mxu1  ;;  %v1721_v5 = vadd.f32 %v13806_v25, %v1720_v2  ;;  %11241 = vmatprep.mubr.msk.f32.mxu0 %vm640_vm1, %v1757_v3  ;;  %11269 = vmatprep.mubr.msk.f32.mxu1 %vm640_vm1, %v1910_v4  ;;  %v9536_v3 = vld [vmem:[%s15320_s3 + $0x1a8] sm:$0xff] }
 0x45e   : > { %v1874_v6 = vadd.f32 %v13806_v25, %v1873_v63  ;;  %vm1744_vm14 = vcmp.gt.f32.partialorder %v1726_v0, 0.0  ;;  %v1752_v8 = vmul.f32 0.01, %v1726_v0  ;;  %11242 = vmatmul.mubr.msk.f32.gmra.mrb[42].mxu0 %vm640_vm1, %v1758_v61  ;;  %11270 = vmatmul.mubr.msk.f32.gmra.mrb[42].mxu1 %vm640_vm1, %v1911_v7  ;;  %v9535_v63 = vld [vmem:[%s15320_s3 + $0x1a0] sm:$0xff] }
 0x45f   : > { %vm1897_vm15 = vcmp.gt.f32.partialorder %v1879_v1, 0.0  ;;  %v1905_v9 = vmul.f32 0.01, %v1879_v1  ;;  %vm1743_vm0 = vcmp.gt.f32.partialorder %v1721_v5, 0.0  ;;  %v1751_v10 = vmul.f32 0.01, %v1721_v5  ;;  %12693 = vmatpush3.bf16.msra.mxu0 %v12690_v43  ;;  %12709 = vmatpush3.bf16.msra.mxu1 %v12690_v43 }
 0x460   : > { %vm1896_vm2 = vcmp.gt.f32.partialorder %v1874_v6, 0.0  ;;  %v1904_v11 = vmul.f32 0.01, %v1874_v6  ;;  %v11193_v13 = vpop.f32.mrb[38].mxu0  ;;  %v11221_v14 = vpop.f32.mrb[38].mxu1  ;;  %v1760_v15 = vsel %vm1744_vm14, %v1726_v0, %v1752_v8  ;;  %12695 = vmatprep.subr.bf16.mxu0 %v12694_v62  ;;  %12711 = vmatprep.subr.bf16.mxu1 %v12694_v62 }
 0x461   : > { %v1736_v12 = vadd.f32 %v11193_v13, %v13806_v25  ;;  %v1889_v16 = vadd.f32 %v11221_v14, %v13806_v25  ;;  %v1730_v17 = vpop.f32.mrb[39].mxu0  ;;  %v1883_v18 = vpop.f32.mrb[39].mxu1  ;;  %v1759_v19 = vsel %vm1743_vm0, %v1721_v5, %v1751_v10  ;;  %v1913_v23 = vsel %vm1897_vm15, %v1879_v1, %v1905_v9 }
 0x462   : > { %v1912_v20 = vsel %vm1896_vm2, %v1874_v6, %v1904_v11  ;;  %v1731_v21 = vadd.f32 %v13806_v25, %v1730_v17  ;;  %v1884_v22 = vadd.f32 %v13806_v25, %v1883_v18  ;;  %11244 = vmatprep.mubr.msk.f32.mxu0 %vm640_vm1, %v1759_v19  ;;  %v12726_v11 = vpack.c.bf16 %v9536_v3, %v9535_v63 }
 0x463   : > { %11272 = vmatprep.mubr.msk.f32.mxu1 %vm640_vm1, %v1912_v20  ;;  %vm1746_vm3 = vcmp.gt.f32.partialorder %v1736_v12, 0.0  ;;  %v1754_v24 = vmul.f32 0.01, %v1736_v12  ;;  %vm1899_vm4 = vcmp.gt.f32.partialorder %v1889_v16, 0.0  ;;  %v1907_v26 = vmul.f32 0.01, %v1889_v16  ;;  %11245 = vmatmul.mubr.msk.f32.gmra.mrb[44].mxu0 %vm640_vm1, %v1760_v15 }
 0x464   : > { %11273 = vmatmul.mubr.msk.f32.gmra.mrb[44].mxu1 %vm640_vm1, %v1913_v23  ;;  %vm1745_vm5 = vcmp.gt.f32.partialorder %v1731_v21, 0.0  ;;  %v1753_v27 = vmul.f32 0.01, %v1731_v21  ;;  %vm1898_vm6 = vcmp.gt.f32.partialorder %v1884_v22, 0.0  ;;  %v1906_v28 = vmul.f32 0.01, %v1884_v22  ;;  %12697 = vmatpush3.bf16.msra.mxu0 %v12694_v62 }
 0x465   : > { %12713 = vmatpush3.bf16.msra.mxu1 %v12694_v62  ;;  %v1762_v30 = vsel %vm1746_vm3, %v1736_v12, %v1754_v24  ;;  %v1915_v31 = vsel %vm1899_vm4, %v1889_v16, %v1907_v26  ;;  %12699 = vmatprep.subr.bf16.mxu0 %v12698_v34 }
 0x466   : > { %v1761_v25 = vsel %vm1745_vm5, %v1731_v21, %v1753_v27  ;;  %v1914_v29 = vsel %vm1898_vm6, %v1884_v22, %v1906_v28  ;;  %12715 = vmatprep.subr.bf16.mxu1 %v12698_v34 }
 0x467   : > { %11247 = vmatprep.mubr.msk.f32.mxu0 %vm640_vm1, %v1761_v25  ;;  %11275 = vmatprep.mubr.msk.f32.mxu1 %vm640_vm1, %v1914_v29 }
 0x468   : > { %11248 = vmatmul.mubr.msk.f32.gmra.mrb[46].mxu0 %vm640_vm1, %v1762_v30  ;;  %11276 = vmatmul.mubr.msk.f32.gmra.mrb[46].mxu1 %vm640_vm1, %v1915_v31 }
 0x469   : > { %12701 = vmatpush3.bf16.msra.mxu0 %v12698_v34  ;;  %12717 = vmatpush3.bf16.msra.mxu1 %v12698_v34 }
 0x46a   : > { %12719 = vmatprep.subr.bf16.mxu0 %v12718_v38  ;;  %12735 = vmatprep.subr.bf16.mxu1 %v12718_v38 }
 0x52c   : > { %v11240_v40 = vpop.f32.mrb[40].mxu0 }
 0x52d   : > { %v11268_v37 = vpop.f32.mrb[40].mxu1  ;;  %v2029_v41 = vadd.f32 %v11240_v40, %v13872_v39  ;;  %v2023_v43 = vpop.f32.mrb[41].mxu0 }
 0x52e   : > { %v2182_v42 = vadd.f32 %v11268_v37, %v13872_v39  ;;  %v2176_v44 = vpop.f32.mrb[41].mxu1  ;;  %v2024_v45 = vadd.f32 %v13872_v39, %v2023_v43 }
 0x52f   : > { %v2177_v46 = vadd.f32 %v13872_v39, %v2176_v44  ;;  %vm2063_vm7 = vcmp.gt.f32.partialorder %v2029_v41, 0.0  ;;  %v2071_v49 = vmul.f32 0.01, %v2029_v41 }
 0x530   : > { %vm2216_vm8 = vcmp.gt.f32.partialorder %v2182_v42, 0.0  ;;  %v2224_v51 = vmul.f32 0.01, %v2182_v42  ;;  %vm2062_vm9 = vcmp.gt.f32.partialorder %v2024_v45, 0.0  ;;  %v2070_v52 = vmul.f32 0.01, %v2024_v45 }
 0x531   : > { %vm2215_vm10 = vcmp.gt.f32.partialorder %v2177_v46, 0.0  ;;  %v2223_v53 = vmul.f32 0.01, %v2177_v46  ;;  %v2079_v50 = vsel %vm2063_vm7, %v2029_v41, %v2071_v49  ;;  %v11243_v54 = vpop.f32.mrb[42].mxu0  ;;  %v11271_v55 = vpop.f32.mrb[42].mxu1  ;;  %v9558_v49 = vld [vmem:[%s15320_s3 + $0x1c8] sm:$0xff] }
 0x532   : > { %v2039_v57 = vadd.f32 %v11243_v54, %v13872_v39  ;;  %v2192_v58 = vadd.f32 %v11271_v55, %v13872_v39  ;;  %v2033_v59 = vpop.f32.mrb[43].mxu0  ;;  %v2186_v60 = vpop.f32.mrb[43].mxu1  ;;  %v2078_v61 = vsel %vm2062_vm9, %v2024_v45, %v2070_v52  ;;  %v2232_v0 = vsel %vm2216_vm8, %v2182_v42, %v2224_v51  ;;  %v9537_v45 = vld [vmem:[%s15320_s3 + $0x1b0] sm:$0xff]  ;;  %v13938_v52 = vld [vmem:[%s15321_s4 + $0x5] ss:$0 sm:$0xff] }
 0x533   : > { %v2231_v62 = vsel %vm2215_vm10, %v2177_v46, %v2223_v53  ;;  %v2034_v1 = vadd.f32 %v13872_v39, %v2033_v59  ;;  %v2187_v2 = vadd.f32 %v13872_v39, %v2186_v60  ;;  %11294 = vmatprep.mubr.msk.f32.mxu0 %vm640_vm1, %v2078_v61  ;;  %v9538_v46 = vld [vmem:[%s15320_s3 + $0x1b8] sm:$0xff]  ;;  %v12750_v51 = vpack.c.bf16 %v9558_v49, %v9557_v48  ;;  %v9559_v60 = vld [vmem:[%s15320_s3 + $0x1d0] sm:$0xff] }
 0x534   : > { %11322 = vmatprep.mubr.msk.f32.mxu1 %vm640_vm1, %v2231_v62  ;;  %vm2065_vm11 = vcmp.gt.f32.partialorder %v2039_v57, 0.0  ;;  %v2073_v4 = vmul.f32 0.01, %v2039_v57  ;;  %vm2218_vm12 = vcmp.gt.f32.partialorder %v2192_v58, 0.0  ;;  %v2226_v5 = vmul.f32 0.01, %v2192_v58  ;;  %11295 = vmatmul.mubr.msk.f32.vlgmr.msra.gmra.mrb[48].mxu0 %vm640_vm1, %v2079_v50 }
 0x535   : > { %11323 = vmatmul.mubr.msk.f32.vlgmr.msra.gmra.mrb[48].mxu1 %vm640_vm1, %v2232_v0  ;;  %vm2064_vm13 = vcmp.gt.f32.partialorder %v2034_v1, 0.0  ;;  %v2072_v6 = vmul.f32 0.01, %v2034_v1  ;;  %vm2217_vm14 = vcmp.gt.f32.partialorder %v2187_v2, 0.0  ;;  %v2225_v7 = vmul.f32 0.01, %v2187_v2  ;;  %12721 = vmatpush3.bf16.msra.mxu0 %v12718_v38 }
 0x536   : > { %12737 = vmatpush3.bf16.msra.mxu1 %v12718_v38  ;;  %v11246_v8 = vpop.f32.mrb[44].mxu0  ;;  %v2081_v10 = vsel %vm2065_vm11, %v2039_v57, %v2073_v4  ;;  %12723 = vmatprep.subr.bf16.mxu0 %v12722_v56  ;;  %v2234_v20 = vsel %vm2218_vm12, %v2192_v58, %v2226_v5  ;;  %v12730_v47 = vpack.c.bf16 %v9538_v46, %v9537_v45  ;;  %v9560_v61 = vld [vmem:[%s15320_s3 + $0x1d8] sm:$0xff] }
 0x537   : > { %v11274_v9 = vpop.f32.mrb[44].mxu1  ;;  %12739 = vmatprep.subr.bf16.mxu1 %v12722_v56  ;;  %v2049_v13 = vadd.f32 %v11246_v8, %v13872_v39  ;;  %v2043_v15 = vpop.f32.mrb[45].mxu0  ;;  %v2080_v16 = vsel %vm2064_vm13, %v2034_v1, %v2072_v6  ;;  %v2233_v17 = vsel %vm2217_vm14, %v2187_v2, %v2225_v7  ;;  %v12754_v5 = vpack.c.bf16 %v9560_v61, %v9559_v60  ;;  %v9583_v61 = vld [vmem:[%s15320_s3 + $0x200] sm:$0xff] }
 0x538   : > { %v2202_v14 = vadd.f32 %v11274_v9, %v13872_v39  ;;  %v2196_v12 = vpop.f32.mrb[45].mxu1  ;;  %v2044_v18 = vadd.f32 %v13872_v39, %v2043_v15  ;;  %11297 = vmatprep.mubr.msk.f32.mxu0 %vm640_vm1, %v2080_v16  ;;  %11325 = vmatprep.mubr.msk.f32.mxu1 %vm640_vm1, %v2233_v17  ;;  %v9562_v16 = vld [vmem:[%s15320_s3 + $0x1e8] sm:$0xff] }
 0x539   : > { %v2197_v19 = vadd.f32 %v13872_v39, %v2196_v12  ;;  %vm2067_vm15 = vcmp.gt.f32.partialorder %v2049_v13, 0.0  ;;  %v2075_v21 = vmul.f32 0.01, %v2049_v13  ;;  %11298 = vmatmul.mubr.msk.f32.gmra.mrb[50].mxu0 %vm640_vm1, %v2081_v10  ;;  %11326 = vmatmul.mubr.msk.f32.gmra.mrb[50].mxu1 %vm640_vm1, %v2234_v20  ;;  %v9561_v12 = vld [vmem:[%s15320_s3 + $0x1e0] sm:$0xff] }
 0x53a   : > { %vm2220_vm0 = vcmp.gt.f32.partialorder %v2202_v14, 0.0  ;;  %v2228_v22 = vmul.f32 0.01, %v2202_v14  ;;  %vm2066_vm2 = vcmp.gt.f32.partialorder %v2044_v18, 0.0  ;;  %v2074_v23 = vmul.f32 0.01, %v2044_v18  ;;  %12725 = vmatpush3.bf16.msra.mxu0 %v12722_v56  ;;  %12741 = vmatpush3.bf16.msra.mxu1 %v12722_v56 }
 0x53b   : > { %vm2219_vm3 = vcmp.gt.f32.partialorder %v2197_v19, 0.0  ;;  %v2227_v24 = vmul.f32 0.01, %v2197_v19  ;;  %v11249_v26 = vpop.f32.mrb[46].mxu0  ;;  %v11277_v27 = vpop.f32.mrb[46].mxu1  ;;  %v2083_v28 = vsel %vm2067_vm15, %v2049_v13, %v2075_v21  ;;  %12727 = vmatprep.subr.bf16.mxu0 %v12726_v11  ;;  %12743 = vmatprep.subr.bf16.mxu1 %v12726_v11 }
 0x53c   : > { %v2059_v25 = vadd.f32 %v11249_v26, %v13872_v39  ;;  %v2212_v29 = vadd.f32 %v11277_v27, %v13872_v39  ;;  %v2053_v30 = vpop.f32.mrb[47].mxu0  ;;  %v2206_v31 = vpop.f32.mrb[47].mxu1  ;;  %v2082_v32 = vsel %vm2066_vm2, %v2044_v18, %v2074_v23  ;;  %v2236_v36 = vsel %vm2220_vm0, %v2202_v14, %v2228_v22 }
 0x53d   : > { %v2235_v33 = vsel %vm2219_vm3, %v2197_v19, %v2227_v24  ;;  %v2054_v34 = vadd.f32 %v13872_v39, %v2053_v30  ;;  %v2207_v35 = vadd.f32 %v13872_v39, %v2206_v31  ;;  %11300 = vmatprep.mubr.msk.f32.mxu0 %vm640_vm1, %v2082_v32  ;;  %v12758_v24 = vpack.c.bf16 %v9562_v16, %v9561_v12 }
 0x53e   : > { %11328 = vmatprep.mubr.msk.f32.mxu1 %vm640_vm1, %v2235_v33  ;;  %vm2069_vm4 = vcmp.gt.f32.partialorder %v2059_v25, 0.0  ;;  %v2077_v38 = vmul.f32 0.01, %v2059_v25  ;;  %vm2222_vm5 = vcmp.gt.f32.partialorder %v2212_v29, 0.0  ;;  %v2230_v40 = vmul.f32 0.01, %v2212_v29  ;;  %11301 = vmatmul.mubr.msk.f32.gmra.mrb[52].mxu0 %vm640_vm1, %v2083_v28 }
 0x53f   : > { %11329 = vmatmul.mubr.msk.f32.gmra.mrb[52].mxu1 %vm640_vm1, %v2236_v36  ;;  %vm2068_vm6 = vcmp.gt.f32.partialorder %v2054_v34, 0.0  ;;  %v2076_v37 = vmul.f32 0.01, %v2054_v34  ;;  %vm2221_vm7 = vcmp.gt.f32.partialorder %v2207_v35, 0.0  ;;  %v2229_v41 = vmul.f32 0.01, %v2207_v35  ;;  %12729 = vmatpush3.bf16.msra.mxu0 %v12726_v11 }
 0x540   : > { %12745 = vmatpush3.bf16.msra.mxu1 %v12726_v11  ;;  %v2085_v43 = vsel %vm2069_vm4, %v2059_v25, %v2077_v38  ;;  %v2238_v44 = vsel %vm2222_vm5, %v2212_v29, %v2230_v40  ;;  %12731 = vmatprep.subr.bf16.mxu0 %v12730_v47 }
 0x541   : > { %v2084_v39 = vsel %vm2068_vm6, %v2054_v34, %v2076_v37  ;;  %v2237_v42 = vsel %vm2221_vm7, %v2207_v35, %v2229_v41  ;;  %12747 = vmatprep.subr.bf16.mxu1 %v12730_v47 }
 0x542   : > { %11303 = vmatprep.mubr.msk.f32.mxu0 %vm640_vm1, %v2084_v39  ;;  %11331 = vmatprep.mubr.msk.f32.mxu1 %vm640_vm1, %v2237_v42 }
 0x543   : > { %11304 = vmatmul.mubr.msk.f32.gmra.mrb[54].mxu0 %vm640_vm1, %v2085_v43  ;;  %11332 = vmatmul.mubr.msk.f32.gmra.mrb[54].mxu1 %vm640_vm1, %v2238_v44 }
 0x544   : > { %12733 = vmatpush3.bf16.msra.mxu0 %v12730_v47  ;;  %12749 = vmatpush3.bf16.msra.mxu1 %v12730_v47 }
 0x545   : > { %12751 = vmatprep.subr.bf16.mxu0 %v12750_v51  ;;  %12767 = vmatprep.subr.bf16.mxu1 %v12750_v51 }
 0x607   : > { %v11296_v53 = vpop.f32.mrb[48].mxu0 }
 0x608   : > { %v11324_v50 = vpop.f32.mrb[48].mxu1  ;;  %v2352_v54 = vadd.f32 %v11296_v53, %v13938_v52  ;;  %v2346_v56 = vpop.f32.mrb[49].mxu0 }
 0x609   : > { %v2505_v55 = vadd.f32 %v11324_v50, %v13938_v52  ;;  %v2499_v57 = vpop.f32.mrb[49].mxu1  ;;  %v2347_v58 = vadd.f32 %v13938_v52, %v2346_v56 }
 0x60a   : > { %v2500_v59 = vadd.f32 %v13938_v52, %v2499_v57  ;;  %vm2386_vm8 = vcmp.gt.f32.partialorder %v2352_v54, 0.0  ;;  %v2394_v62 = vmul.f32 0.01, %v2352_v54 }
 0x60b   : > { %vm2539_vm9 = vcmp.gt.f32.partialorder %v2505_v55, 0.0  ;;  %v2547_v0 = vmul.f32 0.01, %v2505_v55  ;;  %vm2385_vm10 = vcmp.gt.f32.partialorder %v2347_v58, 0.0  ;;  %v2393_v1 = vmul.f32 0.01, %v2347_v58 }
 0x60c   : > { %vm2538_vm11 = vcmp.gt.f32.partialorder %v2500_v59, 0.0  ;;  %v2546_v2 = vmul.f32 0.01, %v2500_v59  ;;  %v2402_v63 = vsel %vm2386_vm8, %v2352_v54, %v2394_v62  ;;  %v11299_v3 = vpop.f32.mrb[50].mxu0  ;;  %v11327_v4 = vpop.f32.mrb[50].mxu1  ;;  %v9584_v62 = vld [vmem:[%s15320_s3 + $0x208] sm:$0xff] }
 0x60d   : > { %v2362_v6 = vadd.f32 %v11299_v3, %v13938_v52  ;;  %v2515_v7 = vadd.f32 %v11327_v4, %v13938_v52  ;;  %v2356_v8 = vpop.f32.mrb[51].mxu0  ;;  %v2509_v9 = vpop.f32.mrb[51].mxu1  ;;  %v2401_v10 = vsel %vm2385_vm10, %v2347_v58, %v2393_v1  ;;  %v2555_v13 = vsel %vm2539_vm9, %v2505_v55, %v2547_v0  ;;  %v9563_v58 = vld [vmem:[%s15320_s3 + $0x1f0] sm:$0xff]  ;;  %v14004_v1 = vld [vmem:[%s15321_s4 + $0x6] ss:$0 sm:$0xff] }
 0x60e   : > { %v2554_v11 = vsel %vm2538_vm11, %v2500_v59, %v2546_v2  ;;  %v2357_v14 = vadd.f32 %v13938_v52, %v2356_v8  ;;  %v2510_v15 = vadd.f32 %v13938_v52, %v2509_v9  ;;  %11350 = vmatprep.mubr.msk.f32.mxu0 %vm640_vm1, %v2401_v10  ;;  %v9564_v59 = vld [vmem:[%s15320_s3 + $0x1f8] sm:$0xff]  ;;  %v12782_v0 = vpack.c.bf16 %v9584_v62, %v9583_v61  ;;  %v9585_v9 = vld [vmem:[%s15320_s3 + $0x210] sm:$0xff] }
 0x60f   : > { %11378 = vmatprep.mubr.msk.f32.mxu1 %vm640_vm1, %v2554_v11  ;;  %vm2388_vm12 = vcmp.gt.f32.partialorder %v2362_v6, 0.0  ;;  %v2396_v17 = vmul.f32 0.01, %v2362_v6  ;;  %vm2541_vm13 = vcmp.gt.f32.partialorder %v2515_v7, 0.0  ;;  %v2549_v18 = vmul.f32 0.01, %v2515_v7  ;;  %11351 = vmatmul.mubr.msk.f32.vlgmr.msra.gmra.mrb[56].mxu0 %vm640_vm1, %v2402_v63 }
 0x610   : > { %11379 = vmatmul.mubr.msk.f32.vlgmr.msra.gmra.mrb[56].mxu1 %vm640_vm1, %v2555_v13  ;;  %vm2387_vm14 = vcmp.gt.f32.partialorder %v2357_v14, 0.0  ;;  %v2395_v19 = vmul.f32 0.01, %v2357_v14  ;;  %vm2540_vm15 = vcmp.gt.f32.partialorder %v2510_v15, 0.0  ;;  %v2548_v20 = vmul.f32 0.01, %v2510_v15  ;;  %12753 = vmatpush3.bf16.msra.mxu0 %v12750_v51 }
 0x611   : > { %12769 = vmatpush3.bf16.msra.mxu1 %v12750_v51  ;;  %v11302_v21 = vpop.f32.mrb[52].mxu0  ;;  %v2404_v23 = vsel %vm2388_vm12, %v2362_v6, %v2396_v17  ;;  %12755 = vmatprep.subr.bf16.mxu0 %v12754_v5  ;;  %v2557_v33 = vsel %vm2541_vm13, %v2515_v7, %v2549_v18  ;;  %v12762_v60 = vpack.c.bf16 %v9564_v59, %v9563_v58  ;;  %v9586_v10 = vld [vmem:[%s15320_s3 + $0x218] sm:$0xff] }
 0x612   : > { %v11330_v22 = vpop.f32.mrb[52].mxu1  ;;  %12771 = vmatprep.subr.bf16.mxu1 %v12754_v5  ;;  %v2372_v26 = vadd.f32 %v11302_v21, %v13938_v52  ;;  %v2366_v28 = vpop.f32.mrb[53].mxu0  ;;  %v2403_v29 = vsel %vm2387_vm14, %v2357_v14, %v2395_v19  ;;  %v2556_v30 = vsel %vm2540_vm15, %v2510_v15, %v2548_v20  ;;  %v12786_v18 = vpack.c.bf16 %v9586_v10, %v9585_v9  ;;  %v9609_v10 = vld [vmem:[%s15320_s3 + $0x240] sm:$0xff] }
 0x613   : > { %v2525_v27 = vadd.f32 %v11330_v22, %v13938_v52  ;;  %v2519_v25 = vpop.f32.mrb[53].mxu1  ;;  %v2367_v31 = vadd.f32 %v13938_v52, %v2366_v28  ;;  %11353 = vmatprep.mubr.msk.f32.mxu0 %vm640_vm1, %v2403_v29  ;;  %11381 = vmatprep.mubr.msk.f32.mxu1 %vm640_vm1, %v2556_v30  ;;  %v9588_v29 = vld [vmem:[%s15320_s3 + $0x228] sm:$0xff] }
 0x614   : > { %v2520_v32 = vadd.f32 %v13938_v52, %v2519_v25  ;;  %vm2390_vm0 = vcmp.gt.f32.partialorder %v2372_v26, 0.0  ;;  %v2398_v34 = vmul.f32 0.01, %v2372_v26  ;;  %11354 = vmatmul.mubr.msk.f32.gmra.mrb[58].mxu0 %vm640_vm1, %v2404_v23  ;;  %11382 = vmatmul.mubr.msk.f32.gmra.mrb[58].mxu1 %vm640_vm1, %v2557_v33  ;;  %v9587_v25 = vld [vmem:[%s15320_s3 + $0x220] sm:$0xff] }
 0x615   : > { %vm2543_vm2 = vcmp.gt.f32.partialorder %v2525_v27, 0.0  ;;  %v2551_v35 = vmul.f32 0.01, %v2525_v27  ;;  %vm2389_vm3 = vcmp.gt.f32.partialorder %v2367_v31, 0.0  ;;  %v2397_v36 = vmul.f32 0.01, %v2367_v31  ;;  %12757 = vmatpush3.bf16.msra.mxu0 %v12754_v5  ;;  %12773 = vmatpush3.bf16.msra.mxu1 %v12754_v5 }
 0x616   : > { %vm2542_vm4 = vcmp.gt.f32.partialorder %v2520_v32, 0.0  ;;  %v2550_v38 = vmul.f32 0.01, %v2520_v32  ;;  %v11305_v40 = vpop.f32.mrb[54].mxu0  ;;  %v11333_v37 = vpop.f32.mrb[54].mxu1  ;;  %v2406_v41 = vsel %vm2390_vm0, %v2372_v26, %v2398_v34  ;;  %12759 = vmatprep.subr.bf16.mxu0 %v12758_v24  ;;  %12775 = vmatprep.subr.bf16.mxu1 %v12758_v24 }
 0x617   : > { %v2382_v39 = vadd.f32 %v11305_v40, %v13938_v52  ;;  %v2535_v42 = vadd.f32 %v11333_v37, %v13938_v52  ;;  %v2376_v43 = vpop.f32.mrb[55].mxu0  ;;  %v2529_v44 = vpop.f32.mrb[55].mxu1  ;;  %v2405_v45 = vsel %vm2389_vm3, %v2367_v31, %v2397_v36  ;;  %v2559_v49 = vsel %vm2543_vm2, %v2525_v27, %v2551_v35 }
 0x618   : > { %v2558_v46 = vsel %vm2542_vm4, %v2520_v32, %v2550_v38  ;;  %v2377_v47 = vadd.f32 %v13938_v52, %v2376_v43  ;;  %v2530_v48 = vadd.f32 %v13938_v52, %v2529_v44  ;;  %11356 = vmatprep.mubr.msk.f32.mxu0 %vm640_vm1, %v2405_v45  ;;  %v12790_v38 = vpack.c.bf16 %v9588_v29, %v9587_v25 }
 0x619   : > { %11384 = vmatprep.mubr.msk.f32.mxu1 %vm640_vm1, %v2558_v46  ;;  %vm2392_vm5 = vcmp.gt.f32.partialorder %v2382_v39, 0.0  ;;  %v2400_v51 = vmul.f32 0.01, %v2382_v39  ;;  %vm2545_vm6 = vcmp.gt.f32.partialorder %v2535_v42, 0.0  ;;  %v2553_v53 = vmul.f32 0.01, %v2535_v42  ;;  %11357 = vmatmul.mubr.msk.f32.gmra.mrb[60].mxu0 %vm640_vm1, %v2406_v41 }
 0x61a   : > { %11385 = vmatmul.mubr.msk.f32.gmra.mrb[60].mxu1 %vm640_vm1, %v2559_v49  ;;  %vm2391_vm7 = vcmp.gt.f32.partialorder %v2377_v47, 0.0  ;;  %v2399_v50 = vmul.f32 0.01, %v2377_v47  ;;  %vm2544_vm8 = vcmp.gt.f32.partialorder %v2530_v48, 0.0  ;;  %v2552_v54 = vmul.f32 0.01, %v2530_v48  ;;  %12761 = vmatpush3.bf16.msra.mxu0 %v12758_v24 }
 0x61b   : > { %12777 = vmatpush3.bf16.msra.mxu1 %v12758_v24  ;;  %v2408_v56 = vsel %vm2392_vm5, %v2382_v39, %v2400_v51  ;;  %v2561_v57 = vsel %vm2545_vm6, %v2535_v42, %v2553_v53  ;;  %12763 = vmatprep.subr.bf16.mxu0 %v12762_v60 }
 0x61c   : > { %v2407_v52 = vsel %vm2391_vm7, %v2377_v47, %v2399_v50  ;;  %v2560_v55 = vsel %vm2544_vm8, %v2530_v48, %v2552_v54  ;;  %12779 = vmatprep.subr.bf16.mxu1 %v12762_v60 }
 0x61d   : > { %11359 = vmatprep.mubr.msk.f32.mxu0 %vm640_vm1, %v2407_v52  ;;  %11387 = vmatprep.mubr.msk.f32.mxu1 %vm640_vm1, %v2560_v55 }
 0x61e   : > { %11360 = vmatmul.mubr.msk.f32.gmra.mrb[62].mxu0 %vm640_vm1, %v2408_v56  ;;  %11388 = vmatmul.mubr.msk.f32.gmra.mrb[62].mxu1 %vm640_vm1, %v2561_v57 }
 0x61f   : > { %12765 = vmatpush3.bf16.msra.mxu0 %v12762_v60  ;;  %12781 = vmatpush3.bf16.msra.mxu1 %v12762_v60 }
 0x620   : > { %12783 = vmatprep.subr.bf16.mxu0 %v12782_v0  ;;  %12799 = vmatprep.subr.bf16.mxu1 %v12782_v0 }
 0x6e2   : > { %v11352_v2 = vpop.f32.mrb[56].mxu0 }
 0x6e3   : > { %v11380_v63 = vpop.f32.mrb[56].mxu1  ;;  %v2675_v3 = vadd.f32 %v11352_v2, %v14004_v1  ;;  %v2669_v5 = vpop.f32.mrb[57].mxu0 }
 0x6e4   : > { %v2828_v4 = vadd.f32 %v11380_v63, %v14004_v1  ;;  %v2822_v6 = vpop.f32.mrb[57].mxu1  ;;  %v2670_v7 = vadd.f32 %v14004_v1, %v2669_v5 }
 0x6e5   : > { %v2823_v8 = vadd.f32 %v14004_v1, %v2822_v6  ;;  %vm2709_vm9 = vcmp.gt.f32.partialorder %v2675_v3, 0.0  ;;  %v2717_v11 = vmul.f32 0.01, %v2675_v3 }
 0x6e6   : > { %vm2862_vm10 = vcmp.gt.f32.partialorder %v2828_v4, 0.0  ;;  %v2870_v13 = vmul.f32 0.01, %v2828_v4  ;;  %vm2708_vm11 = vcmp.gt.f32.partialorder %v2670_v7, 0.0  ;;  %v2716_v14 = vmul.f32 0.01, %v2670_v7 }
 0x6e7   : > { %vm2861_vm12 = vcmp.gt.f32.partialorder %v2823_v8, 0.0  ;;  %v2869_v15 = vmul.f32 0.01, %v2823_v8  ;;  %v2725_v12 = vsel %vm2709_vm9, %v2675_v3, %v2717_v11  ;;  %v11355_v16 = vpop.f32.mrb[58].mxu0  ;;  %v11383_v17 = vpop.f32.mrb[58].mxu1  ;;  %v9610_v11 = vld [vmem:[%s15320_s3 + $0x248] sm:$0xff] }
 0x6e8   : > { %v2685_v19 = vadd.f32 %v11355_v16, %v14004_v1  ;;  %v2838_v20 = vadd.f32 %v11383_v17, %v14004_v1  ;;  %v2679_v21 = vpop.f32.mrb[59].mxu0  ;;  %v2832_v22 = vpop.f32.mrb[59].mxu1  ;;  %v2724_v23 = vsel %vm2708_vm11, %v2670_v7, %v2716_v14  ;;  %v2878_v26 = vsel %vm2862_vm10, %v2828_v4, %v2870_v13  ;;  %v9589_v7 = vld [vmem:[%s15320_s3 + $0x230] sm:$0xff]  ;;  %v14070_v14 = vld [vmem:[%s15321_s4 + $0x7] ss:$0 sm:$0xff] }
 0x6e9   : > { %v2877_v24 = vsel %vm2861_vm12, %v2823_v8, %v2869_v15  ;;  %v2680_v27 = vadd.f32 %v14004_v1, %v2679_v21  ;;  %v2833_v28 = vadd.f32 %v14004_v1, %v2832_v22  ;;  %11406 = vmatprep.mubr.msk.f32.mxu0 %vm640_vm1, %v2724_v23  ;;  %v9590_v8 = vld [vmem:[%s15320_s3 + $0x238] sm:$0xff]  ;;  %v12814_v13 = vpack.c.bf16 %v9610_v11, %v9609_v10  ;;  %v9611_v22 = vld [vmem:[%s15320_s3 + $0x250] sm:$0xff] }
 0x6ea   : > { %11434 = vmatprep.mubr.msk.f32.mxu1 %vm640_vm1, %v2877_v24  ;;  %vm2711_vm13 = vcmp.gt.f32.partialorder %v2685_v19, 0.0  ;;  %v2719_v30 = vmul.f32 0.01, %v2685_v19  ;;  %vm2864_vm14 = vcmp.gt.f32.partialorder %v2838_v20, 0.0  ;;  %v2872_v31 = vmul.f32 0.01, %v2838_v20  ;;  %11407 = vmatmul.mubr.msk.f32.vlgmr.msra.gmra.mrb[64].mxu0 %vm640_vm1, %v2725_v12 }
 0x6eb   : > { %11435 = vmatmul.mubr.msk.f32.vlgmr.msra.gmra.mrb[64].mxu1 %vm640_vm1, %v2878_v26  ;;  %vm2710_vm15 = vcmp.gt.f32.partialorder %v2680_v27, 0.0  ;;  %v2718_v32 = vmul.f32 0.01, %v2680_v27  ;;  %vm2863_vm0 = vcmp.gt.f32.partialorder %v2833_v28, 0.0  ;;  %v2871_v33 = vmul.f32 0.01, %v2833_v28  ;;  %12785 = vmatpush3.bf16.msra.mxu0 %v12782_v0 }
 0x6ec   : > { %12801 = vmatpush3.bf16.msra.mxu1 %v12782_v0  ;;  %v11358_v34 = vpop.f32.mrb[60].mxu0  ;;  %v2727_v36 = vsel %vm2711_vm13, %v2685_v19, %v2719_v30  ;;  %12787 = vmatprep.subr.bf16.mxu0 %v12786_v18  ;;  %v2880_v46 = vsel %vm2864_vm14, %v2838_v20, %v2872_v31  ;;  %v12794_v9 = vpack.c.bf16 %v9590_v8, %v9589_v7  ;;  %v9612_v23 = vld [vmem:[%s15320_s3 + $0x258] sm:$0xff] }
 0x6ed   : > { %v11386_v35 = vpop.f32.mrb[60].mxu1  ;;  %12803 = vmatprep.subr.bf16.mxu1 %v12786_v18  ;;  %v2695_v40 = vadd.f32 %v11358_v34, %v14004_v1  ;;  %v2689_v41 = vpop.f32.mrb[61].mxu0  ;;  %v2726_v42 = vsel %vm2710_vm15, %v2680_v27, %v2718_v32  ;;  %v2879_v43 = vsel %vm2863_vm0, %v2833_v28, %v2871_v33  ;;  %v12818_v31 = vpack.c.bf16 %v9612_v23, %v9611_v22  ;;  %v9635_v23 = vld [vmem:[%s15320_s3 + $0x280] sm:$0xff] }
 0x6ee   : > { %v2848_v37 = vadd.f32 %v11386_v35, %v14004_v1  ;;  %v2842_v39 = vpop.f32.mrb[61].mxu1  ;;  %v2690_v44 = vadd.f32 %v14004_v1, %v2689_v41  ;;  %11409 = vmatprep.mubr.msk.f32.mxu0 %vm640_vm1, %v2726_v42  ;;  %11437 = vmatprep.mubr.msk.f32.mxu1 %vm640_vm1, %v2879_v43  ;;  %v9614_v42 = vld [vmem:[%s15320_s3 + $0x268] sm:$0xff] }
 0x6ef   : > { %v2843_v45 = vadd.f32 %v14004_v1, %v2842_v39  ;;  %vm2713_vm2 = vcmp.gt.f32.partialorder %v2695_v40, 0.0  ;;  %v2721_v47 = vmul.f32 0.01, %v2695_v40  ;;  %11410 = vmatmul.mubr.msk.f32.gmra.mrb[66].mxu0 %vm640_vm1, %v2727_v36  ;;  %11438 = vmatmul.mubr.msk.f32.gmra.mrb[66].mxu1 %vm640_vm1, %v2880_v46  ;;  %v9613_v39 = vld [vmem:[%s15320_s3 + $0x260] sm:$0xff] }
 0x6f0   : > { %vm2866_vm3 = vcmp.gt.f32.partialorder %v2848_v37, 0.0  ;;  %v2874_v48 = vmul.f32 0.01, %v2848_v37  ;;  %vm2712_vm4 = vcmp.gt.f32.partialorder %v2690_v44, 0.0  ;;  %v2720_v49 = vmul.f32 0.01, %v2690_v44  ;;  %12789 = vmatpush3.bf16.msra.mxu0 %v12786_v18  ;;  %12805 = vmatpush3.bf16.msra.mxu1 %v12786_v18 }
 0x6f1   : > { %vm2865_vm5 = vcmp.gt.f32.partialorder %v2843_v45, 0.0  ;;  %v2873_v51 = vmul.f32 0.01, %v2843_v45  ;;  %v11361_v53 = vpop.f32.mrb[62].mxu0  ;;  %v11389_v50 = vpop.f32.mrb[62].mxu1  ;;  %v2729_v54 = vsel %vm2713_vm2, %v2695_v40, %v2721_v47  ;;  %12791 = vmatprep.subr.bf16.mxu0 %v12790_v38  ;;  %12807 = vmatprep.subr.bf16.mxu1 %v12790_v38 }
 0x6f2   : > { %v2705_v52 = vadd.f32 %v11361_v53, %v14004_v1  ;;  %v2858_v55 = vadd.f32 %v11389_v50, %v14004_v1  ;;  %v2699_v56 = vpop.f32.mrb[63].mxu0  ;;  %v2852_v57 = vpop.f32.mrb[63].mxu1  ;;  %v2728_v58 = vsel %vm2712_vm4, %v2690_v44, %v2720_v49  ;;  %v2882_v62 = vsel %vm2866_vm3, %v2848_v37, %v2874_v48 }
 0x6f3   : > { %v2881_v59 = vsel %vm2865_vm5, %v2843_v45, %v2873_v51  ;;  %v2700_v60 = vadd.f32 %v14004_v1, %v2699_v56  ;;  %v2853_v61 = vadd.f32 %v14004_v1, %v2852_v57  ;;  %11412 = vmatprep.mubr.msk.f32.mxu0 %vm640_vm1, %v2728_v58  ;;  %v12822_v51 = vpack.c.bf16 %v9614_v42, %v9613_v39 }
 0x6f4   : > { %11440 = vmatprep.mubr.msk.f32.mxu1 %vm640_vm1, %v2881_v59  ;;  %vm2715_vm6 = vcmp.gt.f32.partialorder %v2705_v52, 0.0  ;;  %v2723_v0 = vmul.f32 0.01, %v2705_v52  ;;  %vm2868_vm7 = vcmp.gt.f32.partialorder %v2858_v55, 0.0  ;;  %v2876_v2 = vmul.f32 0.01, %v2858_v55  ;;  %11413 = vmatmul.mubr.msk.f32.gmra.mrb[68].mxu0 %vm640_vm1, %v2729_v54 }
 0x6f5   : > { %11441 = vmatmul.mubr.msk.f32.gmra.mrb[68].mxu1 %vm640_vm1, %v2882_v62  ;;  %vm2714_vm8 = vcmp.gt.f32.partialorder %v2700_v60, 0.0  ;;  %v2722_v63 = vmul.f32 0.01, %v2700_v60  ;;  %vm2867_vm9 = vcmp.gt.f32.partialorder %v2853_v61, 0.0  ;;  %v2875_v3 = vmul.f32 0.01, %v2853_v61  ;;  %12793 = vmatpush3.bf16.msra.mxu0 %v12790_v38 }
 0x6f6   : > { %12809 = vmatpush3.bf16.msra.mxu1 %v12790_v38  ;;  %v2731_v5 = vsel %vm2715_vm6, %v2705_v52, %v2723_v0  ;;  %v2884_v6 = vsel %vm2868_vm7, %v2858_v55, %v2876_v2  ;;  %12795 = vmatprep.subr.bf16.mxu0 %v12794_v9 }
 0x6f7   : > { %v2730_v1 = vsel %vm2714_vm8, %v2700_v60, %v2722_v63  ;;  %v2883_v4 = vsel %vm2867_vm9, %v2853_v61, %v2875_v3  ;;  %12811 = vmatprep.subr.bf16.mxu1 %v12794_v9 }
 0x6f8   : > { %11415 = vmatprep.mubr.msk.f32.mxu0 %vm640_vm1, %v2730_v1  ;;  %11443 = vmatprep.mubr.msk.f32.mxu1 %vm640_vm1, %v2883_v4 }
 0x6f9   : > { %11416 = vmatmul.mubr.msk.f32.gmra.mrb[70].mxu0 %vm640_vm1, %v2731_v5  ;;  %11444 = vmatmul.mubr.msk.f32.gmra.mrb[70].mxu1 %vm640_vm1, %v2884_v6 }
 0x6fa   : > { %12797 = vmatpush3.bf16.msra.mxu0 %v12794_v9  ;;  %12813 = vmatpush3.bf16.msra.mxu1 %v12794_v9 }
 0x6fb   : > { %12815 = vmatprep.subr.bf16.mxu0 %v12814_v13  ;;  %12831 = vmatprep.subr.bf16.mxu1 %v12814_v13 }
 0x7bd   : > { %v11408_v15 = vpop.f32.mrb[64].mxu0 }
 0x7be   : > { %v11436_v12 = vpop.f32.mrb[64].mxu1  ;;  %v2998_v16 = vadd.f32 %v11408_v15, %v14070_v14  ;;  %v2992_v18 = vpop.f32.mrb[65].mxu0 }
 0x7bf   : > { %v3151_v17 = vadd.f32 %v11436_v12, %v14070_v14  ;;  %v3145_v19 = vpop.f32.mrb[65].mxu1  ;;  %v2993_v20 = vadd.f32 %v14070_v14, %v2992_v18 }
 0x7c0   : > { %v3146_v21 = vadd.f32 %v14070_v14, %v3145_v19  ;;  %vm3032_vm10 = vcmp.gt.f32.partialorder %v2998_v16, 0.0  ;;  %v3040_v24 = vmul.f32 0.01, %v2998_v16 }
 0x7c1   : > { %vm3185_vm11 = vcmp.gt.f32.partialorder %v3151_v17, 0.0  ;;  %v3193_v26 = vmul.f32 0.01, %v3151_v17  ;;  %vm3031_vm12 = vcmp.gt.f32.partialorder %v2993_v20, 0.0  ;;  %v3039_v27 = vmul.f32 0.01, %v2993_v20 }
 0x7c2   : > { %vm3184_vm13 = vcmp.gt.f32.partialorder %v3146_v21, 0.0  ;;  %v3192_v28 = vmul.f32 0.01, %v3146_v21  ;;  %v3048_v25 = vsel %vm3032_vm10, %v2998_v16, %v3040_v24  ;;  %v11411_v29 = vpop.f32.mrb[66].mxu0  ;;  %v11439_v30 = vpop.f32.mrb[66].mxu1  ;;  %v9636_v24 = vld [vmem:[%s15320_s3 + $0x288] sm:$0xff] }
 0x7c3   : > { %v3008_v32 = vadd.f32 %v11411_v29, %v14070_v14  ;;  %v3161_v33 = vadd.f32 %v11439_v30, %v14070_v14  ;;  %v3002_v34 = vpop.f32.mrb[67].mxu0  ;;  %v3155_v35 = vpop.f32.mrb[67].mxu1  ;;  %v3047_v36 = vsel %vm3031_vm12, %v2993_v20, %v3039_v27  ;;  %v3201_v40 = vsel %vm3185_vm11, %v3151_v17, %v3193_v26  ;;  %v9615_v20 = vld [vmem:[%s15320_s3 + $0x270] sm:$0xff]  ;;  %v14136_v27 = vld [vmem:[%s15321_s4 + $0x8] ss:$0 sm:$0xff] }
 0x7c4   : > { %v3200_v38 = vsel %vm3184_vm13, %v3146_v21, %v3192_v28  ;;  %v3003_v37 = vadd.f32 %v14070_v14, %v3002_v34  ;;  %v3156_v41 = vadd.f32 %v14070_v14, %v3155_v35  ;;  %11462 = vmatprep.mubr.msk.f32.mxu0 %vm640_vm1, %v3047_v36  ;;  %v9616_v21 = vld [vmem:[%s15320_s3 + $0x278] sm:$0xff]  ;;  %v12846_v26 = vpack.c.bf16 %v9636_v24, %v9635_v23  ;;  %v9637_v35 = vld [vmem:[%s15320_s3 + $0x290] sm:$0xff] }
 0x7c5   : > { %11490 = vmatprep.mubr.msk.f32.mxu1 %vm640_vm1, %v3200_v38  ;;  %vm3034_vm14 = vcmp.gt.f32.partialorder %v3008_v32, 0.0  ;;  %v3042_v43 = vmul.f32 0.01, %v3008_v32  ;;  %vm3187_vm15 = vcmp.gt.f32.partialorder %v3161_v33, 0.0  ;;  %v3195_v44 = vmul.f32 0.01, %v3161_v33  ;;  %11463 = vmatmul.mubr.msk.f32.vlgmr.msra.gmra.mrb[72].mxu0 %vm640_vm1, %v3048_v25 }
 0x7c6   : > { %11491 = vmatmul.mubr.msk.f32.vlgmr.msra.gmra.mrb[72].mxu1 %vm640_vm1, %v3201_v40  ;;  %vm3033_vm0 = vcmp.gt.f32.partialorder %v3003_v37, 0.0  ;;  %v3041_v45 = vmul.f32 0.01, %v3003_v37  ;;  %vm3186_vm2 = vcmp.gt.f32.partialorder %v3156_v41, 0.0  ;;  %v3194_v46 = vmul.f32 0.01, %v3156_v41  ;;  %12817 = vmatpush3.bf16.msra.mxu0 %v12814_v13 }
 0x7c7   : > { %12833 = vmatpush3.bf16.msra.mxu1 %v12814_v13  ;;  %v11414_v47 = vpop.f32.mrb[68].mxu0  ;;  %v3050_v49 = vsel %vm3034_vm14, %v3008_v32, %v3042_v43  ;;  %12819 = vmatprep.subr.bf16.mxu0 %v12818_v31  ;;  %v3203_v59 = vsel %vm3187_vm15, %v3161_v33, %v3195_v44  ;;  %v12826_v22 = vpack.c.bf16 %v9616_v21, %v9615_v20  ;;  %v9638_v36 = vld [vmem:[%s15320_s3 + $0x298] sm:$0xff] }
 0x7c8   : > { %v11442_v48 = vpop.f32.mrb[68].mxu1  ;;  %12835 = vmatprep.subr.bf16.mxu1 %v12818_v31  ;;  %v3018_v53 = vadd.f32 %v11414_v47, %v14070_v14  ;;  %v3012_v54 = vpop.f32.mrb[69].mxu0  ;;  %v3049_v55 = vsel %vm3033_vm0, %v3003_v37, %v3041_v45  ;;  %v3202_v56 = vsel %vm3186_vm2, %v3156_v41, %v3194_v46  ;;  %v12850_v44 = vpack.c.bf16 %v9638_v36, %v9637_v35  ;;  %v9661_v36 = vld [vmem:[%s15320_s3 + $0x2c0] sm:$0xff] }
 0x7c9   : > { %v3171_v50 = vadd.f32 %v11442_v48, %v14070_v14  ;;  %v3165_v52 = vpop.f32.mrb[69].mxu1  ;;  %v3013_v57 = vadd.f32 %v14070_v14, %v3012_v54  ;;  %11465 = vmatprep.mubr.msk.f32.mxu0 %vm640_vm1, %v3049_v55  ;;  %11493 = vmatprep.mubr.msk.f32.mxu1 %vm640_vm1, %v3202_v56  ;;  %v9640_v55 = vld [vmem:[%s15320_s3 + $0x2a8] sm:$0xff] }
 0x7ca   : > { %v3166_v58 = vadd.f32 %v14070_v14, %v3165_v52  ;;  %vm3036_vm3 = vcmp.gt.f32.partialorder %v3018_v53, 0.0  ;;  %v3044_v60 = vmul.f32 0.01, %v3018_v53  ;;  %11466 = vmatmul.mubr.msk.f32.gmra.mrb[74].mxu0 %vm640_vm1, %v3050_v49  ;;  %11494 = vmatmul.mubr.msk.f32.gmra.mrb[74].mxu1 %vm640_vm1, %v3203_v59  ;;  %v9639_v52 = vld [vmem:[%s15320_s3 + $0x2a0] sm:$0xff] }
 0x7cb   : > { %vm3189_vm4 = vcmp.gt.f32.partialorder %v3171_v50, 0.0  ;;  %v3197_v61 = vmul.f32 0.01, %v3171_v50  ;;  %vm3035_vm5 = vcmp.gt.f32.partialorder %v3013_v57, 0.0  ;;  %v3043_v62 = vmul.f32 0.01, %v3013_v57  ;;  %12821 = vmatpush3.bf16.msra.mxu0 %v12818_v31  ;;  %12837 = vmatpush3.bf16.msra.mxu1 %v12818_v31 }
 0x7cc   : > { %vm3188_vm6 = vcmp.gt.f32.partialorder %v3166_v58, 0.0  ;;  %v3196_v0 = vmul.f32 0.01, %v3166_v58  ;;  %v11417_v2 = vpop.f32.mrb[70].mxu0  ;;  %v11445_v63 = vpop.f32.mrb[70].mxu1  ;;  %v3052_v3 = vsel %vm3036_vm3, %v3018_v53, %v3044_v60  ;;  %12823 = vmatprep.subr.bf16.mxu0 %v12822_v51  ;;  %12839 = vmatprep.subr.bf16.mxu1 %v12822_v51 }
 0x7cd   : > { %v3028_v1 = vadd.f32 %v11417_v2, %v14070_v14  ;;  %v3181_v4 = vadd.f32 %v11445_v63, %v14070_v14  ;;  %v3022_v5 = vpop.f32.mrb[71].mxu0  ;;  %v3175_v6 = vpop.f32.mrb[71].mxu1  ;;  %v3051_v7 = vsel %vm3035_vm5, %v3013_v57, %v3043_v62  ;;  %v3205_v11 = vsel %vm3189_vm4, %v3171_v50, %v3197_v61 }
 0x7ce   : > { %v3204_v8 = vsel %vm3188_vm6, %v3166_v58, %v3196_v0  ;;  %v3023_v9 = vadd.f32 %v14070_v14, %v3022_v5  ;;  %v3176_v10 = vadd.f32 %v14070_v14, %v3175_v6  ;;  %11468 = vmatprep.mubr.msk.f32.mxu0 %vm640_vm1, %v3051_v7  ;;  %v12854_v0 = vpack.c.bf16 %v9640_v55, %v9639_v52 }
 0x7cf   : > { %11496 = vmatprep.mubr.msk.f32.mxu1 %vm640_vm1, %v3204_v8  ;;  %vm3038_vm7 = vcmp.gt.f32.partialorder %v3028_v1, 0.0  ;;  %v3046_v13 = vmul.f32 0.01, %v3028_v1  ;;  %vm3191_vm8 = vcmp.gt.f32.partialorder %v3181_v4, 0.0  ;;  %v3199_v15 = vmul.f32 0.01, %v3181_v4  ;;  %11469 = vmatmul.mubr.msk.f32.gmra.mrb[76].mxu0 %vm640_vm1, %v3052_v3 }
 0x7d0   : > { %11497 = vmatmul.mubr.msk.f32.gmra.mrb[76].mxu1 %vm640_vm1, %v3205_v11  ;;  %vm3037_vm9 = vcmp.gt.f32.partialorder %v3023_v9, 0.0  ;;  %v3045_v12 = vmul.f32 0.01, %v3023_v9  ;;  %vm3190_vm10 = vcmp.gt.f32.partialorder %v3176_v10, 0.0  ;;  %v3198_v16 = vmul.f32 0.01, %v3176_v10  ;;  %12825 = vmatpush3.bf16.msra.mxu0 %v12822_v51 }
 0x7d1   : > { %12841 = vmatpush3.bf16.msra.mxu1 %v12822_v51  ;;  %v3054_v18 = vsel %vm3038_vm7, %v3028_v1, %v3046_v13  ;;  %v3207_v19 = vsel %vm3191_vm8, %v3181_v4, %v3199_v15  ;;  %12827 = vmatprep.subr.bf16.mxu0 %v12826_v22 }
 0x7d2   : > { %v3053_v14 = vsel %vm3037_vm9, %v3023_v9, %v3045_v12  ;;  %v3206_v17 = vsel %vm3190_vm10, %v3176_v10, %v3198_v16  ;;  %12843 = vmatprep.subr.bf16.mxu1 %v12826_v22 }
 0x7d3   : > { %11471 = vmatprep.mubr.msk.f32.mxu0 %vm640_vm1, %v3053_v14  ;;  %11499 = vmatprep.mubr.msk.f32.mxu1 %vm640_vm1, %v3206_v17 }
 0x7d4   : > { %11472 = vmatmul.mubr.msk.f32.gmra.mrb[78].mxu0 %vm640_vm1, %v3054_v18  ;;  %11500 = vmatmul.mubr.msk.f32.gmra.mrb[78].mxu1 %vm640_vm1, %v3207_v19 }
 0x7d5   : > { %12829 = vmatpush3.bf16.msra.mxu0 %v12826_v22  ;;  %12845 = vmatpush3.bf16.msra.mxu1 %v12826_v22 }
 0x7d6   : > { %12847 = vmatprep.subr.bf16.mxu0 %v12846_v26  ;;  %12863 = vmatprep.subr.bf16.mxu1 %v12846_v26 }
 0x898   : > { %v11464_v28 = vpop.f32.mrb[72].mxu0 }
 0x899   : > { %v11492_v25 = vpop.f32.mrb[72].mxu1  ;;  %v3321_v29 = vadd.f32 %v11464_v28, %v14136_v27  ;;  %v3315_v31 = vpop.f32.mrb[73].mxu0 }
 0x89a   : > { %v3474_v30 = vadd.f32 %v11492_v25, %v14136_v27  ;;  %v3468_v32 = vpop.f32.mrb[73].mxu1  ;;  %v3316_v33 = vadd.f32 %v14136_v27, %v3315_v31 }
 0x89b   : > { %v3469_v34 = vadd.f32 %v14136_v27, %v3468_v32  ;;  %vm3355_vm11 = vcmp.gt.f32.partialorder %v3321_v29, 0.0  ;;  %v3363_v38 = vmul.f32 0.01, %v3321_v29 }
 0x89c   : > { %vm3508_vm12 = vcmp.gt.f32.partialorder %v3474_v30, 0.0  ;;  %v3516_v40 = vmul.f32 0.01, %v3474_v30  ;;  %vm3354_vm13 = vcmp.gt.f32.partialorder %v3316_v33, 0.0  ;;  %v3362_v37 = vmul.f32 0.01, %v3316_v33 }
 0x89d   : > { %vm3507_vm14 = vcmp.gt.f32.partialorder %v3469_v34, 0.0  ;;  %v3515_v41 = vmul.f32 0.01, %v3469_v34  ;;  %v3371_v39 = vsel %vm3355_vm11, %v3321_v29, %v3363_v38  ;;  %v11467_v42 = vpop.f32.mrb[74].mxu0  ;;  %v11495_v43 = vpop.f32.mrb[74].mxu1  ;;  %v9662_v38 = vld [vmem:[%s15320_s3 + $0x2c8] sm:$0xff] }
 0x89e   : > { %v3331_v45 = vadd.f32 %v11467_v42, %v14136_v27  ;;  %v3484_v46 = vadd.f32 %v11495_v43, %v14136_v27  ;;  %v3325_v47 = vpop.f32.mrb[75].mxu0  ;;  %v3478_v48 = vpop.f32.mrb[75].mxu1  ;;  %v3370_v49 = vsel %vm3354_vm13, %v3316_v33, %v3362_v37  ;;  %v3524_v53 = vsel %vm3508_vm12, %v3474_v30, %v3516_v40  ;;  %v9641_v33 = vld [vmem:[%s15320_s3 + $0x2b0] sm:$0xff]  ;;  %v14202_v37 = vld [vmem:[%s15321_s4 + $0x9] ss:$0 sm:$0xff] }
 0x89f   : > { %v3523_v51 = vsel %vm3507_vm14, %v3469_v34, %v3515_v41  ;;  %v3326_v50 = vadd.f32 %v14136_v27, %v3325_v47  ;;  %v3479_v54 = vadd.f32 %v14136_v27, %v3478_v48  ;;  %11518 = vmatprep.mubr.msk.f32.mxu0 %vm640_vm1, %v3370_v49  ;;  %v9642_v34 = vld [vmem:[%s15320_s3 + $0x2b8] sm:$0xff]  ;;  %v12878_v40 = vpack.c.bf16 %v9662_v38, %v9661_v36  ;;  %v9663_v48 = vld [vmem:[%s15320_s3 + $0x2d0] sm:$0xff] }
 0x8a0   : > { %11546 = vmatprep.mubr.msk.f32.mxu1 %vm640_vm1, %v3523_v51  ;;  %vm3357_vm15 = vcmp.gt.f32.partialorder %v3331_v45, 0.0  ;;  %v3365_v56 = vmul.f32 0.01, %v3331_v45  ;;  %vm3510_vm0 = vcmp.gt.f32.partialorder %v3484_v46, 0.0  ;;  %v3518_v57 = vmul.f32 0.01, %v3484_v46  ;;  %11519 = vmatmul.mubr.msk.f32.vlgmr.msra.gmra.mrb[80].mxu0 %vm640_vm1, %v3371_v39 }
 0x8a1   : > { %11547 = vmatmul.mubr.msk.f32.vlgmr.msra.gmra.mrb[80].mxu1 %vm640_vm1, %v3524_v53  ;;  %vm3356_vm2 = vcmp.gt.f32.partialorder %v3326_v50, 0.0  ;;  %v3364_v58 = vmul.f32 0.01, %v3326_v50  ;;  %vm3509_vm3 = vcmp.gt.f32.partialorder %v3479_v54, 0.0  ;;  %v3517_v59 = vmul.f32 0.01, %v3479_v54  ;;  %12849 = vmatpush3.bf16.msra.mxu0 %v12846_v26 }
 0x8a2   : > { %12865 = vmatpush3.bf16.msra.mxu1 %v12846_v26  ;;  %v11470_v60 = vpop.f32.mrb[76].mxu0  ;;  %v3373_v62 = vsel %vm3357_vm15, %v3331_v45, %v3365_v56  ;;  %12851 = vmatprep.subr.bf16.mxu0 %v12850_v44  ;;  %v3526_v8 = vsel %vm3510_vm0, %v3484_v46, %v3518_v57  ;;  %v12858_v35 = vpack.c.bf16 %v9642_v34, %v9641_v33  ;;  %v9664_v49 = vld [vmem:[%s15320_s3 + $0x2d8] sm:$0xff] }
 0x8a3   : > { %v11498_v61 = vpop.f32.mrb[76].mxu1  ;;  %12867 = vmatprep.subr.bf16.mxu1 %v12850_v44  ;;  %v3341_v2 = vadd.f32 %v11470_v60, %v14136_v27  ;;  %v3335_v3 = vpop.f32.mrb[77].mxu0  ;;  %v3372_v4 = vsel %vm3356_vm2, %v3326_v50, %v3364_v58  ;;  %v3525_v5 = vsel %vm3509_vm3, %v3479_v54, %v3517_v59  ;;  %v12882_v57 = vpack.c.bf16 %v9664_v49, %v9663_v48  ;;  %v9687_v49 = vld [vmem:[%s15320_s3 + $0x300] sm:$0xff] }
 0x8a4   : > { %v3494_v63 = vadd.f32 %v11498_v61, %v14136_v27  ;;  %v3488_v1 = vpop.f32.mrb[77].mxu1  ;;  %v3336_v6 = vadd.f32 %v14136_v27, %v3335_v3  ;;  %11521 = vmatprep.mubr.msk.f32.mxu0 %vm640_vm1, %v3372_v4  ;;  %11549 = vmatprep.mubr.msk.f32.mxu1 %vm640_vm1, %v3525_v5  ;;  %v9666_v4 = vld [vmem:[%s15320_s3 + $0x2e8] sm:$0xff] }
 0x8a5   : > { %v3489_v7 = vadd.f32 %v14136_v27, %v3488_v1  ;;  %vm3359_vm4 = vcmp.gt.f32.partialorder %v3341_v2, 0.0  ;;  %v3367_v9 = vmul.f32 0.01, %v3341_v2  ;;  %11522 = vmatmul.mubr.msk.f32.gmra.mrb[82].mxu0 %vm640_vm1, %v3373_v62  ;;  %11550 = vmatmul.mubr.msk.f32.gmra.mrb[82].mxu1 %vm640_vm1, %v3526_v8  ;;  %v9665_v1 = vld [vmem:[%s15320_s3 + $0x2e0] sm:$0xff] }
 0x8a6   : > { %vm3512_vm5 = vcmp.gt.f32.partialorder %v3494_v63, 0.0  ;;  %v3520_v10 = vmul.f32 0.01, %v3494_v63  ;;  %vm3358_vm6 = vcmp.gt.f32.partialorder %v3336_v6, 0.0  ;;  %v3366_v11 = vmul.f32 0.01, %v3336_v6  ;;  %12853 = vmatpush3.bf16.msra.mxu0 %v12850_v44  ;;  %12869 = vmatpush3.bf16.msra.mxu1 %v12850_v44 }
 0x8a7   : > { %vm3511_vm7 = vcmp.gt.f32.partialorder %v3489_v7, 0.0  ;;  %v3519_v13 = vmul.f32 0.01, %v3489_v7  ;;  %v11473_v15 = vpop.f32.mrb[78].mxu0  ;;  %v11501_v12 = vpop.f32.mrb[78].mxu1  ;;  %v3375_v16 = vsel %vm3359_vm4, %v3341_v2, %v3367_v9  ;;  %12855 = vmatprep.subr.bf16.mxu0 %v12854_v0  ;;  %12871 = vmatprep.subr.bf16.mxu1 %v12854_v0 }
 0x8a8   : > { %v3351_v14 = vadd.f32 %v11473_v15, %v14136_v27  ;;  %v3504_v17 = vadd.f32 %v11501_v12, %v14136_v27  ;;  %v3345_v18 = vpop.f32.mrb[79].mxu0  ;;  %v3498_v19 = vpop.f32.mrb[79].mxu1  ;;  %v3374_v20 = vsel %vm3358_vm6, %v3336_v6, %v3366_v11  ;;  %v3528_v24 = vsel %vm3512_vm5, %v3494_v63, %v3520_v10 }
 0x8a9   : > { %v3527_v21 = vsel %vm3511_vm7, %v3489_v7, %v3519_v13  ;;  %v3346_v22 = vadd.f32 %v14136_v27, %v3345_v18  ;;  %v3499_v23 = vadd.f32 %v14136_v27, %v3498_v19  ;;  %11524 = vmatprep.mubr.msk.f32.mxu0 %vm640_vm1, %v3374_v20  ;;  %v12886_v13 = vpack.c.bf16 %v9666_v4, %v9665_v1 }
 0x8aa   : > { %11552 = vmatprep.mubr.msk.f32.mxu1 %vm640_vm1, %v3527_v21  ;;  %vm3361_vm8 = vcmp.gt.f32.partialorder %v3351_v14, 0.0  ;;  %v3369_v26 = vmul.f32 0.01, %v3351_v14  ;;  %vm3514_vm9 = vcmp.gt.f32.partialorder %v3504_v17, 0.0  ;;  %v3522_v28 = vmul.f32 0.01, %v3504_v17  ;;  %11525 = vmatmul.mubr.msk.f32.gmra.mrb[84].mxu0 %vm640_vm1, %v3375_v16 }
 0x8ab   : > { %11553 = vmatmul.mubr.msk.f32.gmra.mrb[84].mxu1 %vm640_vm1, %v3528_v24  ;;  %vm3360_vm10 = vcmp.gt.f32.partialorder %v3346_v22, 0.0  ;;  %v3368_v25 = vmul.f32 0.01, %v3346_v22  ;;  %vm3513_vm11 = vcmp.gt.f32.partialorder %v3499_v23, 0.0  ;;  %v3521_v29 = vmul.f32 0.01, %v3499_v23  ;;  %12857 = vmatpush3.bf16.msra.mxu0 %v12854_v0 }
 0x8ac   : > { %12873 = vmatpush3.bf16.msra.mxu1 %v12854_v0  ;;  %v3377_v31 = vsel %vm3361_vm8, %v3351_v14, %v3369_v26  ;;  %v3530_v32 = vsel %vm3514_vm9, %v3504_v17, %v3522_v28  ;;  %12859 = vmatprep.subr.bf16.mxu0 %v12858_v35 }
 0x8ad   : > { %v3376_v27 = vsel %vm3360_vm10, %v3346_v22, %v3368_v25  ;;  %v3529_v30 = vsel %vm3513_vm11, %v3499_v23, %v3521_v29  ;;  %12875 = vmatprep.subr.bf16.mxu1 %v12858_v35 }
 0x8ae   : > { %11527 = vmatprep.mubr.msk.f32.mxu0 %vm640_vm1, %v3376_v27  ;;  %11555 = vmatprep.mubr.msk.f32.mxu1 %vm640_vm1, %v3529_v30 }
 0x8af   : > { %11528 = vmatmul.mubr.msk.f32.gmra.mrb[86].mxu0 %vm640_vm1, %v3377_v31  ;;  %11556 = vmatmul.mubr.msk.f32.gmra.mrb[86].mxu1 %vm640_vm1, %v3530_v32 }
 0x8b0   : > { %12861 = vmatpush3.bf16.msra.mxu0 %v12858_v35  ;;  %12877 = vmatpush3.bf16.msra.mxu1 %v12858_v35 }
 0x8b1   : > { %12879 = vmatprep.subr.bf16.mxu0 %v12878_v40  ;;  %12895 = vmatprep.subr.bf16.mxu1 %v12878_v40 }
 0x973   : > { %v11520_v41 = vpop.f32.mrb[80].mxu0 }
 0x974   : > { %v11548_v39 = vpop.f32.mrb[80].mxu1  ;;  %v3644_v42 = vadd.f32 %v11520_v41, %v14202_v37  ;;  %v3638_v44 = vpop.f32.mrb[81].mxu0 }
 0x975   : > { %v3797_v43 = vadd.f32 %v11548_v39, %v14202_v37  ;;  %v3791_v45 = vpop.f32.mrb[81].mxu1  ;;  %v3639_v46 = vadd.f32 %v14202_v37, %v3638_v44 }
 0x976   : > { %v3792_v47 = vadd.f32 %v14202_v37, %v3791_v45  ;;  %vm3678_vm12 = vcmp.gt.f32.partialorder %v3644_v42, 0.0  ;;  %v3686_v51 = vmul.f32 0.01, %v3644_v42 }
 0x977   : > { %vm3831_vm13 = vcmp.gt.f32.partialorder %v3797_v43, 0.0  ;;  %v3839_v53 = vmul.f32 0.01, %v3797_v43  ;;  %vm3677_vm14 = vcmp.gt.f32.partialorder %v3639_v46, 0.0  ;;  %v3685_v50 = vmul.f32 0.01, %v3639_v46 }
 0x978   : > { %vm3830_vm15 = vcmp.gt.f32.partialorder %v3792_v47, 0.0  ;;  %v3838_v54 = vmul.f32 0.01, %v3792_v47  ;;  %v3694_v52 = vsel %vm3678_vm12, %v3644_v42, %v3686_v51  ;;  %v11523_v55 = vpop.f32.mrb[82].mxu0  ;;  %v11551_v56 = vpop.f32.mrb[82].mxu1  ;;  %v9688_v51 = vld [vmem:[%s15320_s3 + $0x308] sm:$0xff] }
 0x979   : > { %v3654_v58 = vadd.f32 %v11523_v55, %v14202_v37  ;;  %v3807_v59 = vadd.f32 %v11551_v56, %v14202_v37  ;;  %v3648_v60 = vpop.f32.mrb[83].mxu0  ;;  %v3801_v61 = vpop.f32.mrb[83].mxu1  ;;  %v3693_v62 = vsel %vm3677_vm14, %v3639_v46, %v3685_v50  ;;  %v3847_v2 = vsel %vm3831_vm13, %v3797_v43, %v3839_v53  ;;  %v9667_v46 = vld [vmem:[%s15320_s3 + $0x2f0] sm:$0xff]  ;;  %v14268_v50 = vld [vmem:[%s15321_s4 + $0xa] ss:$0 sm:$0xff] }
 0x97a   : > { %v3846_v0 = vsel %vm3830_vm15, %v3792_v47, %v3838_v54  ;;  %v3649_v63 = vadd.f32 %v14202_v37, %v3648_v60  ;;  %v3802_v3 = vadd.f32 %v14202_v37, %v3801_v61  ;;  %11574 = vmatprep.mubr.msk.f32.mxu0 %vm640_vm1, %v3693_v62  ;;  %v9668_v47 = vld [vmem:[%s15320_s3 + $0x2f8] sm:$0xff]  ;;  %v12910_v53 = vpack.c.bf16 %v9688_v51, %v9687_v49  ;;  %v9689_v61 = vld [vmem:[%s15320_s3 + $0x310] sm:$0xff] }
 0x97b   : > { %11602 = vmatprep.mubr.msk.f32.mxu1 %vm640_vm1, %v3846_v0  ;;  %vm3680_vm0 = vcmp.gt.f32.partialorder %v3654_v58, 0.0  ;;  %v3688_v5 = vmul.f32 0.01, %v3654_v58  ;;  %vm3833_vm2 = vcmp.gt.f32.partialorder %v3807_v59, 0.0  ;;  %v3841_v6 = vmul.f32 0.01, %v3807_v59  ;;  %11575 = vmatmul.mubr.msk.f32.vlgmr.msra.gmra.mrb[88].mxu0 %vm640_vm1, %v3694_v52 }
 0x97c   : > { %11603 = vmatmul.mubr.msk.f32.vlgmr.msra.gmra.mrb[88].mxu1 %vm640_vm1, %v3847_v2  ;;  %vm3679_vm3 = vcmp.gt.f32.partialorder %v3649_v63, 0.0  ;;  %v3687_v7 = vmul.f32 0.01, %v3649_v63  ;;  %vm3832_vm4 = vcmp.gt.f32.partialorder %v3802_v3, 0.0  ;;  %v3840_v8 = vmul.f32 0.01, %v3802_v3  ;;  %12881 = vmatpush3.bf16.msra.mxu0 %v12878_v40 }
 0x97d   : > { %12897 = vmatpush3.bf16.msra.mxu1 %v12878_v40  ;;  %v11526_v9 = vpop.f32.mrb[84].mxu0  ;;  %v3696_v11 = vsel %vm3680_vm0, %v3654_v58, %v3688_v5  ;;  %12883 = vmatprep.subr.bf16.mxu0 %v12882_v57  ;;  %v3849_v21 = vsel %vm3833_vm2, %v3807_v59, %v3841_v6  ;;  %v12890_v48 = vpack.c.bf16 %v9668_v47, %v9667_v46  ;;  %v9690_v62 = vld [vmem:[%s15320_s3 + $0x318] sm:$0xff] }
 0x97e   : > { %v11554_v10 = vpop.f32.mrb[84].mxu1  ;;  %12899 = vmatprep.subr.bf16.mxu1 %v12882_v57  ;;  %v3664_v15 = vadd.f32 %v11526_v9, %v14202_v37  ;;  %v3658_v16 = vpop.f32.mrb[85].mxu0  ;;  %v3695_v17 = vsel %vm3679_vm3, %v3649_v63, %v3687_v7  ;;  %v3848_v18 = vsel %vm3832_vm4, %v3802_v3, %v3840_v8  ;;  %v12914_v6 = vpack.c.bf16 %v9690_v62, %v9689_v61  ;;  %v9713_v62 = vld [vmem:[%s15320_s3 + $0x340] sm:$0xff] }
 0x97f   : > { %v3817_v12 = vadd.f32 %v11554_v10, %v14202_v37  ;;  %v3811_v14 = vpop.f32.mrb[85].mxu1  ;;  %v3659_v19 = vadd.f32 %v14202_v37, %v3658_v16  ;;  %11577 = vmatprep.mubr.msk.f32.mxu0 %vm640_vm1, %v3695_v17  ;;  %11605 = vmatprep.mubr.msk.f32.mxu1 %vm640_vm1, %v3848_v18  ;;  %v9692_v17 = vld [vmem:[%s15320_s3 + $0x328] sm:$0xff] }
 0x980   : > { %v3812_v20 = vadd.f32 %v14202_v37, %v3811_v14  ;;  %vm3682_vm5 = vcmp.gt.f32.partialorder %v3664_v15, 0.0  ;;  %v3690_v22 = vmul.f32 0.01, %v3664_v15  ;;  %11578 = vmatmul.mubr.msk.f32.gmra.mrb[90].mxu0 %vm640_vm1, %v3696_v11  ;;  %11606 = vmatmul.mubr.msk.f32.gmra.mrb[90].mxu1 %vm640_vm1, %v3849_v21  ;;  %v9691_v14 = vld [vmem:[%s15320_s3 + $0x320] sm:$0xff] }
 0x981   : > { %vm3835_vm6 = vcmp.gt.f32.partialorder %v3817_v12, 0.0  ;;  %v3843_v23 = vmul.f32 0.01, %v3817_v12  ;;  %vm3681_vm7 = vcmp.gt.f32.partialorder %v3659_v19, 0.0  ;;  %v3689_v24 = vmul.f32 0.01, %v3659_v19  ;;  %12885 = vmatpush3.bf16.msra.mxu0 %v12882_v57  ;;  %12901 = vmatpush3.bf16.msra.mxu1 %v12882_v57 }
 0x982   : > { %vm3834_vm8 = vcmp.gt.f32.partialorder %v3812_v20, 0.0  ;;  %v3842_v26 = vmul.f32 0.01, %v3812_v20  ;;  %v11529_v28 = vpop.f32.mrb[86].mxu0  ;;  %v11557_v25 = vpop.f32.mrb[86].mxu1  ;;  %v3698_v29 = vsel %vm3682_vm5, %v3664_v15, %v3690_v22  ;;  %12887 = vmatprep.subr.bf16.mxu0 %v12886_v13  ;;  %12903 = vmatprep.subr.bf16.mxu1 %v12886_v13 }
 0x983   : > { %v3674_v27 = vadd.f32 %v11529_v28, %v14202_v37  ;;  %v3827_v30 = vadd.f32 %v11557_v25, %v14202_v37  ;;  %v3668_v31 = vpop.f32.mrb[87].mxu0  ;;  %v3821_v32 = vpop.f32.mrb[87].mxu1  ;;  %v3697_v33 = vsel %vm3681_vm7, %v3659_v19, %v3689_v24  ;;  %v3851_v38 = vsel %vm3835_vm6, %v3817_v12, %v3843_v23 }
 0x984   : > { %v3850_v34 = vsel %vm3834_vm8, %v3812_v20, %v3842_v26  ;;  %v3669_v35 = vadd.f32 %v14202_v37, %v3668_v31  ;;  %v3822_v36 = vadd.f32 %v14202_v37, %v3821_v32  ;;  %11580 = vmatprep.mubr.msk.f32.mxu0 %vm640_vm1, %v3697_v33  ;;  %v12918_v26 = vpack.c.bf16 %v9692_v17, %v9691_v14 }
 0x985   : > { %11608 = vmatprep.mubr.msk.f32.mxu1 %vm640_vm1, %v3850_v34  ;;  %vm3684_vm9 = vcmp.gt.f32.partialorder %v3674_v27, 0.0  ;;  %v3692_v40 = vmul.f32 0.01, %v3674_v27  ;;  %vm3837_vm10 = vcmp.gt.f32.partialorder %v3827_v30, 0.0  ;;  %v3845_v41 = vmul.f32 0.01, %v3827_v30  ;;  %11581 = vmatmul.mubr.msk.f32.gmra.mrb[92].mxu0 %vm640_vm1, %v3698_v29 }
 0x986   : > { %11609 = vmatmul.mubr.msk.f32.gmra.mrb[92].mxu1 %vm640_vm1, %v3851_v38  ;;  %vm3683_vm11 = vcmp.gt.f32.partialorder %v3669_v35, 0.0  ;;  %v3691_v39 = vmul.f32 0.01, %v3669_v35  ;;  %vm3836_vm12 = vcmp.gt.f32.partialorder %v3822_v36, 0.0  ;;  %v3844_v42 = vmul.f32 0.01, %v3822_v36  ;;  %12889 = vmatpush3.bf16.msra.mxu0 %v12886_v13 }
 0x987   : > { %12905 = vmatpush3.bf16.msra.mxu1 %v12886_v13  ;;  %v3700_v44 = vsel %vm3684_vm9, %v3674_v27, %v3692_v40  ;;  %v3853_v45 = vsel %vm3837_vm10, %v3827_v30, %v3845_v41  ;;  %12891 = vmatprep.subr.bf16.mxu0 %v12890_v48 }
 0x988   : > { %v3699_v37 = vsel %vm3683_vm11, %v3669_v35, %v3691_v39  ;;  %v3852_v43 = vsel %vm3836_vm12, %v3822_v36, %v3844_v42  ;;  %12907 = vmatprep.subr.bf16.mxu1 %v12890_v48 }
 0x989   : > { %11583 = vmatprep.mubr.msk.f32.mxu0 %vm640_vm1, %v3699_v37  ;;  %11611 = vmatprep.mubr.msk.f32.mxu1 %vm640_vm1, %v3852_v43 }
 0x98a   : > { %11584 = vmatmul.mubr.msk.f32.gmra.mrb[94].mxu0 %vm640_vm1, %v3700_v44  ;;  %11612 = vmatmul.mubr.msk.f32.gmra.mrb[94].mxu1 %vm640_vm1, %v3853_v45 }
 0x98b   : > { %12893 = vmatpush3.bf16.msra.mxu0 %v12890_v48  ;;  %12909 = vmatpush3.bf16.msra.mxu1 %v12890_v48 }
 0x98c   : > { %12911 = vmatprep.subr.bf16.mxu0 %v12910_v53  ;;  %12927 = vmatprep.subr.bf16.mxu1 %v12910_v53 }
 0xa4e   : > { %v11576_v54 = vpop.f32.mrb[88].mxu0 }
 0xa4f   : > { %v11604_v52 = vpop.f32.mrb[88].mxu1  ;;  %v3967_v55 = vadd.f32 %v11576_v54, %v14268_v50  ;;  %v3961_v57 = vpop.f32.mrb[89].mxu0 }
 0xa50   : > { %v4120_v56 = vadd.f32 %v11604_v52, %v14268_v50  ;;  %v4114_v58 = vpop.f32.mrb[89].mxu1  ;;  %v3962_v59 = vadd.f32 %v14268_v50, %v3961_v57 }
 0xa51   : > { %v4115_v60 = vadd.f32 %v14268_v50, %v4114_v58  ;;  %vm4001_vm13 = vcmp.gt.f32.partialorder %v3967_v55, 0.0  ;;  %v4009_v0 = vmul.f32 0.01, %v3967_v55 }
 0xa52   : > { %vm4154_vm14 = vcmp.gt.f32.partialorder %v4120_v56, 0.0  ;;  %v4162_v2 = vmul.f32 0.01, %v4120_v56  ;;  %vm4000_vm15 = vcmp.gt.f32.partialorder %v3962_v59, 0.0  ;;  %v4008_v63 = vmul.f32 0.01, %v3962_v59 }
 0xa53   : > { %vm4153_vm0 = vcmp.gt.f32.partialorder %v4115_v60, 0.0  ;;  %v4161_v3 = vmul.f32 0.01, %v4115_v60  ;;  %v4017_v1 = vsel %vm4001_vm13, %v3967_v55, %v4009_v0  ;;  %v11579_v4 = vpop.f32.mrb[90].mxu0  ;;  %v11607_v5 = vpop.f32.mrb[90].mxu1  ;;  %v9714_v0 = vld [vmem:[%s15320_s3 + $0x348] sm:$0xff] }
 0xa54   : > { %v3977_v7 = vadd.f32 %v11579_v4, %v14268_v50  ;;  %v4130_v8 = vadd.f32 %v11607_v5, %v14268_v50  ;;  %v3971_v9 = vpop.f32.mrb[91].mxu0  ;;  %v4124_v10 = vpop.f32.mrb[91].mxu1  ;;  %v4016_v11 = vsel %vm4000_vm15, %v3962_v59, %v4008_v63  ;;  %v4170_v15 = vsel %vm4154_vm14, %v4120_v56, %v4162_v2  ;;  %v9693_v59 = vld [vmem:[%s15320_s3 + $0x330] sm:$0xff]  ;;  %v14334_v63 = vld [vmem:[%s15321_s4 + $0xb] ss:$0 sm:$0xff] }
 0xa55   : > { %v4169_v13 = vsel %vm4153_vm0, %v4115_v60, %v4161_v3  ;;  %v3972_v12 = vadd.f32 %v14268_v50, %v3971_v9  ;;  %v4125_v16 = vadd.f32 %v14268_v50, %v4124_v10  ;;  %11630 = vmatprep.mubr.msk.f32.mxu0 %vm640_vm1, %v4016_v11  ;;  %v9694_v60 = vld [vmem:[%s15320_s3 + $0x338] sm:$0xff]  ;;  %v12942_v2 = vpack.c.bf16 %v9714_v0, %v9713_v62  ;;  %v9715_v10 = vld [vmem:[%s15320_s3 + $0x350] sm:$0xff] }
 0xa56   : > { %11658 = vmatprep.mubr.msk.f32.mxu1 %vm640_vm1, %v4169_v13  ;;  %vm4003_vm2 = vcmp.gt.f32.partialorder %v3977_v7, 0.0  ;;  %v4011_v18 = vmul.f32 0.01, %v3977_v7  ;;  %vm4156_vm3 = vcmp.gt.f32.partialorder %v4130_v8, 0.0  ;;  %v4164_v19 = vmul.f32 0.01, %v4130_v8  ;;  %11631 = vmatmul.mubr.msk.f32.vlgmr.msra.gmra.mrb[96].mxu0 %vm640_vm1, %v4017_v1 }
 0xa57   : > { %11659 = vmatmul.mubr.msk.f32.vlgmr.msra.gmra.mrb[96].mxu1 %vm640_vm1, %v4170_v15  ;;  %vm4002_vm4 = vcmp.gt.f32.partialorder %v3972_v12, 0.0  ;;  %v4010_v20 = vmul.f32 0.01, %v3972_v12  ;;  %vm4155_vm5 = vcmp.gt.f32.partialorder %v4125_v16, 0.0  ;;  %v4163_v21 = vmul.f32 0.01, %v4125_v16  ;;  %12913 = vmatpush3.bf16.msra.mxu0 %v12910_v53 }
 0xa58   : > { %12929 = vmatpush3.bf16.msra.mxu1 %v12910_v53  ;;  %v11582_v22 = vpop.f32.mrb[92].mxu0  ;;  %v4019_v24 = vsel %vm4003_vm2, %v3977_v7, %v4011_v18  ;;  %12915 = vmatprep.subr.bf16.mxu0 %v12914_v6  ;;  %v4172_v34 = vsel %vm4156_vm3, %v4130_v8, %v4164_v19  ;;  %v12922_v61 = vpack.c.bf16 %v9694_v60, %v9693_v59  ;;  %v9716_v11 = vld [vmem:[%s15320_s3 + $0x358] sm:$0xff] }
 0xa59   : > { %v11610_v23 = vpop.f32.mrb[92].mxu1  ;;  %12931 = vmatprep.subr.bf16.mxu1 %v12914_v6  ;;  %v3987_v28 = vadd.f32 %v11582_v22, %v14268_v50  ;;  %v3981_v29 = vpop.f32.mrb[93].mxu0  ;;  %v4018_v30 = vsel %vm4002_vm4, %v3972_v12, %v4010_v20  ;;  %v4171_v31 = vsel %vm4155_vm5, %v4125_v16, %v4163_v21  ;;  %v12946_v19 = vpack.c.bf16 %v9716_v11, %v9715_v10  ;;  %v9739_v11 = vld [vmem:[%s15320_s3 + $0x380] sm:$0xff] }
 0xa5a   : > { %v4140_v25 = vadd.f32 %v11610_v23, %v14268_v50  ;;  %v4134_v27 = vpop.f32.mrb[93].mxu1  ;;  %v3982_v32 = vadd.f32 %v14268_v50, %v3981_v29  ;;  %11633 = vmatprep.mubr.msk.f32.mxu0 %vm640_vm1, %v4018_v30  ;;  %11661 = vmatprep.mubr.msk.f32.mxu1 %vm640_vm1, %v4171_v31  ;;  %v9718_v30 = vld [vmem:[%s15320_s3 + $0x368] sm:$0xff] }
 0xa5b   : > { %v4135_v33 = vadd.f32 %v14268_v50, %v4134_v27  ;;  %vm4005_vm6 = vcmp.gt.f32.partialorder %v3987_v28, 0.0  ;;  %v4013_v35 = vmul.f32 0.01, %v3987_v28  ;;  %11634 = vmatmul.mubr.msk.f32.gmra.mrb[98].mxu0 %vm640_vm1, %v4019_v24  ;;  %11662 = vmatmul.mubr.msk.f32.gmra.mrb[98].mxu1 %vm640_vm1, %v4172_v34  ;;  %v9717_v27 = vld [vmem:[%s15320_s3 + $0x360] sm:$0xff] }
 0xa5c   : > { %vm4158_vm7 = vcmp.gt.f32.partialorder %v4140_v25, 0.0  ;;  %v4166_v36 = vmul.f32 0.01, %v4140_v25  ;;  %vm4004_vm8 = vcmp.gt.f32.partialorder %v3982_v32, 0.0  ;;  %v4012_v38 = vmul.f32 0.01, %v3982_v32  ;;  %12917 = vmatpush3.bf16.msra.mxu0 %v12914_v6  ;;  %12933 = vmatpush3.bf16.msra.mxu1 %v12914_v6 }
 0xa5d   : > { %vm4157_vm9 = vcmp.gt.f32.partialorder %v4135_v33, 0.0  ;;  %v4165_v40 = vmul.f32 0.01, %v4135_v33  ;;  %v11585_v41 = vpop.f32.mrb[94].mxu0  ;;  %v11613_v39 = vpop.f32.mrb[94].mxu1  ;;  %v4021_v42 = vsel %vm4005_vm6, %v3987_v28, %v4013_v35  ;;  %12919 = vmatprep.subr.bf16.mxu0 %v12918_v26  ;;  %12935 = vmatprep.subr.bf16.mxu1 %v12918_v26 }
 0xa5e   : > { %v3997_v37 = vadd.f32 %v11585_v41, %v14268_v50  ;;  %v4150_v43 = vadd.f32 %v11613_v39, %v14268_v50  ;;  %v3991_v44 = vpop.f32.mrb[95].mxu0  ;;  %v4144_v45 = vpop.f32.mrb[95].mxu1  ;;  %v4020_v46 = vsel %vm4004_vm8, %v3982_v32, %v4012_v38  ;;  %v4174_v51 = vsel %vm4158_vm7, %v4140_v25, %v4166_v36 }
 0xa5f   : > { %v4173_v47 = vsel %vm4157_vm9, %v4135_v33, %v4165_v40  ;;  %v3992_v48 = vadd.f32 %v14268_v50, %v3991_v44  ;;  %v4145_v49 = vadd.f32 %v14268_v50, %v4144_v45  ;;  %11636 = vmatprep.mubr.msk.f32.mxu0 %vm640_vm1, %v4020_v46  ;;  %v12950_v40 = vpack.c.bf16 %v9718_v30, %v9717_v27 }
 0xa60   : > { %11664 = vmatprep.mubr.msk.f32.mxu1 %vm640_vm1, %v4173_v47  ;;  %vm4007_vm10 = vcmp.gt.f32.partialorder %v3997_v37, 0.0  ;;  %v4015_v53 = vmul.f32 0.01, %v3997_v37  ;;  %vm4160_vm11 = vcmp.gt.f32.partialorder %v4150_v43, 0.0  ;;  %v4168_v54 = vmul.f32 0.01, %v4150_v43  ;;  %11637 = vmatmul.mubr.msk.f32.gmra.mrb[100].mxu0 %vm640_vm1, %v4021_v42 }
 0xa61   : > { %11665 = vmatmul.mubr.msk.f32.gmra.mrb[100].mxu1 %vm640_vm1, %v4174_v51  ;;  %vm4006_vm12 = vcmp.gt.f32.partialorder %v3992_v48, 0.0  ;;  %v4014_v52 = vmul.f32 0.01, %v3992_v48  ;;  %vm4159_vm13 = vcmp.gt.f32.partialorder %v4145_v49, 0.0  ;;  %v4167_v55 = vmul.f32 0.01, %v4145_v49  ;;  %12921 = vmatpush3.bf16.msra.mxu0 %v12918_v26 }
 0xa62   : > { %12937 = vmatpush3.bf16.msra.mxu1 %v12918_v26  ;;  %v4023_v57 = vsel %vm4007_vm10, %v3997_v37, %v4015_v53  ;;  %v4176_v58 = vsel %vm4160_vm11, %v4150_v43, %v4168_v54  ;;  %12923 = vmatprep.subr.bf16.mxu0 %v12922_v61 }
 0xa63   : > { %v4022_v50 = vsel %vm4006_vm12, %v3992_v48, %v4014_v52  ;;  %v4175_v56 = vsel %vm4159_vm13, %v4145_v49, %v4167_v55  ;;  %12939 = vmatprep.subr.bf16.mxu1 %v12922_v61 }
 0xa64   : > { %11639 = vmatprep.mubr.msk.f32.mxu0 %vm640_vm1, %v4022_v50  ;;  %11667 = vmatprep.mubr.msk.f32.mxu1 %vm640_vm1, %v4175_v56 }
 0xa65   : > { %11640 = vmatmul.mubr.msk.f32.gmra.mrb[102].mxu0 %vm640_vm1, %v4023_v57  ;;  %11668 = vmatmul.mubr.msk.f32.gmra.mrb[102].mxu1 %vm640_vm1, %v4176_v58 }
 0xa66   : > { %12925 = vmatpush3.bf16.msra.mxu0 %v12922_v61  ;;  %12941 = vmatpush3.bf16.msra.mxu1 %v12922_v61 }
 0xa67   : > { %12943 = vmatprep.subr.bf16.mxu0 %v12942_v2  ;;  %12959 = vmatprep.subr.bf16.mxu1 %v12942_v2 }
 0xb29   : > { %v11632_v3 = vpop.f32.mrb[96].mxu0 }
 0xb2a   : > { %v11660_v1 = vpop.f32.mrb[96].mxu1  ;;  %v4290_v4 = vadd.f32 %v11632_v3, %v14334_v63  ;;  %v4284_v6 = vpop.f32.mrb[97].mxu0 }
 0xb2b   : > { %v4443_v5 = vadd.f32 %v11660_v1, %v14334_v63  ;;  %v4437_v7 = vpop.f32.mrb[97].mxu1  ;;  %v4285_v8 = vadd.f32 %v14334_v63, %v4284_v6 }
 0xb2c   : > { %v4438_v9 = vadd.f32 %v14334_v63, %v4437_v7  ;;  %vm4324_vm14 = vcmp.gt.f32.partialorder %v4290_v4, 0.0  ;;  %v4332_v13 = vmul.f32 0.01, %v4290_v4 }
 0xb2d   : > { %vm4477_vm15 = vcmp.gt.f32.partialorder %v4443_v5, 0.0  ;;  %v4485_v15 = vmul.f32 0.01, %v4443_v5  ;;  %vm4323_vm0 = vcmp.gt.f32.partialorder %v4285_v8, 0.0  ;;  %v4331_v12 = vmul.f32 0.01, %v4285_v8 }
 0xb2e   : > { %vm4476_vm2 = vcmp.gt.f32.partialorder %v4438_v9, 0.0  ;;  %v4484_v16 = vmul.f32 0.01, %v4438_v9  ;;  %v4340_v14 = vsel %vm4324_vm14, %v4290_v4, %v4332_v13  ;;  %v11635_v17 = vpop.f32.mrb[98].mxu0  ;;  %v11663_v18 = vpop.f32.mrb[98].mxu1  ;;  %v9740_v13 = vld [vmem:[%s15320_s3 + $0x388] sm:$0xff] }
 0xb2f   : > { %v4300_v20 = vadd.f32 %v11635_v17, %v14334_v63  ;;  %v4453_v21 = vadd.f32 %v11663_v18, %v14334_v63  ;;  %v4294_v22 = vpop.f32.mrb[99].mxu0  ;;  %v4447_v23 = vpop.f32.mrb[99].mxu1  ;;  %v4339_v24 = vsel %vm4323_vm0, %v4285_v8, %v4331_v12  ;;  %v4493_v28 = vsel %vm4477_vm15, %v4443_v5, %v4485_v15  ;;  %v9719_v8 = vld [vmem:[%s15320_s3 + $0x370] sm:$0xff]  ;;  %v14400_v12 = vld [vmem:[%s15321_s4 + $0xc] ss:$0 sm:$0xff] }
 0xb30   : > { %v4492_v26 = vsel %vm4476_vm2, %v4438_v9, %v4484_v16  ;;  %v4295_v25 = vadd.f32 %v14334_v63, %v4294_v22  ;;  %v4448_v29 = vadd.f32 %v14334_v63, %v4447_v23  ;;  %11686 = vmatprep.mubr.msk.f32.mxu0 %vm640_vm1, %v4339_v24  ;;  %v9720_v9 = vld [vmem:[%s15320_s3 + $0x378] sm:$0xff]  ;;  %v12974_v15 = vpack.c.bf16 %v9740_v13, %v9739_v11  ;;  %v9741_v23 = vld [vmem:[%s15320_s3 + $0x390] sm:$0xff] }
 0xb31   : > { %11714 = vmatprep.mubr.msk.f32.mxu1 %vm640_vm1, %v4492_v26  ;;  %vm4326_vm3 = vcmp.gt.f32.partialorder %v4300_v20, 0.0  ;;  %v4334_v31 = vmul.f32 0.01, %v4300_v20  ;;  %vm4479_vm4 = vcmp.gt.f32.partialorder %v4453_v21, 0.0  ;;  %v4487_v32 = vmul.f32 0.01, %v4453_v21  ;;  %11687 = vmatmul.mubr.msk.f32.vlgmr.msra.gmra.mrb[104].mxu0 %vm640_vm1, %v4340_v14 }
 0xb32   : > { %11715 = vmatmul.mubr.msk.f32.vlgmr.msra.gmra.mrb[104].mxu1 %vm640_vm1, %v4493_v28  ;;  %vm4325_vm5 = vcmp.gt.f32.partialorder %v4295_v25, 0.0  ;;  %v4333_v33 = vmul.f32 0.01, %v4295_v25  ;;  %vm4478_vm6 = vcmp.gt.f32.partialorder %v4448_v29, 0.0  ;;  %v4486_v34 = vmul.f32 0.01, %v4448_v29  ;;  %12945 = vmatpush3.bf16.msra.mxu0 %v12942_v2 }
 0xb33   : > { %12961 = vmatpush3.bf16.msra.mxu1 %v12942_v2  ;;  %v11638_v35 = vpop.f32.mrb[100].mxu0  ;;  %v4342_v38 = vsel %vm4326_vm3, %v4300_v20, %v4334_v31  ;;  %12947 = vmatprep.subr.bf16.mxu0 %v12946_v19  ;;  %v4495_v47 = vsel %vm4479_vm4, %v4453_v21, %v4487_v32  ;;  %v12954_v10 = vpack.c.bf16 %v9720_v9, %v9719_v8  ;;  %v9742_v24 = vld [vmem:[%s15320_s3 + $0x398] sm:$0xff] }
 0xb34   : > { %v11666_v36 = vpop.f32.mrb[100].mxu1  ;;  %12963 = vmatprep.subr.bf16.mxu1 %v12946_v19  ;;  %v4310_v41 = vadd.f32 %v11638_v35, %v14334_v63  ;;  %v4304_v42 = vpop.f32.mrb[101].mxu0  ;;  %v4341_v43 = vsel %vm4325_vm5, %v4295_v25, %v4333_v33  ;;  %v4494_v44 = vsel %vm4478_vm6, %v4448_v29, %v4486_v34  ;;  %v12978_v32 = vpack.c.bf16 %v9742_v24, %v9741_v23  ;;  %v9765_v24 = vld [vmem:[%s15320_s3 + $0x3c0] sm:$0xff] }
 0xb35   : > { %v4463_v39 = vadd.f32 %v11666_v36, %v14334_v63  ;;  %v4457_v37 = vpop.f32.mrb[101].mxu1  ;;  %v4305_v45 = vadd.f32 %v14334_v63, %v4304_v42  ;;  %11689 = vmatprep.mubr.msk.f32.mxu0 %vm640_vm1, %v4341_v43  ;;  %11717 = vmatprep.mubr.msk.f32.mxu1 %vm640_vm1, %v4494_v44  ;;  %v9744_v43 = vld [vmem:[%s15320_s3 + $0x3a8] sm:$0xff] }
 0xb36   : > { %v4458_v46 = vadd.f32 %v14334_v63, %v4457_v37  ;;  %vm4328_vm7 = vcmp.gt.f32.partialorder %v4310_v41, 0.0  ;;  %v4336_v48 = vmul.f32 0.01, %v4310_v41  ;;  %11690 = vmatmul.mubr.msk.f32.gmra.mrb[106].mxu0 %vm640_vm1, %v4342_v38  ;;  %11718 = vmatmul.mubr.msk.f32.gmra.mrb[106].mxu1 %vm640_vm1, %v4495_v47  ;;  %v9743_v37 = vld [vmem:[%s15320_s3 + $0x3a0] sm:$0xff] }
 0xb37   : > { %vm4481_vm8 = vcmp.gt.f32.partialorder %v4463_v39, 0.0  ;;  %v4489_v49 = vmul.f32 0.01, %v4463_v39  ;;  %vm4327_vm9 = vcmp.gt.f32.partialorder %v4305_v45, 0.0  ;;  %v4335_v51 = vmul.f32 0.01, %v4305_v45  ;;  %12949 = vmatpush3.bf16.msra.mxu0 %v12946_v19  ;;  %12965 = vmatpush3.bf16.msra.mxu1 %v12946_v19 }
 0xb38   : > { %vm4480_vm10 = vcmp.gt.f32.partialorder %v4458_v46, 0.0  ;;  %v4488_v53 = vmul.f32 0.01, %v4458_v46  ;;  %v11641_v54 = vpop.f32.mrb[102].mxu0  ;;  %v11669_v52 = vpop.f32.mrb[102].mxu1  ;;  %v4344_v55 = vsel %vm4328_vm7, %v4310_v41, %v4336_v48  ;;  %12951 = vmatprep.subr.bf16.mxu0 %v12950_v40  ;;  %12967 = vmatprep.subr.bf16.mxu1 %v12950_v40 }
 0xb39   : > { %v4320_v50 = vadd.f32 %v11641_v54, %v14334_v63  ;;  %v4473_v56 = vadd.f32 %v11669_v52, %v14334_v63  ;;  %v4314_v57 = vpop.f32.mrb[103].mxu0  ;;  %v4467_v58 = vpop.f32.mrb[103].mxu1  ;;  %v4343_v59 = vsel %vm4327_vm9, %v4305_v45, %v4335_v51  ;;  %v4497_v0 = vsel %vm4481_vm8, %v4463_v39, %v4489_v49 }
 0xb3a   : > { %v4496_v60 = vsel %vm4480_vm10, %v4458_v46, %v4488_v53  ;;  %v4315_v61 = vadd.f32 %v14334_v63, %v4314_v57  ;;  %v4468_v62 = vadd.f32 %v14334_v63, %v4467_v58  ;;  %11692 = vmatprep.mubr.msk.f32.mxu0 %vm640_vm1, %v4343_v59  ;;  %v12982_v53 = vpack.c.bf16 %v9744_v43, %v9743_v37 }
 0xb3b   : > { %11720 = vmatprep.mubr.msk.f32.mxu1 %vm640_vm1, %v4496_v60  ;;  %vm4330_vm11 = vcmp.gt.f32.partialorder %v4320_v50, 0.0  ;;  %v4338_v2 = vmul.f32 0.01, %v4320_v50  ;;  %vm4483_vm12 = vcmp.gt.f32.partialorder %v4473_v56, 0.0  ;;  %v4491_v3 = vmul.f32 0.01, %v4473_v56  ;;  %11693 = vmatmul.mubr.msk.f32.gmra.mrb[108].mxu0 %vm640_vm1, %v4344_v55 }
 0xb3c   : > { %11721 = vmatmul.mubr.msk.f32.gmra.mrb[108].mxu1 %vm640_vm1, %v4497_v0  ;;  %vm4329_vm13 = vcmp.gt.f32.partialorder %v4315_v61, 0.0  ;;  %v4337_v1 = vmul.f32 0.01, %v4315_v61  ;;  %vm4482_vm14 = vcmp.gt.f32.partialorder %v4468_v62, 0.0  ;;  %v4490_v4 = vmul.f32 0.01, %v4468_v62  ;;  %12953 = vmatpush3.bf16.msra.mxu0 %v12950_v40 }
 0xb3d   : > { %12969 = vmatpush3.bf16.msra.mxu1 %v12950_v40  ;;  %v4346_v6 = vsel %vm4330_vm11, %v4320_v50, %v4338_v2  ;;  %v4499_v7 = vsel %vm4483_vm12, %v4473_v56, %v4491_v3  ;;  %12955 = vmatprep.subr.bf16.mxu0 %v12954_v10 }
 0xb3e   : > { %v4345_v63 = vsel %vm4329_vm13, %v4315_v61, %v4337_v1  ;;  %v4498_v5 = vsel %vm4482_vm14, %v4468_v62, %v4490_v4  ;;  %12971 = vmatprep.subr.bf16.mxu1 %v12954_v10 }
 0xb3f   : > { %11695 = vmatprep.mubr.msk.f32.mxu0 %vm640_vm1, %v4345_v63  ;;  %11723 = vmatprep.mubr.msk.f32.mxu1 %vm640_vm1, %v4498_v5 }
 0xb40   : > { %11696 = vmatmul.mubr.msk.f32.gmra.mrb[110].mxu0 %vm640_vm1, %v4346_v6  ;;  %11724 = vmatmul.mubr.msk.f32.gmra.mrb[110].mxu1 %vm640_vm1, %v4499_v7 }
 0xb41   : > { %12957 = vmatpush3.bf16.msra.mxu0 %v12954_v10  ;;  %12973 = vmatpush3.bf16.msra.mxu1 %v12954_v10 }
 0xb42   : > { %12975 = vmatprep.subr.bf16.mxu0 %v12974_v15  ;;  %12991 = vmatprep.subr.bf16.mxu1 %v12974_v15 }
 0xc04   : > { %v11688_v16 = vpop.f32.mrb[104].mxu0 }
 0xc05   : > { %v11716_v14 = vpop.f32.mrb[104].mxu1  ;;  %v4613_v17 = vadd.f32 %v11688_v16, %v14400_v12  ;;  %v4607_v19 = vpop.f32.mrb[105].mxu0 }
 0xc06   : > { %v4766_v18 = vadd.f32 %v11716_v14, %v14400_v12  ;;  %v4760_v20 = vpop.f32.mrb[105].mxu1  ;;  %v4608_v21 = vadd.f32 %v14400_v12, %v4607_v19 }
 0xc07   : > { %v4761_v22 = vadd.f32 %v14400_v12, %v4760_v20  ;;  %vm4647_vm15 = vcmp.gt.f32.partialorder %v4613_v17, 0.0  ;;  %v4655_v26 = vmul.f32 0.01, %v4613_v17 }
 0xc08   : > { %vm4800_vm0 = vcmp.gt.f32.partialorder %v4766_v18, 0.0  ;;  %v4808_v28 = vmul.f32 0.01, %v4766_v18  ;;  %vm4646_vm2 = vcmp.gt.f32.partialorder %v4608_v21, 0.0  ;;  %v4654_v25 = vmul.f32 0.01, %v4608_v21 }
 0xc09   : > { %vm4799_vm3 = vcmp.gt.f32.partialorder %v4761_v22, 0.0  ;;  %v4807_v29 = vmul.f32 0.01, %v4761_v22  ;;  %v4663_v27 = vsel %vm4647_vm15, %v4613_v17, %v4655_v26  ;;  %v11691_v30 = vpop.f32.mrb[106].mxu0  ;;  %v11719_v31 = vpop.f32.mrb[106].mxu1  ;;  %v9766_v26 = vld [vmem:[%s15320_s3 + $0x3c8] sm:$0xff] }
 0xc0a   : > { %v4623_v33 = vadd.f32 %v11691_v30, %v14400_v12  ;;  %v4776_v34 = vadd.f32 %v11719_v31, %v14400_v12  ;;  %v4617_v35 = vpop.f32.mrb[107].mxu0  ;;  %v4770_v36 = vpop.f32.mrb[107].mxu1  ;;  %v4662_v38 = vsel %vm4646_vm2, %v4608_v21, %v4654_v25  ;;  %v4816_v41 = vsel %vm4800_vm0, %v4766_v18, %v4808_v28  ;;  %v9745_v21 = vld [vmem:[%s15320_s3 + $0x3b0] sm:$0xff]  ;;  %v14466_v25 = vld [vmem:[%s15321_s4 + $0xd] ss:$0 sm:$0xff] }
 0xc0b   : > { %v4815_v40 = vsel %vm4799_vm3, %v4761_v22, %v4807_v29  ;;  %v4618_v39 = vadd.f32 %v14400_v12, %v4617_v35  ;;  %v4771_v42 = vadd.f32 %v14400_v12, %v4770_v36  ;;  %11742 = vmatprep.mubr.msk.f32.mxu0 %vm640_vm1, %v4662_v38  ;;  %v9746_v22 = vld [vmem:[%s15320_s3 + $0x3b8] sm:$0xff]  ;;  %v13006_v28 = vpack.c.bf16 %v9766_v26, %v9765_v24  ;;  %v9767_v36 = vld [vmem:[%s15320_s3 + $0x3d0] sm:$0xff] }
 0xc0c   : > { %11770 = vmatprep.mubr.msk.f32.mxu1 %vm640_vm1, %v4815_v40  ;;  %vm4649_vm4 = vcmp.gt.f32.partialorder %v4623_v33, 0.0  ;;  %v4657_v44 = vmul.f32 0.01, %v4623_v33  ;;  %vm4802_vm5 = vcmp.gt.f32.partialorder %v4776_v34, 0.0  ;;  %v4810_v45 = vmul.f32 0.01, %v4776_v34  ;;  %11743 = vmatmul.mubr.msk.f32.vlgmr.msra.gmra.mrb[112].mxu0 %vm640_vm1, %v4663_v27 }
 0xc0d   : > { %11771 = vmatmul.mubr.msk.f32.vlgmr.msra.gmra.mrb[112].mxu1 %vm640_vm1, %v4816_v41  ;;  %vm4648_vm6 = vcmp.gt.f32.partialorder %v4618_v39, 0.0  ;;  %v4656_v46 = vmul.f32 0.01, %v4618_v39  ;;  %vm4801_vm7 = vcmp.gt.f32.partialorder %v4771_v42, 0.0  ;;  %v4809_v47 = vmul.f32 0.01, %v4771_v42  ;;  %12977 = vmatpush3.bf16.msra.mxu0 %v12974_v15 }
 0xc0e   : > { %12993 = vmatpush3.bf16.msra.mxu1 %v12974_v15  ;;  %v11694_v48 = vpop.f32.mrb[108].mxu0  ;;  %v4665_v51 = vsel %vm4649_vm4, %v4623_v33, %v4657_v44  ;;  %12979 = vmatprep.subr.bf16.mxu0 %v12978_v32  ;;  %v4818_v60 = vsel %vm4802_vm5, %v4776_v34, %v4810_v45  ;;  %v12986_v23 = vpack.c.bf16 %v9746_v22, %v9745_v21  ;;  %v9768_v38 = vld [vmem:[%s15320_s3 + $0x3d8] sm:$0xff] }
 0xc0f   : > { %v11722_v49 = vpop.f32.mrb[108].mxu1  ;;  %12995 = vmatprep.subr.bf16.mxu1 %v12978_v32  ;;  %v4633_v54 = vadd.f32 %v11694_v48, %v14400_v12  ;;  %v4627_v55 = vpop.f32.mrb[109].mxu0  ;;  %v4664_v56 = vsel %vm4648_vm6, %v4618_v39, %v4656_v46  ;;  %v4817_v57 = vsel %vm4801_vm7, %v4771_v42, %v4809_v47  ;;  %v13010_v45 = vpack.c.bf16 %v9768_v38, %v9767_v36  ;;  %v9791_v38 = vld [vmem:[%s15320_s3 + $0x400] sm:$0xff] }
 0xc10   : > { %v4786_v52 = vadd.f32 %v11722_v49, %v14400_v12  ;;  %v4780_v50 = vpop.f32.mrb[109].mxu1  ;;  %v4628_v58 = vadd.f32 %v14400_v12, %v4627_v55  ;;  %11745 = vmatprep.mubr.msk.f32.mxu0 %vm640_vm1, %v4664_v56  ;;  %11773 = vmatprep.mubr.msk.f32.mxu1 %vm640_vm1, %v4817_v57  ;;  %v9770_v56 = vld [vmem:[%s15320_s3 + $0x3e8] sm:$0xff] }
 0xc11   : > { %v4781_v59 = vadd.f32 %v14400_v12, %v4780_v50  ;;  %vm4651_vm8 = vcmp.gt.f32.partialorder %v4633_v54, 0.0  ;;  %v4659_v61 = vmul.f32 0.01, %v4633_v54  ;;  %11746 = vmatmul.mubr.msk.f32.gmra.mrb[114].mxu0 %vm640_vm1, %v4665_v51  ;;  %11774 = vmatmul.mubr.msk.f32.gmra.mrb[114].mxu1 %vm640_vm1, %v4818_v60  ;;  %v9769_v50 = vld [vmem:[%s15320_s3 + $0x3e0] sm:$0xff] }
 0xc12   : > { %vm4804_vm9 = vcmp.gt.f32.partialorder %v4786_v52, 0.0  ;;  %v4812_v62 = vmul.f32 0.01, %v4786_v52  ;;  %vm4650_vm10 = vcmp.gt.f32.partialorder %v4628_v58, 0.0  ;;  %v4658_v0 = vmul.f32 0.01, %v4628_v58  ;;  %12981 = vmatpush3.bf16.msra.mxu0 %v12978_v32  ;;  %12997 = vmatpush3.bf16.msra.mxu1 %v12978_v32 }
 0xc13   : > { %vm4803_vm11 = vcmp.gt.f32.partialorder %v4781_v59, 0.0  ;;  %v4811_v2 = vmul.f32 0.01, %v4781_v59  ;;  %v11697_v3 = vpop.f32.mrb[110].mxu0  ;;  %v11725_v1 = vpop.f32.mrb[110].mxu1  ;;  %v4667_v4 = vsel %vm4651_vm8, %v4633_v54, %v4659_v61  ;;  %12983 = vmatprep.subr.bf16.mxu0 %v12982_v53  ;;  %12999 = vmatprep.subr.bf16.mxu1 %v12982_v53 }
 0xc14   : > { %v4643_v63 = vadd.f32 %v11697_v3, %v14400_v12  ;;  %v4796_v5 = vadd.f32 %v11725_v1, %v14400_v12  ;;  %v4637_v6 = vpop.f32.mrb[111].mxu0  ;;  %v4790_v7 = vpop.f32.mrb[111].mxu1  ;;  %v4666_v8 = vsel %vm4650_vm10, %v4628_v58, %v4658_v0  ;;  %v4820_v13 = vsel %vm4804_vm9, %v4786_v52, %v4812_v62 }
 0xc15   : > { %v4819_v9 = vsel %vm4803_vm11, %v4781_v59, %v4811_v2  ;;  %v4638_v10 = vadd.f32 %v14400_v12, %v4637_v6  ;;  %v4791_v11 = vadd.f32 %v14400_v12, %v4790_v7  ;;  %11748 = vmatprep.mubr.msk.f32.mxu0 %vm640_vm1, %v4666_v8  ;;  %v13014_v2 = vpack.c.bf16 %v9770_v56, %v9769_v50 }
 0xc16   : > { %11776 = vmatprep.mubr.msk.f32.mxu1 %vm640_vm1, %v4819_v9  ;;  %vm4653_vm12 = vcmp.gt.f32.partialorder %v4643_v63, 0.0  ;;  %v4661_v15 = vmul.f32 0.01, %v4643_v63  ;;  %vm4806_vm13 = vcmp.gt.f32.partialorder %v4796_v5, 0.0  ;;  %v4814_v16 = vmul.f32 0.01, %v4796_v5  ;;  %11749 = vmatmul.mubr.msk.f32.gmra.mrb[116].mxu0 %vm640_vm1, %v4667_v4 }
 0xc17   : > { %11777 = vmatmul.mubr.msk.f32.gmra.mrb[116].mxu1 %vm640_vm1, %v4820_v13  ;;  %vm4652_vm14 = vcmp.gt.f32.partialorder %v4638_v10, 0.0  ;;  %v4660_v14 = vmul.f32 0.01, %v4638_v10  ;;  %vm4805_vm15 = vcmp.gt.f32.partialorder %v4791_v11, 0.0  ;;  %v4813_v17 = vmul.f32 0.01, %v4791_v11  ;;  %12985 = vmatpush3.bf16.msra.mxu0 %v12982_v53 }
 0xc18   : > { %13001 = vmatpush3.bf16.msra.mxu1 %v12982_v53  ;;  %v4669_v19 = vsel %vm4653_vm12, %v4643_v63, %v4661_v15  ;;  %v4822_v20 = vsel %vm4806_vm13, %v4796_v5, %v4814_v16  ;;  %12987 = vmatprep.subr.bf16.mxu0 %v12986_v23 }
 0xc19   : > { %v4668_v12 = vsel %vm4652_vm14, %v4638_v10, %v4660_v14  ;;  %v4821_v18 = vsel %vm4805_vm15, %v4791_v11, %v4813_v17  ;;  %13003 = vmatprep.subr.bf16.mxu1 %v12986_v23 }
 0xc1a   : > { %11751 = vmatprep.mubr.msk.f32.mxu0 %vm640_vm1, %v4668_v12  ;;  %11779 = vmatprep.mubr.msk.f32.mxu1 %vm640_vm1, %v4821_v18 }
 0xc1b   : > { %11752 = vmatmul.mubr.msk.f32.gmra.mrb[118].mxu0 %vm640_vm1, %v4669_v19  ;;  %11780 = vmatmul.mubr.msk.f32.gmra.mrb[118].mxu1 %vm640_vm1, %v4822_v20 }
 0xc1c   : > { %12989 = vmatpush3.bf16.msra.mxu0 %v12986_v23  ;;  %13005 = vmatpush3.bf16.msra.mxu1 %v12986_v23 }
 0xc1d   : > { %13007 = vmatprep.subr.bf16.mxu0 %v13006_v28  ;;  %13023 = vmatprep.subr.bf16.mxu1 %v13006_v28 }
 0xcdf   : > { %v11744_v29 = vpop.f32.mrb[112].mxu0 }
 0xce0   : > { %v11772_v27 = vpop.f32.mrb[112].mxu1  ;;  %v4936_v30 = vadd.f32 %v11744_v29, %v14466_v25  ;;  %v4930_v32 = vpop.f32.mrb[113].mxu0 }
 0xce1   : > { %v5089_v31 = vadd.f32 %v11772_v27, %v14466_v25  ;;  %v5083_v33 = vpop.f32.mrb[113].mxu1  ;;  %v4931_v34 = vadd.f32 %v14466_v25, %v4930_v32 }
 0xce2   : > { %v5084_v35 = vadd.f32 %v14466_v25, %v5083_v33  ;;  %vm4970_vm0 = vcmp.gt.f32.partialorder %v4936_v30, 0.0  ;;  %v4978_v40 = vmul.f32 0.01, %v4936_v30 }
 0xce3   : > { %vm5123_vm2 = vcmp.gt.f32.partialorder %v5089_v31, 0.0  ;;  %v5131_v41 = vmul.f32 0.01, %v5089_v31  ;;  %vm4969_vm3 = vcmp.gt.f32.partialorder %v4931_v34, 0.0  ;;  %v4977_v39 = vmul.f32 0.01, %v4931_v34 }
 0xce4   : > { %vm5122_vm4 = vcmp.gt.f32.partialorder %v5084_v35, 0.0  ;;  %v5130_v42 = vmul.f32 0.01, %v5084_v35  ;;  %v4986_v37 = vsel %vm4970_vm0, %v4936_v30, %v4978_v40  ;;  %v11747_v43 = vpop.f32.mrb[114].mxu0  ;;  %v11775_v44 = vpop.f32.mrb[114].mxu1  ;;  %v9792_v40 = vld [vmem:[%s15320_s3 + $0x408] sm:$0xff] }
 0xce5   : > { %v4946_v46 = vadd.f32 %v11747_v43, %v14466_v25  ;;  %v5099_v47 = vadd.f32 %v11775_v44, %v14466_v25  ;;  %v4940_v48 = vpop.f32.mrb[115].mxu0  ;;  %v5093_v49 = vpop.f32.mrb[115].mxu1  ;;  %v4985_v51 = vsel %vm4969_vm3, %v4931_v34, %v4977_v39  ;;  %v5139_v54 = vsel %vm5123_vm2, %v5089_v31, %v5131_v41  ;;  %v9771_v34 = vld [vmem:[%s15320_s3 + $0x3f0] sm:$0xff]  ;;  %v14532_v39 = vld [vmem:[%s15321_s4 + $0xe] ss:$0 sm:$0xff] }
 0xce6   : > { %v5138_v53 = vsel %vm5122_vm4, %v5084_v35, %v5130_v42  ;;  %v4941_v52 = vadd.f32 %v14466_v25, %v4940_v48  ;;  %v5094_v55 = vadd.f32 %v14466_v25, %v5093_v49  ;;  %11798 = vmatprep.mubr.msk.f32.mxu0 %vm640_vm1, %v4985_v51  ;;  %v9772_v35 = vld [vmem:[%s15320_s3 + $0x3f8] sm:$0xff]  ;;  %v13038_v41 = vpack.c.bf16 %v9792_v40, %v9791_v38  ;;  %v9793_v49 = vld [vmem:[%s15320_s3 + $0x410] sm:$0xff] }
 0xce7   : > { %11826 = vmatprep.mubr.msk.f32.mxu1 %vm640_vm1, %v5138_v53  ;;  %vm4972_vm5 = vcmp.gt.f32.partialorder %v4946_v46, 0.0  ;;  %v4980_v57 = vmul.f32 0.01, %v4946_v46  ;;  %vm5125_vm6 = vcmp.gt.f32.partialorder %v5099_v47, 0.0  ;;  %v5133_v58 = vmul.f32 0.01, %v5099_v47  ;;  %11799 = vmatmul.mubr.msk.f32.vlgmr.msra.gmra.mrb[120].mxu0 %vm640_vm1, %v4986_v37 }
 0xce8   : > { %11827 = vmatmul.mubr.msk.f32.vlgmr.msra.gmra.mrb[120].mxu1 %vm640_vm1, %v5139_v54  ;;  %vm4971_vm7 = vcmp.gt.f32.partialorder %v4941_v52, 0.0  ;;  %v4979_v59 = vmul.f32 0.01, %v4941_v52  ;;  %vm5124_vm8 = vcmp.gt.f32.partialorder %v5094_v55, 0.0  ;;  %v5132_v60 = vmul.f32 0.01, %v5094_v55  ;;  %13009 = vmatpush3.bf16.msra.mxu0 %v13006_v28 }
 0xce9   : > { %13025 = vmatpush3.bf16.msra.mxu1 %v13006_v28  ;;  %v11750_v61 = vpop.f32.mrb[116].mxu0  ;;  %v4988_v0 = vsel %vm4972_vm5, %v4946_v46, %v4980_v57  ;;  %13011 = vmatprep.subr.bf16.mxu0 %v13010_v45  ;;  %v5141_v9 = vsel %vm5125_vm6, %v5099_v47, %v5133_v58  ;;  %v13018_v36 = vpack.c.bf16 %v9772_v35, %v9771_v34  ;;  %v9794_v51 = vld [vmem:[%s15320_s3 + $0x418] sm:$0xff] }
 0xcea   : > { %v11778_v62 = vpop.f32.mrb[116].mxu1  ;;  %13027 = vmatprep.subr.bf16.mxu1 %v13010_v45  ;;  %v4956_v3 = vadd.f32 %v11750_v61, %v14466_v25  ;;  %v4950_v4 = vpop.f32.mrb[117].mxu0  ;;  %v4987_v5 = vsel %vm4971_vm7, %v4941_v52, %v4979_v59  ;;  %v5140_v6 = vsel %vm5124_vm8, %v5094_v55, %v5132_v60  ;;  %v13042_v58 = vpack.c.bf16 %v9794_v51, %v9793_v49  ;;  %v9817_v51 = vld [vmem:[%s15320_s3 + $0x440] sm:$0xff] }
 0xceb   : > { %v5109_v1 = vadd.f32 %v11778_v62, %v14466_v25  ;;  %v5103_v63 = vpop.f32.mrb[117].mxu1  ;;  %v4951_v7 = vadd.f32 %v14466_v25, %v4950_v4  ;;  %11801 = vmatprep.mubr.msk.f32.mxu0 %vm640_vm1, %v4987_v5  ;;  %11829 = vmatprep.mubr.msk.f32.mxu1 %vm640_vm1, %v5140_v6  ;;  %v9796_v5 = vld [vmem:[%s15320_s3 + $0x428] sm:$0xff] }
 0xcec   : > { %v5104_v8 = vadd.f32 %v14466_v25, %v5103_v63  ;;  %vm4974_vm9 = vcmp.gt.f32.partialorder %v4956_v3, 0.0  ;;  %v4982_v10 = vmul.f32 0.01, %v4956_v3  ;;  %11802 = vmatmul.mubr.msk.f32.gmra.mrb[122].mxu0 %vm640_vm1, %v4988_v0  ;;  %11830 = vmatmul.mubr.msk.f32.gmra.mrb[122].mxu1 %vm640_vm1, %v5141_v9  ;;  %v9795_v63 = vld [vmem:[%s15320_s3 + $0x420] sm:$0xff] }
 0xced   : > { %vm5127_vm10 = vcmp.gt.f32.partialorder %v5109_v1, 0.0  ;;  %v5135_v11 = vmul.f32 0.01, %v5109_v1  ;;  %vm4973_vm11 = vcmp.gt.f32.partialorder %v4951_v7, 0.0  ;;  %v4981_v13 = vmul.f32 0.01, %v4951_v7  ;;  %13013 = vmatpush3.bf16.msra.mxu0 %v13010_v45  ;;  %13029 = vmatpush3.bf16.msra.mxu1 %v13010_v45 }
 0xcee   : > { %vm5126_vm12 = vcmp.gt.f32.partialorder %v5104_v8, 0.0  ;;  %v5134_v15 = vmul.f32 0.01, %v5104_v8  ;;  %v11753_v16 = vpop.f32.mrb[118].mxu0  ;;  %v11781_v14 = vpop.f32.mrb[118].mxu1  ;;  %v4990_v17 = vsel %vm4974_vm9, %v4956_v3, %v4982_v10  ;;  %13015 = vmatprep.subr.bf16.mxu0 %v13014_v2  ;;  %13031 = vmatprep.subr.bf16.mxu1 %v13014_v2 }
 0xcef   : > { %v4966_v12 = vadd.f32 %v11753_v16, %v14466_v25  ;;  %v5119_v18 = vadd.f32 %v11781_v14, %v14466_v25  ;;  %v4960_v19 = vpop.f32.mrb[119].mxu0  ;;  %v5113_v20 = vpop.f32.mrb[119].mxu1  ;;  %v4989_v21 = vsel %vm4973_vm11, %v4951_v7, %v4981_v13  ;;  %v5143_v26 = vsel %vm5127_vm10, %v5109_v1, %v5135_v11 }
 0xcf0   : > { %v5142_v22 = vsel %vm5126_vm12, %v5104_v8, %v5134_v15  ;;  %v4961_v23 = vadd.f32 %v14466_v25, %v4960_v19  ;;  %v5114_v24 = vadd.f32 %v14466_v25, %v5113_v20  ;;  %11804 = vmatprep.mubr.msk.f32.mxu0 %vm640_vm1, %v4989_v21  ;;  %v13046_v15 = vpack.c.bf16 %v9796_v5, %v9795_v63 }
 0xcf1   : > { %11832 = vmatprep.mubr.msk.f32.mxu1 %vm640_vm1, %v5142_v22  ;;  %vm4976_vm13 = vcmp.gt.f32.partialorder %v4966_v12, 0.0  ;;  %v4984_v28 = vmul.f32 0.01, %v4966_v12  ;;  %vm5129_vm14 = vcmp.gt.f32.partialorder %v5119_v18, 0.0  ;;  %v5137_v29 = vmul.f32 0.01, %v5119_v18  ;;  %11805 = vmatmul.mubr.msk.f32.gmra.mrb[124].mxu0 %vm640_vm1, %v4990_v17 }
 0xcf2   : > { %11833 = vmatmul.mubr.msk.f32.gmra.mrb[124].mxu1 %vm640_vm1, %v5143_v26  ;;  %vm4975_vm15 = vcmp.gt.f32.partialorder %v4961_v23, 0.0  ;;  %v4983_v27 = vmul.f32 0.01, %v4961_v23  ;;  %vm5128_vm0 = vcmp.gt.f32.partialorder %v5114_v24, 0.0  ;;  %v5136_v30 = vmul.f32 0.01, %v5114_v24  ;;  %13017 = vmatpush3.bf16.msra.mxu0 %v13014_v2 }
 0xcf3   : > { %13033 = vmatpush3.bf16.msra.mxu1 %v13014_v2  ;;  %v4992_v32 = vsel %vm4976_vm13, %v4966_v12, %v4984_v28  ;;  %v5145_v33 = vsel %vm5129_vm14, %v5119_v18, %v5137_v29  ;;  %13019 = vmatprep.subr.bf16.mxu0 %v13018_v36 }
 0xcf4   : > { %v4991_v25 = vsel %vm4975_vm15, %v4961_v23, %v4983_v27  ;;  %v5144_v31 = vsel %vm5128_vm0, %v5114_v24, %v5136_v30  ;;  %13035 = vmatprep.subr.bf16.mxu1 %v13018_v36 }
 0xcf5   : > { %11807 = vmatprep.mubr.msk.f32.mxu0 %vm640_vm1, %v4991_v25  ;;  %11835 = vmatprep.mubr.msk.f32.mxu1 %vm640_vm1, %v5144_v31 }
 0xcf6   : > { %11808 = vmatmul.mubr.msk.f32.gmra.mrb[126].mxu0 %vm640_vm1, %v4992_v32  ;;  %11836 = vmatmul.mubr.msk.f32.gmra.mrb[126].mxu1 %vm640_vm1, %v5145_v33 }
 0xcf7   : > { %13021 = vmatpush3.bf16.msra.mxu0 %v13018_v36  ;;  %13037 = vmatpush3.bf16.msra.mxu1 %v13018_v36 }
 0xcf8   : > { %13039 = vmatprep.subr.bf16.mxu0 %v13038_v41  ;;  %13055 = vmatprep.subr.bf16.mxu1 %v13038_v41 }
 0xdba   : > { %v11800_v42 = vpop.f32.mrb[120].mxu0 }
 0xdbb   : > { %v11828_v37 = vpop.f32.mrb[120].mxu1  ;;  %v5259_v43 = vadd.f32 %v11800_v42, %v14532_v39  ;;  %v5253_v45 = vpop.f32.mrb[121].mxu0 }
 0xdbc   : > { %v5412_v44 = vadd.f32 %v11828_v37, %v14532_v39  ;;  %v5406_v46 = vpop.f32.mrb[121].mxu1  ;;  %v5254_v47 = vadd.f32 %v14532_v39, %v5253_v45 }
 0xdbd   : > { %v5407_v48 = vadd.f32 %v14532_v39, %v5406_v46  ;;  %vm5293_vm2 = vcmp.gt.f32.partialorder %v5259_v43, 0.0  ;;  %v5301_v53 = vmul.f32 0.01, %v5259_v43 }
 0xdbe   : > { %vm5446_vm3 = vcmp.gt.f32.partialorder %v5412_v44, 0.0  ;;  %v5454_v54 = vmul.f32 0.01, %v5412_v44  ;;  %vm5292_vm4 = vcmp.gt.f32.partialorder %v5254_v47, 0.0  ;;  %v5300_v52 = vmul.f32 0.01, %v5254_v47 }
 0xdbf   : > { %vm5445_vm5 = vcmp.gt.f32.partialorder %v5407_v48, 0.0  ;;  %v5453_v55 = vmul.f32 0.01, %v5407_v48  ;;  %v5309_v50 = vsel %vm5293_vm2, %v5259_v43, %v5301_v53  ;;  %v11803_v56 = vpop.f32.mrb[122].mxu0  ;;  %v11831_v57 = vpop.f32.mrb[122].mxu1  ;;  %v9818_v53 = vld [vmem:[%s15320_s3 + $0x448] sm:$0xff] }
 0xdc0   : > { %v5269_v59 = vadd.f32 %v11803_v56, %v14532_v39  ;;  %v5422_v60 = vadd.f32 %v11831_v57, %v14532_v39  ;;  %v5263_v61 = vpop.f32.mrb[123].mxu0  ;;  %v5416_v62 = vpop.f32.mrb[123].mxu1  ;;  %v5308_v0 = vsel %vm5292_vm4, %v5254_v47, %v5300_v52  ;;  %v5462_v3 = vsel %vm5446_vm3, %v5412_v44, %v5454_v54  ;;  %v9797_v47 = vld [vmem:[%s15320_s3 + $0x430] sm:$0xff]  ;;  %v14598_v52 = vld [vmem:[%s15321_s4 + $0xf] ss:$0 sm:$0xff] }
 0xdc1   : > { %v5461_v2 = vsel %vm5445_vm5, %v5407_v48, %v5453_v55  ;;  %v5264_v1 = vadd.f32 %v14532_v39, %v5263_v61  ;;  %v5417_v4 = vadd.f32 %v14532_v39, %v5416_v62  ;;  %11854 = vmatprep.mubr.msk.f32.mxu0 %vm640_vm1, %v5308_v0  ;;  %v9798_v48 = vld [vmem:[%s15320_s3 + $0x438] sm:$0xff]  ;;  %v13070_v54 = vpack.c.bf16 %v9818_v53, %v9817_v51  ;;  %v9819_v62 = vld [vmem:[%s15320_s3 + $0x450] sm:$0xff] }
 0xdc2   : > { %11882 = vmatprep.mubr.msk.f32.mxu1 %vm640_vm1, %v5461_v2  ;;  %vm5295_vm6 = vcmp.gt.f32.partialorder %v5269_v59, 0.0  ;;  %v5303_v6 = vmul.f32 0.01, %v5269_v59  ;;  %vm5448_vm7 = vcmp.gt.f32.partialorder %v5422_v60, 0.0  ;;  %v5456_v7 = vmul.f32 0.01, %v5422_v60  ;;  %11855 = vmatmul.mubr.msk.f32.vlgmr.msra.gmra.mrb[128].mxu0 %vm640_vm1, %v5309_v50 }
 0xdc3   : > { %11883 = vmatmul.mubr.msk.f32.vlgmr.msra.gmra.mrb[128].mxu1 %vm640_vm1, %v5462_v3  ;;  %vm5294_vm8 = vcmp.gt.f32.partialorder %v5264_v1, 0.0  ;;  %v5302_v8 = vmul.f32 0.01, %v5264_v1  ;;  %vm5447_vm9 = vcmp.gt.f32.partialorder %v5417_v4, 0.0  ;;  %v5455_v9 = vmul.f32 0.01, %v5417_v4  ;;  %13041 = vmatpush3.bf16.msra.mxu0 %v13038_v41 }
 0xdc4   : > { %13057 = vmatpush3.bf16.msra.mxu1 %v13038_v41  ;;  %v11806_v10 = vpop.f32.mrb[124].mxu0  ;;  %v5311_v13 = vsel %vm5295_vm6, %v5269_v59, %v5303_v6  ;;  %13043 = vmatprep.subr.bf16.mxu0 %v13042_v58  ;;  %v5464_v22 = vsel %vm5448_vm7, %v5422_v60, %v5456_v7  ;;  %v13050_v49 = vpack.c.bf16 %v9798_v48, %v9797_v47  ;;  %v9820_v0 = vld [vmem:[%s15320_s3 + $0x458] sm:$0xff] }
 0xdc5   : > { %v11834_v11 = vpop.f32.mrb[124].mxu1  ;;  %13059 = vmatprep.subr.bf16.mxu1 %v13042_v58  ;;  %v5279_v16 = vadd.f32 %v11806_v10, %v14532_v39  ;;  %v5273_v17 = vpop.f32.mrb[125].mxu0  ;;  %v5310_v18 = vsel %vm5294_vm8, %v5264_v1, %v5302_v8  ;;  %v5463_v19 = vsel %vm5447_vm9, %v5417_v4, %v5455_v9  ;;  %v13074_v7 = vpack.c.bf16 %v9820_v0, %v9819_v62  ;;  %v9843_v0 = vld [vmem:[%s15320_s3 + $0x480] sm:$0xff] }
 0xdc6   : > { %v5432_v14 = vadd.f32 %v11834_v11, %v14532_v39  ;;  %v5426_v12 = vpop.f32.mrb[125].mxu1  ;;  %v5274_v20 = vadd.f32 %v14532_v39, %v5273_v17  ;;  %11857 = vmatprep.mubr.msk.f32.mxu0 %vm640_vm1, %v5310_v18  ;;  %11885 = vmatprep.mubr.msk.f32.mxu1 %vm640_vm1, %v5463_v19  ;;  %v9822_v18 = vld [vmem:[%s15320_s3 + $0x468] sm:$0xff] }
 0xdc7   : > { %v5427_v21 = vadd.f32 %v14532_v39, %v5426_v12  ;;  %vm5297_vm10 = vcmp.gt.f32.partialorder %v5279_v16, 0.0  ;;  %v5305_v23 = vmul.f32 0.01, %v5279_v16  ;;  %11858 = vmatmul.mubr.msk.f32.gmra.mrb[130].mxu0 %vm640_vm1, %v5311_v13  ;;  %11886 = vmatmul.mubr.msk.f32.gmra.mrb[130].mxu1 %vm640_vm1, %v5464_v22  ;;  %v9821_v12 = vld [vmem:[%s15320_s3 + $0x460] sm:$0xff] }
 0xdc8   : > { %vm5450_vm11 = vcmp.gt.f32.partialorder %v5432_v14, 0.0  ;;  %v5458_v24 = vmul.f32 0.01, %v5432_v14  ;;  %vm5296_vm12 = vcmp.gt.f32.partialorder %v5274_v20, 0.0  ;;  %v5304_v26 = vmul.f32 0.01, %v5274_v20  ;;  %13045 = vmatpush3.bf16.msra.mxu0 %v13042_v58  ;;  %13061 = vmatpush3.bf16.msra.mxu1 %v13042_v58 }
 0xdc9   : > { %vm5449_vm13 = vcmp.gt.f32.partialorder %v5427_v21, 0.0  ;;  %v5457_v28 = vmul.f32 0.01, %v5427_v21  ;;  %v11809_v29 = vpop.f32.mrb[126].mxu0  ;;  %v11837_v27 = vpop.f32.mrb[126].mxu1  ;;  %v5313_v30 = vsel %vm5297_vm10, %v5279_v16, %v5305_v23  ;;  %13047 = vmatprep.subr.bf16.mxu0 %v13046_v15  ;;  %13063 = vmatprep.subr.bf16.mxu1 %v13046_v15 }
 0xdca   : > { %v5289_v25 = vadd.f32 %v11809_v29, %v14532_v39  ;;  %v5442_v31 = vadd.f32 %v11837_v27, %v14532_v39  ;;  %v5283_v32 = vpop.f32.mrb[127].mxu0  ;;  %v5436_v33 = vpop.f32.mrb[127].mxu1  ;;  %v5312_v34 = vsel %vm5296_vm12, %v5274_v20, %v5304_v26  ;;  %v5466_v40 = vsel %vm5450_vm11, %v5432_v14, %v5458_v24 }
 0xdcb   : > { %v5465_v35 = vsel %vm5449_vm13, %v5427_v21, %v5457_v28  ;;  %v5284_v36 = vadd.f32 %v14532_v39, %v5283_v32  ;;  %v5437_v38 = vadd.f32 %v14532_v39, %v5436_v33  ;;  %11860 = vmatprep.mubr.msk.f32.mxu0 %vm640_vm1, %v5312_v34  ;;  %v13078_v28 = vpack.c.bf16 %v9822_v18, %v9821_v12 }
 0xdcc   : > { %11888 = vmatprep.mubr.msk.f32.mxu1 %vm640_vm1, %v5465_v35  ;;  %vm5299_vm14 = vcmp.gt.f32.partialorder %v5289_v25, 0.0  ;;  %v5307_v41 = vmul.f32 0.01, %v5289_v25  ;;  %vm5452_vm15 = vcmp.gt.f32.partialorder %v5442_v31, 0.0  ;;  %v5460_v42 = vmul.f32 0.01, %v5442_v31  ;;  %11861 = vmatmul.mubr.msk.f32.gmra.mrb[132].mxu0 %vm640_vm1, %v5313_v30 }
 0xdcd   : > { %11889 = vmatmul.mubr.msk.f32.gmra.mrb[132].mxu1 %vm640_vm1, %v5466_v40  ;;  %vm5298_vm0 = vcmp.gt.f32.partialorder %v5284_v36, 0.0  ;;  %v5306_v37 = vmul.f32 0.01, %v5284_v36  ;;  %vm5451_vm2 = vcmp.gt.f32.partialorder %v5437_v38, 0.0  ;;  %v5459_v43 = vmul.f32 0.01, %v5437_v38  ;;  %13049 = vmatpush3.bf16.msra.mxu0 %v13046_v15 }
 0xdce   : > { %13065 = vmatpush3.bf16.msra.mxu1 %v13046_v15  ;;  %v5315_v45 = vsel %vm5299_vm14, %v5289_v25, %v5307_v41  ;;  %v5468_v46 = vsel %vm5452_vm15, %v5442_v31, %v5460_v42  ;;  %13051 = vmatprep.subr.bf16.mxu0 %v13050_v49 }
 0xdcf   : > { %v5314_v39 = vsel %vm5298_vm0, %v5284_v36, %v5306_v37  ;;  %v5467_v44 = vsel %vm5451_vm2, %v5437_v38, %v5459_v43  ;;  %13067 = vmatprep.subr.bf16.mxu1 %v13050_v49 }
 0xdd0   : > { %11863 = vmatprep.mubr.msk.f32.mxu0 %vm640_vm1, %v5314_v39  ;;  %11891 = vmatprep.mubr.msk.f32.mxu1 %vm640_vm1, %v5467_v44 }
 0xdd1   : > { %11864 = vmatmul.mubr.msk.f32.gmra.mrb[134].mxu0 %vm640_vm1, %v5315_v45  ;;  %11892 = vmatmul.mubr.msk.f32.gmra.mrb[134].mxu1 %vm640_vm1, %v5468_v46 }
 0xdd2   : > { %13053 = vmatpush3.bf16.msra.mxu0 %v13050_v49  ;;  %13069 = vmatpush3.bf16.msra.mxu1 %v13050_v49 }
 0xdd3   : > { %13071 = vmatprep.subr.bf16.mxu0 %v13070_v54  ;;  %13087 = vmatprep.subr.bf16.mxu1 %v13070_v54 }
 0xe95   : > { %v11856_v55 = vpop.f32.mrb[128].mxu0 }
 0xe96   : > { %v11884_v50 = vpop.f32.mrb[128].mxu1  ;;  %v5582_v56 = vadd.f32 %v11856_v55, %v14598_v52  ;;  %v5576_v58 = vpop.f32.mrb[129].mxu0 }
 0xe97   : > { %v5735_v57 = vadd.f32 %v11884_v50, %v14598_v52  ;;  %v5729_v59 = vpop.f32.mrb[129].mxu1  ;;  %v5577_v60 = vadd.f32 %v14598_v52, %v5576_v58 }
 0xe98   : > { %v5730_v61 = vadd.f32 %v14598_v52, %v5729_v59  ;;  %vm5616_vm3 = vcmp.gt.f32.partialorder %v5582_v56, 0.0  ;;  %v5624_v2 = vmul.f32 0.01, %v5582_v56 }
 0xe99   : > { %vm5769_vm4 = vcmp.gt.f32.partialorder %v5735_v57, 0.0  ;;  %v5777_v3 = vmul.f32 0.01, %v5735_v57  ;;  %vm5615_vm5 = vcmp.gt.f32.partialorder %v5577_v60, 0.0  ;;  %v5623_v1 = vmul.f32 0.01, %v5577_v60 }
 0xe9a   : > { %vm5768_vm6 = vcmp.gt.f32.partialorder %v5730_v61, 0.0  ;;  %v5776_v4 = vmul.f32 0.01, %v5730_v61  ;;  %v5632_v63 = vsel %vm5616_vm3, %v5582_v56, %v5624_v2  ;;  %v11859_v5 = vpop.f32.mrb[130].mxu0  ;;  %v11887_v6 = vpop.f32.mrb[130].mxu1  ;;  %v9844_v2 = vld [vmem:[%s15320_s3 + $0x488] sm:$0xff] }
 0xe9b   : > { %v5592_v8 = vadd.f32 %v11859_v5, %v14598_v52  ;;  %v5745_v9 = vadd.f32 %v11887_v6, %v14598_v52  ;;  %v5586_v10 = vpop.f32.mrb[131].mxu0  ;;  %v5739_v11 = vpop.f32.mrb[131].mxu1  ;;  %v5631_v13 = vsel %vm5615_vm5, %v5577_v60, %v5623_v1  ;;  %v5785_v16 = vsel %vm5769_vm4, %v5735_v57, %v5777_v3  ;;  %v9823_v60 = vld [vmem:[%s15320_s3 + $0x470] sm:$0xff] }
 0xe9c   : > { %v5784_v15 = vsel %vm5768_vm6, %v5730_v61, %v5776_v4  ;;  %v5587_v14 = vadd.f32 %v14598_v52, %v5586_v10  ;;  %v5740_v17 = vadd.f32 %v14598_v52, %v5739_v11  ;;  %11910 = vmatprep.mubr.msk.f32.mxu0 %vm640_vm1, %v5631_v13  ;;  %v9824_v61 = vld [vmem:[%s15320_s3 + $0x478] sm:$0xff]  ;;  %v13102_v3 = vpack.c.bf16 %v9844_v2, %v9843_v0  ;;  %v14664_v1 = vld [vmem:[%s15321_s4 + $0x10] ss:$0 sm:$0xff] }
 0xe9d   : > { %11938 = vmatprep.mubr.msk.f32.mxu1 %vm640_vm1, %v5784_v15  ;;  %vm5618_vm7 = vcmp.gt.f32.partialorder %v5592_v8, 0.0  ;;  %v5626_v19 = vmul.f32 0.01, %v5592_v8  ;;  %vm5771_vm8 = vcmp.gt.f32.partialorder %v5745_v9, 0.0  ;;  %v5779_v20 = vmul.f32 0.01, %v5745_v9  ;;  %11911 = vmatmul.mubr.msk.f32.vlgmr.msra.gmra.mrb[136].mxu0 %vm640_vm1, %v5632_v63 }
 0xe9e   : > { %11939 = vmatmul.mubr.msk.f32.vlgmr.msra.gmra.mrb[136].mxu1 %vm640_vm1, %v5785_v16  ;;  %vm5617_vm9 = vcmp.gt.f32.partialorder %v5587_v14, 0.0  ;;  %v5625_v21 = vmul.f32 0.01, %v5587_v14  ;;  %vm5770_vm10 = vcmp.gt.f32.partialorder %v5740_v17, 0.0  ;;  %v5778_v22 = vmul.f32 0.01, %v5740_v17  ;;  %13073 = vmatpush3.bf16.msra.mxu0 %v13070_v54 }
 0xe9f   : > { %13089 = vmatpush3.bf16.msra.mxu1 %v13070_v54  ;;  %v11862_v23 = vpop.f32.mrb[132].mxu0  ;;  %v5634_v26 = vsel %vm5618_vm7, %v5592_v8, %v5626_v19  ;;  %13075 = vmatprep.subr.bf16.mxu0 %v13074_v7  ;;  %v5787_v35 = vsel %vm5771_vm8, %v5745_v9, %v5779_v20  ;;  %v13082_v62 = vpack.c.bf16 %v9824_v61, %v9823_v60  ;;  %v9845_v11 = vld [vmem:[%s15320_s3 + $0x490] sm:$0xff]  ;;  %v9846_v13 = vld [vmem:[%s15320_s3 + $0x498] sm:$0xff] }
 0xea0   : > { %v11890_v24 = vpop.f32.mrb[132].mxu1  ;;  %13091 = vmatprep.subr.bf16.mxu1 %v13074_v7  ;;  %v5602_v29 = vadd.f32 %v11862_v23, %v14598_v52  ;;  %v5596_v30 = vpop.f32.mrb[133].mxu0  ;;  %v5633_v31 = vsel %vm5617_vm9, %v5587_v14, %v5625_v21  ;;  %v5786_v32 = vsel %vm5770_vm10, %v5740_v17, %v5778_v22  ;;  %v13106_v20 = vpack.c.bf16 %v9846_v13, %v9845_v11  ;;  %v9869_v13 = vld [vmem:[%s15320_s3 + $0x4c0] sm:$0xff] }
 0xea1   : > { %v5755_v27 = vadd.f32 %v11890_v24, %v14598_v52  ;;  %v5749_v25 = vpop.f32.mrb[133].mxu1  ;;  %v5597_v33 = vadd.f32 %v14598_v52, %v5596_v30  ;;  %11913 = vmatprep.mubr.msk.f32.mxu0 %vm640_vm1, %v5633_v31  ;;  %11941 = vmatprep.mubr.msk.f32.mxu1 %vm640_vm1, %v5786_v32  ;;  %v9848_v31 = vld [vmem:[%s15320_s3 + $0x4a8] sm:$0xff] }
 0xea2   : > { %v5750_v34 = vadd.f32 %v14598_v52, %v5749_v25  ;;  %vm5620_vm11 = vcmp.gt.f32.partialorder %v5602_v29, 0.0  ;;  %v5628_v36 = vmul.f32 0.01, %v5602_v29  ;;  %11914 = vmatmul.mubr.msk.f32.gmra.mrb[138].mxu0 %vm640_vm1, %v5634_v26  ;;  %11942 = vmatmul.mubr.msk.f32.gmra.mrb[138].mxu1 %vm640_vm1, %v5787_v35  ;;  %v9847_v25 = vld [vmem:[%s15320_s3 + $0x4a0] sm:$0xff] }
 0xea3   : > { %vm5773_vm12 = vcmp.gt.f32.partialorder %v5755_v27, 0.0  ;;  %v5781_v38 = vmul.f32 0.01, %v5755_v27  ;;  %vm5619_vm13 = vcmp.gt.f32.partialorder %v5597_v33, 0.0  ;;  %v5627_v40 = vmul.f32 0.01, %v5597_v33  ;;  %13077 = vmatpush3.bf16.msra.mxu0 %v13074_v7  ;;  %13093 = vmatpush3.bf16.msra.mxu1 %v13074_v7 }
 0xea4   : > { %vm5772_vm14 = vcmp.gt.f32.partialorder %v5750_v34, 0.0  ;;  %v5780_v41 = vmul.f32 0.01, %v5750_v34  ;;  %v11865_v42 = vpop.f32.mrb[134].mxu0  ;;  %v11893_v37 = vpop.f32.mrb[134].mxu1  ;;  %v5636_v43 = vsel %vm5620_vm11, %v5602_v29, %v5628_v36  ;;  %13079 = vmatprep.subr.bf16.mxu0 %v13078_v28  ;;  %13095 = vmatprep.subr.bf16.mxu1 %v13078_v28 }
 0xea5   : > { %v5612_v39 = vadd.f32 %v11865_v42, %v14598_v52  ;;  %v5765_v44 = vadd.f32 %v11893_v37, %v14598_v52  ;;  %v5606_v45 = vpop.f32.mrb[135].mxu0  ;;  %v5759_v46 = vpop.f32.mrb[135].mxu1  ;;  %v5635_v47 = vsel %vm5619_vm13, %v5597_v33, %v5627_v40  ;;  %v5789_v53 = vsel %vm5773_vm12, %v5755_v27, %v5781_v38 }
 0xea6   : > { %v5788_v48 = vsel %vm5772_vm14, %v5750_v34, %v5780_v41  ;;  %v5607_v49 = vadd.f32 %v14598_v52, %v5606_v45  ;;  %v5760_v51 = vadd.f32 %v14598_v52, %v5759_v46  ;;  %11916 = vmatprep.mubr.msk.f32.mxu0 %vm640_vm1, %v5635_v47  ;;  %v13110_v41 = vpack.c.bf16 %v9848_v31, %v9847_v25 }
 0xea7   : > { %11944 = vmatprep.mubr.msk.f32.mxu1 %vm640_vm1, %v5788_v48  ;;  %vm5622_vm15 = vcmp.gt.f32.partialorder %v5612_v39, 0.0  ;;  %v5630_v54 = vmul.f32 0.01, %v5612_v39  ;;  %vm5775_vm0 = vcmp.gt.f32.partialorder %v5765_v44, 0.0  ;;  %v5783_v55 = vmul.f32 0.01, %v5765_v44  ;;  %11917 = vmatmul.mubr.msk.f32.gmra.mrb[140].mxu0 %vm640_vm1, %v5636_v43 }
 0xea8   : > { %11945 = vmatmul.mubr.msk.f32.gmra.mrb[140].mxu1 %vm640_vm1, %v5789_v53  ;;  %vm5621_vm2 = vcmp.gt.f32.partialorder %v5607_v49, 0.0  ;;  %v5629_v50 = vmul.f32 0.01, %v5607_v49  ;;  %vm5774_vm3 = vcmp.gt.f32.partialorder %v5760_v51, 0.0  ;;  %v5782_v56 = vmul.f32 0.01, %v5760_v51  ;;  %13081 = vmatpush3.bf16.msra.mxu0 %v13078_v28 }
 0xea9   : > { %13097 = vmatpush3.bf16.msra.mxu1 %v13078_v28  ;;  %v5638_v58 = vsel %vm5622_vm15, %v5612_v39, %v5630_v54  ;;  %v5791_v59 = vsel %vm5775_vm0, %v5765_v44, %v5783_v55  ;;  %13083 = vmatprep.subr.bf16.mxu0 %v13082_v62 }
 0xeaa   : > { %v5637_v52 = vsel %vm5621_vm2, %v5607_v49, %v5629_v50  ;;  %v5790_v57 = vsel %vm5774_vm3, %v5760_v51, %v5782_v56  ;;  %13099 = vmatprep.subr.bf16.mxu1 %v13082_v62 }
 0xeab   : > { %11919 = vmatprep.mubr.msk.f32.mxu0 %vm640_vm1, %v5637_v52  ;;  %11947 = vmatprep.mubr.msk.f32.mxu1 %vm640_vm1, %v5790_v57 }
 0xeac   : > { %11920 = vmatmul.mubr.msk.f32.gmra.mrb[142].mxu0 %vm640_vm1, %v5638_v58  ;;  %11948 = vmatmul.mubr.msk.f32.gmra.mrb[142].mxu1 %vm640_vm1, %v5791_v59 }
 0xead   : > { %13085 = vmatpush3.bf16.msra.mxu0 %v13082_v62  ;;  %13101 = vmatpush3.bf16.msra.mxu1 %v13082_v62 }
 0xeae   : > { %13103 = vmatprep.subr.bf16.mxu0 %v13102_v3  ;;  %13119 = vmatprep.subr.bf16.mxu1 %v13102_v3 }
 0xf70   : > { %v11912_v4 = vpop.f32.mrb[136].mxu0 }
 0xf71   : > { %v11940_v63 = vpop.f32.mrb[136].mxu1  ;;  %v5905_v5 = vadd.f32 %v11912_v4, %v14664_v1  ;;  %v5899_v7 = vpop.f32.mrb[137].mxu0 }
 0xf72   : > { %v6058_v6 = vadd.f32 %v11940_v63, %v14664_v1  ;;  %v6052_v8 = vpop.f32.mrb[137].mxu1  ;;  %v5900_v9 = vadd.f32 %v14664_v1, %v5899_v7 }
 0xf73   : > { %v6053_v10 = vadd.f32 %v14664_v1, %v6052_v8  ;;  %vm5939_vm4 = vcmp.gt.f32.partialorder %v5905_v5, 0.0  ;;  %v5947_v15 = vmul.f32 0.01, %v5905_v5 }
 0xf74   : > { %vm6092_vm5 = vcmp.gt.f32.partialorder %v6058_v6, 0.0  ;;  %v6100_v16 = vmul.f32 0.01, %v6058_v6  ;;  %vm5938_vm6 = vcmp.gt.f32.partialorder %v5900_v9, 0.0  ;;  %v5946_v14 = vmul.f32 0.01, %v5900_v9 }
 0xf75   : > { %vm6091_vm7 = vcmp.gt.f32.partialorder %v6053_v10, 0.0  ;;  %v6099_v17 = vmul.f32 0.01, %v6053_v10  ;;  %v5955_v12 = vsel %vm5939_vm4, %v5905_v5, %v5947_v15  ;;  %v11915_v18 = vpop.f32.mrb[138].mxu0  ;;  %v11943_v19 = vpop.f32.mrb[138].mxu1  ;;  %v9870_v15 = vld [vmem:[%s15320_s3 + $0x4c8] sm:$0xff] }
 0xf76   : > { %v5915_v21 = vadd.f32 %v11915_v18, %v14664_v1  ;;  %v6068_v22 = vadd.f32 %v11943_v19, %v14664_v1  ;;  %v5909_v23 = vpop.f32.mrb[139].mxu0  ;;  %v6062_v24 = vpop.f32.mrb[139].mxu1  ;;  %v5954_v26 = vsel %vm5938_vm6, %v5900_v9, %v5946_v14  ;;  %v6108_v29 = vsel %vm6092_vm5, %v6058_v6, %v6100_v16  ;;  %v9849_v9 = vld [vmem:[%s15320_s3 + $0x4b0] sm:$0xff] }
 0xf77   : > { %v6107_v28 = vsel %vm6091_vm7, %v6053_v10, %v6099_v17  ;;  %v5910_v27 = vadd.f32 %v14664_v1, %v5909_v23  ;;  %v6063_v30 = vadd.f32 %v14664_v1, %v6062_v24  ;;  %11966 = vmatprep.mubr.msk.f32.mxu0 %vm640_vm1, %v5954_v26  ;;  %v9850_v10 = vld [vmem:[%s15320_s3 + $0x4b8] sm:$0xff]  ;;  %v13134_v16 = vpack.c.bf16 %v9870_v15, %v9869_v13  ;;  %v14730_v14 = vld [vmem:[%s15321_s4 + $0x11] ss:$0 sm:$0xff] }
 0xf78   : > { %11994 = vmatprep.mubr.msk.f32.mxu1 %vm640_vm1, %v6107_v28  ;;  %vm5941_vm8 = vcmp.gt.f32.partialorder %v5915_v21, 0.0  ;;  %v5949_v32 = vmul.f32 0.01, %v5915_v21  ;;  %vm6094_vm9 = vcmp.gt.f32.partialorder %v6068_v22, 0.0  ;;  %v6102_v33 = vmul.f32 0.01, %v6068_v22  ;;  %11967 = vmatmul.mubr.msk.f32.vlgmr.msra.gmra.mrb[144].mxu0 %vm640_vm1, %v5955_v12 }
 0xf79   : > { %11995 = vmatmul.mubr.msk.f32.vlgmr.msra.gmra.mrb[144].mxu1 %vm640_vm1, %v6108_v29  ;;  %vm5940_vm10 = vcmp.gt.f32.partialorder %v5910_v27, 0.0  ;;  %v5948_v34 = vmul.f32 0.01, %v5910_v27  ;;  %vm6093_vm11 = vcmp.gt.f32.partialorder %v6063_v30, 0.0  ;;  %v6101_v35 = vmul.f32 0.01, %v6063_v30  ;;  %13105 = vmatpush3.bf16.msra.mxu0 %v13102_v3 }
 0xf7a   : > { %13121 = vmatpush3.bf16.msra.mxu1 %v13102_v3  ;;  %v11918_v36 = vpop.f32.mrb[140].mxu0  ;;  %v5957_v40 = vsel %vm5941_vm8, %v5915_v21, %v5949_v32  ;;  %13107 = vmatprep.subr.bf16.mxu0 %v13106_v20  ;;  %v6110_v48 = vsel %vm6094_vm9, %v6068_v22, %v6102_v33  ;;  %v13114_v11 = vpack.c.bf16 %v9850_v10, %v9849_v9  ;;  %v9871_v24 = vld [vmem:[%s15320_s3 + $0x4d0] sm:$0xff]  ;;  %v9872_v26 = vld [vmem:[%s15320_s3 + $0x4d8] sm:$0xff] }
 0xf7b   : > { %v11946_v38 = vpop.f32.mrb[140].mxu1  ;;  %13123 = vmatprep.subr.bf16.mxu1 %v13106_v20  ;;  %v5925_v42 = vadd.f32 %v11918_v36, %v14664_v1  ;;  %v5919_v43 = vpop.f32.mrb[141].mxu0  ;;  %v5956_v44 = vsel %vm5940_vm10, %v5910_v27, %v5948_v34  ;;  %v6109_v45 = vsel %vm6093_vm11, %v6063_v30, %v6101_v35  ;;  %v13138_v33 = vpack.c.bf16 %v9872_v26, %v9871_v24  ;;  %v9895_v26 = vld [vmem:[%s15320_s3 + $0x500] sm:$0xff] }
 0xf7c   : > { %v6078_v37 = vadd.f32 %v11946_v38, %v14664_v1  ;;  %v6072_v39 = vpop.f32.mrb[141].mxu1  ;;  %v5920_v46 = vadd.f32 %v14664_v1, %v5919_v43  ;;  %11969 = vmatprep.mubr.msk.f32.mxu0 %vm640_vm1, %v5956_v44  ;;  %11997 = vmatprep.mubr.msk.f32.mxu1 %vm640_vm1, %v6109_v45  ;;  %v9874_v44 = vld [vmem:[%s15320_s3 + $0x4e8] sm:$0xff] }
 0xf7d   : > { %v6073_v47 = vadd.f32 %v14664_v1, %v6072_v39  ;;  %vm5943_vm12 = vcmp.gt.f32.partialorder %v5925_v42, 0.0  ;;  %v5951_v49 = vmul.f32 0.01, %v5925_v42  ;;  %11970 = vmatmul.mubr.msk.f32.gmra.mrb[146].mxu0 %vm640_vm1, %v5957_v40  ;;  %11998 = vmatmul.mubr.msk.f32.gmra.mrb[146].mxu1 %vm640_vm1, %v6110_v48  ;;  %v9873_v39 = vld [vmem:[%s15320_s3 + $0x4e0] sm:$0xff] }
 0xf7e   : > { %vm6096_vm13 = vcmp.gt.f32.partialorder %v6078_v37, 0.0  ;;  %v6104_v51 = vmul.f32 0.01, %v6078_v37  ;;  %vm5942_vm14 = vcmp.gt.f32.partialorder %v5920_v46, 0.0  ;;  %v5950_v53 = vmul.f32 0.01, %v5920_v46  ;;  %13109 = vmatpush3.bf16.msra.mxu0 %v13106_v20  ;;  %13125 = vmatpush3.bf16.msra.mxu1 %v13106_v20 }
 0xf7f   : > { %vm6095_vm15 = vcmp.gt.f32.partialorder %v6073_v47, 0.0  ;;  %v6103_v54 = vmul.f32 0.01, %v6073_v47  ;;  %v11921_v55 = vpop.f32.mrb[142].mxu0  ;;  %v11949_v50 = vpop.f32.mrb[142].mxu1  ;;  %v5959_v56 = vsel %vm5943_vm12, %v5925_v42, %v5951_v49  ;;  %13111 = vmatprep.subr.bf16.mxu0 %v13110_v41  ;;  %13127 = vmatprep.subr.bf16.mxu1 %v13110_v41 }
 0xf80   : > { %v5935_v52 = vadd.f32 %v11921_v55, %v14664_v1  ;;  %v6088_v57 = vadd.f32 %v11949_v50, %v14664_v1  ;;  %v5929_v58 = vpop.f32.mrb[143].mxu0  ;;  %v6082_v59 = vpop.f32.mrb[143].mxu1  ;;  %v5958_v60 = vsel %vm5942_vm14, %v5920_v46, %v5950_v53  ;;  %v6112_v2 = vsel %vm6096_vm13, %v6078_v37, %v6104_v51 }
 0xf81   : > { %v6111_v61 = vsel %vm6095_vm15, %v6073_v47, %v6103_v54  ;;  %v5930_v62 = vadd.f32 %v14664_v1, %v5929_v58  ;;  %v6083_v0 = vadd.f32 %v14664_v1, %v6082_v59  ;;  %11972 = vmatprep.mubr.msk.f32.mxu0 %vm640_vm1, %v5958_v60  ;;  %v13142_v54 = vpack.c.bf16 %v9874_v44, %v9873_v39 }
 0xf82   : > { %12000 = vmatprep.mubr.msk.f32.mxu1 %vm640_vm1, %v6111_v61  ;;  %vm5945_vm0 = vcmp.gt.f32.partialorder %v5935_v52, 0.0  ;;  %v5953_v3 = vmul.f32 0.01, %v5935_v52  ;;  %vm6098_vm2 = vcmp.gt.f32.partialorder %v6088_v57, 0.0  ;;  %v6106_v4 = vmul.f32 0.01, %v6088_v57  ;;  %11973 = vmatmul.mubr.msk.f32.gmra.mrb[148].mxu0 %vm640_vm1, %v5959_v56 }
 0xf83   : > { %12001 = vmatmul.mubr.msk.f32.gmra.mrb[148].mxu1 %vm640_vm1, %v6112_v2  ;;  %vm5944_vm3 = vcmp.gt.f32.partialorder %v5930_v62, 0.0  ;;  %v5952_v63 = vmul.f32 0.01, %v5930_v62  ;;  %vm6097_vm4 = vcmp.gt.f32.partialorder %v6083_v0, 0.0  ;;  %v6105_v5 = vmul.f32 0.01, %v6083_v0  ;;  %13113 = vmatpush3.bf16.msra.mxu0 %v13110_v41 }
 0xf84   : > { %13129 = vmatpush3.bf16.msra.mxu1 %v13110_v41  ;;  %v5961_v7 = vsel %vm5945_vm0, %v5935_v52, %v5953_v3  ;;  %v6114_v8 = vsel %vm6098_vm2, %v6088_v57, %v6106_v4  ;;  %13115 = vmatprep.subr.bf16.mxu0 %v13114_v11 }
 0xf85   : > { %v5960_v1 = vsel %vm5944_vm3, %v5930_v62, %v5952_v63  ;;  %v6113_v6 = vsel %vm6097_vm4, %v6083_v0, %v6105_v5  ;;  %13131 = vmatprep.subr.bf16.mxu1 %v13114_v11 }
 0xf86   : > { %11975 = vmatprep.mubr.msk.f32.mxu0 %vm640_vm1, %v5960_v1  ;;  %12003 = vmatprep.mubr.msk.f32.mxu1 %vm640_vm1, %v6113_v6 }
 0xf87   : > { %11976 = vmatmul.mubr.msk.f32.gmra.mrb[150].mxu0 %vm640_vm1, %v5961_v7  ;;  %12004 = vmatmul.mubr.msk.f32.gmra.mrb[150].mxu1 %vm640_vm1, %v6114_v8 }
 0xf88   : > { %13117 = vmatpush3.bf16.msra.mxu0 %v13114_v11  ;;  %13133 = vmatpush3.bf16.msra.mxu1 %v13114_v11 }
 0xf89   : > { %13135 = vmatprep.subr.bf16.mxu0 %v13134_v16  ;;  %13151 = vmatprep.subr.bf16.mxu1 %v13134_v16 }
0x104b   : > { %v11968_v17 = vpop.f32.mrb[144].mxu0 }
0x104c   : > { %v11996_v12 = vpop.f32.mrb[144].mxu1  ;;  %v6228_v18 = vadd.f32 %v11968_v17, %v14730_v14  ;;  %v6222_v20 = vpop.f32.mrb[145].mxu0 }
0x104d   : > { %v6381_v19 = vadd.f32 %v11996_v12, %v14730_v14  ;;  %v6375_v21 = vpop.f32.mrb[145].mxu1  ;;  %v6223_v22 = vadd.f32 %v14730_v14, %v6222_v20 }
0x104e   : > { %v6376_v23 = vadd.f32 %v14730_v14, %v6375_v21  ;;  %vm6262_vm5 = vcmp.gt.f32.partialorder %v6228_v18, 0.0  ;;  %v6270_v28 = vmul.f32 0.01, %v6228_v18 }
0x104f   : > { %vm6415_vm6 = vcmp.gt.f32.partialorder %v6381_v19, 0.0  ;;  %v6423_v29 = vmul.f32 0.01, %v6381_v19  ;;  %vm6261_vm7 = vcmp.gt.f32.partialorder %v6223_v22, 0.0  ;;  %v6269_v27 = vmul.f32 0.01, %v6223_v22 }
0x1050   : > { %vm6414_vm8 = vcmp.gt.f32.partialorder %v6376_v23, 0.0  ;;  %v6422_v30 = vmul.f32 0.01, %v6376_v23  ;;  %v6278_v25 = vsel %vm6262_vm5, %v6228_v18, %v6270_v28  ;;  %v11971_v31 = vpop.f32.mrb[146].mxu0  ;;  %v11999_v32 = vpop.f32.mrb[146].mxu1  ;;  %v9896_v28 = vld [vmem:[%s15320_s3 + $0x508] sm:$0xff] }
0x1051   : > { %v6238_v34 = vadd.f32 %v11971_v31, %v14730_v14  ;;  %v6391_v35 = vadd.f32 %v11999_v32, %v14730_v14  ;;  %v6232_v36 = vpop.f32.mrb[147].mxu0  ;;  %v6385_v38 = vpop.f32.mrb[147].mxu1  ;;  %v6277_v40 = vsel %vm6261_vm7, %v6223_v22, %v6269_v27  ;;  %v6431_v42 = vsel %vm6415_vm6, %v6381_v19, %v6423_v29  ;;  %v9875_v22 = vld [vmem:[%s15320_s3 + $0x4f0] sm:$0xff] }
0x1052   : > { %v6430_v41 = vsel %vm6414_vm8, %v6376_v23, %v6422_v30  ;;  %v6233_v37 = vadd.f32 %v14730_v14, %v6232_v36  ;;  %v6386_v43 = vadd.f32 %v14730_v14, %v6385_v38  ;;  %12022 = vmatprep.mubr.msk.f32.mxu0 %vm640_vm1, %v6277_v40  ;;  %v9876_v23 = vld [vmem:[%s15320_s3 + $0x4f8] sm:$0xff]  ;;  %v13166_v29 = vpack.c.bf16 %v9896_v28, %v9895_v26  ;;  %v14796_v27 = vld [vmem:[%s15321_s4 + $0x12] ss:$0 sm:$0xff] }
0x1053   : > { %12050 = vmatprep.mubr.msk.f32.mxu1 %vm640_vm1, %v6430_v41  ;;  %vm6264_vm9 = vcmp.gt.f32.partialorder %v6238_v34, 0.0  ;;  %v6272_v45 = vmul.f32 0.01, %v6238_v34  ;;  %vm6417_vm10 = vcmp.gt.f32.partialorder %v6391_v35, 0.0  ;;  %v6425_v46 = vmul.f32 0.01, %v6391_v35  ;;  %12023 = vmatmul.mubr.msk.f32.vlgmr.msra.gmra.mrb[152].mxu0 %vm640_vm1, %v6278_v25 }
0x1054   : > { %12051 = vmatmul.mubr.msk.f32.vlgmr.msra.gmra.mrb[152].mxu1 %vm640_vm1, %v6431_v42  ;;  %vm6263_vm11 = vcmp.gt.f32.partialorder %v6233_v37, 0.0  ;;  %v6271_v47 = vmul.f32 0.01, %v6233_v37  ;;  %vm6416_vm12 = vcmp.gt.f32.partialorder %v6386_v43, 0.0  ;;  %v6424_v48 = vmul.f32 0.01, %v6386_v43  ;;  %13137 = vmatpush3.bf16.msra.mxu0 %v13134_v16 }
0x1055   : > { %13153 = vmatpush3.bf16.msra.mxu1 %v13134_v16  ;;  %v11974_v49 = vpop.f32.mrb[148].mxu0  ;;  %v6280_v53 = vsel %vm6264_vm9, %v6238_v34, %v6272_v45  ;;  %13139 = vmatprep.subr.bf16.mxu0 %v13138_v33  ;;  %v6433_v61 = vsel %vm6417_vm10, %v6391_v35, %v6425_v46  ;;  %v13146_v24 = vpack.c.bf16 %v9876_v23, %v9875_v22  ;;  %v9897_v38 = vld [vmem:[%s15320_s3 + $0x510] sm:$0xff]  ;;  %v9898_v40 = vld [vmem:[%s15320_s3 + $0x518] sm:$0xff] }
0x1056   : > { %v12002_v51 = vpop.f32.mrb[148].mxu1  ;;  %13155 = vmatprep.subr.bf16.mxu1 %v13138_v33  ;;  %v6248_v55 = vadd.f32 %v11974_v49, %v14730_v14  ;;  %v6242_v56 = vpop.f32.mrb[149].mxu0  ;;  %v6279_v57 = vsel %vm6263_vm11, %v6233_v37, %v6271_v47  ;;  %v6432_v58 = vsel %vm6416_vm12, %v6386_v43, %v6424_v48  ;;  %v13170_v46 = vpack.c.bf16 %v9898_v40, %v9897_v38  ;;  %v9921_v40 = vld [vmem:[%s15320_s3 + $0x540] sm:$0xff] }
0x1057   : > { %v6401_v50 = vadd.f32 %v12002_v51, %v14730_v14  ;;  %v6395_v52 = vpop.f32.mrb[149].mxu1  ;;  %v6243_v59 = vadd.f32 %v14730_v14, %v6242_v56  ;;  %12025 = vmatprep.mubr.msk.f32.mxu0 %vm640_vm1, %v6279_v57  ;;  %12053 = vmatprep.mubr.msk.f32.mxu1 %vm640_vm1, %v6432_v58  ;;  %v9900_v57 = vld [vmem:[%s15320_s3 + $0x528] sm:$0xff] }
0x1058   : > { %v6396_v60 = vadd.f32 %v14730_v14, %v6395_v52  ;;  %vm6266_vm13 = vcmp.gt.f32.partialorder %v6248_v55, 0.0  ;;  %v6274_v62 = vmul.f32 0.01, %v6248_v55  ;;  %12026 = vmatmul.mubr.msk.f32.gmra.mrb[154].mxu0 %vm640_vm1, %v6280_v53  ;;  %12054 = vmatmul.mubr.msk.f32.gmra.mrb[154].mxu1 %vm640_vm1, %v6433_v61  ;;  %v9899_v52 = vld [vmem:[%s15320_s3 + $0x520] sm:$0xff] }
0x1059   : > { %vm6419_vm14 = vcmp.gt.f32.partialorder %v6401_v50, 0.0  ;;  %v6427_v0 = vmul.f32 0.01, %v6401_v50  ;;  %vm6265_vm15 = vcmp.gt.f32.partialorder %v6243_v59, 0.0  ;;  %v6273_v2 = vmul.f32 0.01, %v6243_v59  ;;  %13141 = vmatpush3.bf16.msra.mxu0 %v13138_v33  ;;  %13157 = vmatpush3.bf16.msra.mxu1 %v13138_v33 }
0x105a   : > { %vm6418_vm0 = vcmp.gt.f32.partialorder %v6396_v60, 0.0  ;;  %v6426_v3 = vmul.f32 0.01, %v6396_v60  ;;  %v11977_v4 = vpop.f32.mrb[150].mxu0  ;;  %v12005_v63 = vpop.f32.mrb[150].mxu1  ;;  %v6282_v5 = vsel %vm6266_vm13, %v6248_v55, %v6274_v62  ;;  %13143 = vmatprep.subr.bf16.mxu0 %v13142_v54  ;;  %13159 = vmatprep.subr.bf16.mxu1 %v13142_v54 }
0x105b   : > { %v6258_v1 = vadd.f32 %v11977_v4, %v14730_v14  ;;  %v6411_v6 = vadd.f32 %v12005_v63, %v14730_v14  ;;  %v6252_v7 = vpop.f32.mrb[151].mxu0  ;;  %v6405_v8 = vpop.f32.mrb[151].mxu1  ;;  %v6281_v9 = vsel %vm6265_vm15, %v6243_v59, %v6273_v2  ;;  %v6435_v15 = vsel %vm6419_vm14, %v6401_v50, %v6427_v0 }
0x105c   : > { %v6434_v10 = vsel %vm6418_vm0, %v6396_v60, %v6426_v3  ;;  %v6253_v11 = vadd.f32 %v14730_v14, %v6252_v7  ;;  %v6406_v13 = vadd.f32 %v14730_v14, %v6405_v8  ;;  %12028 = vmatprep.mubr.msk.f32.mxu0 %vm640_vm1, %v6281_v9  ;;  %v13174_v3 = vpack.c.bf16 %v9900_v57, %v9899_v52 }
0x105d   : > { %12056 = vmatprep.mubr.msk.f32.mxu1 %vm640_vm1, %v6434_v10  ;;  %vm6268_vm2 = vcmp.gt.f32.partialorder %v6258_v1, 0.0  ;;  %v6276_v16 = vmul.f32 0.01, %v6258_v1  ;;  %vm6421_vm3 = vcmp.gt.f32.partialorder %v6411_v6, 0.0  ;;  %v6429_v17 = vmul.f32 0.01, %v6411_v6  ;;  %12029 = vmatmul.mubr.msk.f32.gmra.mrb[156].mxu0 %vm640_vm1, %v6282_v5 }
0x105e   : > { %12057 = vmatmul.mubr.msk.f32.gmra.mrb[156].mxu1 %vm640_vm1, %v6435_v15  ;;  %vm6267_vm4 = vcmp.gt.f32.partialorder %v6253_v11, 0.0  ;;  %v6275_v12 = vmul.f32 0.01, %v6253_v11  ;;  %vm6420_vm5 = vcmp.gt.f32.partialorder %v6406_v13, 0.0  ;;  %v6428_v18 = vmul.f32 0.01, %v6406_v13  ;;  %13145 = vmatpush3.bf16.msra.mxu0 %v13142_v54 }
0x105f   : > { %13161 = vmatpush3.bf16.msra.mxu1 %v13142_v54  ;;  %v6284_v20 = vsel %vm6268_vm2, %v6258_v1, %v6276_v16  ;;  %v6437_v21 = vsel %vm6421_vm3, %v6411_v6, %v6429_v17  ;;  %13147 = vmatprep.subr.bf16.mxu0 %v13146_v24 }
0x1060   : > { %v6283_v14 = vsel %vm6267_vm4, %v6253_v11, %v6275_v12  ;;  %v6436_v19 = vsel %vm6420_vm5, %v6406_v13, %v6428_v18  ;;  %13163 = vmatprep.subr.bf16.mxu1 %v13146_v24 }
0x1061   : > { %12031 = vmatprep.mubr.msk.f32.mxu0 %vm640_vm1, %v6283_v14  ;;  %12059 = vmatprep.mubr.msk.f32.mxu1 %vm640_vm1, %v6436_v19 }
0x1062   : > { %12032 = vmatmul.mubr.msk.f32.gmra.mrb[158].mxu0 %vm640_vm1, %v6284_v20  ;;  %12060 = vmatmul.mubr.msk.f32.gmra.mrb[158].mxu1 %vm640_vm1, %v6437_v21 }
0x1063   : > { %13149 = vmatpush3.bf16.msra.mxu0 %v13146_v24  ;;  %13165 = vmatpush3.bf16.msra.mxu1 %v13146_v24 }
0x1064   : > { %13167 = vmatprep.subr.bf16.mxu0 %v13166_v29  ;;  %13183 = vmatprep.subr.bf16.mxu1 %v13166_v29 }
0x1126   : > { %v12024_v30 = vpop.f32.mrb[152].mxu0 }
0x1127   : > { %v12052_v25 = vpop.f32.mrb[152].mxu1  ;;  %v6551_v31 = vadd.f32 %v12024_v30, %v14796_v27  ;;  %v6545_v33 = vpop.f32.mrb[153].mxu0 }
0x1128   : > { %v6704_v32 = vadd.f32 %v12052_v25, %v14796_v27  ;;  %v6698_v34 = vpop.f32.mrb[153].mxu1  ;;  %v6546_v35 = vadd.f32 %v14796_v27, %v6545_v33 }
0x1129   : > { %v6699_v36 = vadd.f32 %v14796_v27, %v6698_v34  ;;  %vm6585_vm6 = vcmp.gt.f32.partialorder %v6551_v31, 0.0  ;;  %v6593_v41 = vmul.f32 0.01, %v6551_v31 }
0x112a   : > { %vm6738_vm7 = vcmp.gt.f32.partialorder %v6704_v32, 0.0  ;;  %v6746_v42 = vmul.f32 0.01, %v6704_v32  ;;  %vm6584_vm8 = vcmp.gt.f32.partialorder %v6546_v35, 0.0  ;;  %v6592_v37 = vmul.f32 0.01, %v6546_v35 }
0x112b   : > { %vm6737_vm9 = vcmp.gt.f32.partialorder %v6699_v36, 0.0  ;;  %v6745_v43 = vmul.f32 0.01, %v6699_v36  ;;  %v6601_v39 = vsel %vm6585_vm6, %v6551_v31, %v6593_v41  ;;  %v12027_v44 = vpop.f32.mrb[154].mxu0  ;;  %v12055_v45 = vpop.f32.mrb[154].mxu1  ;;  %v9922_v41 = vld [vmem:[%s15320_s3 + $0x548] sm:$0xff] }
0x112c   : > { %v6561_v47 = vadd.f32 %v12027_v44, %v14796_v27  ;;  %v6714_v48 = vadd.f32 %v12055_v45, %v14796_v27  ;;  %v6555_v49 = vpop.f32.mrb[155].mxu0  ;;  %v6708_v51 = vpop.f32.mrb[155].mxu1  ;;  %v6600_v53 = vsel %vm6584_vm8, %v6546_v35, %v6592_v37  ;;  %v6754_v55 = vsel %vm6738_vm7, %v6704_v32, %v6746_v42  ;;  %v9901_v35 = vld [vmem:[%s15320_s3 + $0x530] sm:$0xff] }
0x112d   : > { %v6753_v54 = vsel %vm6737_vm9, %v6699_v36, %v6745_v43  ;;  %v6556_v50 = vadd.f32 %v14796_v27, %v6555_v49  ;;  %v6709_v56 = vadd.f32 %v14796_v27, %v6708_v51  ;;  %12078 = vmatprep.mubr.msk.f32.mxu0 %vm640_vm1, %v6600_v53  ;;  %v9902_v36 = vld [vmem:[%s15320_s3 + $0x538] sm:$0xff]  ;;  %v13198_v42 = vpack.c.bf16 %v9922_v41, %v9921_v40  ;;  %v14862_v37 = vld [vmem:[%s15321_s4 + $0x13] ss:$0 sm:$0xff] }
0x112e   : > { %12106 = vmatprep.mubr.msk.f32.mxu1 %vm640_vm1, %v6753_v54  ;;  %vm6587_vm10 = vcmp.gt.f32.partialorder %v6561_v47, 0.0  ;;  %v6595_v58 = vmul.f32 0.01, %v6561_v47  ;;  %vm6740_vm11 = vcmp.gt.f32.partialorder %v6714_v48, 0.0  ;;  %v6748_v59 = vmul.f32 0.01, %v6714_v48  ;;  %12079 = vmatmul.mubr.msk.f32.vlgmr.msra.gmra.mrb[160].mxu0 %vm640_vm1, %v6601_v39 }
0x112f   : > { %12107 = vmatmul.mubr.msk.f32.vlgmr.msra.gmra.mrb[160].mxu1 %vm640_vm1, %v6754_v55  ;;  %vm6586_vm12 = vcmp.gt.f32.partialorder %v6556_v50, 0.0  ;;  %v6594_v60 = vmul.f32 0.01, %v6556_v50  ;;  %vm6739_vm13 = vcmp.gt.f32.partialorder %v6709_v56, 0.0  ;;  %v6747_v61 = vmul.f32 0.01, %v6709_v56  ;;  %13169 = vmatpush3.bf16.msra.mxu0 %v13166_v29 }
0x1130   : > { %13185 = vmatpush3.bf16.msra.mxu1 %v13166_v29  ;;  %v12030_v62 = vpop.f32.mrb[156].mxu0  ;;  %v6603_v2 = vsel %vm6587_vm10, %v6561_v47, %v6595_v58  ;;  %13171 = vmatprep.subr.bf16.mxu0 %v13170_v46  ;;  %v6756_v10 = vsel %vm6740_vm11, %v6714_v48, %v6748_v59  ;;  %v13178_v38 = vpack.c.bf16 %v9902_v36, %v9901_v35  ;;  %v9923_v51 = vld [vmem:[%s15320_s3 + $0x550] sm:$0xff]  ;;  %v9924_v53 = vld [vmem:[%s15320_s3 + $0x558] sm:$0xff] }
0x1131   : > { %v12058_v0 = vpop.f32.mrb[156].mxu1  ;;  %13187 = vmatprep.subr.bf16.mxu1 %v13170_v46  ;;  %v6571_v4 = vadd.f32 %v12030_v62, %v14796_v27  ;;  %v6565_v5 = vpop.f32.mrb[157].mxu0  ;;  %v6602_v6 = vsel %vm6586_vm12, %v6556_v50, %v6594_v60  ;;  %v6755_v7 = vsel %vm6739_vm13, %v6709_v56, %v6747_v61  ;;  %v13202_v59 = vpack.c.bf16 %v9924_v53, %v9923_v51  ;;  %v9947_v53 = vld [vmem:[%s15320_s3 + $0x580] sm:$0xff] }
0x1132   : > { %v6724_v63 = vadd.f32 %v12058_v0, %v14796_v27  ;;  %v6718_v1 = vpop.f32.mrb[157].mxu1  ;;  %v6566_v8 = vadd.f32 %v14796_v27, %v6565_v5  ;;  %12081 = vmatprep.mubr.msk.f32.mxu0 %vm640_vm1, %v6602_v6  ;;  %12109 = vmatprep.mubr.msk.f32.mxu1 %vm640_vm1, %v6755_v7  ;;  %v9926_v6 = vld [vmem:[%s15320_s3 + $0x568] sm:$0xff] }
0x1133   : > { %v6719_v9 = vadd.f32 %v14796_v27, %v6718_v1  ;;  %vm6589_vm14 = vcmp.gt.f32.partialorder %v6571_v4, 0.0  ;;  %v6597_v11 = vmul.f32 0.01, %v6571_v4  ;;  %12082 = vmatmul.mubr.msk.f32.gmra.mrb[162].mxu0 %vm640_vm1, %v6603_v2  ;;  %12110 = vmatmul.mubr.msk.f32.gmra.mrb[162].mxu1 %vm640_vm1, %v6756_v10  ;;  %v9925_v1 = vld [vmem:[%s15320_s3 + $0x560] sm:$0xff] }
0x1134   : > { %vm6742_vm15 = vcmp.gt.f32.partialorder %v6724_v63, 0.0  ;;  %v6750_v13 = vmul.f32 0.01, %v6724_v63  ;;  %vm6588_vm0 = vcmp.gt.f32.partialorder %v6566_v8, 0.0  ;;  %v6596_v15 = vmul.f32 0.01, %v6566_v8  ;;  %13173 = vmatpush3.bf16.msra.mxu0 %v13170_v46  ;;  %13189 = vmatpush3.bf16.msra.mxu1 %v13170_v46 }
0x1135   : > { %vm6741_vm2 = vcmp.gt.f32.partialorder %v6719_v9, 0.0  ;;  %v6749_v16 = vmul.f32 0.01, %v6719_v9  ;;  %v12033_v17 = vpop.f32.mrb[158].mxu0  ;;  %v12061_v12 = vpop.f32.mrb[158].mxu1  ;;  %v6605_v18 = vsel %vm6589_vm14, %v6571_v4, %v6597_v11  ;;  %13175 = vmatprep.subr.bf16.mxu0 %v13174_v3  ;;  %13191 = vmatprep.subr.bf16.mxu1 %v13174_v3 }
0x1136   : > { %v6581_v14 = vadd.f32 %v12033_v17, %v14796_v27  ;;  %v6734_v19 = vadd.f32 %v12061_v12, %v14796_v27  ;;  %v6575_v20 = vpop.f32.mrb[159].mxu0  ;;  %v6728_v21 = vpop.f32.mrb[159].mxu1  ;;  %v6604_v22 = vsel %vm6588_vm0, %v6566_v8, %v6596_v15  ;;  %v6758_v28 = vsel %vm6742_vm15, %v6724_v63, %v6750_v13 }
0x1137   : > { %v6757_v23 = vsel %vm6741_vm2, %v6719_v9, %v6749_v16  ;;  %v6576_v24 = vadd.f32 %v14796_v27, %v6575_v20  ;;  %v6729_v26 = vadd.f32 %v14796_v27, %v6728_v21  ;;  %12084 = vmatprep.mubr.msk.f32.mxu0 %vm640_vm1, %v6604_v22  ;;  %v13206_v16 = vpack.c.bf16 %v9926_v6, %v9925_v1 }
0x1138   : > { %12112 = vmatprep.mubr.msk.f32.mxu1 %vm640_vm1, %v6757_v23  ;;  %vm6591_vm3 = vcmp.gt.f32.partialorder %v6581_v14, 0.0  ;;  %v6599_v29 = vmul.f32 0.01, %v6581_v14  ;;  %vm6744_vm4 = vcmp.gt.f32.partialorder %v6734_v19, 0.0  ;;  %v6752_v30 = vmul.f32 0.01, %v6734_v19  ;;  %12085 = vmatmul.mubr.msk.f32.gmra.mrb[164].mxu0 %vm640_vm1, %v6605_v18 }
0x1139   : > { %12113 = vmatmul.mubr.msk.f32.gmra.mrb[164].mxu1 %vm640_vm1, %v6758_v28  ;;  %vm6590_vm5 = vcmp.gt.f32.partialorder %v6576_v24, 0.0  ;;  %v6598_v25 = vmul.f32 0.01, %v6576_v24  ;;  %vm6743_vm6 = vcmp.gt.f32.partialorder %v6729_v26, 0.0  ;;  %v6751_v31 = vmul.f32 0.01, %v6729_v26  ;;  %13177 = vmatpush3.bf16.msra.mxu0 %v13174_v3 }
0x113a   : > { %13193 = vmatpush3.bf16.msra.mxu1 %v13174_v3  ;;  %v6607_v33 = vsel %vm6591_vm3, %v6581_v14, %v6599_v29  ;;  %v6760_v34 = vsel %vm6744_vm4, %v6734_v19, %v6752_v30  ;;  %13179 = vmatprep.subr.bf16.mxu0 %v13178_v38 }
0x113b   : > { %v6606_v27 = vsel %vm6590_vm5, %v6576_v24, %v6598_v25  ;;  %v6759_v32 = vsel %vm6743_vm6, %v6729_v26, %v6751_v31  ;;  %13195 = vmatprep.subr.bf16.mxu1 %v13178_v38 }
0x113c   : > { %12087 = vmatprep.mubr.msk.f32.mxu0 %vm640_vm1, %v6606_v27  ;;  %12115 = vmatprep.mubr.msk.f32.mxu1 %vm640_vm1, %v6759_v32 }
0x113d   : > { %12088 = vmatmul.mubr.msk.f32.gmra.mrb[166].mxu0 %vm640_vm1, %v6607_v33  ;;  %12116 = vmatmul.mubr.msk.f32.gmra.mrb[166].mxu1 %vm640_vm1, %v6760_v34 }
0x113e   : > { %13181 = vmatpush3.bf16.msra.mxu0 %v13178_v38  ;;  %13197 = vmatpush3.bf16.msra.mxu1 %v13178_v38 }
0x113f   : > { %13199 = vmatprep.subr.bf16.mxu0 %v13198_v42  ;;  %13215 = vmatprep.subr.bf16.mxu1 %v13198_v42 }
0x1201   : > { %v12080_v43 = vpop.f32.mrb[160].mxu0 }
0x1202   : > { %v12108_v39 = vpop.f32.mrb[160].mxu1  ;;  %v6874_v44 = vadd.f32 %v12080_v43, %v14862_v37  ;;  %v6868_v46 = vpop.f32.mrb[161].mxu0 }
0x1203   : > { %v7027_v45 = vadd.f32 %v12108_v39, %v14862_v37  ;;  %v7021_v47 = vpop.f32.mrb[161].mxu1  ;;  %v6869_v48 = vadd.f32 %v14862_v37, %v6868_v46 }
0x1204   : > { %v7022_v49 = vadd.f32 %v14862_v37, %v7021_v47  ;;  %vm6908_vm7 = vcmp.gt.f32.partialorder %v6874_v44, 0.0  ;;  %v6916_v54 = vmul.f32 0.01, %v6874_v44 }
0x1205   : > { %vm7061_vm8 = vcmp.gt.f32.partialorder %v7027_v45, 0.0  ;;  %v7069_v55 = vmul.f32 0.01, %v7027_v45  ;;  %vm6907_vm9 = vcmp.gt.f32.partialorder %v6869_v48, 0.0  ;;  %v6915_v50 = vmul.f32 0.01, %v6869_v48 }
0x1206   : > { %vm7060_vm10 = vcmp.gt.f32.partialorder %v7022_v49, 0.0  ;;  %v7068_v56 = vmul.f32 0.01, %v7022_v49  ;;  %v6924_v52 = vsel %vm6908_vm7, %v6874_v44, %v6916_v54  ;;  %v12083_v57 = vpop.f32.mrb[162].mxu0  ;;  %v12111_v58 = vpop.f32.mrb[162].mxu1  ;;  %v9948_v54 = vld [vmem:[%s15320_s3 + $0x588] sm:$0xff] }
0x1207   : > { %v6884_v60 = vadd.f32 %v12083_v57, %v14862_v37  ;;  %v7037_v61 = vadd.f32 %v12111_v58, %v14862_v37  ;;  %v6878_v62 = vpop.f32.mrb[163].mxu0  ;;  %v7031_v0 = vpop.f32.mrb[163].mxu1  ;;  %v6923_v2 = vsel %vm6907_vm9, %v6869_v48, %v6915_v50  ;;  %v7077_v4 = vsel %vm7061_vm8, %v7027_v45, %v7069_v55  ;;  %v9927_v48 = vld [vmem:[%s15320_s3 + $0x570] sm:$0xff] }
0x1208   : > { %v7076_v3 = vsel %vm7060_vm10, %v7022_v49, %v7068_v56  ;;  %v6879_v63 = vadd.f32 %v14862_v37, %v6878_v62  ;;  %v7032_v5 = vadd.f32 %v14862_v37, %v7031_v0  ;;  %12134 = vmatprep.mubr.msk.f32.mxu0 %vm640_vm1, %v6923_v2  ;;  %v9928_v49 = vld [vmem:[%s15320_s3 + $0x578] sm:$0xff]  ;;  %v13230_v55 = vpack.c.bf16 %v9948_v54, %v9947_v53  ;;  %v14928_v50 = vld [vmem:[%s15321_s4 + $0x14] ss:$0 sm:$0xff] }
0x1209   : > { %12162 = vmatprep.mubr.msk.f32.mxu1 %vm640_vm1, %v7076_v3  ;;  %vm6910_vm11 = vcmp.gt.f32.partialorder %v6884_v60, 0.0  ;;  %v6918_v7 = vmul.f32 0.01, %v6884_v60  ;;  %vm7063_vm12 = vcmp.gt.f32.partialorder %v7037_v61, 0.0  ;;  %v7071_v8 = vmul.f32 0.01, %v7037_v61  ;;  %12135 = vmatmul.mubr.msk.f32.vlgmr.msra.gmra.mrb[168].mxu0 %vm640_vm1, %v6924_v52 }
0x120a   : > { %12163 = vmatmul.mubr.msk.f32.vlgmr.msra.gmra.mrb[168].mxu1 %vm640_vm1, %v7077_v4  ;;  %vm6909_vm13 = vcmp.gt.f32.partialorder %v6879_v63, 0.0  ;;  %v6917_v9 = vmul.f32 0.01, %v6879_v63  ;;  %vm7062_vm14 = vcmp.gt.f32.partialorder %v7032_v5, 0.0  ;;  %v7070_v10 = vmul.f32 0.01, %v7032_v5  ;;  %13201 = vmatpush3.bf16.msra.mxu0 %v13198_v42 }
0x120b   : > { %13217 = vmatpush3.bf16.msra.mxu1 %v13198_v42  ;;  %v12086_v11 = vpop.f32.mrb[164].mxu0  ;;  %v6926_v15 = vsel %vm6910_vm11, %v6884_v60, %v6918_v7  ;;  %13203 = vmatprep.subr.bf16.mxu0 %v13202_v59  ;;  %v7079_v23 = vsel %vm7063_vm12, %v7037_v61, %v7071_v8  ;;  %v13210_v51 = vpack.c.bf16 %v9928_v49, %v9927_v48  ;;  %v9949_v0 = vld [vmem:[%s15320_s3 + $0x590] sm:$0xff]  ;;  %v9950_v2 = vld [vmem:[%s15320_s3 + $0x598] sm:$0xff] }
0x120c   : > { %v12114_v13 = vpop.f32.mrb[164].mxu1  ;;  %13219 = vmatprep.subr.bf16.mxu1 %v13202_v59  ;;  %v6894_v17 = vadd.f32 %v12086_v11, %v14862_v37  ;;  %v6888_v18 = vpop.f32.mrb[165].mxu0  ;;  %v6925_v19 = vsel %vm6909_vm13, %v6879_v63, %v6917_v9  ;;  %v7078_v20 = vsel %vm7062_vm14, %v7032_v5, %v7070_v10  ;;  %v13234_v8 = vpack.c.bf16 %v9950_v2, %v9949_v0  ;;  %v9973_v2 = vld [vmem:[%s15320_s3 + $0x5c0] sm:$0xff] }
0x120d   : > { %v7047_v12 = vadd.f32 %v12114_v13, %v14862_v37  ;;  %v7041_v14 = vpop.f32.mrb[165].mxu1  ;;  %v6889_v21 = vadd.f32 %v14862_v37, %v6888_v18  ;;  %12137 = vmatprep.mubr.msk.f32.mxu0 %vm640_vm1, %v6925_v19  ;;  %12165 = vmatprep.mubr.msk.f32.mxu1 %vm640_vm1, %v7078_v20  ;;  %v9952_v19 = vld [vmem:[%s15320_s3 + $0x5a8] sm:$0xff] }
0x120e   : > { %v7042_v22 = vadd.f32 %v14862_v37, %v7041_v14  ;;  %vm6912_vm15 = vcmp.gt.f32.partialorder %v6894_v17, 0.0  ;;  %v6920_v24 = vmul.f32 0.01, %v6894_v17  ;;  %12138 = vmatmul.mubr.msk.f32.gmra.mrb[170].mxu0 %vm640_vm1, %v6926_v15  ;;  %12166 = vmatmul.mubr.msk.f32.gmra.mrb[170].mxu1 %vm640_vm1, %v7079_v23  ;;  %v9951_v14 = vld [vmem:[%s15320_s3 + $0x5a0] sm:$0xff] }
0x120f   : > { %vm7065_vm0 = vcmp.gt.f32.partialorder %v7047_v12, 0.0  ;;  %v7073_v26 = vmul.f32 0.01, %v7047_v12  ;;  %vm6911_vm2 = vcmp.gt.f32.partialorder %v6889_v21, 0.0  ;;  %v6919_v28 = vmul.f32 0.01, %v6889_v21  ;;  %13205 = vmatpush3.bf16.msra.mxu0 %v13202_v59  ;;  %13221 = vmatpush3.bf16.msra.mxu1 %v13202_v59 }
0x1210   : > { %vm7064_vm3 = vcmp.gt.f32.partialorder %v7042_v22, 0.0  ;;  %v7072_v29 = vmul.f32 0.01, %v7042_v22  ;;  %v12089_v30 = vpop.f32.mrb[166].mxu0  ;;  %v12117_v25 = vpop.f32.mrb[166].mxu1  ;;  %v6928_v31 = vsel %vm6912_vm15, %v6894_v17, %v6920_v24  ;;  %13207 = vmatprep.subr.bf16.mxu0 %v13206_v16  ;;  %13223 = vmatprep.subr.bf16.mxu1 %v13206_v16 }
0x1211   : > { %v6904_v27 = vadd.f32 %v12089_v30, %v14862_v37  ;;  %v7057_v32 = vadd.f32 %v12117_v25, %v14862_v37  ;;  %v6898_v33 = vpop.f32.mrb[167].mxu0  ;;  %v7051_v34 = vpop.f32.mrb[167].mxu1  ;;  %v6927_v35 = vsel %vm6911_vm2, %v6889_v21, %v6919_v28  ;;  %v7081_v41 = vsel %vm7065_vm0, %v7047_v12, %v7073_v26 }
0x1212   : > { %v7080_v36 = vsel %vm7064_vm3, %v7042_v22, %v7072_v29  ;;  %v6899_v38 = vadd.f32 %v14862_v37, %v6898_v33  ;;  %v7052_v40 = vadd.f32 %v14862_v37, %v7051_v34  ;;  %12140 = vmatprep.mubr.msk.f32.mxu0 %vm640_vm1, %v6927_v35  ;;  %v13238_v29 = vpack.c.bf16 %v9952_v19, %v9951_v14 }
0x1213   : > { %12168 = vmatprep.mubr.msk.f32.mxu1 %vm640_vm1, %v7080_v36  ;;  %vm6914_vm4 = vcmp.gt.f32.partialorder %v6904_v27, 0.0  ;;  %v6922_v42 = vmul.f32 0.01, %v6904_v27  ;;  %vm7067_vm5 = vcmp.gt.f32.partialorder %v7057_v32, 0.0  ;;  %v7075_v43 = vmul.f32 0.01, %v7057_v32  ;;  %12141 = vmatmul.mubr.msk.f32.gmra.mrb[172].mxu0 %vm640_vm1, %v6928_v31 }
0x1214   : > { %12169 = vmatmul.mubr.msk.f32.gmra.mrb[172].mxu1 %vm640_vm1, %v7081_v41  ;;  %vm6913_vm6 = vcmp.gt.f32.partialorder %v6899_v38, 0.0  ;;  %v6921_v39 = vmul.f32 0.01, %v6899_v38  ;;  %vm7066_vm7 = vcmp.gt.f32.partialorder %v7052_v40, 0.0  ;;  %v7074_v44 = vmul.f32 0.01, %v7052_v40  ;;  %13209 = vmatpush3.bf16.msra.mxu0 %v13206_v16 }
0x1215   : > { %13225 = vmatpush3.bf16.msra.mxu1 %v13206_v16  ;;  %v6930_v46 = vsel %vm6914_vm4, %v6904_v27, %v6922_v42  ;;  %v7083_v47 = vsel %vm7067_vm5, %v7057_v32, %v7075_v43  ;;  %13211 = vmatprep.subr.bf16.mxu0 %v13210_v51 }
0x1216   : > { %v6929_v37 = vsel %vm6913_vm6, %v6899_v38, %v6921_v39  ;;  %v7082_v45 = vsel %vm7066_vm7, %v7052_v40, %v7074_v44  ;;  %13227 = vmatprep.subr.bf16.mxu1 %v13210_v51 }
0x1217   : > { %12143 = vmatprep.mubr.msk.f32.mxu0 %vm640_vm1, %v6929_v37  ;;  %12171 = vmatprep.mubr.msk.f32.mxu1 %vm640_vm1, %v7082_v45 }
0x1218   : > { %12144 = vmatmul.mubr.msk.f32.gmra.mrb[174].mxu0 %vm640_vm1, %v6930_v46  ;;  %12172 = vmatmul.mubr.msk.f32.gmra.mrb[174].mxu1 %vm640_vm1, %v7083_v47 }
0x1219   : > { %13213 = vmatpush3.bf16.msra.mxu0 %v13210_v51  ;;  %13229 = vmatpush3.bf16.msra.mxu1 %v13210_v51 }
0x121a   : > { %13231 = vmatprep.subr.bf16.mxu0 %v13230_v55  ;;  %13247 = vmatprep.subr.bf16.mxu1 %v13230_v55 }
0x12dc   : > { %v12136_v56 = vpop.f32.mrb[168].mxu0 }
0x12dd   : > { %v12164_v52 = vpop.f32.mrb[168].mxu1  ;;  %v7197_v57 = vadd.f32 %v12136_v56, %v14928_v50  ;;  %v7191_v59 = vpop.f32.mrb[169].mxu0 }
0x12de   : > { %v7350_v58 = vadd.f32 %v12164_v52, %v14928_v50  ;;  %v7344_v60 = vpop.f32.mrb[169].mxu1  ;;  %v7192_v61 = vadd.f32 %v14928_v50, %v7191_v59 }
0x12df   : > { %v7345_v62 = vadd.f32 %v14928_v50, %v7344_v60  ;;  %vm7231_vm8 = vcmp.gt.f32.partialorder %v7197_v57, 0.0  ;;  %v7239_v3 = vmul.f32 0.01, %v7197_v57 }
0x12e0   : > { %vm7384_vm9 = vcmp.gt.f32.partialorder %v7350_v58, 0.0  ;;  %v7392_v4 = vmul.f32 0.01, %v7350_v58  ;;  %vm7230_vm10 = vcmp.gt.f32.partialorder %v7192_v61, 0.0  ;;  %v7238_v63 = vmul.f32 0.01, %v7192_v61 }
0x12e1   : > { %vm7383_vm11 = vcmp.gt.f32.partialorder %v7345_v62, 0.0  ;;  %v7391_v5 = vmul.f32 0.01, %v7345_v62  ;;  %v7247_v1 = vsel %vm7231_vm8, %v7197_v57, %v7239_v3  ;;  %v12139_v6 = vpop.f32.mrb[170].mxu0  ;;  %v12167_v7 = vpop.f32.mrb[170].mxu1  ;;  %v9974_v3 = vld [vmem:[%s15320_s3 + $0x5c8] sm:$0xff] }
0x12e2   : > { %v7207_v9 = vadd.f32 %v12139_v6, %v14928_v50  ;;  %v7360_v10 = vadd.f32 %v12167_v7, %v14928_v50  ;;  %v7201_v11 = vpop.f32.mrb[171].mxu0  ;;  %v7354_v13 = vpop.f32.mrb[171].mxu1  ;;  %v7246_v15 = vsel %vm7230_vm10, %v7192_v61, %v7238_v63  ;;  %v7400_v17 = vsel %vm7384_vm9, %v7350_v58, %v7392_v4  ;;  %v9953_v61 = vld [vmem:[%s15320_s3 + $0x5b0] sm:$0xff] }
0x12e3   : > { %v7399_v16 = vsel %vm7383_vm11, %v7345_v62, %v7391_v5  ;;  %v7202_v12 = vadd.f32 %v14928_v50, %v7201_v11  ;;  %v7355_v18 = vadd.f32 %v14928_v50, %v7354_v13  ;;  %12190 = vmatprep.mubr.msk.f32.mxu0 %vm640_vm1, %v7246_v15  ;;  %v9954_v62 = vld [vmem:[%s15320_s3 + $0x5b8] sm:$0xff]  ;;  %v13262_v4 = vpack.c.bf16 %v9974_v3, %v9973_v2  ;;  %v14994_v63 = vld [vmem:[%s15321_s4 + $0x15] ss:$0 sm:$0xff] }
0x12e4   : > { %12218 = vmatprep.mubr.msk.f32.mxu1 %vm640_vm1, %v7399_v16  ;;  %vm7233_vm12 = vcmp.gt.f32.partialorder %v7207_v9, 0.0  ;;  %v7241_v20 = vmul.f32 0.01, %v7207_v9  ;;  %vm7386_vm13 = vcmp.gt.f32.partialorder %v7360_v10, 0.0  ;;  %v7394_v21 = vmul.f32 0.01, %v7360_v10  ;;  %12191 = vmatmul.mubr.msk.f32.vlgmr.msra.gmra.mrb[176].mxu0 %vm640_vm1, %v7247_v1 }
0x12e5   : > { %12219 = vmatmul.mubr.msk.f32.vlgmr.msra.gmra.mrb[176].mxu1 %vm640_vm1, %v7400_v17  ;;  %vm7232_vm14 = vcmp.gt.f32.partialorder %v7202_v12, 0.0  ;;  %v7240_v22 = vmul.f32 0.01, %v7202_v12  ;;  %vm7385_vm15 = vcmp.gt.f32.partialorder %v7355_v18, 0.0  ;;  %v7393_v23 = vmul.f32 0.01, %v7355_v18  ;;  %13233 = vmatpush3.bf16.msra.mxu0 %v13230_v55 }
0x12e6   : > { %13249 = vmatpush3.bf16.msra.mxu1 %v13230_v55  ;;  %v12142_v24 = vpop.f32.mrb[172].mxu0  ;;  %v7249_v28 = vsel %vm7233_vm12, %v7207_v9, %v7241_v20  ;;  %13235 = vmatprep.subr.bf16.mxu0 %v13234_v8  ;;  %v7402_v36 = vsel %vm7386_vm13, %v7360_v10, %v7394_v21  ;;  %v13242_v0 = vpack.c.bf16 %v9954_v62, %v9953_v61  ;;  %v9975_v13 = vld [vmem:[%s15320_s3 + $0x5d0] sm:$0xff]  ;;  %v9976_v15 = vld [vmem:[%s15320_s3 + $0x5d8] sm:$0xff] }
0x12e7   : > { %v12170_v26 = vpop.f32.mrb[172].mxu1  ;;  %13251 = vmatprep.subr.bf16.mxu1 %v13234_v8  ;;  %v7217_v30 = vadd.f32 %v12142_v24, %v14928_v50  ;;  %v7211_v31 = vpop.f32.mrb[173].mxu0  ;;  %v7248_v32 = vsel %vm7232_vm14, %v7202_v12, %v7240_v22  ;;  %v7401_v33 = vsel %vm7385_vm15, %v7355_v18, %v7393_v23  ;;  %v13266_v21 = vpack.c.bf16 %v9976_v15, %v9975_v13  ;;  %v9999_v15 = vld [vmem:[%s15320_s3 + $0x600] sm:$0xff] }
0x12e8   : > { %v7370_v25 = vadd.f32 %v12170_v26, %v14928_v50  ;;  %v7364_v27 = vpop.f32.mrb[173].mxu1  ;;  %v7212_v34 = vadd.f32 %v14928_v50, %v7211_v31  ;;  %12193 = vmatprep.mubr.msk.f32.mxu0 %vm640_vm1, %v7248_v32  ;;  %12221 = vmatprep.mubr.msk.f32.mxu1 %vm640_vm1, %v7401_v33  ;;  %v9978_v32 = vld [vmem:[%s15320_s3 + $0x5e8] sm:$0xff] }
0x12e9   : > { %v7365_v35 = vadd.f32 %v14928_v50, %v7364_v27  ;;  %vm7235_vm0 = vcmp.gt.f32.partialorder %v7217_v30, 0.0  ;;  %v7243_v38 = vmul.f32 0.01, %v7217_v30  ;;  %12194 = vmatmul.mubr.msk.f32.gmra.mrb[178].mxu0 %vm640_vm1, %v7249_v28  ;;  %12222 = vmatmul.mubr.msk.f32.gmra.mrb[178].mxu1 %vm640_vm1, %v7402_v36  ;;  %v9977_v27 = vld [vmem:[%s15320_s3 + $0x5e0] sm:$0xff] }
0x12ea   : > { %vm7388_vm2 = vcmp.gt.f32.partialorder %v7370_v25, 0.0  ;;  %v7396_v40 = vmul.f32 0.01, %v7370_v25  ;;  %vm7234_vm3 = vcmp.gt.f32.partialorder %v7212_v34, 0.0  ;;  %v7242_v41 = vmul.f32 0.01, %v7212_v34  ;;  %13237 = vmatpush3.bf16.msra.mxu0 %v13234_v8  ;;  %13253 = vmatpush3.bf16.msra.mxu1 %v13234_v8 }
0x12eb   : > { %vm7387_vm4 = vcmp.gt.f32.partialorder %v7365_v35, 0.0  ;;  %v7395_v42 = vmul.f32 0.01, %v7365_v35  ;;  %v12145_v43 = vpop.f32.mrb[174].mxu0  ;;  %v12173_v39 = vpop.f32.mrb[174].mxu1  ;;  %v7251_v44 = vsel %vm7235_vm0, %v7217_v30, %v7243_v38  ;;  %13239 = vmatprep.subr.bf16.mxu0 %v13238_v29  ;;  %13255 = vmatprep.subr.bf16.mxu1 %v13238_v29 }
0x12ec   : > { %v7227_v37 = vadd.f32 %v12145_v43, %v14928_v50  ;;  %v7380_v45 = vadd.f32 %v12173_v39, %v14928_v50  ;;  %v7221_v46 = vpop.f32.mrb[175].mxu0  ;;  %v7374_v47 = vpop.f32.mrb[175].mxu1  ;;  %v7250_v48 = vsel %vm7234_vm3, %v7212_v34, %v7242_v41  ;;  %v7404_v54 = vsel %vm7388_vm2, %v7370_v25, %v7396_v40 }
0x12ed   : > { %v7403_v49 = vsel %vm7387_vm4, %v7365_v35, %v7395_v42  ;;  %v7222_v51 = vadd.f32 %v14928_v50, %v7221_v46  ;;  %v7375_v53 = vadd.f32 %v14928_v50, %v7374_v47  ;;  %12196 = vmatprep.mubr.msk.f32.mxu0 %vm640_vm1, %v7250_v48  ;;  %v13270_v42 = vpack.c.bf16 %v9978_v32, %v9977_v27 }
0x12ee   : > { %12224 = vmatprep.mubr.msk.f32.mxu1 %vm640_vm1, %v7403_v49  ;;  %vm7237_vm5 = vcmp.gt.f32.partialorder %v7227_v37, 0.0  ;;  %v7245_v55 = vmul.f32 0.01, %v7227_v37  ;;  %vm7390_vm6 = vcmp.gt.f32.partialorder %v7380_v45, 0.0  ;;  %v7398_v56 = vmul.f32 0.01, %v7380_v45  ;;  %12197 = vmatmul.mubr.msk.f32.gmra.mrb[180].mxu0 %vm640_vm1, %v7251_v44 }
0x12ef   : > { %12225 = vmatmul.mubr.msk.f32.gmra.mrb[180].mxu1 %vm640_vm1, %v7404_v54  ;;  %vm7236_vm7 = vcmp.gt.f32.partialorder %v7222_v51, 0.0  ;;  %v7244_v52 = vmul.f32 0.01, %v7222_v51  ;;  %vm7389_vm8 = vcmp.gt.f32.partialorder %v7375_v53, 0.0  ;;  %v7397_v57 = vmul.f32 0.01, %v7375_v53  ;;  %13241 = vmatpush3.bf16.msra.mxu0 %v13238_v29 }
0x12f0   : > { %13257 = vmatpush3.bf16.msra.mxu1 %v13238_v29  ;;  %v7253_v59 = vsel %vm7237_vm5, %v7227_v37, %v7245_v55  ;;  %v7406_v60 = vsel %vm7390_vm6, %v7380_v45, %v7398_v56  ;;  %13243 = vmatprep.subr.bf16.mxu0 %v13242_v0 }
0x12f1   : > { %v7252_v50 = vsel %vm7236_vm7, %v7222_v51, %v7244_v52  ;;  %v7405_v58 = vsel %vm7389_vm8, %v7375_v53, %v7397_v57  ;;  %13259 = vmatprep.subr.bf16.mxu1 %v13242_v0 }
0x12f2   : > { %12199 = vmatprep.mubr.msk.f32.mxu0 %vm640_vm1, %v7252_v50  ;;  %12227 = vmatprep.mubr.msk.f32.mxu1 %vm640_vm1, %v7405_v58 }
0x12f3   : > { %12200 = vmatmul.mubr.msk.f32.gmra.mrb[182].mxu0 %vm640_vm1, %v7253_v59  ;;  %12228 = vmatmul.mubr.msk.f32.gmra.mrb[182].mxu1 %vm640_vm1, %v7406_v60 }
0x12f4   : > { %13245 = vmatpush3.bf16.msra.mxu0 %v13242_v0  ;;  %13261 = vmatpush3.bf16.msra.mxu1 %v13242_v0 }
0x12f5   : > { %13263 = vmatprep.subr.bf16.mxu0 %v13262_v4  ;;  %13279 = vmatprep.subr.bf16.mxu1 %v13262_v4 }
0x13b7   : > { %v12192_v5 = vpop.f32.mrb[176].mxu0 }
0x13b8   : > { %v12220_v1 = vpop.f32.mrb[176].mxu1  ;;  %v7520_v6 = vadd.f32 %v12192_v5, %v14994_v63  ;;  %v7514_v8 = vpop.f32.mrb[177].mxu0 }
0x13b9   : > { %v7673_v7 = vadd.f32 %v12220_v1, %v14994_v63  ;;  %v7667_v9 = vpop.f32.mrb[177].mxu1  ;;  %v7515_v10 = vadd.f32 %v14994_v63, %v7514_v8 }
0x13ba   : > { %v7668_v11 = vadd.f32 %v14994_v63, %v7667_v9  ;;  %vm7554_vm9 = vcmp.gt.f32.partialorder %v7520_v6, 0.0  ;;  %v7562_v16 = vmul.f32 0.01, %v7520_v6 }
0x13bb   : > { %vm7707_vm10 = vcmp.gt.f32.partialorder %v7673_v7, 0.0  ;;  %v7715_v17 = vmul.f32 0.01, %v7673_v7  ;;  %vm7553_vm11 = vcmp.gt.f32.partialorder %v7515_v10, 0.0  ;;  %v7561_v12 = vmul.f32 0.01, %v7515_v10 }
0x13bc   : > { %vm7706_vm12 = vcmp.gt.f32.partialorder %v7668_v11, 0.0  ;;  %v7714_v18 = vmul.f32 0.01, %v7668_v11  ;;  %v7570_v14 = vsel %vm7554_vm9, %v7520_v6, %v7562_v16  ;;  %v12195_v19 = vpop.f32.mrb[178].mxu0  ;;  %v12223_v20 = vpop.f32.mrb[178].mxu1  ;;  %v10000_v16 = vld [vmem:[%s15320_s3 + $0x608] sm:$0xff] }
0x13bd   : > { %v7530_v22 = vadd.f32 %v12195_v19, %v14994_v63  ;;  %v7683_v23 = vadd.f32 %v12223_v20, %v14994_v63  ;;  %v7524_v24 = vpop.f32.mrb[179].mxu0  ;;  %v7677_v26 = vpop.f32.mrb[179].mxu1  ;;  %v7569_v28 = vsel %vm7553_vm11, %v7515_v10, %v7561_v12  ;;  %v7723_v30 = vsel %vm7707_vm10, %v7673_v7, %v7715_v17  ;;  %v9979_v10 = vld [vmem:[%s15320_s3 + $0x5f0] sm:$0xff] }
0x13be   : > { %v7722_v29 = vsel %vm7706_vm12, %v7668_v11, %v7714_v18  ;;  %v7525_v25 = vadd.f32 %v14994_v63, %v7524_v24  ;;  %v7678_v31 = vadd.f32 %v14994_v63, %v7677_v26  ;;  %12246 = vmatprep.mubr.msk.f32.mxu0 %vm640_vm1, %v7569_v28  ;;  %v9980_v11 = vld [vmem:[%s15320_s3 + $0x5f8] sm:$0xff]  ;;  %v13294_v17 = vpack.c.bf16 %v10000_v16, %v9999_v15  ;;  %v15060_v12 = vld [vmem:[%s15321_s4 + $0x16] ss:$0 sm:$0xff] }
0x13bf   : > { %12274 = vmatprep.mubr.msk.f32.mxu1 %vm640_vm1, %v7722_v29  ;;  %vm7556_vm13 = vcmp.gt.f32.partialorder %v7530_v22, 0.0  ;;  %v7564_v33 = vmul.f32 0.01, %v7530_v22  ;;  %vm7709_vm14 = vcmp.gt.f32.partialorder %v7683_v23, 0.0  ;;  %v7717_v34 = vmul.f32 0.01, %v7683_v23  ;;  %12247 = vmatmul.mubr.msk.f32.vlgmr.msra.gmra.mrb[184].mxu0 %vm640_vm1, %v7570_v14 }
0x13c0   : > { %12275 = vmatmul.mubr.msk.f32.vlgmr.msra.gmra.mrb[184].mxu1 %vm640_vm1, %v7723_v30  ;;  %vm7555_vm15 = vcmp.gt.f32.partialorder %v7525_v25, 0.0  ;;  %v7563_v35 = vmul.f32 0.01, %v7525_v25  ;;  %vm7708_vm0 = vcmp.gt.f32.partialorder %v7678_v31, 0.0  ;;  %v7716_v36 = vmul.f32 0.01, %v7678_v31  ;;  %13265 = vmatpush3.bf16.msra.mxu0 %v13262_v4 }
0x13c1   : > { %13281 = vmatpush3.bf16.msra.mxu1 %v13262_v4  ;;  %v12198_v38 = vpop.f32.mrb[180].mxu0  ;;  %v7572_v41 = vsel %vm7556_vm13, %v7530_v22, %v7564_v33  ;;  %13267 = vmatprep.subr.bf16.mxu0 %v13266_v21  ;;  %v7725_v49 = vsel %vm7709_vm14, %v7683_v23, %v7717_v34  ;;  %v13274_v13 = vpack.c.bf16 %v9980_v11, %v9979_v10  ;;  %v10001_v26 = vld [vmem:[%s15320_s3 + $0x610] sm:$0xff]  ;;  %v10002_v28 = vld [vmem:[%s15320_s3 + $0x618] sm:$0xff] }
0x13c2   : > { %v12226_v40 = vpop.f32.mrb[180].mxu1  ;;  %13283 = vmatprep.subr.bf16.mxu1 %v13266_v21  ;;  %v7540_v43 = vadd.f32 %v12198_v38, %v14994_v63  ;;  %v7534_v44 = vpop.f32.mrb[181].mxu0  ;;  %v7571_v45 = vsel %vm7555_vm15, %v7525_v25, %v7563_v35  ;;  %v7724_v46 = vsel %vm7708_vm0, %v7678_v31, %v7716_v36  ;;  %v13298_v34 = vpack.c.bf16 %v10002_v28, %v10001_v26  ;;  %v10025_v28 = vld [vmem:[%s15320_s3 + $0x640] sm:$0xff] }
0x13c3   : > { %v7693_v39 = vadd.f32 %v12226_v40, %v14994_v63  ;;  %v7687_v37 = vpop.f32.mrb[181].mxu1  ;;  %v7535_v47 = vadd.f32 %v14994_v63, %v7534_v44  ;;  %12249 = vmatprep.mubr.msk.f32.mxu0 %vm640_vm1, %v7571_v45  ;;  %12277 = vmatprep.mubr.msk.f32.mxu1 %vm640_vm1, %v7724_v46  ;;  %v10004_v45 = vld [vmem:[%s15320_s3 + $0x628] sm:$0xff] }
0x13c4   : > { %v7688_v48 = vadd.f32 %v14994_v63, %v7687_v37  ;;  %vm7558_vm2 = vcmp.gt.f32.partialorder %v7540_v43, 0.0  ;;  %v7566_v51 = vmul.f32 0.01, %v7540_v43  ;;  %12250 = vmatmul.mubr.msk.f32.gmra.mrb[186].mxu0 %vm640_vm1, %v7572_v41  ;;  %12278 = vmatmul.mubr.msk.f32.gmra.mrb[186].mxu1 %vm640_vm1, %v7725_v49  ;;  %v10003_v37 = vld [vmem:[%s15320_s3 + $0x620] sm:$0xff] }
0x13c5   : > { %vm7711_vm3 = vcmp.gt.f32.partialorder %v7693_v39, 0.0  ;;  %v7719_v53 = vmul.f32 0.01, %v7693_v39  ;;  %vm7557_vm4 = vcmp.gt.f32.partialorder %v7535_v47, 0.0  ;;  %v7565_v54 = vmul.f32 0.01, %v7535_v47  ;;  %13269 = vmatpush3.bf16.msra.mxu0 %v13266_v21  ;;  %13285 = vmatpush3.bf16.msra.mxu1 %v13266_v21 }
0x13c6   : > { %vm7710_vm5 = vcmp.gt.f32.partialorder %v7688_v48, 0.0  ;;  %v7718_v55 = vmul.f32 0.01, %v7688_v48  ;;  %v12201_v56 = vpop.f32.mrb[182].mxu0  ;;  %v12229_v52 = vpop.f32.mrb[182].mxu1  ;;  %v7574_v57 = vsel %vm7558_vm2, %v7540_v43, %v7566_v51  ;;  %13271 = vmatprep.subr.bf16.mxu0 %v13270_v42  ;;  %13287 = vmatprep.subr.bf16.mxu1 %v13270_v42 }
0x13c7   : > { %v7550_v50 = vadd.f32 %v12201_v56, %v14994_v63  ;;  %v7703_v58 = vadd.f32 %v12229_v52, %v14994_v63  ;;  %v7544_v59 = vpop.f32.mrb[183].mxu0  ;;  %v7697_v60 = vpop.f32.mrb[183].mxu1  ;;  %v7573_v61 = vsel %vm7557_vm4, %v7535_v47, %v7565_v54  ;;  %v7727_v3 = vsel %vm7711_vm3, %v7693_v39, %v7719_v53 }
0x13c8   : > { %v7726_v62 = vsel %vm7710_vm5, %v7688_v48, %v7718_v55  ;;  %v7545_v0 = vadd.f32 %v14994_v63, %v7544_v59  ;;  %v7698_v2 = vadd.f32 %v14994_v63, %v7697_v60  ;;  %12252 = vmatprep.mubr.msk.f32.mxu0 %vm640_vm1, %v7573_v61  ;;  %v13302_v55 = vpack.c.bf16 %v10004_v45, %v10003_v37 }
0x13c9   : > { %12280 = vmatprep.mubr.msk.f32.mxu1 %vm640_vm1, %v7726_v62  ;;  %vm7560_vm6 = vcmp.gt.f32.partialorder %v7550_v50, 0.0  ;;  %v7568_v4 = vmul.f32 0.01, %v7550_v50  ;;  %vm7713_vm7 = vcmp.gt.f32.partialorder %v7703_v58, 0.0  ;;  %v7721_v5 = vmul.f32 0.01, %v7703_v58  ;;  %12253 = vmatmul.mubr.msk.f32.gmra.mrb[188].mxu0 %vm640_vm1, %v7574_v57 }
0x13ca   : > { %12281 = vmatmul.mubr.msk.f32.gmra.mrb[188].mxu1 %vm640_vm1, %v7727_v3  ;;  %vm7559_vm8 = vcmp.gt.f32.partialorder %v7545_v0, 0.0  ;;  %v7567_v1 = vmul.f32 0.01, %v7545_v0  ;;  %vm7712_vm9 = vcmp.gt.f32.partialorder %v7698_v2, 0.0  ;;  %v7720_v6 = vmul.f32 0.01, %v7698_v2  ;;  %13273 = vmatpush3.bf16.msra.mxu0 %v13270_v42 }
0x13cb   : > { %13289 = vmatpush3.bf16.msra.mxu1 %v13270_v42  ;;  %v7576_v8 = vsel %vm7560_vm6, %v7550_v50, %v7568_v4  ;;  %v7729_v9 = vsel %vm7713_vm7, %v7703_v58, %v7721_v5  ;;  %13275 = vmatprep.subr.bf16.mxu0 %v13274_v13 }
0x13cc   : > { %v7575_v63 = vsel %vm7559_vm8, %v7545_v0, %v7567_v1  ;;  %v7728_v7 = vsel %vm7712_vm9, %v7698_v2, %v7720_v6  ;;  %13291 = vmatprep.subr.bf16.mxu1 %v13274_v13 }
0x13cd   : > { %12255 = vmatprep.mubr.msk.f32.mxu0 %vm640_vm1, %v7575_v63  ;;  %12283 = vmatprep.mubr.msk.f32.mxu1 %vm640_vm1, %v7728_v7 }
0x13ce   : > { %12256 = vmatmul.mubr.msk.f32.gmra.mrb[190].mxu0 %vm640_vm1, %v7576_v8  ;;  %12284 = vmatmul.mubr.msk.f32.gmra.mrb[190].mxu1 %vm640_vm1, %v7729_v9 }
0x13cf   : > { %13277 = vmatpush3.bf16.msra.mxu0 %v13274_v13  ;;  %13293 = vmatpush3.bf16.msra.mxu1 %v13274_v13 }
0x13d0   : > { %13295 = vmatprep.subr.bf16.mxu0 %v13294_v17  ;;  %13311 = vmatprep.subr.bf16.mxu1 %v13294_v17 }
0x1492   : > { %v12248_v18 = vpop.f32.mrb[184].mxu0 }
0x1493   : > { %v12276_v14 = vpop.f32.mrb[184].mxu1  ;;  %v7843_v19 = vadd.f32 %v12248_v18, %v15060_v12  ;;  %v7837_v21 = vpop.f32.mrb[185].mxu0 }
0x1494   : > { %v7996_v20 = vadd.f32 %v12276_v14, %v15060_v12  ;;  %v7990_v22 = vpop.f32.mrb[185].mxu1  ;;  %v7838_v23 = vadd.f32 %v15060_v12, %v7837_v21 }
0x1495   : > { %v7991_v24 = vadd.f32 %v15060_v12, %v7990_v22  ;;  %vm7877_vm10 = vcmp.gt.f32.partialorder %v7843_v19, 0.0  ;;  %v7885_v29 = vmul.f32 0.01, %v7843_v19 }
0x1496   : > { %vm8030_vm11 = vcmp.gt.f32.partialorder %v7996_v20, 0.0  ;;  %v8038_v30 = vmul.f32 0.01, %v7996_v20  ;;  %vm7876_vm12 = vcmp.gt.f32.partialorder %v7838_v23, 0.0  ;;  %v7884_v25 = vmul.f32 0.01, %v7838_v23 }
0x1497   : > { %vm8029_vm13 = vcmp.gt.f32.partialorder %v7991_v24, 0.0  ;;  %v8037_v31 = vmul.f32 0.01, %v7991_v24  ;;  %v7893_v27 = vsel %vm7877_vm10, %v7843_v19, %v7885_v29  ;;  %v12251_v32 = vpop.f32.mrb[186].mxu0  ;;  %v12279_v33 = vpop.f32.mrb[186].mxu1  ;;  %v10026_v29 = vld [vmem:[%s15320_s3 + $0x648] sm:$0xff] }
0x1498   : > { %v7853_v35 = vadd.f32 %v12251_v32, %v15060_v12  ;;  %v8006_v36 = vadd.f32 %v12279_v33, %v15060_v12  ;;  %v7847_v38 = vpop.f32.mrb[187].mxu0  ;;  %v8000_v40 = vpop.f32.mrb[187].mxu1  ;;  %v7892_v41 = vsel %vm7876_vm12, %v7838_v23, %v7884_v25  ;;  %v8046_v43 = vsel %vm8030_vm11, %v7996_v20, %v8038_v30  ;;  %v10005_v23 = vld [vmem:[%s15320_s3 + $0x630] sm:$0xff] }
0x1499   : > { %v8045_v42 = vsel %vm8029_vm13, %v7991_v24, %v8037_v31  ;;  %v7848_v39 = vadd.f32 %v15060_v12, %v7847_v38  ;;  %v8001_v44 = vadd.f32 %v15060_v12, %v8000_v40  ;;  %12302 = vmatprep.mubr.msk.f32.mxu0 %vm640_vm1, %v7892_v41  ;;  %v10006_v24 = vld [vmem:[%s15320_s3 + $0x638] sm:$0xff]  ;;  %v13326_v30 = vpack.c.bf16 %v10026_v29, %v10025_v28  ;;  %v15126_v25 = vld [vmem:[%s15321_s4 + $0x17] ss:$0 sm:$0xff] }
0x149a   : > { %12330 = vmatprep.mubr.msk.f32.mxu1 %vm640_vm1, %v8045_v42  ;;  %vm7879_vm14 = vcmp.gt.f32.partialorder %v7853_v35, 0.0  ;;  %v7887_v46 = vmul.f32 0.01, %v7853_v35  ;;  %vm8032_vm15 = vcmp.gt.f32.partialorder %v8006_v36, 0.0  ;;  %v8040_v47 = vmul.f32 0.01, %v8006_v36  ;;  %12303 = vmatmul.mubr.msk.f32.vlgmr.msra.gmra.mrb[192].mxu0 %vm640_vm1, %v7893_v27 }
0x149b   : > { %12331 = vmatmul.mubr.msk.f32.vlgmr.msra.gmra.mrb[192].mxu1 %vm640_vm1, %v8046_v43  ;;  %vm7878_vm0 = vcmp.gt.f32.partialorder %v7848_v39, 0.0  ;;  %v7886_v48 = vmul.f32 0.01, %v7848_v39  ;;  %vm8031_vm2 = vcmp.gt.f32.partialorder %v8001_v44, 0.0  ;;  %v8039_v49 = vmul.f32 0.01, %v8001_v44  ;;  %13297 = vmatpush3.bf16.msra.mxu0 %v13294_v17 }
0x149c   : > { %13313 = vmatpush3.bf16.msra.mxu1 %v13294_v17  ;;  %v12254_v51 = vpop.f32.mrb[188].mxu0  ;;  %v7895_v54 = vsel %vm7879_vm14, %v7853_v35, %v7887_v46  ;;  %13299 = vmatprep.subr.bf16.mxu0 %v13298_v34  ;;  %v8048_v62 = vsel %vm8032_vm15, %v8006_v36, %v8040_v47  ;;  %v13306_v26 = vpack.c.bf16 %v10006_v24, %v10005_v23  ;;  %v10027_v40 = vld [vmem:[%s15320_s3 + $0x650] sm:$0xff]  ;;  %v10028_v41 = vld [vmem:[%s15320_s3 + $0x658] sm:$0xff] }
0x149d   : > { %v12282_v53 = vpop.f32.mrb[188].mxu1  ;;  %13315 = vmatprep.subr.bf16.mxu1 %v13298_v34  ;;  %v7863_v56 = vadd.f32 %v12254_v51, %v15060_v12  ;;  %v7857_v57 = vpop.f32.mrb[189].mxu0  ;;  %v7894_v58 = vsel %vm7878_vm0, %v7848_v39, %v7886_v48  ;;  %v8047_v59 = vsel %vm8031_vm2, %v8001_v44, %v8039_v49  ;;  %v13330_v47 = vpack.c.bf16 %v10028_v41, %v10027_v40  ;;  %v287_v41 = vld [vmem:[%s15322_s5] sm:$0xff] }
0x149e   : > { %v8016_v52 = vadd.f32 %v12282_v53, %v15060_v12  ;;  %v8010_v50 = vpop.f32.mrb[189].mxu1  ;;  %v7858_v60 = vadd.f32 %v15060_v12, %v7857_v57  ;;  %12305 = vmatprep.mubr.msk.f32.mxu0 %vm640_vm1, %v7894_v58  ;;  %12333 = vmatprep.mubr.msk.f32.mxu1 %vm640_vm1, %v8047_v59  ;;  %v10030_v58 = vld [vmem:[%s15320_s3 + $0x668] sm:$0xff] }
0x149f   : > { %v8011_v61 = vadd.f32 %v15060_v12, %v8010_v50  ;;  %vm7881_vm3 = vcmp.gt.f32.partialorder %v7863_v56, 0.0  ;;  %v7889_v0 = vmul.f32 0.01, %v7863_v56  ;;  %12306 = vmatmul.mubr.msk.f32.gmra.mrb[194].mxu0 %vm640_vm1, %v7895_v54  ;;  %12334 = vmatmul.mubr.msk.f32.gmra.mrb[194].mxu1 %vm640_vm1, %v8048_v62  ;;  %v10029_v50 = vld [vmem:[%s15320_s3 + $0x660] sm:$0xff] }
0x14a0   : > { %vm8034_vm4 = vcmp.gt.f32.partialorder %v8016_v52, 0.0  ;;  %v8042_v2 = vmul.f32 0.01, %v8016_v52  ;;  %vm7880_vm5 = vcmp.gt.f32.partialorder %v7858_v60, 0.0  ;;  %v7888_v3 = vmul.f32 0.01, %v7858_v60  ;;  %13301 = vmatpush3.bf16.msra.mxu0 %v13298_v34  ;;  %13317 = vmatpush3.bf16.msra.mxu1 %v13298_v34 }
0x14a1   : > { %vm8033_vm6 = vcmp.gt.f32.partialorder %v8011_v61, 0.0  ;;  %v8041_v4 = vmul.f32 0.01, %v8011_v61  ;;  %v12257_v5 = vpop.f32.mrb[190].mxu0  ;;  %v12285_v1 = vpop.f32.mrb[190].mxu1  ;;  %v7897_v6 = vsel %vm7881_vm3, %v7863_v56, %v7889_v0  ;;  %13303 = vmatprep.subr.bf16.mxu0 %v13302_v55  ;;  %13319 = vmatprep.subr.bf16.mxu1 %v13302_v55 }
0x14a2   : > { %v7873_v63 = vadd.f32 %v12257_v5, %v15060_v12  ;;  %v8026_v7 = vadd.f32 %v12285_v1, %v15060_v12  ;;  %v7867_v8 = vpop.f32.mrb[191].mxu0  ;;  %v8020_v9 = vpop.f32.mrb[191].mxu1  ;;  %v7896_v10 = vsel %vm7880_vm5, %v7858_v60, %v7888_v3  ;;  %v8050_v16 = vsel %vm8034_vm4, %v8016_v52, %v8042_v2 }
0x14a3   : > { %v8049_v11 = vsel %vm8033_vm6, %v8011_v61, %v8041_v4  ;;  %v7868_v13 = vadd.f32 %v15060_v12, %v7867_v8  ;;  %v8021_v15 = vadd.f32 %v15060_v12, %v8020_v9  ;;  %12308 = vmatprep.mubr.msk.f32.mxu0 %vm640_vm1, %v7896_v10  ;;  %v13334_v4 = vpack.c.bf16 %v10030_v58, %v10029_v50 }
0x14a4   : > { %12336 = vmatprep.mubr.msk.f32.mxu1 %vm640_vm1, %v8049_v11  ;;  %vm7883_vm7 = vcmp.gt.f32.partialorder %v7873_v63, 0.0  ;;  %v7891_v17 = vmul.f32 0.01, %v7873_v63  ;;  %vm8036_vm8 = vcmp.gt.f32.partialorder %v8026_v7, 0.0  ;;  %v8044_v18 = vmul.f32 0.01, %v8026_v7  ;;  %12309 = vmatmul.mubr.msk.f32.gmra.mrb[196].mxu0 %vm640_vm1, %v7897_v6 }
0x14a5   : > { %12337 = vmatmul.mubr.msk.f32.gmra.mrb[196].mxu1 %vm640_vm1, %v8050_v16  ;;  %vm7882_vm9 = vcmp.gt.f32.partialorder %v7868_v13, 0.0  ;;  %v7890_v14 = vmul.f32 0.01, %v7868_v13  ;;  %vm8035_vm10 = vcmp.gt.f32.partialorder %v8021_v15, 0.0  ;;  %v8043_v19 = vmul.f32 0.01, %v8021_v15  ;;  %13305 = vmatpush3.bf16.msra.mxu0 %v13302_v55 }
0x14a6   : > { %13321 = vmatpush3.bf16.msra.mxu1 %v13302_v55  ;;  %v7899_v21 = vsel %vm7883_vm7, %v7873_v63, %v7891_v17  ;;  %v8052_v22 = vsel %vm8036_vm8, %v8026_v7, %v8044_v18  ;;  %13307 = vmatprep.subr.bf16.mxu0 %v13306_v26 }
0x14a7   : > { %v7898_v12 = vsel %vm7882_vm9, %v7868_v13, %v7890_v14  ;;  %v8051_v20 = vsel %vm8035_vm10, %v8021_v15, %v8043_v19  ;;  %13323 = vmatprep.subr.bf16.mxu1 %v13306_v26 }
0x14a8   : > { %12311 = vmatprep.mubr.msk.f32.mxu0 %vm640_vm1, %v7898_v12  ;;  %12339 = vmatprep.mubr.msk.f32.mxu1 %vm640_vm1, %v8051_v20 }
0x14a9   : > { %12312 = vmatmul.mubr.msk.f32.gmra.mrb[198].mxu0 %vm640_vm1, %v7899_v21  ;;  %12340 = vmatmul.mubr.msk.f32.gmra.mrb[198].mxu1 %vm640_vm1, %v8052_v22 }
0x14aa   : > { %13309 = vmatpush3.bf16.msra.mxu0 %v13306_v26  ;;  %13325 = vmatpush3.bf16.msra.mxu1 %v13306_v26 }
0x14ab   : > { %13327 = vmatprep.subr.bf16.mxu0 %v13326_v30  ;;  %13343 = vmatprep.subr.bf16.mxu1 %v13326_v30 }
0x156d   : > { %v12304_v31 = vpop.f32.mrb[192].mxu0 }
0x156e   : > { %v12332_v27 = vpop.f32.mrb[192].mxu1  ;;  %v8166_v32 = vadd.f32 %v12304_v31, %v15126_v25  ;;  %v8160_v34 = vpop.f32.mrb[193].mxu0 }
0x156f   : > { %v8319_v33 = vadd.f32 %v12332_v27, %v15126_v25  ;;  %v8313_v35 = vpop.f32.mrb[193].mxu1  ;;  %v8161_v36 = vadd.f32 %v15126_v25, %v8160_v34 }
0x1570   : > { %v8314_v38 = vadd.f32 %v15126_v25, %v8313_v35  ;;  %vm8200_vm11 = vcmp.gt.f32.partialorder %v8166_v32, 0.0  ;;  %v8208_v42 = vmul.f32 0.01, %v8166_v32 }
0x1571   : > { %vm8353_vm12 = vcmp.gt.f32.partialorder %v8319_v33, 0.0  ;;  %v8361_v43 = vmul.f32 0.01, %v8319_v33  ;;  %vm8199_vm13 = vcmp.gt.f32.partialorder %v8161_v36, 0.0  ;;  %v8207_v39 = vmul.f32 0.01, %v8161_v36 }
0x1572   : > { %vm8352_vm14 = vcmp.gt.f32.partialorder %v8314_v38, 0.0  ;;  %v8360_v44 = vmul.f32 0.01, %v8314_v38  ;;  %v8216_v37 = vsel %vm8200_vm11, %v8166_v32, %v8208_v42  ;;  %v12307_v45 = vpop.f32.mrb[194].mxu0  ;;  %v12335_v46 = vpop.f32.mrb[194].mxu1  ;;  %v288_v42 = vld [vmem:[%s15322_s5 + $0x8] sm:$0xff] }
0x1573   : > { %v8176_v48 = vadd.f32 %v12307_v45, %v15126_v25  ;;  %v8329_v49 = vadd.f32 %v12335_v46, %v15126_v25  ;;  %v8170_v51 = vpop.f32.mrb[195].mxu0  ;;  %v8323_v53 = vpop.f32.mrb[195].mxu1  ;;  %v8215_v54 = vsel %vm8199_vm13, %v8161_v36, %v8207_v39  ;;  %v8369_v56 = vsel %vm8353_vm12, %v8319_v33, %v8361_v43  ;;  %v10031_v36 = vld [vmem:[%s15320_s3 + $0x670] sm:$0xff]  ;;  %v15192_v39 = vld [vmem:[%s15321_s4 + $0x18] ss:$0 sm:$0xff] }
0x1574   : > { %v8368_v55 = vsel %vm8352_vm14, %v8314_v38, %v8360_v44  ;;  %v8171_v52 = vadd.f32 %v15126_v25, %v8170_v51  ;;  %v8324_v57 = vadd.f32 %v15126_v25, %v8323_v53  ;;  %12358 = vmatprep.mubr.msk.f32.mxu0 %vm640_vm1, %v8215_v54  ;;  %v10032_v38 = vld [vmem:[%s15320_s3 + $0x678] sm:$0xff]  ;;  %v13358_v43 = vpack.c.bf16 %v288_v42, %v287_v41  ;;  %v289_v53 = vld [vmem:[%s15322_s5 + $0x10] sm:$0xff] }
0x1575   : > { %12386 = vmatprep.mubr.msk.f32.mxu1 %vm640_vm1, %v8368_v55  ;;  %vm8202_vm15 = vcmp.gt.f32.partialorder %v8176_v48, 0.0  ;;  %v8210_v59 = vmul.f32 0.01, %v8176_v48  ;;  %vm8355_vm0 = vcmp.gt.f32.partialorder %v8329_v49, 0.0  ;;  %v8363_v60 = vmul.f32 0.01, %v8329_v49  ;;  %12359 = vmatmul.mubr.msk.f32.vlgmr.msra.gmra.mrb[200].mxu0 %vm640_vm1, %v8216_v37 }
0x1576   : > { %12387 = vmatmul.mubr.msk.f32.vlgmr.msra.gmra.mrb[200].mxu1 %vm640_vm1, %v8369_v56  ;;  %vm8201_vm2 = vcmp.gt.f32.partialorder %v8171_v52, 0.0  ;;  %v8209_v61 = vmul.f32 0.01, %v8171_v52  ;;  %vm8354_vm3 = vcmp.gt.f32.partialorder %v8324_v57, 0.0  ;;  %v8362_v62 = vmul.f32 0.01, %v8324_v57  ;;  %13329 = vmatpush3.bf16.msra.mxu0 %v13326_v30 }
0x1577   : > { %13345 = vmatpush3.bf16.msra.mxu1 %v13326_v30  ;;  %v12310_v0 = vpop.f32.mrb[196].mxu0  ;;  %v8218_v3 = vsel %vm8202_vm15, %v8176_v48, %v8210_v59  ;;  %13331 = vmatprep.subr.bf16.mxu0 %v13330_v47  ;;  %v8371_v11 = vsel %vm8355_vm0, %v8329_v49, %v8363_v60  ;;  %v13338_v40 = vpack.c.bf16 %v10032_v38, %v10031_v36  ;;  %v290_v54 = vld [vmem:[%s15322_s5 + $0x18] sm:$0xff] }
0x1578   : > { %v12338_v2 = vpop.f32.mrb[196].mxu1  ;;  %13347 = vmatprep.subr.bf16.mxu1 %v13330_v47  ;;  %v8186_v5 = vadd.f32 %v12310_v0, %v15126_v25  ;;  %v8180_v6 = vpop.f32.mrb[197].mxu0  ;;  %v8217_v7 = vsel %vm8201_vm2, %v8171_v52, %v8209_v61  ;;  %v8370_v8 = vsel %vm8354_vm3, %v8324_v57, %v8362_v62  ;;  %v13362_v60 = vpack.c.bf16 %v290_v54, %v289_v53  ;;  %v15252_v54 = vld [vmem:[%s15321_s4 + $0x19] ss:$0 sm:$0xff] }
0x1579   : > { %v8339_v1 = vadd.f32 %v12338_v2, %v15126_v25  ;;  %v8333_v63 = vpop.f32.mrb[197].mxu1  ;;  %v8181_v9 = vadd.f32 %v15126_v25, %v8180_v6  ;;  %12361 = vmatprep.mubr.msk.f32.mxu0 %vm640_vm1, %v8217_v7  ;;  %12389 = vmatprep.mubr.msk.f32.mxu1 %vm640_vm1, %v8370_v8  ;;  %v292_v7 = vld [vmem:[%s15322_s5 + $0x28] sm:$0xff] }
0x157a   : > { %v8334_v10 = vadd.f32 %v15126_v25, %v8333_v63  ;;  %vm8204_vm4 = vcmp.gt.f32.partialorder %v8186_v5, 0.0  ;;  %v8212_v13 = vmul.f32 0.01, %v8186_v5  ;;  %12362 = vmatmul.mubr.msk.f32.gmra.mrb[202].mxu0 %vm640_vm1, %v8218_v3  ;;  %12390 = vmatmul.mubr.msk.f32.gmra.mrb[202].mxu1 %vm640_vm1, %v8371_v11  ;;  %v291_v63 = vld [vmem:[%s15322_s5 + $0x20] sm:$0xff] }
0x157b   : > { %vm8357_vm5 = vcmp.gt.f32.partialorder %v8339_v1, 0.0  ;;  %v8365_v15 = vmul.f32 0.01, %v8339_v1  ;;  %vm8203_vm6 = vcmp.gt.f32.partialorder %v8181_v9, 0.0  ;;  %v8211_v16 = vmul.f32 0.01, %v8181_v9  ;;  %13333 = vmatpush3.bf16.msra.mxu0 %v13330_v47  ;;  %13349 = vmatpush3.bf16.msra.mxu1 %v13330_v47 }
0x157c   : > { %vm8356_vm7 = vcmp.gt.f32.partialorder %v8334_v10, 0.0  ;;  %v8364_v17 = vmul.f32 0.01, %v8334_v10  ;;  %v12313_v18 = vpop.f32.mrb[198].mxu0  ;;  %v12341_v14 = vpop.f32.mrb[198].mxu1  ;;  %v8220_v19 = vsel %vm8204_vm4, %v8186_v5, %v8212_v13  ;;  %13335 = vmatprep.subr.bf16.mxu0 %v13334_v4  ;;  %13351 = vmatprep.subr.bf16.mxu1 %v13334_v4 }
0x157d   : > { %v8196_v12 = vadd.f32 %v12313_v18, %v15126_v25  ;;  %v8349_v20 = vadd.f32 %v12341_v14, %v15126_v25  ;;  %v8190_v21 = vpop.f32.mrb[199].mxu0  ;;  %v8343_v22 = vpop.f32.mrb[199].mxu1  ;;  %v8219_v23 = vsel %vm8203_vm6, %v8181_v9, %v8211_v16  ;;  %v8373_v29 = vsel %vm8357_vm5, %v8339_v1, %v8365_v15 }
0x157e   : > { %v8372_v24 = vsel %vm8356_vm7, %v8334_v10, %v8364_v17  ;;  %v8191_v26 = vadd.f32 %v15126_v25, %v8190_v21  ;;  %v8344_v28 = vadd.f32 %v15126_v25, %v8343_v22  ;;  %12364 = vmatprep.mubr.msk.f32.mxu0 %vm640_vm1, %v8219_v23  ;;  %v13366_v17 = vpack.c.bf16 %v292_v7, %v291_v63 }
0x157f   : > { %12392 = vmatprep.mubr.msk.f32.mxu1 %vm640_vm1, %v8372_v24  ;;  %vm8206_vm8 = vcmp.gt.f32.partialorder %v8196_v12, 0.0  ;;  %v8214_v30 = vmul.f32 0.01, %v8196_v12  ;;  %vm8359_vm9 = vcmp.gt.f32.partialorder %v8349_v20, 0.0  ;;  %v8367_v31 = vmul.f32 0.01, %v8349_v20  ;;  %12365 = vmatmul.mubr.msk.f32.gmra.mrb[204].mxu0 %vm640_vm1, %v8220_v19 }
0x1580   : > { %12393 = vmatmul.mubr.msk.f32.gmra.mrb[204].mxu1 %vm640_vm1, %v8373_v29  ;;  %vm8205_vm10 = vcmp.gt.f32.partialorder %v8191_v26, 0.0  ;;  %v8213_v27 = vmul.f32 0.01, %v8191_v26  ;;  %vm8358_vm11 = vcmp.gt.f32.partialorder %v8344_v28, 0.0  ;;  %v8366_v32 = vmul.f32 0.01, %v8344_v28  ;;  %13337 = vmatpush3.bf16.msra.mxu0 %v13334_v4 }
0x1581   : > { %13353 = vmatpush3.bf16.msra.mxu1 %v13334_v4  ;;  %v8222_v34 = vsel %vm8206_vm8, %v8196_v12, %v8214_v30  ;;  %v8375_v35 = vsel %vm8359_vm9, %v8349_v20, %v8367_v31  ;;  %13339 = vmatprep.subr.bf16.mxu0 %v13338_v40 }
0x1582   : > { %v8221_v25 = vsel %vm8205_vm10, %v8191_v26, %v8213_v27  ;;  %v8374_v33 = vsel %vm8358_vm11, %v8344_v28, %v8366_v32  ;;  %13355 = vmatprep.subr.bf16.mxu1 %v13338_v40 }
0x1583   : > { %12367 = vmatprep.mubr.msk.f32.mxu0 %vm640_vm1, %v8221_v25  ;;  %12395 = vmatprep.mubr.msk.f32.mxu1 %vm640_vm1, %v8374_v33 }
0x1584   : > { %12368 = vmatmul.mubr.msk.f32.gmra.mrb[206].mxu0 %vm640_vm1, %v8222_v34  ;;  %12396 = vmatmul.mubr.msk.f32.gmra.mrb[206].mxu1 %vm640_vm1, %v8375_v35 }
0x1585   : > { %13341 = vmatpush3.bf16.msra.mxu0 %v13338_v40  ;;  %13357 = vmatpush3.bf16.msra.mxu1 %v13338_v40 }
0x1586   : > { %13359 = vmatprep.subr.bf16.mxu0 %v13358_v43  ;;  %13375 = vmatprep.subr.bf16.mxu1 %v13358_v43 }
0x1648   : > { %v12360_v44 = vpop.f32.mrb[200].mxu0 }
0x1649   : > { %v12388_v37 = vpop.f32.mrb[200].mxu1  ;;  %v8489_v45 = vadd.f32 %v12360_v44, %v15192_v39  ;;  %v8483_v47 = vpop.f32.mrb[201].mxu0 }
0x164a   : > { %v8642_v46 = vadd.f32 %v12388_v37, %v15192_v39  ;;  %v8636_v48 = vpop.f32.mrb[201].mxu1  ;;  %v8484_v49 = vadd.f32 %v15192_v39, %v8483_v47 }
0x164b   : > { %v8637_v51 = vadd.f32 %v15192_v39, %v8636_v48  ;;  %vm8523_vm12 = vcmp.gt.f32.partialorder %v8489_v45, 0.0  ;;  %v8531_v55 = vmul.f32 0.01, %v8489_v45 }
0x164c   : > { %vm8676_vm13 = vcmp.gt.f32.partialorder %v8642_v46, 0.0  ;;  %v8684_v56 = vmul.f32 0.01, %v8642_v46  ;;  %vm8522_vm14 = vcmp.gt.f32.partialorder %v8484_v49, 0.0  ;;  %v8530_v52 = vmul.f32 0.01, %v8484_v49 }
0x164d   : > { %vm8675_vm15 = vcmp.gt.f32.partialorder %v8637_v51, 0.0  ;;  %v8683_v57 = vmul.f32 0.01, %v8637_v51  ;;  %v8539_v50 = vsel %vm8523_vm12, %v8489_v45, %v8531_v55  ;;  %v12363_v58 = vpop.f32.mrb[202].mxu0  ;;  %v12391_v59 = vpop.f32.mrb[202].mxu1 }
0x164e   : > { %v8499_v61 = vadd.f32 %v12363_v58, %v15192_v39  ;;  %v8652_v62 = vadd.f32 %v12391_v59, %v15192_v39  ;;  %v8493_v0 = vpop.f32.mrb[203].mxu0  ;;  %v8646_v2 = vpop.f32.mrb[203].mxu1  ;;  %v8538_v3 = vsel %vm8522_vm14, %v8484_v49, %v8530_v52  ;;  %v8692_v5 = vsel %vm8676_vm13, %v8642_v46, %v8684_v56  ;;  %v293_v49 = vld [vmem:[%s15322_s5 + $0x30] sm:$0xff] }
0x164f   : > { %v8691_v4 = vsel %vm8675_vm15, %v8637_v51, %v8683_v57  ;;  %v8494_v1 = vadd.f32 %v15192_v39, %v8493_v0  ;;  %v8647_v6 = vadd.f32 %v15192_v39, %v8646_v2  ;;  %12414 = vmatprep.mubr.msk.f32.mxu0 %vm640_vm1, %v8538_v3  ;;  %v294_v51 = vld [vmem:[%s15322_s5 + $0x38] sm:$0xff] }
0x1650   : > { %12442 = vmatprep.mubr.msk.f32.mxu1 %vm640_vm1, %v8691_v4  ;;  %vm8525_vm0 = vcmp.gt.f32.partialorder %v8499_v61, 0.0  ;;  %v8533_v8 = vmul.f32 0.01, %v8499_v61  ;;  %vm8678_vm2 = vcmp.gt.f32.partialorder %v8652_v62, 0.0  ;;  %v8686_v9 = vmul.f32 0.01, %v8652_v62  ;;  %12415 = vmatmul.mubr.msk.f32.vlgmr.msra.gmra.mrb[208].mxu0 %vm640_vm1, %v8539_v50 }
0x1651   : > { %12443 = vmatmul.mubr.msk.f32.vlgmr.msra.gmra.mrb[208].mxu1 %vm640_vm1, %v8692_v5  ;;  %vm8524_vm3 = vcmp.gt.f32.partialorder %v8494_v1, 0.0  ;;  %v8532_v10 = vmul.f32 0.01, %v8494_v1  ;;  %vm8677_vm4 = vcmp.gt.f32.partialorder %v8647_v6, 0.0  ;;  %v8685_v11 = vmul.f32 0.01, %v8647_v6  ;;  %13361 = vmatpush3.bf16.msra.mxu0 %v13358_v43 }
0x1652   : > { %13377 = vmatpush3.bf16.msra.mxu1 %v13358_v43  ;;  %v12366_v13 = vpop.f32.mrb[204].mxu0  ;;  %v8541_v16 = vsel %vm8525_vm0, %v8499_v61, %v8533_v8  ;;  %13363 = vmatprep.subr.bf16.mxu0 %v13362_v60  ;;  %v8694_v24 = vsel %vm8678_vm2, %v8652_v62, %v8686_v9  ;;  %v13370_v53 = vpack.c.bf16 %v294_v51, %v293_v49 }
0x1653   : > { %v12394_v15 = vpop.f32.mrb[204].mxu1  ;;  %13379 = vmatprep.subr.bf16.mxu1 %v13362_v60  ;;  %v8509_v18 = vadd.f32 %v12366_v13, %v15192_v39  ;;  %v8503_v19 = vpop.f32.mrb[205].mxu0  ;;  %v8540_v20 = vsel %vm8524_vm3, %v8494_v1, %v8532_v10  ;;  %v8693_v21 = vsel %vm8677_vm4, %v8647_v6, %v8685_v11 }
0x1654   : > { %v8662_v14 = vadd.f32 %v12394_v15, %v15192_v39  ;;  %v8656_v12 = vpop.f32.mrb[205].mxu1  ;;  %v8504_v22 = vadd.f32 %v15192_v39, %v8503_v19  ;;  %12417 = vmatprep.mubr.msk.f32.mxu0 %vm640_vm1, %v8540_v20  ;;  %12445 = vmatprep.mubr.msk.f32.mxu1 %vm640_vm1, %v8693_v21 }
0x1655   : > { %v8657_v23 = vadd.f32 %v15192_v39, %v8656_v12  ;;  %vm8527_vm5 = vcmp.gt.f32.partialorder %v8509_v18, 0.0  ;;  %v8535_v26 = vmul.f32 0.01, %v8509_v18  ;;  %12418 = vmatmul.mubr.msk.f32.gmra.mrb[210].mxu0 %vm640_vm1, %v8541_v16  ;;  %12446 = vmatmul.mubr.msk.f32.gmra.mrb[210].mxu1 %vm640_vm1, %v8694_v24 }
0x1656   : > { %vm8680_vm6 = vcmp.gt.f32.partialorder %v8662_v14, 0.0  ;;  %v8688_v28 = vmul.f32 0.01, %v8662_v14  ;;  %vm8526_vm7 = vcmp.gt.f32.partialorder %v8504_v22, 0.0  ;;  %v8534_v29 = vmul.f32 0.01, %v8504_v22  ;;  %13365 = vmatpush3.bf16.msra.mxu0 %v13362_v60  ;;  %13381 = vmatpush3.bf16.msra.mxu1 %v13362_v60 }
0x1657   : > { %vm8679_vm8 = vcmp.gt.f32.partialorder %v8657_v23, 0.0  ;;  %v8687_v30 = vmul.f32 0.01, %v8657_v23  ;;  %v12369_v31 = vpop.f32.mrb[206].mxu0  ;;  %v12397_v27 = vpop.f32.mrb[206].mxu1  ;;  %v8543_v32 = vsel %vm8527_vm5, %v8509_v18, %v8535_v26  ;;  %13367 = vmatprep.subr.bf16.mxu0 %v13366_v17  ;;  %13383 = vmatprep.subr.bf16.mxu1 %v13366_v17 }
0x1658   : > { %v8519_v25 = vadd.f32 %v12369_v31, %v15192_v39  ;;  %v8672_v33 = vadd.f32 %v12397_v27, %v15192_v39  ;;  %v8513_v34 = vpop.f32.mrb[207].mxu0  ;;  %v8666_v35 = vpop.f32.mrb[207].mxu1  ;;  %v8542_v36 = vsel %vm8526_vm7, %v8504_v22, %v8534_v29  ;;  %v8696_v42 = vsel %vm8680_vm6, %v8662_v14, %v8688_v28 }
0x1659   : > { %v8695_v38 = vsel %vm8679_vm8, %v8657_v23, %v8687_v30  ;;  %v8514_v40 = vadd.f32 %v15192_v39, %v8513_v34  ;;  %v8667_v41 = vadd.f32 %v15192_v39, %v8666_v35  ;;  %12420 = vmatprep.mubr.msk.f32.mxu0 %vm640_vm1, %v8542_v36 }
0x165a   : > { %12448 = vmatprep.mubr.msk.f32.mxu1 %vm640_vm1, %v8695_v38  ;;  %vm8529_vm9 = vcmp.gt.f32.partialorder %v8519_v25, 0.0  ;;  %v8537_v43 = vmul.f32 0.01, %v8519_v25  ;;  %vm8682_vm10 = vcmp.gt.f32.partialorder %v8672_v33, 0.0  ;;  %v8690_v44 = vmul.f32 0.01, %v8672_v33  ;;  %12421 = vmatmul.mubr.msk.f32.gmra.mrb[212].mxu0 %vm640_vm1, %v8543_v32 }
0x165b   : > { %12449 = vmatmul.mubr.msk.f32.gmra.mrb[212].mxu1 %vm640_vm1, %v8696_v42  ;;  %vm8528_vm11 = vcmp.gt.f32.partialorder %v8514_v40, 0.0  ;;  %v8536_v37 = vmul.f32 0.01, %v8514_v40  ;;  %vm8681_vm12 = vcmp.gt.f32.partialorder %v8667_v41, 0.0  ;;  %v8689_v45 = vmul.f32 0.01, %v8667_v41  ;;  %13369 = vmatpush3.bf16.msra.mxu0 %v13366_v17 }
0x165c   : > { %13385 = vmatpush3.bf16.msra.mxu1 %v13366_v17  ;;  %v8545_v47 = vsel %vm8529_vm9, %v8519_v25, %v8537_v43  ;;  %v8698_v48 = vsel %vm8682_vm10, %v8672_v33, %v8690_v44  ;;  %13371 = vmatprep.subr.bf16.mxu0 %v13370_v53 }
0x165d   : > { %v8544_v39 = vsel %vm8528_vm11, %v8514_v40, %v8536_v37  ;;  %v8697_v46 = vsel %vm8681_vm12, %v8667_v41, %v8689_v45  ;;  %13387 = vmatprep.subr.bf16.mxu1 %v13370_v53 }
0x165e   : > { %12423 = vmatprep.mubr.msk.f32.mxu0 %vm640_vm1, %v8544_v39  ;;  %12451 = vmatprep.mubr.msk.f32.mxu1 %vm640_vm1, %v8697_v46 }
0x165f   : > { %12424 = vmatmul.mubr.msk.f32.gmra.mrb[214].mxu0 %vm640_vm1, %v8545_v47  ;;  %12452 = vmatmul.mubr.msk.f32.gmra.mrb[214].mxu1 %vm640_vm1, %v8698_v48 }
0x1660   : > { %13373 = vmatpush3.bf16.msra.mxu0 %v13370_v53  ;;  %13389 = vmatpush3.bf16.msra.mxu1 %v13370_v53 }
0x1723   : > { %v12416_v55 = vpop.f32.mrb[208].mxu0 }
0x1724   : > { %v12444_v56 = vpop.f32.mrb[208].mxu1  ;;  %v8812_v52 = vadd.f32 %v12416_v55, %v15252_v54  ;;  %v8806_v50 = vpop.f32.mrb[209].mxu0  ;;  %v10051_v55 = vld [vmem:[%s15323_s6] ss:$0 sm:$0xff] }
0x1725   : > { %v8965_v57 = vadd.f32 %v12444_v56, %v15252_v54  ;;  %v8959_v58 = vpop.f32.mrb[209].mxu1  ;;  %v8807_v59 = vadd.f32 %v15252_v54, %v8806_v50 }
0x1726   : > { %v8960_v60 = vadd.f32 %v15252_v54, %v8959_v58  ;;  %vm8846_vm13 = vcmp.gt.f32.partialorder %v8812_v52, 0.0  ;;  %v8854_v61 = vmul.f32 0.01, %v8812_v52 }
0x1727   : > { %vm8999_vm14 = vcmp.gt.f32.partialorder %v8965_v57, 0.0  ;;  %v9007_v62 = vmul.f32 0.01, %v8965_v57  ;;  %vm8845_vm15 = vcmp.gt.f32.partialorder %v8807_v59, 0.0  ;;  %v8853_v0 = vmul.f32 0.01, %v8807_v59 }
0x1728   : > { %vm8998_vm0 = vcmp.gt.f32.partialorder %v8960_v60, 0.0  ;;  %v9006_v2 = vmul.f32 0.01, %v8960_v60  ;;  %v8862_v3 = vsel %vm8846_vm13, %v8812_v52, %v8854_v61  ;;  %v12419_v4 = vpop.f32.mrb[210].mxu0  ;;  %v12447_v5 = vpop.f32.mrb[210].mxu1 }
0x1729   : > { %v8822_v1 = vadd.f32 %v12419_v4, %v15252_v54  ;;  %v8975_v6 = vadd.f32 %v12447_v5, %v15252_v54  ;;  %v8816_v63 = vpop.f32.mrb[211].mxu0  ;;  %v8969_v7 = vpop.f32.mrb[211].mxu1  ;;  %v8861_v8 = vsel %vm8845_vm15, %v8807_v59, %v8853_v0  ;;  %v9015_v10 = vsel %vm8999_vm14, %v8965_v57, %v9007_v62 }
0x172a   : > { %v9014_v9 = vsel %vm8998_vm0, %v8960_v60, %v9006_v2  ;;  %v8817_v11 = vadd.f32 %v15252_v54, %v8816_v63  ;;  %v8970_v13 = vadd.f32 %v15252_v54, %v8969_v7  ;;  %12470 = vmatprep.mubr.msk.f32.mxu0 %vm640_vm1, %v8861_v8 }
0x172b   : > { %12498 = vmatprep.mubr.msk.f32.mxu1 %vm640_vm1, %v9014_v9  ;;  %vm8848_vm2 = vcmp.gt.f32.partialorder %v8822_v1, 0.0  ;;  %v8856_v15 = vmul.f32 0.01, %v8822_v1  ;;  %vm9001_vm3 = vcmp.gt.f32.partialorder %v8975_v6, 0.0  ;;  %v9009_v16 = vmul.f32 0.01, %v8975_v6  ;;  %12471 = vmatmul.mubr.msk.f32.vlgmr.msra.gmra.mrb[216].mxu0 %vm640_vm1, %v8862_v3 }
0x172c   : > { %12499 = vmatmul.mubr.msk.f32.vlgmr.msra.gmra.mrb[216].mxu1 %vm640_vm1, %v9015_v10  ;;  %vm8847_vm4 = vcmp.gt.f32.partialorder %v8817_v11, 0.0  ;;  %v8855_v17 = vmul.f32 0.01, %v8817_v11  ;;  %vm9000_vm5 = vcmp.gt.f32.partialorder %v8970_v13, 0.0  ;;  %v9008_v18 = vmul.f32 0.01, %v8970_v13 }
0x172d   : > { %v12422_v14 = vpop.f32.mrb[212].mxu0  ;;  %v8864_v12 = vsel %vm8848_vm2, %v8822_v1, %v8856_v15  ;;  %v9017_v30 = vsel %vm9001_vm3, %v8975_v6, %v9009_v16 }
0x172e   : > { %v12450_v19 = vpop.f32.mrb[212].mxu1  ;;  %v8832_v20 = vadd.f32 %v12422_v14, %v15252_v54  ;;  %v8826_v22 = vpop.f32.mrb[213].mxu0  ;;  %v8863_v24 = vsel %vm8847_vm4, %v8817_v11, %v8855_v17  ;;  %v9016_v26 = vsel %vm9000_vm5, %v8970_v13, %v9008_v18 }
0x172f   : > { %v8985_v21 = vadd.f32 %v12450_v19, %v15252_v54  ;;  %v8979_v23 = vpop.f32.mrb[213].mxu1  ;;  %v8827_v28 = vadd.f32 %v15252_v54, %v8826_v22  ;;  %12473 = vmatprep.mubr.msk.f32.mxu0 %vm640_vm1, %v8863_v24  ;;  %12501 = vmatprep.mubr.msk.f32.mxu1 %vm640_vm1, %v9016_v26 }
0x1730   : > { %v8980_v29 = vadd.f32 %v15252_v54, %v8979_v23  ;;  %vm8850_vm6 = vcmp.gt.f32.partialorder %v8832_v20, 0.0  ;;  %v8858_v31 = vmul.f32 0.01, %v8832_v20  ;;  %12474 = vmatmul.mubr.msk.f32.gmra.mrb[218].mxu0 %vm640_vm1, %v8864_v12  ;;  %12502 = vmatmul.mubr.msk.f32.gmra.mrb[218].mxu1 %vm640_vm1, %v9017_v30 }
0x1731   : > { %vm9003_vm7 = vcmp.gt.f32.partialorder %v8985_v21, 0.0  ;;  %v9011_v27 = vmul.f32 0.01, %v8985_v21  ;;  %vm8849_vm8 = vcmp.gt.f32.partialorder %v8827_v28, 0.0  ;;  %v8857_v32 = vmul.f32 0.01, %v8827_v28 }
0x1732   : > { %vm9002_vm9 = vcmp.gt.f32.partialorder %v8980_v29, 0.0  ;;  %v9010_v25 = vmul.f32 0.01, %v8980_v29  ;;  %v12425_v33 = vpop.f32.mrb[214].mxu0  ;;  %v12453_v34 = vpop.f32.mrb[214].mxu1  ;;  %v8866_v35 = vsel %vm8850_vm6, %v8832_v20, %v8858_v31 }
0x1733   : > { %v8842_v36 = vadd.f32 %v12425_v33, %v15252_v54  ;;  %v8995_v38 = vadd.f32 %v12453_v34, %v15252_v54  ;;  %v8836_v40 = vpop.f32.mrb[215].mxu0  ;;  %v8989_v41 = vpop.f32.mrb[215].mxu1  ;;  %v8865_v42 = vsel %vm8849_vm8, %v8827_v28, %v8857_v32  ;;  %v9019_v45 = vsel %vm9003_vm7, %v8985_v21, %v9011_v27 }
0x1734   : > { %v9018_v43 = vsel %vm9002_vm9, %v8980_v29, %v9010_v25  ;;  %v8837_v44 = vadd.f32 %v15252_v54, %v8836_v40  ;;  %v8990_v37 = vadd.f32 %v15252_v54, %v8989_v41  ;;  %12476 = vmatprep.mubr.msk.f32.mxu0 %vm640_vm1, %v8865_v42 }
0x1735   : > { %12504 = vmatprep.mubr.msk.f32.mxu1 %vm640_vm1, %v9018_v43  ;;  %vm8852_vm10 = vcmp.gt.f32.partialorder %v8842_v36, 0.0  ;;  %v8860_v39 = vmul.f32 0.01, %v8842_v36  ;;  %vm9005_vm11 = vcmp.gt.f32.partialorder %v8995_v38, 0.0  ;;  %v9013_v46 = vmul.f32 0.01, %v8995_v38  ;;  %12477 = vmatmul.mubr.msk.f32.gmra.mrb[220].mxu0 %vm640_vm1, %v8866_v35 }
0x1736   : > { %12505 = vmatmul.mubr.msk.f32.gmra.mrb[220].mxu1 %vm640_vm1, %v9019_v45  ;;  %vm8851_vm12 = vcmp.gt.f32.partialorder %v8837_v44, 0.0  ;;  %v8859_v47 = vmul.f32 0.01, %v8837_v44  ;;  %vm9004_vm13 = vcmp.gt.f32.partialorder %v8990_v37, 0.0  ;;  %v9012_v48 = vmul.f32 0.01, %v8990_v37 }
0x1737   : > { %v8868_v53 = vsel %vm8852_vm10, %v8842_v36, %v8860_v39  ;;  %v9021_v54 = vsel %vm9005_vm11, %v8995_v38, %v9013_v46 }
0x1738   : > { %v8867_v49 = vsel %vm8851_vm12, %v8837_v44, %v8859_v47  ;;  %v9020_v51 = vsel %vm9004_vm13, %v8990_v37, %v9012_v48 }
0x1739   : > { %12479 = vmatprep.mubr.msk.f32.mxu0 %vm640_vm1, %v8867_v49  ;;  %12507 = vmatprep.mubr.msk.f32.mxu1 %vm640_vm1, %v9020_v51 }
0x173a   : > { %12480 = vmatmul.mubr.msk.f32.gmra.mrb[222].mxu0 %vm640_vm1, %v8868_v53  ;;  %12508 = vmatmul.mubr.msk.f32.gmra.mrb[222].mxu1 %vm640_vm1, %v9021_v54 }
0x17fe   : > { %v12472_v56 = vpop.f32.mrb[216].mxu0 }
0x17ff   : > { %v12500_v52 = vpop.f32.mrb[216].mxu1  ;;  %v9124_v57 = vadd.f32 %v12472_v56, %v10051_v55  ;;  %v9118_v58 = vpop.f32.mrb[217].mxu0 }
0x1800   : > { %v9261_v50 = vadd.f32 %v12500_v52, %v10051_v55  ;;  %v9255_v59 = vpop.f32.mrb[217].mxu1  ;;  %v9119_v60 = vadd.f32 %v10051_v55, %v9118_v58 }
0x1801   : > { %v9256_v61 = vadd.f32 %v10051_v55, %v9255_v59  ;;  %9158 = vst [vmem:[%s15296_s27 + $0x8] sm:$0xff] %v9124_v57 }
0x1802   : > { %9295 = vst [vmem:[%s15296_s27 + $0x48] sm:$0xff] %v9261_v50  ;;  %9157 = vst [vmem:[%s15296_s27] sm:$0xff] %v9119_v60 }
0x1803   : > { %9294 = vst [vmem:[%s15296_s27 + $0x40] sm:$0xff] %v9256_v61  ;;  %v12475_v62 = vpop.f32.mrb[218].mxu0  ;;  %v12503_v0 = vpop.f32.mrb[218].mxu1 }
0x1804   : > { %v9134_v2 = vadd.f32 %v12475_v62, %v10051_v55  ;;  %v9271_v3 = vadd.f32 %v12503_v0, %v10051_v55  ;;  %v9128_v4 = vpop.f32.mrb[219].mxu0  ;;  %v9265_v5 = vpop.f32.mrb[219].mxu1 }
0x1805   : > { %v9129_v1 = vadd.f32 %v10051_v55, %v9128_v4  ;;  %v9266_v6 = vadd.f32 %v10051_v55, %v9265_v5 }
0x1806   : > { %9160 = vst [vmem:[%s15296_s27 + $0x18] sm:$0xff] %v9134_v2  ;;  %9297 = vst [vmem:[%s15296_s27 + $0x58] sm:$0xff] %v9271_v3 }
0x1807   : > { %9159 = vst [vmem:[%s15296_s27 + $0x10] sm:$0xff] %v9129_v1  ;;  %9296 = vst [vmem:[%s15296_s27 + $0x50] sm:$0xff] %v9266_v6 }
0x1808   : > { %v12478_v63 = vpop.f32.mrb[220].mxu0 }
0x1809   : > { %v12506_v7 = vpop.f32.mrb[220].mxu1  ;;  %v9144_v8 = vadd.f32 %v12478_v63, %v10051_v55  ;;  %v9138_v10 = vpop.f32.mrb[221].mxu0 }
0x180a   : > { %v9281_v9 = vadd.f32 %v12506_v7, %v10051_v55  ;;  %v9275_v11 = vpop.f32.mrb[221].mxu1  ;;  %v9139_v13 = vadd.f32 %v10051_v55, %v9138_v10 }
0x180b   : > { %v9276_v15 = vadd.f32 %v10051_v55, %v9275_v11  ;;  %9162 = vst [vmem:[%s15296_s27 + $0x28] sm:$0xff] %v9144_v8 }
0x180c   : > { %9299 = vst [vmem:[%s15296_s27 + $0x68] sm:$0xff] %v9281_v9  ;;  %9161 = vst [vmem:[%s15296_s27 + $0x20] sm:$0xff] %v9139_v13 }
0x180d   : > { %9298 = vst [vmem:[%s15296_s27 + $0x60] sm:$0xff] %v9276_v15  ;;  %v12481_v16 = vpop.f32.mrb[222].mxu0  ;;  %v12509_v17 = vpop.f32.mrb[222].mxu1 }
0x180e   : > { %v9154_v18 = vadd.f32 %v12481_v16, %v10051_v55  ;;  %v9291_v14 = vadd.f32 %v12509_v17, %v10051_v55  ;;  %v9148_v19 = vpop.f32.mrb[223].mxu0  ;;  %v9285_v12 = vpop.f32.mrb[223].mxu1 }
0x180f   : > { %v9149_v20 = vadd.f32 %v10051_v55, %v9148_v19  ;;  %v9286_v21 = vadd.f32 %v10051_v55, %v9285_v12 }
0x1810   : > { %9164 = vst [vmem:[%s15296_s27 + $0x38] sm:$0xff] %v9154_v18  ;;  %9301 = vst [vmem:[%s15296_s27 + $0x78] sm:$0xff] %v9291_v14 }
0x1811   : > { %9163 = vst [vmem:[%s15296_s27 + $0x30] sm:$0xff] %v9149_v20  ;;  %9300 = vst [vmem:[%s15296_s27 + $0x70] sm:$0xff] %v9286_v21 }
0x1812 PF: > { %s17_s24 = sadd.s32 1, %s13404_s24  }
0x1813   : > { %p14_p4 = scmp.ge.s32.totalorder %s17_s24, 4  }
0x1815   :  { %16 = sbr.rel (!%p14_p4) target bundleno = 1 (0x1), region = 128 }

</bundles_post_ra>
